<compile_context>
chip_gen: v5e
topology: v5e:2x2
jax: 0.10.0
libtpu: 0.0.40
codegen_flags: <defaults>
</compile_context>

<pallas_src>
import jax
import jax.numpy as jnp
from jax.experimental import pallas as pl
from jax.experimental.pallas import tpu as pltpu


# ----------------------------------------------------------------------------
# Kernel 1: fused per-scale pipeline + feature fusion (grid over batch)
# ----------------------------------------------------------------------------

def _scale_fuse_kernel(f1_ref, f2_ref, f3_ref, f4_ref,
                       l1w_ref, l1b_ref, l2w_ref, l2b_ref,
                       l3w_ref, l3b_ref, l4w_ref, l4b_ref,
                       s1a_ref, s1b_ref, s2a_ref, s2b_ref,
                       s3a_ref, s3b_ref, s4a_ref, s4b_ref,
                       o_ref):
    def gated_scale(f_ref, w_ref, b_ref, sa_ref, sb_ref):
        # AdaptiveAvgPool2d((7,7)) commuted BEFORE the 1x1 lateral conv:
        # f_ref is (49, kh*kw, C_in); averaging the bins here is the pool.
        p49 = jnp.mean(f_ref[...], axis=1)                              # (49, C_in) f32
        # lateral 1x1 conv as a matmul (bf16 operands, f32 accumulate)
        x = jnp.dot(p49.astype(jnp.bfloat16), w_ref[...],
                    preferred_element_type=jnp.float32) + b_ref[...]    # (49, 512)
        # attention_pool_i (global spatial mean) == mean over the 49 equal bins
        m = jnp.mean(x, axis=0, keepdims=True)                          # (1, 512)
        # se_fc_i: Linear(512,32,no bias) -> ReLU -> Linear(32,1,no bias) -> ReLU -> Sigmoid
        h = jnp.maximum(jnp.dot(m.astype(jnp.bfloat16), sa_ref[...],
                                preferred_element_type=jnp.float32), 0.0)
        z = jnp.maximum(jnp.dot(h.astype(jnp.bfloat16), sb_ref[...],
                                preferred_element_type=jnp.float32), 0.0)
        gate = pl.reciprocal(1.0 + jnp.exp(-z), approx=True)            # sigmoid, (1,1)
        # x_i = x_i + x_i * w_i
        return x * (1.0 + gate)

    o_ref[...] = (gated_scale(f1_ref, l1w_ref, l1b_ref, s1a_ref, s1b_ref)
                  + gated_scale(f2_ref, l2w_ref, l2b_ref, s2a_ref, s2b_ref)
                  + gated_scale(f3_ref, l3w_ref, l3b_ref, s3a_ref, s3b_ref)
                  + gated_scale(f4_ref, l4w_ref, l4b_ref, s4a_ref, s4b_ref))


def pallas_scale_fuse(fb, p):
    """fb: tuple of 4 pre-bucketed features, each (B, 49, kh*kw, C_in) f32.
    Returns the fused, gated 7x7 feature map (B, 49, 512) f32."""
    B = fb[0].shape[0]

    def feat_spec(a):
        return pl.BlockSpec((None,) + a.shape[1:], lambda b: (b, 0, 0, 0))

    def full2d_spec(a):
        return pl.BlockSpec(a.shape, lambda b: (0, 0))

    ins = list(fb)
    for i in (1, 2, 3, 4):
        ins += [p[f"lat{i}_w"], p[f"lat{i}_b"].reshape(1, 512)]
    for i in (1, 2, 3, 4):
        ins += [p[f"se{i}_w1"], p[f"se{i}_w2"]]

    in_specs = [feat_spec(a) for a in fb] + [full2d_spec(a) for a in ins[4:]]

    return pl.pallas_call(
        _scale_fuse_kernel,
        out_shape=jax.ShapeDtypeStruct((B, 49, 512), jnp.float32),
        grid=(B,),
        in_specs=in_specs,
        out_specs=pl.BlockSpec((None, 49, 512), lambda b: (b, 0, 0)),
        compiler_params=pltpu.CompilerParams(dimension_semantics=("parallel",)),
    )(*ins)


# ----------------------------------------------------------------------------
# Kernel 2: conv1_1 + avgpool1 + fc1_1 + attention1 + softmax + mm + fc2_1
# ----------------------------------------------------------------------------

def _tail_kernel(y_ref, c11w_ref, c11b_ref, fcw_ref, fcb_ref,
                 a1w_ref, a1b_ref, a2w_ref, a2b_ref, f2w_ref, f2b_ref, o_ref):
    # avgpool1 commutes with the affine 1x1 conv1_1, so pool the fused 7x7 map
    # first and run conv1_1 on (B, 512) rows — mathematically identical.
    pooled = jnp.mean(y_ref[...], axis=1)                               # (B, 512)
    z = jnp.dot(pooled.astype(jnp.bfloat16), c11w_ref[...],
                preferred_element_type=jnp.float32) + c11b_ref[...]     # conv1_1: (B, 512)
    x = jnp.maximum(
        jnp.dot(z.astype(jnp.bfloat16), fcw_ref[...],
                preferred_element_type=jnp.float32) + fcb_ref[...], 0.0)  # fc1_1: (B, 256)
    h = jnp.tanh(
        jnp.dot(x.astype(jnp.bfloat16), a1w_ref[...],
                preferred_element_type=jnp.float32) + a1b_ref[...])       # (B, 128)
    a = (jnp.dot(h.astype(jnp.bfloat16), a2w_ref[...],
                 preferred_element_type=jnp.float32) + a2b_ref[...])      # (B, 1)
    # softmax over the bag dimension (== PyTorch transpose + Softmax(dim=1))
    a = a - jnp.max(a, axis=0, keepdims=True)
    e = jnp.exp(a)
    attn = e * pl.reciprocal(jnp.sum(e, axis=0, keepdims=True), approx=True)  # (B, 1)
    m = jnp.sum(attn * x, axis=0, keepdims=True)                        # torch.mm(a, x): (1, 256)
    o_ref[...] = (jnp.dot(m.astype(jnp.bfloat16), f2w_ref[...],
                          preferred_element_type=jnp.float32) + f2b_ref[...])  # fc2_1: (1, K)


def pallas_tail(y, p):
    K = p["fc2_w"].shape[1]
    ins = [y,
           p["c11_w"], p["c11_b"].reshape(1, 512),
           p["fc1_w"], p["fc1_b"].reshape(1, 256),
           p["a1_w"], p["a1_b"].reshape(1, 128),
           p["a2_w"], p["a2_b"].reshape(1, 1),
           p["fc2_w"], p["fc2_b"].reshape(1, K)]
    in_specs = ([pl.BlockSpec(y.shape, lambda i: (0, 0, 0))]
                + [pl.BlockSpec(a.shape, lambda i: (0, 0)) for a in ins[1:]])
    return pl.pallas_call(
        _tail_kernel,
        out_shape=jax.ShapeDtypeStruct((1, K), jnp.float32),
        grid=(1,),
        in_specs=in_specs,
        out_specs=pl.BlockSpec((1, K), lambda i: (0, 0)),
    )(*ins)


# ----------------------------------------------------------------------------
# Plain-JAX glue: synthetic backbone stand-in + pooling-bin bucketing (layout only)
# ----------------------------------------------------------------------------

def conv_bn_relu(x, w, gamma, beta, stride):
    # x: NHWC, w: HWIO.  Eval-mode BN with zero running mean / unit variance.
    y = jax.lax.conv_general_dilated(
        x, w, (stride, stride), "SAME",
        dimension_numbers=("NHWC", "HWIO", "NHWC"))
    return jnp.maximum(y * gamma + beta, 0.0)


def maxpool_3x3_s2(x):
    return jax.lax.reduce_window(
        x, -jnp.inf, jax.lax.max, (1, 3, 3, 1), (1, 2, 2, 1), "SAME")


def pool_blocks(f, oh=7, ow=7):
    # Bucket a NHWC feature map into the 7x7 adaptive-pool bins: (B, 49, kh*kw, C).
    # This is pure layout plumbing; the averaging itself runs inside kernel 1.
    # TODO(synk): non-divisible adaptive-pool bin edges are not handled here
    # (exact for H, W divisible by 7, which holds for the 56x56 demo input).
    B, H, W, C = f.shape
    assert H % oh == 0 and W % ow == 0
    kh, kw = H // oh, W // ow
    f = f.reshape(B, oh, kh, ow, kw, C)
    f = jnp.transpose(f, (0, 1, 3, 2, 4, 5))
    return f.reshape(B, oh * ow, kh * kw, C)


def init_params(key, num_classes):
    keys = jax.random.split(key, 24)
    ki = iter(keys)

    def rnd(shape, scale=0.1):
        return jax.random.normal(next(ki), shape, jnp.float32) * scale

    def rnd_bf16(shape, scale=0.1):
        return rnd(shape, scale).astype(jnp.bfloat16)

    p = {}
    # --- synthetic stand-in for the external ResNet `model` backbone (f32) ---
    p["conv1_w"] = rnd((3, 3, 3, 64))
    p["bn1_g"], p["bn1_b"] = jnp.ones((64,)), jnp.zeros((64,))
    p["l1_w"] = rnd((3, 3, 64, 64));   p["l1_g"], p["l1_b"] = jnp.ones((64,)), jnp.zeros((64,))
    p["l2_w"] = rnd((3, 3, 64, 128));  p["l2_g"], p["l2_b"] = jnp.ones((128,)), jnp.zeros((128,))
    p["l3_w"] = rnd((3, 3, 128, 256)); p["l3_g"], p["l3_b"] = jnp.ones((256,)), jnp.zeros((256,))
    p["l4_w"] = rnd((3, 3, 256, 512)); p["l4_g"], p["l4_b"] = jnp.ones((512,)), jnp.zeros((512,))

    # --- module's own parameters: MXU-facing weights stored bf16, biases f32 ---
    p["lat1_w"] = rnd_bf16((64, 512));   p["lat1_b"] = rnd((512,), 0.01)
    p["lat2_w"] = rnd_bf16((128, 512));  p["lat2_b"] = rnd((512,), 0.01)
    p["lat3_w"] = rnd_bf16((256, 512));  p["lat3_b"] = rnd((512,), 0.01)
    p["lat4_w"] = rnd_bf16((512, 512));  p["lat4_b"] = rnd((512,), 0.01)
    # se_fc_* Linear weights are zero-initialized in the PyTorch module.
    for i in (1, 2, 3, 4):
        p[f"se{i}_w1"] = jnp.zeros((512, 32), jnp.bfloat16)
        p[f"se{i}_w2"] = jnp.zeros((32, 1), jnp.bfloat16)
    p["c11_w"] = rnd_bf16((512, 512));  p["c11_b"] = rnd((512,), 0.01)
    p["fc1_w"] = rnd_bf16((512, 256));  p["fc1_b"] = rnd((256,), 0.01)
    p["a1_w"] = rnd_bf16((256, 128));   p["a1_b"] = rnd((128,), 0.01)
    p["a2_w"] = rnd_bf16((128, 1));     p["a2_b"] = rnd((1,), 0.01)
    p["fc2_w"] = rnd_bf16((256, num_classes)); p["fc2_b"] = rnd((num_classes,), 0.01)
    return p


def resnet_attention_forward(x, p):
    # x: (1, B, 3, H, W)  (PyTorch NCHW with an extra leading bag dim)
    x = jnp.squeeze(x, axis=0)               # (B, 3, H, W)   == x.squeeze(0)
    x = jnp.transpose(x, (0, 2, 3, 1))       # -> NHWC

    # synthetic backbone (plain-JAX glue; external `model` in the PyTorch code)
    x = conv_bn_relu(x, p["conv1_w"], p["bn1_g"], p["bn1_b"], 1)   # (B,56,56,64)
    x = maxpool_3x3_s2(x)                                          # (B,28,28,64)
    f1 = conv_bn_relu(x, p["l1_w"], p["l1_g"], p["l1_b"], 1)       # (B,28,28,64)
    f2 = conv_bn_relu(f1, p["l2_w"], p["l2_g"], p["l2_b"], 2)      # (B,14,14,128)
    f3 = conv_bn_relu(f2, p["l3_w"], p["l3_g"], p["l3_b"], 2)      # (B,7,7,256)
    f4 = conv_bn_relu(f3, p["l4_w"], p["l4_g"], p["l4_b"], 1)      # (B,7,7,512)

    # Pool-before-lateral (linearity): the 7x7 adaptive pool and SE global mean
    # commute with the 1x1 laterals, so bucket into 49 bins now; the averaging,
    # laterals, SE gates, gating and 4-scale fusion all run in one Pallas kernel.
    fb = (pool_blocks(f1), pool_blocks(f2), pool_blocks(f3), pool_blocks(f4))
    fused = pallas_scale_fuse(fb, p)                               # (B, 49, 512)

    # conv1_1 + avgpool1 + fc1_1 + attention1 + softmax + mm + fc2_1 (one kernel)
    return pallas_tail(fused, p)                                   # (1, num_classes)


if __name__ == "__main__":
    num_classes = 5
    bag_size, H, W = 2, 56, 56
    key = jax.random.PRNGKey(0)
    pkey, xkey = jax.random.split(key)
    params = init_params(pkey, num_classes)
    x = jax.random.normal(xkey, (1, bag_size, 3, H, W), jnp.float32)

    fwd = jax.jit(lambda inp: resnet_attention_forward(inp, params))
    out = jax.block_until_ready(fwd(x))
    assert out.shape == (1, num_classes), out.shape
    assert bool(jnp.all(jnp.isfinite(out)))
    print("KERNEL_OK")
</pallas_src>

<mosaic_0001>
module attributes {stable_mosaic.version = 11 : i64} {
  func.func @_scale_fuse_kernel(%arg0: i32, %arg1: memref<1x49x16x64xf32, #tpu.memory_space<vmem>>, %arg2: memref<1x49x4x128xf32, #tpu.memory_space<vmem>>, %arg3: memref<1x49x1x256xf32, #tpu.memory_space<vmem>>, %arg4: memref<1x49x1x512xf32, #tpu.memory_space<vmem>>, %arg5: memref<64x512xbf16, #tpu.memory_space<vmem>>, %arg6: memref<1x512xf32, #tpu.memory_space<vmem>>, %arg7: memref<128x512xbf16, #tpu.memory_space<vmem>>, %arg8: memref<1x512xf32, #tpu.memory_space<vmem>>, %arg9: memref<256x512xbf16, #tpu.memory_space<vmem>>, %arg10: memref<1x512xf32, #tpu.memory_space<vmem>>, %arg11: memref<512x512xbf16, #tpu.memory_space<vmem>>, %arg12: memref<1x512xf32, #tpu.memory_space<vmem>>, %arg13: memref<512x32xbf16, #tpu.memory_space<vmem>>, %arg14: memref<32x1xbf16, #tpu.memory_space<vmem>>, %arg15: memref<512x32xbf16, #tpu.memory_space<vmem>>, %arg16: memref<32x1xbf16, #tpu.memory_space<vmem>>, %arg17: memref<512x32xbf16, #tpu.memory_space<vmem>>, %arg18: memref<32x1xbf16, #tpu.memory_space<vmem>>, %arg19: memref<512x32xbf16, #tpu.memory_space<vmem>>, %arg20: memref<32x1xbf16, #tpu.memory_space<vmem>>, %arg21: memref<1x49x512xf32, #tpu.memory_space<vmem>>) attributes {dimension_semantics = [#tpu.dimension_semantics<parallel>], iteration_bounds = array<i64: 2>, scalar_prefetch = 0 : i64, scratch_operands = 0 : i64, tpu.core_type = #tpu.core_type<tc>, window_params = [{transform_indices = @transform_0, window_bounds = array<i64: 1, 49, 16, 64>}, {transform_indices = @transform_1, window_bounds = array<i64: 1, 49, 4, 128>}, {transform_indices = @transform_2, window_bounds = array<i64: 1, 49, 1, 256>}, {transform_indices = @transform_3, window_bounds = array<i64: 1, 49, 1, 512>}, {pipeline_mode = #tpu.pipeline_mode<synchronous>, transform_indices = @transform_4, window_bounds = array<i64: 64, 512>}, {pipeline_mode = #tpu.pipeline_mode<synchronous>, transform_indices = @transform_5, window_bounds = array<i64: 1, 512>}, {pipeline_mode = #tpu.pipeline_mode<synchronous>, transform_indices = @transform_6, window_bounds = array<i64: 128, 512>}, {pipeline_mode = #tpu.pipeline_mode<synchronous>, transform_indices = @transform_7, window_bounds = array<i64: 1, 512>}, {pipeline_mode = #tpu.pipeline_mode<synchronous>, transform_indices = @transform_8, window_bounds = array<i64: 256, 512>}, {pipeline_mode = #tpu.pipeline_mode<synchronous>, transform_indices = @transform_9, window_bounds = array<i64: 1, 512>}, {pipeline_mode = #tpu.pipeline_mode<synchronous>, transform_indices = @transform_10, window_bounds = array<i64: 512, 512>}, {pipeline_mode = #tpu.pipeline_mode<synchronous>, transform_indices = @transform_11, window_bounds = array<i64: 1, 512>}, {pipeline_mode = #tpu.pipeline_mode<synchronous>, transform_indices = @transform_12, window_bounds = array<i64: 512, 32>}, {pipeline_mode = #tpu.pipeline_mode<synchronous>, transform_indices = @transform_13, window_bounds = array<i64: 32, 1>}, {pipeline_mode = #tpu.pipeline_mode<synchronous>, transform_indices = @transform_14, window_bounds = array<i64: 512, 32>}, {pipeline_mode = #tpu.pipeline_mode<synchronous>, transform_indices = @transform_15, window_bounds = array<i64: 32, 1>}, {pipeline_mode = #tpu.pipeline_mode<synchronous>, transform_indices = @transform_16, window_bounds = array<i64: 512, 32>}, {pipeline_mode = #tpu.pipeline_mode<synchronous>, transform_indices = @transform_17, window_bounds = array<i64: 32, 1>}, {pipeline_mode = #tpu.pipeline_mode<synchronous>, transform_indices = @transform_18, window_bounds = array<i64: 512, 32>}, {pipeline_mode = #tpu.pipeline_mode<synchronous>, transform_indices = @transform_19, window_bounds = array<i64: 32, 1>}, {transform_indices = @transform_20, window_bounds = array<i64: 1, 49, 512>}]} {
    %c0 = arith.constant 0 : index
    %c0_0 = arith.constant 0 : index
    %c0_1 = arith.constant 0 : index
    %c0_2 = arith.constant 0 : index
    %0 = vector.load %arg1[%c0, %c0_0, %c0_1, %c0_2] : memref<1x49x16x64xf32, #tpu.memory_space<vmem>>, vector<1x49x16x64xf32>
    %1 = vector.shape_cast %0 : vector<1x49x16x64xf32> to vector<49x16x64xf32>
    %cst = arith.constant dense<0.000000e+00> : vector<49x64xf32>
    %2 = vector.multi_reduction <add>, %1, %cst [1] : vector<49x16x64xf32> to vector<49x64xf32>
    %cst_3 = arith.constant 1.600000e+01 : f32
    %3 = vector.broadcast %cst_3 : f32 to vector<49x64xf32>
    %4 = arith.divf %2, %3 : vector<49x64xf32>
    %5 = arith.truncf %4 : vector<49x64xf32> to vector<49x64xbf16>
    %c0_4 = arith.constant 0 : index
    %c0_5 = arith.constant 0 : index
    %6 = vector.load %arg5[%c0_4, %c0_5] : memref<64x512xbf16, #tpu.memory_space<vmem>>, vector<64x512xbf16>
    %cst_6 = arith.constant dense<0.000000e+00> : vector<49x512xf32>
    %7 = tpu.matmul %5, %6, %cst_6 {dimension_numbers = #tpu.dot_dimension_numbers<[1], [0], [0], [1], [0, 0, 1, 1], [], []>} : vector<49x64xbf16>, vector<64x512xbf16>, vector<49x512xf32> -> vector<49x512xf32>
    %c0_7 = arith.constant 0 : index
    %c0_8 = arith.constant 0 : index
    %8 = vector.load %arg6[%c0_7, %c0_8] : memref<1x512xf32, #tpu.memory_space<vmem>>, vector<1x512xf32>
    %9 = vector.broadcast %8 : vector<1x512xf32> to vector<49x512xf32>
    %10 = arith.addf %7, %9 : vector<49x512xf32>
    %cst_9 = arith.constant dense<0.000000e+00> : vector<512xf32>
    %11 = vector.multi_reduction <add>, %10, %cst_9 [0] : vector<49x512xf32> to vector<512xf32>
    %12 = vector.shape_cast %11 : vector<512xf32> to vector<1x512xf32>
    %cst_10 = arith.constant 4.900000e+01 : f32
    %13 = vector.broadcast %cst_10 : f32 to vector<1x512xf32>
    %14 = arith.divf %12, %13 : vector<1x512xf32>
    %15 = arith.truncf %14 : vector<1x512xf32> to vector<1x512xbf16>
    %c0_11 = arith.constant 0 : index
    %c0_12 = arith.constant 0 : index
    %16 = vector.load %arg13[%c0_11, %c0_12] : memref<512x32xbf16, #tpu.memory_space<vmem>>, vector<512x32xbf16>
    %cst_13 = arith.constant dense<0.000000e+00> : vector<1x32xf32>
    %17 = tpu.matmul %15, %16, %cst_13 {dimension_numbers = #tpu.dot_dimension_numbers<[1], [0], [0], [1], [0, 0, 1, 1], [], []>} : vector<1x512xbf16>, vector<512x32xbf16>, vector<1x32xf32> -> vector<1x32xf32>
    %cst_14 = arith.constant 0.000000e+00 : f32
    %18 = vector.broadcast %cst_14 : f32 to vector<1x32xf32>
    %19 = arith.maximumf %17, %18 : vector<1x32xf32>
    %20 = arith.truncf %19 : vector<1x32xf32> to vector<1x32xbf16>
    %c0_15 = arith.constant 0 : index
    %c0_16 = arith.constant 0 : index
    %21 = vector.load %arg14[%c0_15, %c0_16] : memref<32x1xbf16, #tpu.memory_space<vmem>>, vector<32x1xbf16>
    %cst_17 = arith.constant dense<0.000000e+00> : vector<1x1xf32>
    %22 = tpu.matmul %20, %21, %cst_17 {dimension_numbers = #tpu.dot_dimension_numbers<[1], [0], [0], [1], [0, 0, 1, 1], [], []>} : vector<1x32xbf16>, vector<32x1xbf16>, vector<1x1xf32> -> vector<1x1xf32>
    %cst_18 = arith.constant 0.000000e+00 : f32
    %23 = vector.broadcast %cst_18 : f32 to vector<1x1xf32>
    %24 = arith.maximumf %22, %23 : vector<1x1xf32>
    %cst_19 = arith.constant 0.000000e+00 : f32
    %25 = vector.broadcast %cst_19 : f32 to vector<1x1xf32>
    %26 = arith.subf %25, %24 : vector<1x1xf32>
    %27 = math.exp %26 : vector<1x1xf32>
    %cst_20 = arith.constant 1.000000e+00 : f32
    %28 = vector.broadcast %cst_20 : f32 to vector<1x1xf32>
    %29 = arith.addf %28, %27 : vector<1x1xf32>
    %30 = tpu.reciprocal %29 {approx = true} : vector<1x1xf32> -> vector<1x1xf32>
    %cst_21 = arith.constant 1.000000e+00 : f32
    %31 = vector.broadcast %cst_21 : f32 to vector<1x1xf32>
    %32 = arith.addf %31, %30 : vector<1x1xf32>
    %33 = vector.broadcast %32 : vector<1x1xf32> to vector<49x512xf32>
    %34 = arith.mulf %10, %33 : vector<49x512xf32>
    %c0_22 = arith.constant 0 : index
    %c0_23 = arith.constant 0 : index
    %c0_24 = arith.constant 0 : index
    %c0_25 = arith.constant 0 : index
    %35 = vector.load %arg2[%c0_22, %c0_23, %c0_24, %c0_25] : memref<1x49x4x128xf32, #tpu.memory_space<vmem>>, vector<1x49x4x128xf32>
    %36 = vector.shape_cast %35 : vector<1x49x4x128xf32> to vector<49x4x128xf32>
    %cst_26 = arith.constant dense<0.000000e+00> : vector<49x128xf32>
    %37 = vector.multi_reduction <add>, %36, %cst_26 [1] : vector<49x4x128xf32> to vector<49x128xf32>
    %cst_27 = arith.constant 4.000000e+00 : f32
    %38 = vector.broadcast %cst_27 : f32 to vector<49x128xf32>
    %39 = arith.divf %37, %38 : vector<49x128xf32>
    %40 = arith.truncf %39 : vector<49x128xf32> to vector<49x128xbf16>
    %c0_28 = arith.constant 0 : index
    %c0_29 = arith.constant 0 : index
    %41 = vector.load %arg7[%c0_28, %c0_29] : memref<128x512xbf16, #tpu.memory_space<vmem>>, vector<128x512xbf16>
    %cst_30 = arith.constant dense<0.000000e+00> : vector<49x512xf32>
    %42 = tpu.matmul %40, %41, %cst_30 {dimension_numbers = #tpu.dot_dimension_numbers<[1], [0], [0], [1], [0, 0, 1, 1], [], []>} : vector<49x128xbf16>, vector<128x512xbf16>, vector<49x512xf32> -> vector<49x512xf32>
    %c0_31 = arith.constant 0 : index
    %c0_32 = arith.constant 0 : index
    %43 = vector.load %arg8[%c0_31, %c0_32] : memref<1x512xf32, #tpu.memory_space<vmem>>, vector<1x512xf32>
    %44 = vector.broadcast %43 : vector<1x512xf32> to vector<49x512xf32>
    %45 = arith.addf %42, %44 : vector<49x512xf32>
    %cst_33 = arith.constant dense<0.000000e+00> : vector<512xf32>
    %46 = vector.multi_reduction <add>, %45, %cst_33 [0] : vector<49x512xf32> to vector<512xf32>
    %47 = vector.shape_cast %46 : vector<512xf32> to vector<1x512xf32>
    %cst_34 = arith.constant 4.900000e+01 : f32
    %48 = vector.broadcast %cst_34 : f32 to vector<1x512xf32>
    %49 = arith.divf %47, %48 : vector<1x512xf32>
    %50 = arith.truncf %49 : vector<1x512xf32> to vector<1x512xbf16>
    %c0_35 = arith.constant 0 : index
    %c0_36 = arith.constant 0 : index
    %51 = vector.load %arg15[%c0_35, %c0_36] : memref<512x32xbf16, #tpu.memory_space<vmem>>, vector<512x32xbf16>
    %cst_37 = arith.constant dense<0.000000e+00> : vector<1x32xf32>
    %52 = tpu.matmul %50, %51, %cst_37 {dimension_numbers = #tpu.dot_dimension_numbers<[1], [0], [0], [1], [0, 0, 1, 1], [], []>} : vector<1x512xbf16>, vector<512x32xbf16>, vector<1x32xf32> -> vector<1x32xf32>
    %cst_38 = arith.constant 0.000000e+00 : f32
    %53 = vector.broadcast %cst_38 : f32 to vector<1x32xf32>
    %54 = arith.maximumf %52, %53 : vector<1x32xf32>
    %55 = arith.truncf %54 : vector<1x32xf32> to vector<1x32xbf16>
    %c0_39 = arith.constant 0 : index
    %c0_40 = arith.constant 0 : index
    %56 = vector.load %arg16[%c0_39, %c0_40] : memref<32x1xbf16, #tpu.memory_space<vmem>>, vector<32x1xbf16>
    %cst_41 = arith.constant dense<0.000000e+00> : vector<1x1xf32>
    %57 = tpu.matmul %55, %56, %cst_41 {dimension_numbers = #tpu.dot_dimension_numbers<[1], [0], [0], [1], [0, 0, 1, 1], [], []>} : vector<1x32xbf16>, vector<32x1xbf16>, vector<1x1xf32> -> vector<1x1xf32>
    %cst_42 = arith.constant 0.000000e+00 : f32
    %58 = vector.broadcast %cst_42 : f32 to vector<1x1xf32>
    %59 = arith.maximumf %57, %58 : vector<1x1xf32>
    %cst_43 = arith.constant 0.000000e+00 : f32
    %60 = vector.broadcast %cst_43 : f32 to vector<1x1xf32>
    %61 = arith.subf %60, %59 : vector<1x1xf32>
    %62 = math.exp %61 : vector<1x1xf32>
    %cst_44 = arith.constant 1.000000e+00 : f32
    %63 = vector.broadcast %cst_44 : f32 to vector<1x1xf32>
    %64 = arith.addf %63, %62 : vector<1x1xf32>
    %65 = tpu.reciprocal %64 {approx = true} : vector<1x1xf32> -> vector<1x1xf32>
    %cst_45 = arith.constant 1.000000e+00 : f32
    %66 = vector.broadcast %cst_45 : f32 to vector<1x1xf32>
    %67 = arith.addf %66, %65 : vector<1x1xf32>
    %68 = vector.broadcast %67 : vector<1x1xf32> to vector<49x512xf32>
    %69 = arith.mulf %45, %68 : vector<49x512xf32>
    %70 = arith.addf %34, %69 : vector<49x512xf32>
    %c0_46 = arith.constant 0 : index
    %c0_47 = arith.constant 0 : index
    %c0_48 = arith.constant 0 : index
    %c0_49 = arith.constant 0 : index
    %71 = vector.load %arg3[%c0_46, %c0_47, %c0_48, %c0_49] : memref<1x49x1x256xf32, #tpu.memory_space<vmem>>, vector<1x49x1x256xf32>
    %72 = vector.shape_cast %71 : vector<1x49x1x256xf32> to vector<49x1x256xf32>
    %cst_50 = arith.constant dense<0.000000e+00> : vector<49x256xf32>
    %73 = vector.multi_reduction <add>, %72, %cst_50 [1] : vector<49x1x256xf32> to vector<49x256xf32>
    %cst_51 = arith.constant 1.000000e+00 : f32
    %74 = vector.broadcast %cst_51 : f32 to vector<49x256xf32>
    %75 = arith.divf %73, %74 : vector<49x256xf32>
    %76 = arith.truncf %75 : vector<49x256xf32> to vector<49x256xbf16>
    %c0_52 = arith.constant 0 : index
    %c0_53 = arith.constant 0 : index
    %77 = vector.load %arg9[%c0_52, %c0_53] : memref<256x512xbf16, #tpu.memory_space<vmem>>, vector<256x512xbf16>
    %cst_54 = arith.constant dense<0.000000e+00> : vector<49x512xf32>
    %78 = tpu.matmul %76, %77, %cst_54 {dimension_numbers = #tpu.dot_dimension_numbers<[1], [0], [0], [1], [0, 0, 1, 1], [], []>} : vector<49x256xbf16>, vector<256x512xbf16>, vector<49x512xf32> -> vector<49x512xf32>
    %c0_55 = arith.constant 0 : index
    %c0_56 = arith.constant 0 : index
    %79 = vector.load %arg10[%c0_55, %c0_56] : memref<1x512xf32, #tpu.memory_space<vmem>>, vector<1x512xf32>
    %80 = vector.broadcast %79 : vector<1x512xf32> to vector<49x512xf32>
    %81 = arith.addf %78, %80 : vector<49x512xf32>
    %cst_57 = arith.constant dense<0.000000e+00> : vector<512xf32>
    %82 = vector.multi_reduction <add>, %81, %cst_57 [0] : vector<49x512xf32> to vector<512xf32>
    %83 = vector.shape_cast %82 : vector<512xf32> to vector<1x512xf32>
    %cst_58 = arith.constant 4.900000e+01 : f32
    %84 = vector.broadcast %cst_58 : f32 to vector<1x512xf32>
    %85 = arith.divf %83, %84 : vector<1x512xf32>
    %86 = arith.truncf %85 : vector<1x512xf32> to vector<1x512xbf16>
    %c0_59 = arith.constant 0 : index
    %c0_60 = arith.constant 0 : index
    %87 = vector.load %arg17[%c0_59, %c0_60] : memref<512x32xbf16, #tpu.memory_space<vmem>>, vector<512x32xbf16>
    %cst_61 = arith.constant dense<0.000000e+00> : vector<1x32xf32>
    %88 = tpu.matmul %86, %87, %cst_61 {dimension_numbers = #tpu.dot_dimension_numbers<[1], [0], [0], [1], [0, 0, 1, 1], [], []>} : vector<1x512xbf16>, vector<512x32xbf16>, vector<1x32xf32> -> vector<1x32xf32>
    %cst_62 = arith.constant 0.000000e+00 : f32
    %89 = vector.broadcast %cst_62 : f32 to vector<1x32xf32>
    %90 = arith.maximumf %88, %89 : vector<1x32xf32>
    %91 = arith.truncf %90 : vector<1x32xf32> to vector<1x32xbf16>
    %c0_63 = arith.constant 0 : index
    %c0_64 = arith.constant 0 : index
    %92 = vector.load %arg18[%c0_63, %c0_64] : memref<32x1xbf16, #tpu.memory_space<vmem>>, vector<32x1xbf16>
    %cst_65 = arith.constant dense<0.000000e+00> : vector<1x1xf32>
    %93 = tpu.matmul %91, %92, %cst_65 {dimension_numbers = #tpu.dot_dimension_numbers<[1], [0], [0], [1], [0, 0, 1, 1], [], []>} : vector<1x32xbf16>, vector<32x1xbf16>, vector<1x1xf32> -> vector<1x1xf32>
    %cst_66 = arith.constant 0.000000e+00 : f32
    %94 = vector.broadcast %cst_66 : f32 to vector<1x1xf32>
    %95 = arith.maximumf %93, %94 : vector<1x1xf32>
    %cst_67 = arith.constant 0.000000e+00 : f32
    %96 = vector.broadcast %cst_67 : f32 to vector<1x1xf32>
    %97 = arith.subf %96, %95 : vector<1x1xf32>
    %98 = math.exp %97 : vector<1x1xf32>
    %cst_68 = arith.constant 1.000000e+00 : f32
    %99 = vector.broadcast %cst_68 : f32 to vector<1x1xf32>
    %100 = arith.addf %99, %98 : vector<1x1xf32>
    %101 = tpu.reciprocal %100 {approx = true} : vector<1x1xf32> -> vector<1x1xf32>
    %cst_69 = arith.constant 1.000000e+00 : f32
    %102 = vector.broadcast %cst_69 : f32 to vector<1x1xf32>
    %103 = arith.addf %102, %101 : vector<1x1xf32>
    %104 = vector.broadcast %103 : vector<1x1xf32> to vector<49x512xf32>
    %105 = arith.mulf %81, %104 : vector<49x512xf32>
    %106 = arith.addf %70, %105 : vector<49x512xf32>
    %c0_70 = arith.constant 0 : index
    %c0_71 = arith.constant 0 : index
    %c0_72 = arith.constant 0 : index
    %c0_73 = arith.constant 0 : index
    %107 = vector.load %arg4[%c0_70, %c0_71, %c0_72, %c0_73] : memref<1x49x1x512xf32, #tpu.memory_space<vmem>>, vector<1x49x1x512xf32>
    %108 = vector.shape_cast %107 : vector<1x49x1x512xf32> to vector<49x1x512xf32>
    %cst_74 = arith.constant dense<0.000000e+00> : vector<49x512xf32>
    %109 = vector.multi_reduction <add>, %108, %cst_74 [1] : vector<49x1x512xf32> to vector<49x512xf32>
    %cst_75 = arith.constant 1.000000e+00 : f32
    %110 = vector.broadcast %cst_75 : f32 to vector<49x512xf32>
    %111 = arith.divf %109, %110 : vector<49x512xf32>
    %112 = arith.truncf %111 : vector<49x512xf32> to vector<49x512xbf16>
    %c0_76 = arith.constant 0 : index
    %c0_77 = arith.constant 0 : index
    %113 = vector.load %arg11[%c0_76, %c0_77] : memref<512x512xbf16, #tpu.memory_space<vmem>>, vector<512x512xbf16>
    %cst_78 = arith.constant dense<0.000000e+00> : vector<49x512xf32>
    %114 = tpu.matmul %112, %113, %cst_78 {dimension_numbers = #tpu.dot_dimension_numbers<[1], [0], [0], [1], [0, 0, 1, 1], [], []>} : vector<49x512xbf16>, vector<512x512xbf16>, vector<49x512xf32> -> vector<49x512xf32>
    %c0_79 = arith.constant 0 : index
    %c0_80 = arith.constant 0 : index
    %115 = vector.load %arg12[%c0_79, %c0_80] : memref<1x512xf32, #tpu.memory_space<vmem>>, vector<1x512xf32>
    %116 = vector.broadcast %115 : vector<1x512xf32> to vector<49x512xf32>
    %117 = arith.addf %114, %116 : vector<49x512xf32>
    %cst_81 = arith.constant dense<0.000000e+00> : vector<512xf32>
    %118 = vector.multi_reduction <add>, %117, %cst_81 [0] : vector<49x512xf32> to vector<512xf32>
    %119 = vector.shape_cast %118 : vector<512xf32> to vector<1x512xf32>
    %cst_82 = arith.constant 4.900000e+01 : f32
    %120 = vector.broadcast %cst_82 : f32 to vector<1x512xf32>
    %121 = arith.divf %119, %120 : vector<1x512xf32>
    %122 = arith.truncf %121 : vector<1x512xf32> to vector<1x512xbf16>
    %c0_83 = arith.constant 0 : index
    %c0_84 = arith.constant 0 : index
    %123 = vector.load %arg19[%c0_83, %c0_84] : memref<512x32xbf16, #tpu.memory_space<vmem>>, vector<512x32xbf16>
    %cst_85 = arith.constant dense<0.000000e+00> : vector<1x32xf32>
    %124 = tpu.matmul %122, %123, %cst_85 {dimension_numbers = #tpu.dot_dimension_numbers<[1], [0], [0], [1], [0, 0, 1, 1], [], []>} : vector<1x512xbf16>, vector<512x32xbf16>, vector<1x32xf32> -> vector<1x32xf32>
    %cst_86 = arith.constant 0.000000e+00 : f32
    %125 = vector.broadcast %cst_86 : f32 to vector<1x32xf32>
    %126 = arith.maximumf %124, %125 : vector<1x32xf32>
    %127 = arith.truncf %126 : vector<1x32xf32> to vector<1x32xbf16>
    %c0_87 = arith.constant 0 : index
    %c0_88 = arith.constant 0 : index
    %128 = vector.load %arg20[%c0_87, %c0_88] : memref<32x1xbf16, #tpu.memory_space<vmem>>, vector<32x1xbf16>
    %cst_89 = arith.constant dense<0.000000e+00> : vector<1x1xf32>
    %129 = tpu.matmul %127, %128, %cst_89 {dimension_numbers = #tpu.dot_dimension_numbers<[1], [0], [0], [1], [0, 0, 1, 1], [], []>} : vector<1x32xbf16>, vector<32x1xbf16>, vector<1x1xf32> -> vector<1x1xf32>
    %cst_90 = arith.constant 0.000000e+00 : f32
    %130 = vector.broadcast %cst_90 : f32 to vector<1x1xf32>
    %131 = arith.maximumf %129, %130 : vector<1x1xf32>
    %cst_91 = arith.constant 0.000000e+00 : f32
    %132 = vector.broadcast %cst_91 : f32 to vector<1x1xf32>
    %133 = arith.subf %132, %131 : vector<1x1xf32>
    %134 = math.exp %133 : vector<1x1xf32>
    %cst_92 = arith.constant 1.000000e+00 : f32
    %135 = vector.broadcast %cst_92 : f32 to vector<1x1xf32>
    %136 = arith.addf %135, %134 : vector<1x1xf32>
    %137 = tpu.reciprocal %136 {approx = true} : vector<1x1xf32> -> vector<1x1xf32>
    %cst_93 = arith.constant 1.000000e+00 : f32
    %138 = vector.broadcast %cst_93 : f32 to vector<1x1xf32>
    %139 = arith.addf %138, %137 : vector<1x1xf32>
    %140 = vector.broadcast %139 : vector<1x1xf32> to vector<49x512xf32>
    %141 = arith.mulf %117, %140 : vector<49x512xf32>
    %142 = arith.addf %106, %141 : vector<49x512xf32>
    %c0_94 = arith.constant 0 : index
    %c0_95 = arith.constant 0 : index
    %c0_96 = arith.constant 0 : index
    %143 = vector.load %arg21[%c0_94, %c0_95, %c0_96] : memref<1x49x512xf32, #tpu.memory_space<vmem>>, vector<1x49x512xf32>
    %144 = vector.shape_cast %143 : vector<1x49x512xf32> to vector<49x512xf32>
    %145 = vector.shape_cast %142 : vector<49x512xf32> to vector<1x49x512xf32>
    tpu.vector_store %arg21[%c0_94, %c0_95, %c0_96], %145 {strides = array<i32>} : memref<1x49x512xf32, #tpu.memory_space<vmem>>, vector<1x49x512xf32>,
    return
  }
  func.func @transform_0(%arg0: i32) -> (i32, i32, i32, i32) {
    %c0_i32 = arith.constant 0 : i32
    %c0_i32_0 = arith.constant 0 : i32
    %c0_i32_1 = arith.constant 0 : i32
    %c0_i32_2 = arith.constant 0 : i32
    return %arg0, %c0_i32, %c0_i32_0, %c0_i32_1 : i32, i32, i32, i32
  }
  func.func @transform_1(%arg0: i32) -> (i32, i32, i32, i32) {
    %c0_i32 = arith.constant 0 : i32
    %c0_i32_0 = arith.constant 0 : i32
    %c0_i32_1 = arith.constant 0 : i32
    %c0_i32_2 = arith.constant 0 : i32
    return %arg0, %c0_i32, %c0_i32_0, %c0_i32_1 : i32, i32, i32, i32
  }
  func.func @transform_2(%arg0: i32) -> (i32, i32, i32, i32) {
    %c0_i32 = arith.constant 0 : i32
    %c0_i32_0 = arith.constant 0 : i32
    %c0_i32_1 = arith.constant 0 : i32
    %c0_i32_2 = arith.constant 0 : i32
    return %arg0, %c0_i32, %c0_i32_0, %c0_i32_1 : i32, i32, i32, i32
  }
  func.func @transform_3(%arg0: i32) -> (i32, i32, i32, i32) {
    %c0_i32 = arith.constant 0 : i32
    %c0_i32_0 = arith.constant 0 : i32
    %c0_i32_1 = arith.constant 0 : i32
    %c0_i32_2 = arith.constant 0 : i32
    return %arg0, %c0_i32, %c0_i32_0, %c0_i32_1 : i32, i32, i32, i32
  }
  func.func @transform_4(%arg0: i32) -> (i32, i32) {
    %c0_i32 = arith.constant 0 : i32
    %c0_i32_0 = arith.constant 0 : i32
    %c0_i32_1 = arith.constant 0 : i32
    return %c0_i32, %c0_i32_0 : i32, i32
  }
  func.func @transform_5(%arg0: i32) -> (i32, i32) {
    %c0_i32 = arith.constant 0 : i32
    %c0_i32_0 = arith.constant 0 : i32
    %c0_i32_1 = arith.constant 0 : i32
    return %c0_i32, %c0_i32_0 : i32, i32
  }
  func.func @transform_6(%arg0: i32) -> (i32, i32) {
    %c0_i32 = arith.constant 0 : i32
    %c0_i32_0 = arith.constant 0 : i32
    %c0_i32_1 = arith.constant 0 : i32
    return %c0_i32, %c0_i32_0 : i32, i32
  }
  func.func @transform_7(%arg0: i32) -> (i32, i32) {
    %c0_i32 = arith.constant 0 : i32
    %c0_i32_0 = arith.constant 0 : i32
    %c0_i32_1 = arith.constant 0 : i32
    return %c0_i32, %c0_i32_0 : i32, i32
  }
  func.func @transform_8(%arg0: i32) -> (i32, i32) {
    %c0_i32 = arith.constant 0 : i32
    %c0_i32_0 = arith.constant 0 : i32
    %c0_i32_1 = arith.constant 0 : i32
    return %c0_i32, %c0_i32_0 : i32, i32
  }
  func.func @transform_9(%arg0: i32) -> (i32, i32) {
    %c0_i32 = arith.constant 0 : i32
    %c0_i32_0 = arith.constant 0 : i32
    %c0_i32_1 = arith.constant 0 : i32
    return %c0_i32, %c0_i32_0 : i32, i32
  }
  func.func @transform_10(%arg0: i32) -> (i32, i32) {
    %c0_i32 = arith.constant 0 : i32
    %c0_i32_0 = arith.constant 0 : i32
    %c0_i32_1 = arith.constant 0 : i32
    return %c0_i32, %c0_i32_0 : i32, i32
  }
  func.func @transform_11(%arg0: i32) -> (i32, i32) {
    %c0_i32 = arith.constant 0 : i32
    %c0_i32_0 = arith.constant 0 : i32
    %c0_i32_1 = arith.constant 0 : i32
    return %c0_i32, %c0_i32_0 : i32, i32
  }
  func.func @transform_12(%arg0: i32) -> (i32, i32) {
    %c0_i32 = arith.constant 0 : i32
    %c0_i32_0 = arith.constant 0 : i32
    %c0_i32_1 = arith.constant 0 : i32
    return %c0_i32, %c0_i32_0 : i32, i32
  }
  func.func @transform_13(%arg0: i32) -> (i32, i32) {
    %c0_i32 = arith.constant 0 : i32
    %c0_i32_0 = arith.constant 0 : i32
    %c0_i32_1 = arith.constant 0 : i32
    return %c0_i32, %c0_i32_0 : i32, i32
  }
  func.func @transform_14(%arg0: i32) -> (i32, i32) {
    %c0_i32 = arith.constant 0 : i32
    %c0_i32_0 = arith.constant 0 : i32
    %c0_i32_1 = arith.constant 0 : i32
    return %c0_i32, %c0_i32_0 : i32, i32
  }
  func.func @transform_15(%arg0: i32) -> (i32, i32) {
    %c0_i32 = arith.constant 0 : i32
    %c0_i32_0 = arith.constant 0 : i32
    %c0_i32_1 = arith.constant 0 : i32
    return %c0_i32, %c0_i32_0 : i32, i32
  }
  func.func @transform_16(%arg0: i32) -> (i32, i32) {
    %c0_i32 = arith.constant 0 : i32
    %c0_i32_0 = arith.constant 0 : i32
    %c0_i32_1 = arith.constant 0 : i32
    return %c0_i32, %c0_i32_0 : i32, i32
  }
  func.func @transform_17(%arg0: i32) -> (i32, i32) {
    %c0_i32 = arith.constant 0 : i32
    %c0_i32_0 = arith.constant 0 : i32
    %c0_i32_1 = arith.constant 0 : i32
    return %c0_i32, %c0_i32_0 : i32, i32
  }
  func.func @transform_18(%arg0: i32) -> (i32, i32) {
    %c0_i32 = arith.constant 0 : i32
    %c0_i32_0 = arith.constant 0 : i32
    %c0_i32_1 = arith.constant 0 : i32
    return %c0_i32, %c0_i32_0 : i32, i32
  }
  func.func @transform_19(%arg0: i32) -> (i32, i32) {
    %c0_i32 = arith.constant 0 : i32
    %c0_i32_0 = arith.constant 0 : i32
    %c0_i32_1 = arith.constant 0 : i32
    return %c0_i32, %c0_i32_0 : i32, i32
  }
  func.func @transform_20(%arg0: i32) -> (i32, i32, i32) {
    %c0_i32 = arith.constant 0 : i32
    %c0_i32_0 = arith.constant 0 : i32
    %c0_i32_1 = arith.constant 0 : i32
    return %arg0, %c0_i32, %c0_i32_0 : i32, i32, i32
  }
}

module attributes {stable_mosaic.version = 11 : i64} {
  func.func @_tail_kernel(%arg0: i32, %arg1: memref<2x49x512xf32, #tpu.memory_space<vmem>>, %arg2: memref<512x512xbf16, #tpu.memory_space<vmem>>, %arg3: memref<1x512xf32, #tpu.memory_space<vmem>>, %arg4: memref<512x256xbf16, #tpu.memory_space<vmem>>, %arg5: memref<1x256xf32, #tpu.memory_space<vmem>>, %arg6: memref<256x128xbf16, #tpu.memory_space<vmem>>, %arg7: memref<1x128xf32, #tpu.memory_space<vmem>>, %arg8: memref<128x1xbf16, #tpu.memory_space<vmem>>, %arg9: memref<1x1xf32, #tpu.memory_space<vmem>>, %arg10: memref<256x5xbf16, #tpu.memory_space<vmem>>, %arg11: memref<1x5xf32, #tpu.memory_space<vmem>>, %arg12: memref<1x5xf32, #tpu.memory_space<vmem>>) attributes {dimension_semantics = [#tpu.dimension_semantics<arbitrary>], iteration_bounds = array<i64: 1>, scalar_prefetch = 0 : i64, scratch_operands = 0 : i64, tpu.core_type = #tpu.core_type<tc>, window_params = [{pipeline_mode = #tpu.pipeline_mode<synchronous>, transform_indices = @transform_0, window_bounds = array<i64: 2, 49, 512>}, {pipeline_mode = #tpu.pipeline_mode<synchronous>, transform_indices = @transform_1, window_bounds = array<i64: 512, 512>}, {pipeline_mode = #tpu.pipeline_mode<synchronous>, transform_indices = @transform_2, window_bounds = array<i64: 1, 512>}, {pipeline_mode = #tpu.pipeline_mode<synchronous>, transform_indices = @transform_3, window_bounds = array<i64: 512, 256>}, {pipeline_mode = #tpu.pipeline_mode<synchronous>, transform_indices = @transform_4, window_bounds = array<i64: 1, 256>}, {pipeline_mode = #tpu.pipeline_mode<synchronous>, transform_indices = @transform_5, window_bounds = array<i64: 256, 128>}, {pipeline_mode = #tpu.pipeline_mode<synchronous>, transform_indices = @transform_6, window_bounds = array<i64: 1, 128>}, {pipeline_mode = #tpu.pipeline_mode<synchronous>, transform_indices = @transform_7, window_bounds = array<i64: 128, 1>}, {pipeline_mode = #tpu.pipeline_mode<synchronous>, transform_indices = @transform_8, window_bounds = array<i64: 1, 1>}, {pipeline_mode = #tpu.pipeline_mode<synchronous>, transform_indices = @transform_9, window_bounds = array<i64: 256, 5>}, {pipeline_mode = #tpu.pipeline_mode<synchronous>, transform_indices = @transform_10, window_bounds = array<i64: 1, 5>}, {pipeline_mode = #tpu.pipeline_mode<synchronous>, transform_indices = @transform_11, window_bounds = array<i64: 1, 5>}]} {
    %c0 = arith.constant 0 : index
    %c0_0 = arith.constant 0 : index
    %c0_1 = arith.constant 0 : index
    %0 = vector.load %arg1[%c0, %c0_0, %c0_1] : memref<2x49x512xf32, #tpu.memory_space<vmem>>, vector<2x49x512xf32>
    %cst = arith.constant dense<0.000000e+00> : vector<2x512xf32>
    %1 = vector.multi_reduction <add>, %0, %cst [1] : vector<2x49x512xf32> to vector<2x512xf32>
    %cst_2 = arith.constant 4.900000e+01 : f32
    %2 = vector.broadcast %cst_2 : f32 to vector<2x512xf32>
    %3 = arith.divf %1, %2 : vector<2x512xf32>
    %4 = arith.truncf %3 : vector<2x512xf32> to vector<2x512xbf16>
    %c0_3 = arith.constant 0 : index
    %c0_4 = arith.constant 0 : index
    %5 = vector.load %arg2[%c0_3, %c0_4] : memref<512x512xbf16, #tpu.memory_space<vmem>>, vector<512x512xbf16>
    %cst_5 = arith.constant dense<0.000000e+00> : vector<2x512xf32>
    %6 = tpu.matmul %4, %5, %cst_5 {dimension_numbers = #tpu.dot_dimension_numbers<[1], [0], [0], [1], [0, 0, 1, 1], [], []>} : vector<2x512xbf16>, vector<512x512xbf16>, vector<2x512xf32> -> vector<2x512xf32>
    %c0_6 = arith.constant 0 : index
    %c0_7 = arith.constant 0 : index
    %7 = vector.load %arg3[%c0_6, %c0_7] : memref<1x512xf32, #tpu.memory_space<vmem>>, vector<1x512xf32>
    %8 = vector.broadcast %7 : vector<1x512xf32> to vector<2x512xf32>
    %9 = arith.addf %6, %8 : vector<2x512xf32>
    %10 = arith.truncf %9 : vector<2x512xf32> to vector<2x512xbf16>
    %c0_8 = arith.constant 0 : index
    %c0_9 = arith.constant 0 : index
    %11 = vector.load %arg4[%c0_8, %c0_9] : memref<512x256xbf16, #tpu.memory_space<vmem>>, vector<512x256xbf16>
    %cst_10 = arith.constant dense<0.000000e+00> : vector<2x256xf32>
    %12 = tpu.matmul %10, %11, %cst_10 {dimension_numbers = #tpu.dot_dimension_numbers<[1], [0], [0], [1], [0, 0, 1, 1], [], []>} : vector<2x512xbf16>, vector<512x256xbf16>, vector<2x256xf32> -> vector<2x256xf32>
    %c0_11 = arith.constant 0 : index
    %c0_12 = arith.constant 0 : index
    %13 = vector.load %arg5[%c0_11, %c0_12] : memref<1x256xf32, #tpu.memory_space<vmem>>, vector<1x256xf32>
    %14 = vector.broadcast %13 : vector<1x256xf32> to vector<2x256xf32>
    %15 = arith.addf %12, %14 : vector<2x256xf32>
    %cst_13 = arith.constant 0.000000e+00 : f32
    %16 = vector.broadcast %cst_13 : f32 to vector<2x256xf32>
    %17 = arith.maximumf %15, %16 : vector<2x256xf32>
    %18 = arith.truncf %17 : vector<2x256xf32> to vector<2x256xbf16>
    %c0_14 = arith.constant 0 : index
    %c0_15 = arith.constant 0 : index
    %19 = vector.load %arg6[%c0_14, %c0_15] : memref<256x128xbf16, #tpu.memory_space<vmem>>, vector<256x128xbf16>
    %cst_16 = arith.constant dense<0.000000e+00> : vector<2x128xf32>
    %20 = tpu.matmul %18, %19, %cst_16 {dimension_numbers = #tpu.dot_dimension_numbers<[1], [0], [0], [1], [0, 0, 1, 1], [], []>} : vector<2x256xbf16>, vector<256x128xbf16>, vector<2x128xf32> -> vector<2x128xf32>
    %c0_17 = arith.constant 0 : index
    %c0_18 = arith.constant 0 : index
    %21 = vector.load %arg7[%c0_17, %c0_18] : memref<1x128xf32, #tpu.memory_space<vmem>>, vector<1x128xf32>
    %22 = vector.broadcast %21 : vector<1x128xf32> to vector<2x128xf32>
    %23 = arith.addf %20, %22 : vector<2x128xf32>
    %24 = math.tanh %23 : vector<2x128xf32>
    %25 = arith.truncf %24 : vector<2x128xf32> to vector<2x128xbf16>
    %c0_19 = arith.constant 0 : index
    %c0_20 = arith.constant 0 : index
    %26 = vector.load %arg8[%c0_19, %c0_20] : memref<128x1xbf16, #tpu.memory_space<vmem>>, vector<128x1xbf16>
    %cst_21 = arith.constant dense<0.000000e+00> : vector<2x1xf32>
    %27 = tpu.matmul %25, %26, %cst_21 {dimension_numbers = #tpu.dot_dimension_numbers<[1], [0], [0], [1], [0, 0, 1, 1], [], []>} : vector<2x128xbf16>, vector<128x1xbf16>, vector<2x1xf32> -> vector<2x1xf32>
    %c0_22 = arith.constant 0 : index
    %c0_23 = arith.constant 0 : index
    %28 = vector.load %arg9[%c0_22, %c0_23] : memref<1x1xf32, #tpu.memory_space<vmem>>, vector<1x1xf32>
    %29 = vector.broadcast %28 : vector<1x1xf32> to vector<2x1xf32>
    %30 = arith.addf %27, %29 : vector<2x1xf32>
    %cst_24 = arith.constant dense<0xFF800000> : vector<1xf32>
    %31 = vector.multi_reduction <maximumf>, %30, %cst_24 [0] : vector<2x1xf32> to vector<1xf32>
    %32 = vector.shape_cast %31 : vector<1xf32> to vector<1x1xf32>
    %33 = vector.broadcast %32 : vector<1x1xf32> to vector<2x1xf32>
    %34 = arith.subf %30, %33 : vector<2x1xf32>
    %35 = math.exp %34 : vector<2x1xf32>
    %cst_25 = arith.constant dense<0.000000e+00> : vector<1xf32>
    %36 = vector.multi_reduction <add>, %35, %cst_25 [0] : vector<2x1xf32> to vector<1xf32>
    %37 = vector.shape_cast %36 : vector<1xf32> to vector<1x1xf32>
    %38 = tpu.reciprocal %37 {approx = true} : vector<1x1xf32> -> vector<1x1xf32>
    %39 = vector.broadcast %38 : vector<1x1xf32> to vector<2x1xf32>
    %40 = arith.mulf %35, %39 : vector<2x1xf32>
    %41 = vector.broadcast %40 : vector<2x1xf32> to vector<2x256xf32>
    %42 = arith.mulf %41, %17 : vector<2x256xf32>
    %cst_26 = arith.constant dense<0.000000e+00> : vector<256xf32>
    %43 = vector.multi_reduction <add>, %42, %cst_26 [0] : vector<2x256xf32> to vector<256xf32>
    %44 = vector.shape_cast %43 : vector<256xf32> to vector<1x256xf32>
    %45 = arith.truncf %44 : vector<1x256xf32> to vector<1x256xbf16>
    %c0_27 = arith.constant 0 : index
    %c0_28 = arith.constant 0 : index
    %46 = vector.load %arg10[%c0_27, %c0_28] : memref<256x5xbf16, #tpu.memory_space<vmem>>, vector<256x5xbf16>
    %cst_29 = arith.constant dense<0.000000e+00> : vector<1x5xf32>
    %47 = tpu.matmul %45, %46, %cst_29 {dimension_numbers = #tpu.dot_dimension_numbers<[1], [0], [0], [1], [0, 0, 1, 1], [], []>} : vector<1x256xbf16>, vector<256x5xbf16>, vector<1x5xf32> -> vector<1x5xf32>
    %c0_30 = arith.constant 0 : index
    %c0_31 = arith.constant 0 : index
    %48 = vector.load %arg11[%c0_30, %c0_31] : memref<1x5xf32, #tpu.memory_space<vmem>>, vector<1x5xf32>
    %49 = arith.addf %47, %48 : vector<1x5xf32>
    %c0_32 = arith.constant 0 : index
    %c0_33 = arith.constant 0 : index
    %50 = vector.load %arg12[%c0_32, %c0_33] : memref<1x5xf32, #tpu.memory_space<vmem>>, vector<1x5xf32>
    tpu.vector_store %arg12[%c0_32, %c0_33], %49 {strides = array<i32>} : memref<1x5xf32, #tpu.memory_space<vmem>>, vector<1x5xf32>,
    return
  }
  func.func @transform_0(%arg0: i32) -> (i32, i32, i32) {
    %c0_i32 = arith.constant 0 : i32
    %c0_i32_0 = arith.constant 0 : i32
    %c0_i32_1 = arith.constant 0 : i32
    %c0_i32_2 = arith.constant 0 : i32
    return %c0_i32, %c0_i32_0, %c0_i32_1 : i32, i32, i32
  }
  func.func @transform_1(%arg0: i32) -> (i32, i32) {
    %c0_i32 = arith.constant 0 : i32
    %c0_i32_0 = arith.constant 0 : i32
    %c0_i32_1 = arith.constant 0 : i32
    return %c0_i32, %c0_i32_0 : i32, i32
  }
  func.func @transform_2(%arg0: i32) -> (i32, i32) {
    %c0_i32 = arith.constant 0 : i32
    %c0_i32_0 = arith.constant 0 : i32
    %c0_i32_1 = arith.constant 0 : i32
    return %c0_i32, %c0_i32_0 : i32, i32
  }
  func.func @transform_3(%arg0: i32) -> (i32, i32) {
    %c0_i32 = arith.constant 0 : i32
    %c0_i32_0 = arith.constant 0 : i32
    %c0_i32_1 = arith.constant 0 : i32
    return %c0_i32, %c0_i32_0 : i32, i32
  }
  func.func @transform_4(%arg0: i32) -> (i32, i32) {
    %c0_i32 = arith.constant 0 : i32
    %c0_i32_0 = arith.constant 0 : i32
    %c0_i32_1 = arith.constant 0 : i32
    return %c0_i32, %c0_i32_0 : i32, i32
  }
  func.func @transform_5(%arg0: i32) -> (i32, i32) {
    %c0_i32 = arith.constant 0 : i32
    %c0_i32_0 = arith.constant 0 : i32
    %c0_i32_1 = arith.constant 0 : i32
    return %c0_i32, %c0_i32_0 : i32, i32
  }
  func.func @transform_6(%arg0: i32) -> (i32, i32) {
    %c0_i32 = arith.constant 0 : i32
    %c0_i32_0 = arith.constant 0 : i32
    %c0_i32_1 = arith.constant 0 : i32
    return %c0_i32, %c0_i32_0 : i32, i32
  }
  func.func @transform_7(%arg0: i32) -> (i32, i32) {
    %c0_i32 = arith.constant 0 : i32
    %c0_i32_0 = arith.constant 0 : i32
    %c0_i32_1 = arith.constant 0 : i32
    return %c0_i32, %c0_i32_0 : i32, i32
  }
  func.func @transform_8(%arg0: i32) -> (i32, i32) {
    %c0_i32 = arith.constant 0 : i32
    %c0_i32_0 = arith.constant 0 : i32
    %c0_i32_1 = arith.constant 0 : i32
    return %c0_i32, %c0_i32_0 : i32, i32
  }
  func.func @transform_9(%arg0: i32) -> (i32, i32) {
    %c0_i32 = arith.constant 0 : i32
    %c0_i32_0 = arith.constant 0 : i32
    %c0_i32_1 = arith.constant 0 : i32
    return %c0_i32, %c0_i32_0 : i32, i32
  }
  func.func @transform_10(%arg0: i32) -> (i32, i32) {
    %c0_i32 = arith.constant 0 : i32
    %c0_i32_0 = arith.constant 0 : i32
    %c0_i32_1 = arith.constant 0 : i32
    return %c0_i32, %c0_i32_0 : i32, i32
  }
  func.func @transform_11(%arg0: i32) -> (i32, i32) {
    %c0_i32 = arith.constant 0 : i32
    %c0_i32_0 = arith.constant 0 : i32
    %c0_i32_1 = arith.constant 0 : i32
    return %c0_i32, %c0_i32_0 : i32, i32
  }
}

</mosaic_0001>

<bundles_post_ra>
// kernel: _lambda_.2
= control target key start
LH: loop header
LB: loop body
LE: loop exit
PB: predicated region body
PF: predicated region fallthrough
CT: control target
= control target key end

     0   :  { %s15493_s0 = inlined_call_operand.vmem [shape: f32[2,49,16,64], index: 0, kind: input, shape index: {}]   ;;  %s15494_s1 = inlined_call_operand.vmem [shape: f32[2,49,4,128], index: 1, kind: input, shape index: {}]   ;;  %s15495_s2 = inlined_call_operand.vmem [shape: f32[2,49,1,256], index: 2, kind: input, shape index: {}]   ;;  %s15496_s3 = inlined_call_operand.vmem [shape: f32[2,49,1,512], index: 3, kind: input, shape index: {}]   ;;  %s15497_s4 = inlined_call_operand.vmem [shape: bf16[64,512], index: 4, kind: input, shape index: {}]   ;;  %s15498_s5 = inlined_call_operand.vmem [shape: f32[1,512], index: 5, kind: input, shape index: {}]   ;;  %s15499_s6 = inlined_call_operand.vmem [shape: bf16[128,512], index: 6, kind: input, shape index: {}]   ;;  %s15500_s7 = inlined_call_operand.vmem [shape: f32[1,512], index: 7, kind: input, shape index: {}]   ;;  %s15501_s8 = inlined_call_operand.vmem [shape: bf16[256,512], index: 8, kind: input, shape index: {}]   ;;  %s15502_s9 = inlined_call_operand.vmem [shape: f32[1,512], index: 9, kind: input, shape index: {}]   ;;  %s15503_s10 = inlined_call_operand.vmem [shape: bf16[512,512], index: 10, kind: input, shape index: {}]   ;;  %s15504_s11 = inlined_call_operand.vmem [shape: f32[1,512], index: 11, kind: input, shape index: {}]   ;;  %s15505_s12 = inlined_call_operand.vmem [shape: bf16[512,32], index: 12, kind: input, shape index: {}, may-alias: {12,14,16,18}]   ;;  %s15506_s13 = inlined_call_operand.vmem [shape: bf16[32,1], index: 13, kind: input, shape index: {}, may-alias: {13,15,17,19}]   ;;  %s15507_s14 = inlined_call_operand.vmem [shape: bf16[512,32], index: 14, kind: input, shape index: {}, may-alias: {12,14,16,18}]   ;;  %s15508_s15 = inlined_call_operand.vmem [shape: bf16[32,1], index: 15, kind: input, shape index: {}, may-alias: {13,15,17,19}]   ;;  %s15509_s16 = inlined_call_operand.vmem [shape: bf16[512,32], index: 16, kind: input, shape index: {}, may-alias: {12,14,16,18}]   ;;  %s15510_s17 = inlined_call_operand.vmem [shape: bf16[32,1], index: 17, kind: input, shape index: {}, may-alias: {13,15,17,19}]   ;;  %s15511_s18 = inlined_call_operand.vmem [shape: bf16[512,32], index: 18, kind: input, shape index: {}, may-alias: {12,14,16,18}]   ;;  %s15512_s19 = inlined_call_operand.vmem [shape: bf16[32,1], index: 19, kind: input, shape index: {}, may-alias: {13,15,17,19}]   ;;  %s15513_s20 = inlined_call_operand.vmem [shape: f32[2,49,512], index: 20, kind: output, shape index: {}]  }
   0x1   :  { %15627 = sst [smem:[#allocation114_spill]] %s15493_s0 }
   0x2   :  { %15628 = sst [smem:[#allocation115_spill]] %s15494_s1  ;;  %s10927_s1 = smov 0  }
   0x3   :  { %15629 = sst [smem:[#allocation116_spill]] %s15495_s2 }
   0x4   :  { %15630 = sst [smem:[#allocation117_spill]] %s15496_s3 }
   0x5   :  { %15631 = sst [smem:[#allocation118_spill]] %s15497_s4 }
   0x6 LB: > { %s8807_s22 = sadd.s32 4294967295, %s10817_s1   ;;  %p8811_p0 = scmp.ge.s32.totalorder %s10817_s1, 1  ;;  %s10817_s1 = sphi %s10927_s1, %s30_s1  }
   0x7   : > { %p590_p1 = scmp.lt.s32.totalorder %s10817_s1, 3 }
   0x9   : > { %p591_p2 = pnand %p8811_p0, %p590_p1 }
   0xb   : > { %594 = sbr.rel (%p591_p2) target bundleno = 2211 (0x8a3), region = 100 }
  0x10   : > { %s15632_s2 = sld [smem:[#allocation118_spill]]  ;;  %p661_p3 = scmp.lt.s32.totalorder %s8807_s22, 1  ;;  %vm783_vm0 = vcmask 523264   ;;  %vm1454_vm2 = vcmask 1041409   ;;  %vm1456_vm3 = vcmask 1042434   ;;  %vm1458_vm4 = vcmask 1043459  }
  0x11   : > { %s15633_s4 = sld [smem:[#allocation114_spill]]  ;;  %vm1460_vm5 = vcmask 1044484   ;;  %vm1462_vm6 = vcmask 1045509   ;;  %vm1464_vm7 = vcmask 1046534   ;;  %vm1466_vm8 = vcmask 1047559  }
  0x12   : > { %s15874_s22 = smov (!%p661_p3, %s8807_s22), 1  ;;  %vm1716_vm9 = vcmask 1040384   ;;  %s15662_s3 = sld [smem:[#allocation115_spill]]  ;;  %vm2210_vm11 = vcmask 1043456   ;;  %vm2105_vm13 = vcmask 261120  }
  0x13   : > { %s10717_s26 = smul.u32 784, %s15874_s22  ;;  %s15691_s24 = sld [smem:[#allocation116_spill]] }
  0x14   : > { %s10718_s21 = smul.u32 196, %s15874_s22 }
  0x15   : > { %s10719_s27 = smul.u32 98, %s15874_s22 }
  0x16   : > { %v8865_v0 = vld [vmem:[%s15632_s2 + $0x60] sm:$0xf]  ;;  %v10355_v1 = vld [vmem:[%s15632_s2 + $0x6c] sm:$0xf0]  ;;  %v10353_v2 = vld [vmem:[%s15632_s2 + $0x64] sm:$0xf] }
  0x17   : > { %v8866_v3 = vor.u32 %v10355_v1, %v8865_v0  ;;  %v8867_v4 = vld [vmem:[%s15632_s2 + $0x70] sm:$0xf0]  ;;  %v8873_v5 = vld [vmem:[%s15632_s2 + $0x68] sm:$0xf]  ;;  %v10356_v6 = vld [vmem:[%s15632_s2 + $0x74] sm:$0xf0]  ;;  %s11041_s29 = scalar_lea.vmem %s15633_s4, %s10717_s26 }
  0x18   : > { %v8870_v7 = vor.u32 %v10353_v2, %v8867_v4  ;;  %v8874_v8 = vor.u32 %v10356_v6, %v8873_v5  ;;  %v10354_v9 = vld [vmem:[%s15632_s2 + $0x6c] sm:$0xf]  ;;  %v8875_v10 = vld [vmem:[%s15632_s2 + $0x78] sm:$0xf0]  ;;  %v8849_v11 = vld [vmem:[%s15632_s2 + $0x40] sm:$0xf]  ;;  %s11774_s26 = scalar_lea.vmem %s15662_s3, %s10718_s21 }
  0x19   : > { %1603 = vmatpush.bf16.msra.mxu0 %v8866_v3  ;;  %v8878_v12 = vor.u32 %v10354_v9, %v8875_v10  ;;  %v10351_v13 = vld [vmem:[%s15632_s2 + $0x4c] sm:$0xf0]  ;;  %v10349_v14 = vld [vmem:[%s15632_s2 + $0x44] sm:$0xf]  ;;  %v8851_v15 = vld [vmem:[%s15632_s2 + $0x50] sm:$0xf0]  ;;  %s12409_s25 = scalar_lea.vmem %s15691_s24, %s10719_s27 }
  0x1a   : > { %1631 = vmatpush.bf16.msra.mxu1 %v8870_v7  ;;  %1659 = vmatpush.bf16.msra.mxu2 %v8874_v8  ;;  %v8850_v16 = vor.u32 %v10351_v13, %v8849_v11  ;;  %v8854_v17 = vor.u32 %v10349_v14, %v8851_v15  ;;  %v8857_v18 = vld [vmem:[%s15632_s2 + $0x48] sm:$0xf]  ;;  %v10352_v19 = vld [vmem:[%s15632_s2 + $0x54] sm:$0xf0]  ;;  %v10350_v20 = vld [vmem:[%s15632_s2 + $0x4c] sm:$0xf] }
  0x1b   : > { %1687 = vmatpush.bf16.msra.mxu3 %v8878_v12  ;;  %v8858_v21 = vor.u32 %v10352_v19, %v8857_v18  ;;  %v8859_v22 = vld [vmem:[%s15632_s2 + $0x58] sm:$0xf0]  ;;  %v8833_v23 = vld [vmem:[%s15632_s2 + $0x20] sm:$0xf]  ;;  %v10347_v24 = vld [vmem:[%s15632_s2 + $0x2c] sm:$0xf0] }
  0x1c   : > { %v8862_v25 = vor.u32 %v10350_v20, %v8859_v22  ;;  %v10345_v26 = vld [vmem:[%s15632_s2 + $0x24] sm:$0xf]  ;;  %v8835_v27 = vld [vmem:[%s15632_s2 + $0x30] sm:$0xf0]  ;;  %v8841_v28 = vld [vmem:[%s15632_s2 + $0x28] sm:$0xf]  ;;  %v8834_v29 = vor.u32 %v10347_v24, %v8833_v23 }
  0x1d   : > { %1604 = vmatpush.bf16.msra.mxu0 %v8850_v16  ;;  %v10348_v30 = vld [vmem:[%s15632_s2 + $0x34] sm:$0xf0]  ;;  %v10346_v31 = vld [vmem:[%s15632_s2 + $0x2c] sm:$0xf]  ;;  %v8843_v32 = vld [vmem:[%s15632_s2 + $0x38] sm:$0xf0]  ;;  %v8838_v33 = vor.u32 %v10345_v26, %v8835_v27 }
  0x1e   : > { %1632 = vmatpush.bf16.msra.mxu1 %v8854_v17  ;;  %1660 = vmatpush.bf16.msra.mxu2 %v8858_v21  ;;  %v8842_v34 = vor.u32 %v10348_v30, %v8841_v28  ;;  %v8817_v35 = vld [vmem:[%s15632_s2] sm:$0xf]  ;;  %v10343_v36 = vld [vmem:[%s15632_s2 + $0xc] sm:$0xf0]  ;;  %v10341_v37 = vld [vmem:[%s15632_s2 + $0x4] sm:$0xf]  ;;  %v8846_v38 = vor.u32 %v10346_v31, %v8843_v32 }
  0x1f   : > { %1688 = vmatpush.bf16.msra.mxu3 %v8862_v25  ;;  %v8819_v39 = vld [vmem:[%s15632_s2 + $0x10] sm:$0xf0]  ;;  %v8825_v40 = vld [vmem:[%s15632_s2 + $0x8] sm:$0xf]  ;;  %v10344_v41 = vld [vmem:[%s15632_s2 + $0x14] sm:$0xf0]  ;;  %v8818_v44 = vor.u32 %v10343_v36, %v8817_v35 }
  0x20   : > { %v10342_v42 = vld [vmem:[%s15632_s2 + $0xc] sm:$0xf]  ;;  %v8827_v43 = vld [vmem:[%s15632_s2 + $0x18] sm:$0xf0]  ;;  %v8822_v45 = vor.u32 %v10341_v37, %v8819_v39  ;;  %v8826_v46 = vor.u32 %v10344_v41, %v8825_v40  ;;  %v685_v48 = vld [vmem:[%s11041_s29] sm:$0xff]  ;;  %s15720_s3 = sld [smem:[#allocation117_spill]] }
  0x21   : > { %1605 = vmatpush.bf16.msra.mxu0 %v8834_v29  ;;  %v8830_v47 = vor.u32 %v10342_v42, %v8827_v43  ;;  %v686_v49 = vld [vmem:[%s11041_s29 + $0x8] sm:$0xff]  ;;  %v687_v50 = vld [vmem:[%s11041_s29 + $0x10] sm:$0xff]  ;;  %v688_v51 = vld [vmem:[%s11041_s29 + $0x18] sm:$0xff]  ;;  %v784_v54 = vsel %vm783_vm0, %v685_v48, 0.0  ;;  %s10720_s4 = smul.u32 224, %s15874_s22 }
  0x22   : > { %1633 = vmatpush.bf16.msra.mxu1 %v8838_v33  ;;  %1661 = vmatpush.bf16.msra.mxu2 %v8842_v34  ;;  %v689_v52 = vld [vmem:[%s11041_s29 + $0x20] sm:$0xff]  ;;  %v690_v53 = vld [vmem:[%s11041_s29 + $0x28] sm:$0xff]  ;;  %v785_v55 = vsel %vm783_vm0, %v686_v49, 0.0  ;;  %v793_v56 = vsel %vm783_vm0, %v687_v50, 0.0  ;;  %v691_v57 = vld [vmem:[%s11041_s29 + $0x30] sm:$0xff]  ;;  %v794_v61 = vsel %vm783_vm0, %v688_v51, 0.0 }
  0x23   : > { %1689 = vmatpush.bf16.msra.mxu3 %v8846_v38  ;;  %v692_v58 = vld [vmem:[%s11041_s29 + $0x38] sm:$0xff]  ;;  %v693_v59 = vld [vmem:[%s11041_s29 + $0x40] sm:$0xff]  ;;  %v786_v60 = vadd.f32 %v785_v55, %v784_v54  ;;  %v802_v62 = vsel %vm783_vm0, %v689_v52, 0.0  ;;  %v803_v63 = vsel %vm783_vm0, %v690_v53, 0.0  ;;  %v694_v0 = vld [vmem:[%s11041_s29 + $0x48] sm:$0xff]  ;;  %v795_v3 = vadd.f32 %v794_v61, %v793_v56  ;;  %s15355_s27 = scalar_lea.vmem %s15513_s20, %s10720_s4 }
  0x24   : > { %v695_v1 = vld [vmem:[%s11041_s29 + $0x50] sm:$0xff]  ;;  %v696_v2 = vld [vmem:[%s11041_s29 + $0x58] sm:$0xff]  ;;  %v804_v4 = vadd.f32 %v803_v63, %v802_v62  ;;  %v811_v5 = vsel %vm783_vm0, %v691_v57, 0.0  ;;  %v812_v6 = vsel %vm783_vm0, %v692_v58, 0.0  ;;  %v697_v7 = vld [vmem:[%s11041_s29 + $0x60] sm:$0xff]  ;;  %v820_v10 = vsel %vm783_vm0, %v693_v59, 0.0 }
  0x25   : > { %1606 = vmatpush.bf16.msra.mxu0 %v8818_v44  ;;  %v787_v8 = vrot.slane %v786_v60, 4  ;;  %v813_v9 = vadd.f32 %v812_v6, %v811_v5  ;;  %v821_v11 = vsel %vm783_vm0, %v694_v0, 0.0  ;;  %v698_v12 = vld [vmem:[%s11041_s29 + $0x68] sm:$0xff]  ;;  %v699_v13 = vld [vmem:[%s11041_s29 + $0x70] sm:$0xff]  ;;  %v796_v14 = vrot.slane %v795_v3, 4  ;;  %v700_v22 = vld [vmem:[%s11041_s29 + $0x78] sm:$0xff] }
  0x26   : > { %1634 = vmatpush.bf16.msra.mxu1 %v8822_v45  ;;  %1662 = vmatpush.bf16.msra.mxu2 %v8826_v46  ;;  %v805_v15 = vrot.slane %v804_v4, 4  ;;  %v822_v16 = vadd.f32 %v821_v11, %v820_v10  ;;  %v829_v17 = vsel %vm783_vm0, %v695_v1, 0.0  ;;  %v830_v20 = vsel %vm783_vm0, %v696_v2, 0.0  ;;  %v701_v46 = vld [vmem:[%s11041_s29 + $0x80] sm:$0xff]  ;;  %v702_v49 = vld [vmem:[%s11041_s29 + $0x88] sm:$0xff]  ;;  %v703_v50 = vld [vmem:[%s11041_s29 + $0x90] sm:$0xff] }
  0x27   : > { %1690 = vmatpush.bf16.msra.mxu3 %v8830_v47  ;;  %v788_v18 = vadd.f32 %v787_v8, %v786_v60  ;;  %v814_v19 = vrot.slane %v813_v9, 4  ;;  %v838_v21 = vsel %vm783_vm0, %v697_v7, 0.0  ;;  %v797_v23 = vadd.f32 %v796_v14, %v795_v3  ;;  %v704_v54 = vld [vmem:[%s11041_s29 + $0x98] sm:$0xff]  ;;  %v705_v57 = vld [vmem:[%s11041_s29 + $0xa0] sm:$0xff]  ;;  %v706_v58 = vld [vmem:[%s11041_s29 + $0xa8] sm:$0xff] }
  0x28   : > { %v806_v24 = vadd.f32 %v805_v15, %v804_v4  ;;  %v823_v25 = vrot.slane %v822_v16, 4  ;;  %v831_v26 = vadd.f32 %v830_v20, %v829_v17  ;;  %v839_v29 = vsel %vm783_vm0, %v698_v12, 0.0  ;;  %v707_v3 = vld [vmem:[%s11041_s29 + $0xb0] sm:$0xff]  ;;  %v708_v4 = vld [vmem:[%s11041_s29 + $0xb8] sm:$0xff]  ;;  %v709_v5 = vld [vmem:[%s11041_s29 + $0xc0] sm:$0xff] }
  0x29   : > { %v789_v27 = vrot.slane %v788_v18, 2  ;;  %v815_v28 = vadd.f32 %v814_v19, %v813_v9  ;;  %v847_v30 = vsel %vm783_vm0, %v699_v13, 0.0  ;;  %v798_v31 = vrot.slane %v797_v23, 2  ;;  %v710_v14 = vld [vmem:[%s11041_s29 + $0xc8] sm:$0xff]  ;;  %v711_v15 = vld [vmem:[%s11041_s29 + $0xd0] sm:$0xff] }
  0x2a   : > { %v807_v32 = vrot.slane %v806_v24, 2  ;;  %v824_v33 = vadd.f32 %v823_v25, %v822_v16  ;;  %v832_v34 = vrot.slane %v831_v26, 4  ;;  %v840_v37 = vadd.f32 %v839_v29, %v838_v21  ;;  %v712_v25 = vld [vmem:[%s11041_s29 + $0xd8] sm:$0xff] }
  0x2b   : > { %v790_v35 = vadd.f32 %v789_v27, %v788_v18  ;;  %v816_v36 = vrot.slane %v815_v28, 2  ;;  %v848_v38 = vsel %vm783_vm0, %v700_v22, 0.0  ;;  %v799_v39 = vadd.f32 %v798_v31, %v797_v23 }
  0x2c   : > { %v808_v40 = vadd.f32 %v807_v32, %v806_v24  ;;  %v825_v41 = vrot.slane %v824_v33, 2  ;;  %v833_v42 = vadd.f32 %v832_v34, %v831_v26  ;;  %v841_v44 = vrot.slane %v840_v37, 4 }
  0x2d   : > { %v791_v43 = vrot.slane %v790_v35, 1  ;;  %v849_v45 = vadd.f32 %v848_v38, %v847_v30  ;;  %v800_v47 = vrot.slane %v799_v39, 1  ;;  %v817_v48 = vadd.f32 %v816_v36, %v815_v28  ;;  %v713_v30 = vld [vmem:[%s11041_s29 + $0xe0] sm:$0xff] }
  0x2e   : > { %v809_v51 = vrot.slane %v808_v40, 1  ;;  %v826_v52 = vadd.f32 %v825_v41, %v824_v33  ;;  %v834_v55 = vrot.slane %v833_v42, 2  ;;  %v10819_v56 = vmov 16.0  }
  0x2f   : > { %v850_v53 = vrot.slane %v849_v45, 4  ;;  %10740 = vrcp.f32 %v10819_v56  ;;  %v11081_v59 = vadd.f32 %v791_v43, %v790_v35  ;;  %v842_v60 = vadd.f32 %v841_v44, %v840_v37  ;;  %v714_v35 = vld [vmem:[%s11041_s29 + $0xe8] sm:$0xff] }
  0x30   : > { %v856_v62 = vsel %vm783_vm0, %v701_v46, 0.0  ;;  %v11084_v63 = vadd.f32 %v800_v47, %v799_v39  ;;  %v818_v0 = vrot.slane %v817_v48, 1  ;;  %v857_v1 = vsel %vm783_vm0, %v702_v49, 0.0 }
  0x31   : > { %v851_v61 = vadd.f32 %v850_v53, %v849_v45  ;;  %v865_v2 = vsel %vm783_vm0, %v703_v50, 0.0  ;;  %v11091_v6 = vadd.f32 %v809_v51, %v808_v40  ;;  %v827_v7 = vrot.slane %v826_v52, 1  ;;  %v715_v40 = vld [vmem:[%s11041_s29 + $0xf0] sm:$0xff]  ;;  %v716_v45 = vld [vmem:[%s11041_s29 + $0xf8] sm:$0xff] }
  0x32   : > { %v858_v8 = vadd.f32 %v857_v1, %v856_v62  ;;  %v866_v9 = vsel %vm783_vm0, %v704_v54, 0.0  ;;  %v11094_v10 = vadd.f32 %v834_v55, %v833_v42  ;;  %v874_v12 = vsel %vm783_vm0, %v705_v57, 0.0 }
  0x33   : > { %v867_v11 = vadd.f32 %v866_v9, %v865_v2  ;;  %v875_v13 = vsel %vm783_vm0, %v706_v58, 0.0  ;;  %v843_v16 = vrot.slane %v842_v60, 2  ;;  %v852_v17 = vrot.slane %v851_v61, 2 }
  0x34   : > { %v859_v18 = vrot.slane %v858_v8, 4  ;;  %v876_v19 = vadd.f32 %v875_v13, %v874_v12  ;;  %v883_v22 = vsel %vm783_vm0, %v707_v3, 0.0  ;;  %v884_v23 = vsel %vm783_vm0, %v708_v4, 0.0 }
  0x35   : > { %v11100_v20 = vpop.eup %10740  ;;  %v868_v21 = vrot.slane %v867_v11, 4  ;;  %v892_v24 = vsel %vm783_vm0, %v709_v5, 0.0  ;;  %v11106_v26 = vadd.f32 %v818_v0, %v817_v48  ;;  %v11108_v27 = vadd.f32 %v827_v7, %v826_v52 }
  0x36   : > { %v860_v28 = vadd.f32 %v859_v18, %v858_v8  ;;  %v877_v29 = vrot.slane %v876_v19, 4  ;;  %v885_v32 = vadd.f32 %v884_v23, %v883_v22  ;;  %v893_v33 = vsel %vm783_vm0, %v710_v14, 0.0 }
  0x37   : > { %v869_v31 = vadd.f32 %v868_v21, %v867_v11  ;;  %v901_v34 = vsel %vm783_vm0, %v711_v15, 0.0  ;;  %v844_v36 = vadd.f32 %v843_v16, %v842_v60  ;;  %v894_v39 = vadd.f32 %v893_v33, %v892_v24  ;;  %v718_v33 = vld [vmem:[%s11041_s29 + $0x108] sm:$0xff] }
  0x38   : > { %v861_v37 = vrot.slane %v860_v28, 2  ;;  %v878_v38 = vadd.f32 %v877_v29, %v876_v19  ;;  %v853_v41 = vadd.f32 %v852_v17, %v851_v61  ;;  %v886_v43 = vrot.slane %v885_v32, 4 }
  0x39   : > { %v870_v42 = vrot.slane %v869_v31, 2  ;;  %v902_v44 = vsel %vm783_vm0, %v712_v25, 0.0  ;;  %v895_v47 = vrot.slane %v894_v39, 4  ;;  %v910_v49 = vsel %vm783_vm0, %v713_v30, 0.0 }
  0x3a   : > { %v879_v46 = vrot.slane %v878_v38, 2  ;;  %v903_v48 = vadd.f32 %v902_v44, %v901_v34  ;;  %v836_v50 = vrot.slane %v11094_v10, 1  ;;  %v862_v51 = vadd.f32 %v861_v37, %v860_v28 }
  0x3b   : > { %v887_v52 = vadd.f32 %v886_v43, %v885_v32  ;;  %v911_v53 = vsel %vm783_vm0, %v714_v35, 0.0  ;;  %v871_v54 = vadd.f32 %v870_v42, %v869_v31  ;;  %v896_v55 = vadd.f32 %v895_v47, %v894_v39  ;;  %v717_v32 = vld [vmem:[%s11041_s29 + $0x100] sm:$0xff]  ;;  %v720_v39 = vld [vmem:[%s11041_s29 + $0x118] sm:$0xff] }
  0x3c   : > { %v904_v56 = vrot.slane %v903_v48, 4  ;;  %v919_v57 = vsel %vm783_vm0, %v715_v40, 0.0  ;;  %v880_v58 = vadd.f32 %v879_v46, %v878_v38  ;;  %v912_v61 = vadd.f32 %v911_v53, %v910_v49  ;;  %v719_v38 = vld [vmem:[%s11041_s29 + $0x110] sm:$0xff] }
  0x3d   : > { %v888_v60 = vrot.slane %v887_v52, 2  ;;  %v920_v62 = vsel %vm783_vm0, %v716_v45, 0.0  ;;  %v845_v0 = vrot.slane %v844_v36, 1  ;;  %v854_v1 = vrot.slane %v853_v41, 1 }
  0x3e   : > { %v897_v2 = vrot.slane %v896_v55, 2  ;;  %v905_v3 = vadd.f32 %v904_v56, %v903_v48  ;;  %v863_v4 = vrot.slane %v862_v51, 1  ;;  %v913_v7 = vrot.slane %v912_v61, 4 }
  0x3f   : > { %v889_v5 = vadd.f32 %v888_v60, %v887_v52  ;;  %v921_v8 = vadd.f32 %v920_v62, %v919_v57  ;;  %v872_v9 = vrot.slane %v871_v54, 1  ;;  %v1226_v13 = vmul.f32 16.0, %v11100_v20 }
  0x40   : > { %v898_v11 = vadd.f32 %v897_v2, %v896_v55  ;;  %v906_v12 = vrot.slane %v905_v3, 2  ;;  %v837_v14 = vadd.f32 %v836_v50, %v11094_v10  ;;  %v881_v15 = vrot.slane %v880_v58, 1 }
  0x41   : > { %v914_v16 = vadd.f32 %v913_v7, %v912_v61  ;;  %v922_v17 = vrot.slane %v921_v8, 4  ;;  %v890_v18 = vrot.slane %v889_v5, 1  ;;  %v1227_v22 = vsub.f32 1.0, %v1226_v13 }
  0x42   : > { %v899_v19 = vrot.slane %v898_v11, 1  ;;  %v907_v21 = vadd.f32 %v906_v12, %v905_v3  ;;  %v846_v23 = vadd.f32 %v845_v0, %v844_v36  ;;  %v855_v24 = vadd.f32 %v854_v1, %v853_v41 }
  0x43   : > { %v915_v25 = vrot.slane %v914_v16, 2  ;;  %v923_v28 = vadd.f32 %v922_v17, %v921_v8  ;;  %v864_v29 = vadd.f32 %v863_v4, %v862_v51  ;;  %v873_v30 = vadd.f32 %v872_v9, %v871_v54 }
  0x44   : > { %v908_v31 = vrot.slane %v907_v21, 1  ;;  %v1228_v10 = vmul.f32 %v11100_v20, %v1227_v22  ;;  %v882_v34 = vadd.f32 %v881_v15, %v880_v58  ;;  %vm1230_vm1 = vweird.f32 %v11100_v20 }
  0x45   : > { %v916_v35 = vadd.f32 %v915_v25, %v914_v16  ;;  %v924_v37 = vrot.slane %v923_v28, 2  ;;  %v891_v40 = vadd.f32 %v890_v18, %v889_v5  ;;  %v900_v42 = vadd.f32 %v899_v19, %v898_v11 }
  0x46   : > { %v909_v36 = vadd.f32 %v908_v31, %v907_v21  ;;  %v1229_v41 = vadd.f32 %v11100_v20, %v1228_v10  ;;  %v928_v45 = vsel %vm783_vm0, %v717_v32, 0.0  ;;  %v929_v46 = vsel %vm783_vm0, %v718_v33, 0.0 }
  0x47   : > { %v917_v43 = vrot.slane %v916_v35, 1  ;;  %v925_v44 = vadd.f32 %v924_v37, %v923_v28  ;;  %v11136_v48 = vadd.f32 %v929_v46, %v928_v45  ;;  %v11139_v49 = vsel %vm783_vm0, %v719_v38, 0.0  ;;  %v722_v37 = vld [vmem:[%s11041_s29 + $0x128] sm:$0xff] }
  0x48   : > { %v11134_v47 = vsel %vm1230_vm1, %v11100_v20, %v1229_v41  ;;  %v11142_v50 = vsel %vm783_vm0, %v720_v39, 0.0 }
  0x49   : > { %v918_v51 = vadd.f32 %v917_v43, %v916_v35  ;;  %v926_v52 = vrot.slane %v925_v44, 1  ;;  %v1232_v53 = vmul.f32 %v11134_v47, %v11081_v59  ;;  %v1233_v54 = vmul.f32 %v11134_v47, %v11084_v63  ;;  %v721_v35 = vld [vmem:[%s11041_s29 + $0x120] sm:$0xff]  ;;  %v723_v43 = vld [vmem:[%s11041_s29 + $0x130] sm:$0xff] }
  0x4a   : > { %v1234_v20 = vmul.f32 %v11134_v47, %v11091_v6  ;;  %v1235_v55 = vmul.f32 %v11134_v47, %v11106_v26  ;;  %v1236_v56 = vmul.f32 %v11134_v47, %v11108_v27  ;;  %v1237_v57 = vmul.f32 %v11134_v47, %v837_v14 }
  0x4b   : > { %v927_v58 = vadd.f32 %v926_v52, %v925_v44  ;;  %v1238_v60 = vmul.f32 %v11134_v47, %v846_v23  ;;  %v1239_v59 = vmul.f32 %v11134_v47, %v855_v24  ;;  %v1240_v61 = vmul.f32 %v11134_v47, %v864_v29 }
  0x4c   : > { %v1241_v63 = vmul.f32 %v11134_v47, %v873_v30  ;;  %v1242_v6 = vmul.f32 %v11134_v47, %v882_v34  ;;  %v1243_v26 = vmul.f32 %v11134_v47, %v891_v40  ;;  %v1244_v62 = vmul.f32 %v11134_v47, %v900_v42 }
  0x4d   : > { %v1245_v27 = vmul.f32 %v11134_v47, %v909_v36  ;;  %v1246_v0 = vmul.f32 %v11134_v47, %v918_v51  ;;  %v1247_v1 = vmul.f32 %v11134_v47, %v927_v58  ;;  %v1281_v2 = vpack.c.bf16 %v1232_v53, %v1232_v53 }
  0x4e   : > { %v1282_v3 = vpack.c.bf16 %v1233_v54, %v1233_v54  ;;  %v1283_v4 = vpack.c.bf16 %v1234_v20, %v1234_v20  ;;  %v1284_v5 = vpack.c.bf16 %v1235_v55, %v1235_v55  ;;  %v1285_v7 = vpack.c.bf16 %v1236_v56, %v1236_v56  ;;  %v724_v55 = vld [vmem:[%s11041_s29 + $0x138] sm:$0xff] }
  0x4f   : > { %v1286_v8 = vpack.c.bf16 %v1237_v57, %v1237_v57  ;;  %v1287_v9 = vpack.c.bf16 %v1238_v60, %v1238_v60  ;;  %v1288_v11 = vpack.c.bf16 %v1239_v59, %v1239_v59  ;;  %v1289_v12 = vpack.c.bf16 %v1240_v61, %v1240_v61 }
  0x50   : > { %v1290_v13 = vpack.c.bf16 %v1241_v63, %v1241_v63  ;;  %v1291_v14 = vpack.c.bf16 %v1242_v6, %v1242_v6  ;;  %v1292_v15 = vpack.c.bf16 %v1243_v26, %v1243_v26  ;;  %v1293_v16 = vpack.c.bf16 %v1244_v62, %v1244_v62  ;;  %v725_v63 = vld [vmem:[%s11041_s29 + $0x140] sm:$0xff]  ;;  %v726_v6 = vld [vmem:[%s11041_s29 + $0x148] sm:$0xff] }
  0x51   : > { %v1294_v17 = vpack.c.bf16 %v1245_v27, %v1245_v27  ;;  %v1295_v18 = vpack.c.bf16 %v1246_v0, %v1246_v0  ;;  %v1296_v19 = vpack.c.bf16 %v1247_v1, %v1247_v1  ;;  %v1405_v21 = vunpack.c.l.b16 %v1281_v2 }
  0x52   : > { %v1406_v22 = vunpack.c.l.b16 %v1282_v3  ;;  %v1407_v23 = vunpack.c.l.b16 %v1283_v4  ;;  %v1408_v24 = vunpack.c.l.b16 %v1284_v5  ;;  %v1409_v25 = vunpack.c.l.b16 %v1285_v7  ;;  %v727_v3 = vld [vmem:[%s11041_s29 + $0x150] sm:$0xff]  ;;  %v728_v4 = vld [vmem:[%s11041_s29 + $0x158] sm:$0xff]  ;;  %v729_v5 = vld [vmem:[%s11041_s29 + $0x160] sm:$0xff] }
  0x53   : > { %v1410_v28 = vunpack.c.l.b16 %v1286_v8  ;;  %v1411_v29 = vunpack.c.l.b16 %v1287_v9  ;;  %v1412_v30 = vunpack.c.l.b16 %v1288_v11  ;;  %v1413_v31 = vunpack.c.l.b16 %v1289_v12 }
  0x54   : > { %v1414_v10 = vunpack.c.l.b16 %v1290_v13  ;;  %v1415_v32 = vunpack.c.l.b16 %v1291_v14  ;;  %v1416_v33 = vunpack.c.l.b16 %v1292_v15  ;;  %v1417_v34 = vunpack.c.l.b16 %v1293_v16  ;;  %v730_v15 = vld [vmem:[%s11041_s29 + $0x168] sm:$0xff]  ;;  %v731_v16 = vld [vmem:[%s11041_s29 + $0x170] sm:$0xff] }
  0x55   : > { %v1418_v38 = vunpack.c.l.b16 %v1294_v17  ;;  %v1419_v39 = vunpack.c.l.b16 %v1295_v18  ;;  %v1420_v40 = vunpack.c.l.b16 %v1296_v19  ;;  %v1455_v42 = vsel %vm1454_vm2, %v1406_v22, %v1405_v21 }
  0x56   : > { %v1457_v36 = vsel %vm1456_vm3, %v1407_v23, %v1455_v42  ;;  %v1468_v41 = vsel %vm1454_vm2, %v1414_v10, %v1413_v31  ;;  %v931_v44 = vrot.slane %v11136_v48, 4  ;;  %v939_v45 = vadd.f32 %v11142_v50, %v11139_v49 }
  0x57   : > { %v1459_v46 = vsel %vm1458_vm4, %v1408_v24, %v1457_v36  ;;  %v1469_v51 = vsel %vm1456_vm3, %v1415_v32, %v1468_v41  ;;  %v946_v52 = vsel %vm783_vm0, %v721_v35, 0.0  ;;  %v947_v53 = vsel %vm783_vm0, %v722_v37, 0.0 }
  0x58   : > { %v1461_v54 = vsel %vm1460_vm5, %v1409_v25, %v1459_v46  ;;  %v1470_v20 = vsel %vm1458_vm4, %v1416_v33, %v1469_v51  ;;  %v932_v56 = vadd.f32 %v931_v44, %v11136_v48  ;;  %v940_v57 = vrot.slane %v939_v45, 4  ;;  %v736_v51 = vld [vmem:[%s11041_s29 + $0x198] sm:$0xff] }
  0x59   : > { %v1463_v49 = vsel %vm1462_vm6, %v1410_v28, %v1461_v54  ;;  %v1471_v50 = vsel %vm1460_vm5, %v1417_v34, %v1470_v20  ;;  %v948_v58 = vadd.f32 %v947_v53, %v946_v52  ;;  %v955_v60 = vsel %vm783_vm0, %v723_v43, 0.0  ;;  %v732_v28 = vld [vmem:[%s11041_s29 + $0x178] sm:$0xff]  ;;  %v737_v52 = vld [vmem:[%s11041_s29 + $0x1a0] sm:$0xff] }
  0x5a   : > { %v1465_v59 = vsel %vm1464_vm7, %v1411_v29, %v1463_v49  ;;  %v1472_v61 = vsel %vm1462_vm6, %v1418_v38, %v1471_v50  ;;  %v933_v26 = vrot.slane %v932_v56, 2  ;;  %v941_v62 = vadd.f32 %v940_v57, %v939_v45  ;;  %v733_v29 = vld [vmem:[%s11041_s29 + $0x180] sm:$0xff]  ;;  %v734_v38 = vld [vmem:[%s11041_s29 + $0x188] sm:$0xff] }
  0x5b   : > { %v1467_v48 = vsel %vm1466_vm8, %v1412_v30, %v1465_v59  ;;  %v1473_v27 = vsel %vm1464_vm7, %v1419_v39, %v1472_v61  ;;  %v949_v0 = vrot.slane %v948_v58, 4  ;;  %v956_v1 = vsel %vm783_vm0, %v724_v55, 0.0  ;;  %v735_v39 = vld [vmem:[%s11041_s29 + $0x190] sm:$0xff] }
  0x5c   : > { %v1474_v2 = vsel %vm1466_vm8, %v1420_v40, %v1473_v27  ;;  %v934_v7 = vadd.f32 %v933_v26, %v932_v56  ;;  %v942_v8 = vrot.slane %v941_v62, 2  ;;  %v957_v9 = vadd.f32 %v956_v1, %v955_v60  ;;  %v739_v27 = vld [vmem:[%s11041_s29 + $0x1b0] sm:$0xff] }
  0x5d   : > { %v1503_v11 = vpack.c.b16 %v1474_v2, %v1467_v48  ;;  %v950_v12 = vadd.f32 %v949_v0, %v948_v58  ;;  %v964_v13 = vsel %vm783_vm0, %v725_v63, 0.0  ;;  %v965_v14 = vsel %vm783_vm0, %v726_v6, 0.0  ;;  %v738_v58 = vld [vmem:[%s11041_s29 + $0x1a8] sm:$0xff] }
  0x5e   : > { %v935_v17 = vrot.slane %v934_v7, 1  ;;  %v943_v18 = vadd.f32 %v942_v8, %v941_v62  ;;  %v958_v19 = vrot.slane %v957_v9, 4  ;;  %v966_v21 = vadd.f32 %v965_v14, %v964_v13 }
  0x5f   : > { %8879 = vmatmul.msk.bf16.vlgmr.msra.gmra.mxu0 %vm783_vm0, %v1503_v11  ;;  %8883 = vmatmul.msk.bf16.vlgmr.msra.gmra.mxu1 %vm783_vm0, %v1503_v11  ;;  %v951_v22 = vrot.slane %v950_v12, 2  ;;  %v973_v23 = vsel %vm783_vm0, %v727_v3, 0.0  ;;  %v974_v24 = vsel %vm783_vm0, %v728_v4, 0.0  ;;  %v982_v25 = vsel %vm783_vm0, %v729_v5, 0.0  ;;  %v740_v4 = vld [vmem:[%s11041_s29 + $0x1b8] sm:$0xff] }
  0x60   : > { %8887 = vmatmul.msk.bf16.vlgmr.msra.gmra.mxu2 %vm783_vm0, %v1503_v11  ;;  %8891 = vmatmul.msk.bf16.vlgmr.msra.gmra.mxu3 %vm783_vm0, %v1503_v11  ;;  %v11209_v30 = vadd.f32 %v935_v17, %v934_v7  ;;  %v944_v31 = vrot.slane %v943_v18, 1  ;;  %v959_v10 = vadd.f32 %v958_v19, %v957_v9  ;;  %v967_v32 = vrot.slane %v966_v21, 4 }
  0x61   : > { %v952_v33 = vadd.f32 %v951_v22, %v950_v12  ;;  %v975_v34 = vadd.f32 %v974_v24, %v973_v23  ;;  %v983_v35 = vsel %vm783_vm0, %v730_v15, 0.0  ;;  %v991_v37 = vsel %vm783_vm0, %v731_v16, 0.0  ;;  %v741_v15 = vld [vmem:[%s11041_s29 + $0x1c0] sm:$0xff] }
  0x62   : > { %v11215_v40 = vadd.f32 %v944_v31, %v943_v18  ;;  %v960_v42 = vrot.slane %v959_v10, 2  ;;  %v968_v36 = vadd.f32 %v967_v32, %v966_v21  ;;  %v984_v41 = vadd.f32 %v983_v35, %v982_v25  ;;  %v742_v21 = vld [vmem:[%s11041_s29 + $0x1c8] sm:$0xff] }
  0x63   : > { %v953_v43 = vrot.slane %v952_v33, 1  ;;  %v976_v44 = vrot.slane %v975_v34, 4  ;;  %v992_v45 = vsel %vm783_vm0, %v732_v28, 0.0  ;;  %v1000_v46 = vsel %vm783_vm0, %v733_v29, 0.0  ;;  %v743_v28 = vld [vmem:[%s11041_s29 + $0x1d0] sm:$0xff] }
  0x64   : > { %v961_v53 = vadd.f32 %v960_v42, %v959_v10  ;;  %v969_v54 = vrot.slane %v968_v36, 2  ;;  %v985_v20 = vrot.slane %v984_v41, 4  ;;  %v993_v55 = vadd.f32 %v992_v45, %v991_v37 }
  0x65   : > { %v11221_v56 = vadd.f32 %v953_v43, %v952_v33  ;;  %v977_v57 = vadd.f32 %v976_v44, %v975_v34  ;;  %v1001_v49 = vsel %vm783_vm0, %v734_v38, 0.0  ;;  %v1009_v50 = vsel %vm783_vm0, %v735_v39, 0.0  ;;  %v744_v33 = vld [vmem:[%s11041_s29 + $0x1d8] sm:$0xff]  ;;  %v745_v39 = vld [vmem:[%s11041_s29 + $0x1e0] sm:$0xff]  ;;  %v746_v44 = vld [vmem:[%s11041_s29 + $0x1e8] sm:$0xff] }
  0x66   : > { %v962_v60 = vrot.slane %v961_v53, 1  ;;  %v970_v59 = vadd.f32 %v969_v54, %v968_v36  ;;  %v986_v61 = vadd.f32 %v985_v20, %v984_v41  ;;  %v994_v63 = vrot.slane %v993_v55, 4 }
  0x67   : > { %v978_v6 = vrot.slane %v977_v57, 2  ;;  %v1002_v26 = vadd.f32 %v1001_v49, %v1000_v46  ;;  %v1010_v62 = vsel %vm783_vm0, %v736_v51, 0.0  ;;  %v1018_v48 = vsel %vm783_vm0, %v737_v52, 0.0  ;;  %v748_v49 = vld [vmem:[%s11041_s29 + $0x1f8] sm:$0xff] }
  0x68   : > { %v11229_v0 = vadd.f32 %v962_v60, %v961_v53  ;;  %v971_v1 = vrot.slane %v970_v59, 1  ;;  %v987_v2 = vrot.slane %v986_v61, 2  ;;  %v995_v3 = vadd.f32 %v994_v63, %v993_v55 }
  0x69   : > { %v979_v5 = vadd.f32 %v978_v6, %v977_v57  ;;  %v1003_v7 = vrot.slane %v1002_v26, 4  ;;  %v1011_v8 = vadd.f32 %v1010_v62, %v1009_v50  ;;  %v1019_v9 = vsel %vm783_vm0, %v738_v58, 0.0  ;;  %v747_v57 = vld [vmem:[%s11041_s29 + $0x1f0] sm:$0xff] }
  0x6a   : > { %v11233_v11 = vadd.f32 %v971_v1, %v970_v59  ;;  %v988_v12 = vadd.f32 %v987_v2, %v986_v61  ;;  %v996_v13 = vrot.slane %v995_v3, 2  ;;  %v1020_v14 = vadd.f32 %v1019_v9, %v1018_v48 }
  0x6b   : > { %v980_v16 = vrot.slane %v979_v5, 1  ;;  %v1004_v17 = vadd.f32 %v1003_v7, %v1002_v26  ;;  %v1012_v18 = vrot.slane %v1011_v8, 4  ;;  %v1027_v19 = vsel %vm783_vm0, %v739_v27, 0.0 }
  0x6c   : > { %v989_v22 = vrot.slane %v988_v12, 1  ;;  %v997_v23 = vadd.f32 %v996_v13, %v995_v3  ;;  %v1021_v24 = vrot.slane %v1020_v14, 4  ;;  %v1028_v25 = vsel %vm783_vm0, %v740_v4, 0.0 }
  0x6d   : > { %v981_v29 = vadd.f32 %v980_v16, %v979_v5  ;;  %v1005_v31 = vrot.slane %v1004_v17, 2  ;;  %v1013_v10 = vadd.f32 %v1012_v18, %v1011_v8  ;;  %v1029_v32 = vadd.f32 %v1028_v25, %v1027_v19 }
  0x6e   : > { %v990_v34 = vadd.f32 %v989_v22, %v988_v12  ;;  %v998_v35 = vrot.slane %v997_v23, 1  ;;  %v1022_v37 = vadd.f32 %v1021_v24, %v1020_v14  ;;  %v1036_v38 = vsel %vm783_vm0, %v741_v15, 0.0 }
  0x6f   : > { %v1006_v42 = vadd.f32 %v1005_v31, %v1004_v17  ;;  %v1014_v36 = vrot.slane %v1013_v10, 2  ;;  %v1030_v41 = vrot.slane %v1029_v32, 4  ;;  %v1037_v43 = vsel %vm783_vm0, %v742_v21, 0.0 }
  0x70   : > { %v999_v45 = vadd.f32 %v998_v35, %v997_v23  ;;  %v1023_v46 = vrot.slane %v1022_v37, 2  ;;  %v1038_v51 = vadd.f32 %v1037_v43, %v1036_v38  ;;  %v1045_v52 = vsel %vm783_vm0, %v743_v28, 0.0 }
  0x71   : > { %v1007_v53 = vrot.slane %v1006_v42, 1  ;;  %v1015_v54 = vadd.f32 %v1014_v36, %v1013_v10  ;;  %v1031_v20 = vadd.f32 %v1030_v41, %v1029_v32  ;;  %v1046_v55 = vsel %vm783_vm0, %v744_v33, 0.0 }
  0x72   : > { %v1024_v50 = vadd.f32 %v1023_v46, %v1022_v37  ;;  %v1039_v58 = vrot.slane %v1038_v51, 4  ;;  %v1047_v60 = vadd.f32 %v1046_v55, %v1045_v52  ;;  %v1054_v59 = vsel %vm783_vm0, %v745_v39, 0.0 }
  0x73   : > { %v1008_v61 = vadd.f32 %v1007_v53, %v1006_v42  ;;  %v1016_v63 = vrot.slane %v1015_v54, 1  ;;  %v1032_v6 = vrot.slane %v1031_v20, 2  ;;  %v1055_v26 = vsel %vm783_vm0, %v746_v44, 0.0 }
  0x74   : > { %v1025_v62 = vrot.slane %v1024_v50, 1  ;;  %v1040_v48 = vadd.f32 %v1039_v58, %v1038_v51  ;;  %v1048_v27 = vrot.slane %v1047_v60, 4  ;;  %v1056_v1 = vadd.f32 %v1055_v26, %v1054_v59 }
  0x75   : > { %v1017_v2 = vadd.f32 %v1016_v63, %v1015_v54  ;;  %v1033_v3 = vadd.f32 %v1032_v6, %v1031_v20  ;;  %v1063_v4 = vsel %vm783_vm0, %v747_v57, 0.0  ;;  %v1064_v5 = vsel %vm783_vm0, %v748_v49, 0.0 }
  0x76   : > { %v1026_v7 = vadd.f32 %v1025_v62, %v1024_v50  ;;  %v1041_v8 = vrot.slane %v1040_v48, 2  ;;  %v1049_v9 = vadd.f32 %v1048_v27, %v1047_v60  ;;  %v1057_v12 = vrot.slane %v1056_v1, 4 }
  0x77   : > { %v1034_v13 = vrot.slane %v1033_v3, 1  ;;  %v1065_v14 = vadd.f32 %v1064_v5, %v1063_v4  ;;  %v1248_v15 = vmul.f32 %v11134_v47, %v11209_v30  ;;  %v1249_v16 = vmul.f32 %v11134_v47, %v11215_v40 }
  0x78   : > { %v1042_v17 = vadd.f32 %v1041_v8, %v1040_v48  ;;  %v1050_v18 = vrot.slane %v1049_v9, 2  ;;  %v1058_v19 = vadd.f32 %v1057_v12, %v1056_v1  ;;  %v1250_v21 = vmul.f32 %v11134_v47, %v11221_v56  ;;  %v749_v8 = vld [vmem:[%s11041_s29 + $0x200] sm:$0xff] }
  0x79   : > { %v1035_v22 = vadd.f32 %v1034_v13, %v1033_v3  ;;  %v1066_v23 = vrot.slane %v1065_v14, 4  ;;  %v1251_v24 = vmul.f32 %v11134_v47, %v11229_v0  ;;  %v1252_v25 = vmul.f32 %v11134_v47, %v11233_v11 }
  0x7a   : > { %v1043_v28 = vrot.slane %v1042_v17, 1  ;;  %v1051_v31 = vadd.f32 %v1050_v18, %v1049_v9  ;;  %v1059_v30 = vrot.slane %v1058_v19, 2  ;;  %v1253_v10 = vmul.f32 %v11134_v47, %v981_v29  ;;  %v750_v9 = vld [vmem:[%s11041_s29 + $0x208] sm:$0xff] }
  0x7b   : > { %v1067_v40 = vadd.f32 %v1066_v23, %v1065_v14  ;;  %v1254_v32 = vmul.f32 %v11134_v47, %v990_v34  ;;  %v1255_v33 = vmul.f32 %v11134_v47, %v999_v45  ;;  %v1256_v56 = vmul.f32 %v11134_v47, %v1008_v61 }
  0x7c   : > { %v1044_v35 = vadd.f32 %v1043_v28, %v1042_v17  ;;  %v1052_v37 = vrot.slane %v1051_v31, 1  ;;  %v1060_v38 = vadd.f32 %v1059_v30, %v1058_v19  ;;  %v1257_v0 = vmul.f32 %v11134_v47, %v1017_v2 }
  0x7d   : > { %v1068_v39 = vrot.slane %v1067_v40, 2  ;;  %v1258_v11 = vmul.f32 %v11134_v47, %v1026_v7  ;;  %v1259_v42 = vmul.f32 %v11134_v47, %v1035_v22  ;;  %v1297_v36 = vpack.c.bf16 %v1248_v15, %v1248_v15  ;;  %v752_v22 = vld [vmem:[%s11041_s29 + $0x218] sm:$0xff] }
  0x7e   : > { %v1053_v41 = vadd.f32 %v1052_v37, %v1051_v31  ;;  %v1061_v29 = vrot.slane %v1060_v38, 1  ;;  %v1260_v43 = vmul.f32 %v11134_v47, %v1044_v35  ;;  %v1298_v34 = vpack.c.bf16 %v1249_v16, %v1249_v16 }
  0x7f   : > { %v1069_v44 = vadd.f32 %v1068_v39, %v1067_v40  ;;  %v1299_v45 = vpack.c.bf16 %v1250_v21, %v1250_v21  ;;  %v1300_v46 = vpack.c.bf16 %v1251_v24, %v1251_v24  ;;  %v1301_v51 = vpack.c.bf16 %v1252_v25, %v1252_v25  ;;  %v751_v21 = vld [vmem:[%s11041_s29 + $0x210] sm:$0xff]  ;;  %v753_v40 = vld [vmem:[%s11041_s29 + $0x220] sm:$0xff] }
  0x80   : > { %v1062_v52 = vadd.f32 %v1061_v29, %v1060_v38  ;;  %v1261_v53 = vmul.f32 %v11134_v47, %v1053_v41  ;;  %v1302_v54 = vpack.c.bf16 %v1253_v10, %v1253_v10  ;;  %v1303_v20 = vpack.c.bf16 %v1254_v32, %v1254_v32  ;;  %v754_v32 = vld [vmem:[%s11041_s29 + $0x228] sm:$0xff] }
  0x81   : > { %v1070_v55 = vrot.slane %v1069_v44, 1  ;;  %v1304_v57 = vpack.c.bf16 %v1255_v33, %v1255_v33  ;;  %v1305_v49 = vpack.c.bf16 %v1256_v56, %v1256_v56  ;;  %v1306_v50 = vpack.c.bf16 %v1257_v0, %v1257_v0 }
  0x82   : > { %v1262_v58 = vmul.f32 %v11134_v47, %v1062_v52  ;;  %v1307_v60 = vpack.c.bf16 %v1258_v11, %v1258_v11  ;;  %v1308_v59 = vpack.c.bf16 %v1259_v42, %v1259_v42  ;;  %v1309_v61 = vpack.c.bf16 %v1260_v43, %v1260_v43  ;;  %v755_v11 = vld [vmem:[%s11041_s29 + $0x230] sm:$0xff]  ;;  %v756_v43 = vld [vmem:[%s11041_s29 + $0x238] sm:$0xff]  ;;  %v758_v52 = vld [vmem:[%s11041_s29 + $0x248] sm:$0xff] }
  0x83   : > { %v1071_v63 = vadd.f32 %v1070_v55, %v1069_v44  ;;  %v1310_v6 = vpack.c.bf16 %v1261_v53, %v1261_v53  ;;  %v1421_v26 = vunpack.c.l.b16 %v1297_v36  ;;  %v1422_v62 = vunpack.c.l.b16 %v1298_v34 }
  0x84   : > { %v1311_v48 = vpack.c.bf16 %v1262_v58, %v1262_v58  ;;  %v1423_v27 = vunpack.c.l.b16 %v1299_v45  ;;  %v1424_v1 = vunpack.c.l.b16 %v1300_v46  ;;  %v1425_v2 = vunpack.c.l.b16 %v1301_v51  ;;  %v757_v51 = vld [vmem:[%s11041_s29 + $0x240] sm:$0xff] }
  0x85   : > { %v1263_v3 = vmul.f32 %v11134_v47, %v1071_v63  ;;  %v1426_v4 = vunpack.c.l.b16 %v1302_v54  ;;  %v1427_v5 = vunpack.c.l.b16 %v1303_v20  ;;  %v1428_v7 = vunpack.c.l.b16 %v1304_v57  ;;  %v759_v57 = vld [vmem:[%s11041_s29 + $0x250] sm:$0xff] }
  0x86   : > { %v1429_v12 = vunpack.c.l.b16 %v1305_v49  ;;  %v1430_v13 = vunpack.c.l.b16 %v1306_v50  ;;  %v1431_v14 = vunpack.c.l.b16 %v1307_v60  ;;  %v1432_v15 = vunpack.c.l.b16 %v1308_v59  ;;  %v760_v60 = vld [vmem:[%s11041_s29 + $0x258] sm:$0xff] }
  0x87   : > { %v1312_v16 = vpack.c.bf16 %v1263_v3, %v1263_v3  ;;  %v1433_v17 = vunpack.c.l.b16 %v1309_v61  ;;  %v1434_v18 = vunpack.c.l.b16 %v1310_v6  ;;  %v1435_v19 = vunpack.c.l.b16 %v1311_v48  ;;  %v761_v6 = vld [vmem:[%s11041_s29 + $0x260] sm:$0xff] }
  0x88   : > { %v1475_v23 = vsel %vm1454_vm2, %v1422_v62, %v1421_v26  ;;  %v1482_v24 = vsel %vm1454_vm2, %v1430_v13, %v1429_v12  ;;  %v1072_v25 = vsel %vm783_vm0, %v749_v8, 0.0  ;;  %v1073_v28 = vsel %vm783_vm0, %v750_v9, 0.0  ;;  %v764_v13 = vld [vmem:[%s11041_s29 + $0x278] sm:$0xff] }
  0x89   : > { %v1436_v31 = vunpack.c.l.b16 %v1312_v16  ;;  %v1476_v30 = vsel %vm1456_vm3, %v1423_v27, %v1475_v23  ;;  %v1483_v10 = vsel %vm1456_vm3, %v1431_v14, %v1482_v24  ;;  %v1074_v33 = vadd.f32 %v1073_v28, %v1072_v25  ;;  %v765_v23 = vld [vmem:[%s11041_s29 + $0x280] sm:$0xff] }
  0x8a   : > { %v1477_v56 = vsel %vm1458_vm4, %v1424_v1, %v1476_v30  ;;  %v1484_v35 = vsel %vm1458_vm4, %v1432_v15, %v1483_v10  ;;  %v1081_v37 = vsel %vm783_vm0, %v751_v21, 0.0  ;;  %v1082_v38 = vsel %vm783_vm0, %v752_v22, 0.0  ;;  %v762_v1 = vld [vmem:[%s11041_s29 + $0x268] sm:$0xff] }
  0x8b   : > { %v1478_v0 = vsel %vm1460_vm5, %v1425_v2, %v1477_v56  ;;  %v1485_v39 = vsel %vm1460_vm5, %v1433_v17, %v1484_v35  ;;  %v1075_v42 = vrot.slane %v1074_v33, 4  ;;  %v1083_v36 = vadd.f32 %v1082_v38, %v1081_v37  ;;  %v763_v2 = vld [vmem:[%s11041_s29 + $0x270] sm:$0xff]  ;;  %v766_v30 = vld [vmem:[%s11041_s29 + $0x288] sm:$0xff] }
  0x8c   : > { %v1479_v41 = vsel %vm1462_vm6, %v1426_v4, %v1478_v0  ;;  %v1486_v29 = vsel %vm1462_vm6, %v1434_v18, %v1485_v39  ;;  %v1090_v34 = vsel %vm783_vm0, %v753_v40, 0.0  ;;  %v1091_v44 = vsel %vm783_vm0, %v754_v32, 0.0  ;;  %v767_v38 = vld [vmem:[%s11041_s29 + $0x290] sm:$0xff] }
  0x8d   : > { %v1480_v45 = vsel %vm1464_vm7, %v1427_v5, %v1479_v41  ;;  %v1487_v46 = vsel %vm1464_vm7, %v1435_v19, %v1486_v29  ;;  %v1076_v53 = vadd.f32 %v1075_v42, %v1074_v33  ;;  %v1084_v54 = vrot.slane %v1083_v36, 4 }
  0x8e   : > { %v1481_v20 = vsel %vm1466_vm8, %v1428_v7, %v1480_v45  ;;  %v1488_v55 = vsel %vm1466_vm8, %v1436_v31, %v1487_v46  ;;  %v1092_v49 = vadd.f32 %v1091_v44, %v1090_v34  ;;  %v1099_v50 = vsel %vm783_vm0, %v755_v11, 0.0 }
  0x8f   : > { %v1504_v58 = vpack.c.b16 %v1488_v55, %v1481_v20  ;;  %v1077_v59 = vrot.slane %v1076_v53, 2  ;;  %v1085_v61 = vadd.f32 %v1084_v54, %v1083_v36  ;;  %v1100_v63 = vsel %vm783_vm0, %v756_v43, 0.0  ;;  %v768_v36 = vld [vmem:[%s11041_s29 + $0x298] sm:$0xff] }
  0x90   : > { %v1093_v26 = vrot.slane %v1092_v49, 4  ;;  %v1101_v62 = vadd.f32 %v1100_v63, %v1099_v50  ;;  %v1108_v48 = vsel %vm783_vm0, %v757_v51, 0.0  ;;  %v1109_v27 = vsel %vm783_vm0, %v758_v52, 0.0  ;;  %v769_v52 = vld [vmem:[%s11041_s29 + $0x2a0] sm:$0xff] }
  0x91   : > { %8880 = vmatmul.msk.bf16.gmra.mxu0 %vm783_vm0, %v1504_v58  ;;  %8884 = vmatmul.msk.bf16.gmra.mxu1 %vm783_vm0, %v1504_v58  ;;  %v1078_v3 = vadd.f32 %v1077_v59, %v1076_v53  ;;  %v1086_v4 = vrot.slane %v1085_v61, 2  ;;  %v1110_v5 = vadd.f32 %v1109_v27, %v1108_v48  ;;  %v1117_v7 = vsel %vm783_vm0, %v759_v57, 0.0  ;;  %v770_v53 = vld [vmem:[%s11041_s29 + $0x2a8] sm:$0xff]  ;;  %v771_v59 = vld [vmem:[%s11041_s29 + $0x2b0] sm:$0xff] }
  0x92   : > { %8888 = vmatmul.msk.bf16.gmra.mxu2 %vm783_vm0, %v1504_v58  ;;  %8892 = vmatmul.msk.bf16.gmra.mxu3 %vm783_vm0, %v1504_v58  ;;  %v1094_v8 = vadd.f32 %v1093_v26, %v1092_v49  ;;  %v1102_v9 = vrot.slane %v1101_v62, 4  ;;  %v1118_v12 = vsel %vm783_vm0, %v760_v60, 0.0  ;;  %v1126_v17 = vsel %vm783_vm0, %v761_v6, 0.0 }
  0x93   : > { %v1087_v14 = vadd.f32 %v1086_v4, %v1085_v61  ;;  %v1111_v15 = vrot.slane %v1110_v5, 4  ;;  %v1119_v16 = vadd.f32 %v1118_v12, %v1117_v7  ;;  %v1127_v21 = vsel %vm783_vm0, %v762_v1, 0.0  ;;  %v772_v61 = vld [vmem:[%s11041_s29 + $0x2b8] sm:$0xff]  ;;  %v774_v4 = vld [vmem:[%s11041_s29 + $0x2c8] sm:$0xff] }
  0x94   : > { %v1095_v18 = vrot.slane %v1094_v8, 2  ;;  %v1103_v19 = vadd.f32 %v1102_v9, %v1101_v62  ;;  %v1135_v22 = vsel %vm783_vm0, %v763_v2, 0.0  ;;  %v1079_v24 = vrot.slane %v1078_v3, 1 }
  0x95   : > { %v1088_v25 = vrot.slane %v1087_v14, 1  ;;  %v1112_v28 = vadd.f32 %v1111_v15, %v1110_v5  ;;  %v1120_v31 = vrot.slane %v1119_v16, 4  ;;  %v1128_v32 = vadd.f32 %v1127_v21, %v1126_v17  ;;  %v776_v17 = vld [vmem:[%s11041_s29 + $0x2d8] sm:$0xff] }
  0x96   : > { %v1096_v10 = vadd.f32 %v1095_v18, %v1094_v8  ;;  %v1104_v40 = vrot.slane %v1103_v19, 2  ;;  %v1136_v33 = vsel %vm783_vm0, %v764_v13, 0.0  ;;  %v1144_v42 = vsel %vm783_vm0, %v765_v23, 0.0 }
  0x97   : > { %v1113_v56 = vrot.slane %v1112_v28, 2  ;;  %v1121_v35 = vadd.f32 %v1120_v31, %v1119_v16  ;;  %v1137_v37 = vadd.f32 %v1136_v33, %v1135_v22  ;;  %v1129_v11 = vrot.slane %v1128_v32, 4  ;;  %v775_v16 = vld [vmem:[%s11041_s29 + $0x2d0] sm:$0xff]  ;;  %v777_v31 = vld [vmem:[%s11041_s29 + $0x2e0] sm:$0xff] }
  0x98   : > { %v1097_v0 = vrot.slane %v1096_v10, 1  ;;  %v1105_v39 = vadd.f32 %v1104_v40, %v1103_v19  ;;  %v1145_v34 = vsel %vm783_vm0, %v766_v30, 0.0  ;;  %v11330_v44 = vadd.f32 %v1079_v24, %v1078_v3  ;;  %v773_v3 = vld [vmem:[%s11041_s29 + $0x2c0] sm:$0xff]  ;;  %v778_v30 = vld [vmem:[%s11041_s29 + $0x2e8] sm:$0xff] }
  0x99   : > { %v1114_v41 = vadd.f32 %v1113_v56, %v1112_v28  ;;  %v1122_v29 = vrot.slane %v1121_v35, 2  ;;  %v1138_v43 = vrot.slane %v1137_v37, 4  ;;  %v11332_v45 = vadd.f32 %v1088_v25, %v1087_v14 }
  0x9a   : > { %v1130_v46 = vadd.f32 %v1129_v11, %v1128_v32  ;;  %v1146_v51 = vadd.f32 %v1145_v34, %v1144_v42  ;;  %v1106_v54 = vrot.slane %v1105_v39, 1  ;;  %v1153_v57 = vsel %vm783_vm0, %v767_v38, 0.0 }
  0x9b   : > { %v1123_v20 = vadd.f32 %v1122_v29, %v1121_v35  ;;  %v1139_v55 = vadd.f32 %v1138_v43, %v1137_v37  ;;  %v11337_v49 = vadd.f32 %v1097_v0, %v1096_v10  ;;  %v1154_v60 = vsel %vm783_vm0, %v768_v36, 0.0  ;;  %v779_v0 = vld [vmem:[%s11041_s29 + $0x2f0] sm:$0xff] }
  0x9c   : > { %v1131_v50 = vrot.slane %v1130_v46, 2  ;;  %v1147_v58 = vrot.slane %v1146_v51, 4  ;;  %v1115_v63 = vrot.slane %v1114_v41, 1  ;;  %v1155_v62 = vadd.f32 %v1154_v60, %v1153_v57 }
  0x9d   : > { %v1124_v6 = vrot.slane %v1123_v20, 1  ;;  %v1140_v26 = vrot.slane %v1139_v55, 2  ;;  %v1162_v1 = vsel %vm783_vm0, %v769_v52, 0.0  ;;  %v1163_v2 = vsel %vm783_vm0, %v770_v53, 0.0 }
  0x9e   : > { %v1132_v48 = vadd.f32 %v1131_v50, %v1130_v46  ;;  %v1148_v27 = vadd.f32 %v1147_v58, %v1146_v51  ;;  %v11346_v5 = vadd.f32 %v1106_v54, %v1105_v39  ;;  %v1156_v8 = vrot.slane %v1155_v62, 4  ;;  %v780_v39 = vld [vmem:[%s11041_s29 + $0x2f8] sm:$0xff] }
  0x9f   : > { %v1141_v7 = vadd.f32 %v1140_v26, %v1139_v55  ;;  %v1164_v9 = vadd.f32 %v1163_v2, %v1162_v1  ;;  %v1171_v14 = vsel %vm783_vm0, %v771_v59, 0.0  ;;  %v1172_v15 = vsel %vm783_vm0, %v772_v61, 0.0 }
  0xa0   : > { %v1133_v12 = vrot.slane %v1132_v48, 1  ;;  %v1149_v13 = vrot.slane %v1148_v27, 2  ;;  %v1116_v18 = vadd.f32 %v1115_v63, %v1114_v41  ;;  %v1157_v19 = vadd.f32 %v1156_v8, %v1155_v62 }
  0xa1   : > { %v1165_v21 = vrot.slane %v1164_v9, 4  ;;  %v1173_v22 = vadd.f32 %v1172_v15, %v1171_v14  ;;  %v1125_v23 = vadd.f32 %v1124_v6, %v1123_v20  ;;  %v1180_v25 = vsel %vm783_vm0, %v773_v3, 0.0 }
  0xa2   : > { %v1150_v24 = vadd.f32 %v1149_v13, %v1148_v27  ;;  %v1181_v28 = vsel %vm783_vm0, %v774_v4, 0.0  ;;  %v1142_v10 = vrot.slane %v1141_v7, 1  ;;  %v1158_v40 = vrot.slane %v1157_v19, 2 }
  0xa3   : > { %v1166_v32 = vadd.f32 %v1165_v21, %v1164_v9  ;;  %v1174_v33 = vrot.slane %v1173_v22, 4  ;;  %v1134_v56 = vadd.f32 %v1133_v12, %v1132_v48  ;;  %v1182_v35 = vadd.f32 %v1181_v28, %v1180_v25 }
  0xa4   : > { %v1189_v37 = vsel %vm783_vm0, %v775_v16, 0.0  ;;  %v1190_v38 = vsel %vm783_vm0, %v776_v17, 0.0  ;;  %v1159_v11 = vadd.f32 %v1158_v40, %v1157_v19  ;;  %v1151_v29 = vrot.slane %v1150_v24, 1 }
  0xa5   : > { %v1167_v42 = vrot.slane %v1166_v32, 2  ;;  %v1175_v36 = vadd.f32 %v1174_v33, %v1173_v22  ;;  %v1191_v41 = vadd.f32 %v1190_v38, %v1189_v37  ;;  %v1183_v43 = vrot.slane %v1182_v35, 4 }
  0xa6   : > { %v1198_v34 = vsel %vm783_vm0, %v777_v31, 0.0  ;;  %v1199_v46 = vsel %vm783_vm0, %v778_v30, 0.0  ;;  %v1160_v51 = vrot.slane %v1159_v11, 1  ;;  %v1207_v57 = vsel %vm783_vm0, %v779_v0, 0.0 }
  0xa7   : > { %v1168_v52 = vadd.f32 %v1167_v42, %v1166_v32  ;;  %v1176_v53 = vrot.slane %v1175_v36, 2  ;;  %v1192_v54 = vrot.slane %v1191_v41, 4  ;;  %v1184_v20 = vadd.f32 %v1183_v43, %v1182_v35 }
  0xa8   : > { %v1200_v55 = vadd.f32 %v1199_v46, %v1198_v34  ;;  %v1208_v50 = vsel %vm783_vm0, %v780_v39, 0.0  ;;  %v1143_v58 = vadd.f32 %v1142_v10, %v1141_v7  ;;  %v1152_v63 = vadd.f32 %v1151_v29, %v1150_v24 }
  0xa9   : > { %v1169_v60 = vrot.slane %v1168_v52, 1  ;;  %v1177_v59 = vadd.f32 %v1176_v53, %v1175_v36  ;;  %v1193_v61 = vadd.f32 %v1192_v54, %v1191_v41  ;;  %v1185_v6 = vrot.slane %v1184_v20, 2 }
  0xaa   : > { %v1201_v26 = vrot.slane %v1200_v55, 4  ;;  %v1209_v62 = vadd.f32 %v1208_v50, %v1207_v57  ;;  %v1161_v48 = vadd.f32 %v1160_v51, %v1159_v11  ;;  %v1264_v2 = vmul.f32 %v11134_v47, %v11330_v44 }
  0xab   : > { %v1178_v27 = vrot.slane %v1177_v59, 1  ;;  %v1194_v1 = vrot.slane %v1193_v61, 2  ;;  %v1170_v3 = vadd.f32 %v1169_v60, %v1168_v52  ;;  %v1186_v4 = vadd.f32 %v1185_v6, %v1184_v20  ;;  %v781_v6 = vld [vmem:[%s11041_s29 + $0x300] sm:$0xff] }
  0xac   : > { %v1202_v8 = vadd.f32 %v1201_v26, %v1200_v55  ;;  %v1210_v9 = vrot.slane %v1209_v62, 4  ;;  %v1265_v7 = vmul.f32 %v11134_v47, %v11332_v45  ;;  %v1266_v14 = vmul.f32 %v11134_v47, %v11337_v49 }
  0xad   : > { %v1179_v12 = vadd.f32 %v1178_v27, %v1177_v59  ;;  %v1195_v13 = vadd.f32 %v1194_v1, %v1193_v61  ;;  %v1187_v15 = vrot.slane %v1186_v4, 1  ;;  %v1267_v19 = vmul.f32 %v11134_v47, %v11346_v5  ;;  %v782_v1 = vld [vmem:[%s11041_s29 + $0x308] sm:$0xff] }
  0xae   : > { %v1203_v16 = vrot.slane %v1202_v8, 2  ;;  %v1211_v17 = vadd.f32 %v1210_v9, %v1209_v62  ;;  %v1268_v44 = vmul.f32 %v11134_v47, %v1116_v18  ;;  %v1269_v22 = vmul.f32 %v11134_v47, %v1125_v23 }
  0xaf   : > { %v1196_v21 = vrot.slane %v1195_v13, 1  ;;  %v1270_v24 = vmul.f32 %v11134_v47, %v1134_v56  ;;  %v1188_v25 = vadd.f32 %v1187_v15, %v1186_v4  ;;  %v1271_v45 = vmul.f32 %v11134_v47, %v1143_v58 }
  0xb0   : > { %v1204_v28 = vadd.f32 %v1203_v16, %v1202_v8  ;;  %v1212_v31 = vrot.slane %v1211_v17, 2  ;;  %v1272_v49 = vmul.f32 %v11134_v47, %v1152_v63  ;;  %v1273_v10 = vmul.f32 %v11134_v47, %v1161_v48 }
  0xb1   : > { %v1197_v30 = vadd.f32 %v1196_v21, %v1195_v13  ;;  %v1274_v40 = vmul.f32 %v11134_v47, %v1170_v3  ;;  %v1275_v18 = vmul.f32 %v11134_v47, %v1179_v12  ;;  %v1313_v33 = vpack.c.bf16 %v1264_v2, %v1264_v2 }
  0xb2   : > { %v1205_v5 = vrot.slane %v1204_v28, 1  ;;  %v1213_v32 = vadd.f32 %v1212_v31, %v1211_v17  ;;  %v1276_v23 = vmul.f32 %v11134_v47, %v1188_v25  ;;  %v1314_v35 = vpack.c.bf16 %v1265_v7, %v1265_v7 }
  0xb3   : > { %v1277_v56 = vmul.f32 %v11134_v47, %v1197_v30  ;;  %v1315_v37 = vpack.c.bf16 %v1266_v14, %v1266_v14  ;;  %v1316_v39 = vpack.c.bf16 %v1267_v19, %v1267_v19  ;;  %v1317_v11 = vpack.c.bf16 %v1268_v44, %v1268_v44 }
  0xb4   : > { %v1206_v38 = vadd.f32 %v1205_v5, %v1204_v28  ;;  %v1214_v0 = vrot.slane %v1213_v32, 1  ;;  %v1318_v42 = vpack.c.bf16 %v1269_v22, %v1269_v22  ;;  %v1319_v36 = vpack.c.bf16 %v1270_v24, %v1270_v24 }
  0xb5   : > { %v1321_v41 = vpack.c.bf16 %v1272_v49, %v1272_v49  ;;  %v1322_v29 = vpack.c.bf16 %v1273_v10, %v1273_v10  ;;  %v1323_v46 = vpack.c.bf16 %v1274_v40, %v1274_v40  ;;  %v1324_v51 = vpack.c.bf16 %v1275_v18, %v1275_v18 }
  0xb6   : > { %v1215_v43 = vadd.f32 %v1214_v0, %v1213_v32  ;;  %v1278_v34 = vmul.f32 %v11134_v47, %v1206_v38  ;;  %v1320_v52 = vpack.c.bf16 %v1271_v45, %v1271_v45  ;;  %v1325_v53 = vpack.c.bf16 %v1276_v23, %v1276_v23  ;;  %v10388_v38 = vld [vmem:[%s15505_s12 + $0xf8] sm:$0xff] }
  0xb7   : > { %v1437_v54 = vunpack.c.l.b16 %v1313_v33  ;;  %v1438_v20 = vunpack.c.l.b16 %v1314_v35  ;;  %v1326_v57 = vpack.c.bf16 %v1277_v56, %v1277_v56  ;;  %v1439_v58 = vunpack.c.l.b16 %v1315_v37  ;;  %v10380_v33 = vld [vmem:[%s15505_s12 + $0xb8] sm:$0xff]  ;;  %2074 = vmatpush.bf16.msrb.mxu3 %v10388_v38 }
  0xb8   : > { %v1279_v55 = vmul.f32 %v11134_v47, %v1215_v43  ;;  %v1327_v50 = vpack.c.bf16 %v1278_v34, %v1278_v34  ;;  %v1440_v60 = vunpack.c.l.b16 %v1316_v39  ;;  %v1441_v59 = vunpack.c.l.b16 %v1317_v11  ;;  %2061 = vmatpush.bf16.msrb.mxu2 %v10380_v33  ;;  %v10372_v11 = vld [vmem:[%s15505_s12 + $0x78] sm:$0xff]  ;;  %v10378_v43 = vld [vmem:[%s15505_s12 + $0xa8] sm:$0xff] }
  0xb9   : > { %v1442_v61 = vunpack.c.l.b16 %v1318_v42  ;;  %v1445_v63 = vunpack.c.l.b16 %v1321_v41  ;;  %v1446_v62 = vunpack.c.l.b16 %v1322_v29  ;;  %v1447_v48 = vunpack.c.l.b16 %v1323_v46  ;;  %v10379_v42 = vld [vmem:[%s15505_s12 + $0xb0] sm:$0xff]  ;;  %2048 = vmatpush.bf16.msrb.mxu1 %v10372_v11  ;;  %v10386_v34 = vld [vmem:[%s15505_s12 + $0xe8] sm:$0xff] }
  0xba   : > { %v1328_v26 = vpack.c.bf16 %v1279_v55, %v1279_v55  ;;  %v1448_v27 = vunpack.c.l.b16 %v1324_v51  ;;  %v1443_v2 = vunpack.c.l.b16 %v1319_v36  ;;  %v1444_v3 = vunpack.c.l.b16 %v1320_v52  ;;  %v10387_v36 = vld [vmem:[%s15505_s12 + $0xf0] sm:$0xff]  ;;  %v10362_v55 = vld [vmem:[%s15505_s12 + $0x28] sm:$0xff] }
  0xbb   : > { %v1449_v4 = vunpack.c.l.b16 %v1325_v53  ;;  %v1489_v8 = vsel %vm1454_vm2, %v1438_v20, %v1437_v54  ;;  %v1450_v9 = vunpack.c.l.b16 %v1326_v57  ;;  %v1496_v13 = vsel %vm1454_vm2, %v1446_v62, %v1445_v63  ;;  %v10363_v41 = vld [vmem:[%s15505_s12 + $0x30] sm:$0xff]  ;;  %2075 = vmatpush.bf16.msrb.mxu3 %v10387_v36  ;;  %v10370_v57 = vld [vmem:[%s15505_s12 + $0x68] sm:$0xff]  ;;  %v10369_v63 = vld [vmem:[%s15505_s12 + $0x60] sm:$0xff] }
  0xbc   : > { %v1490_v12 = vsel %vm1456_vm3, %v1439_v58, %v1489_v8  ;;  %v1216_v7 = vsel %vm783_vm0, %v781_v6, 0.0  ;;  %v1451_v14 = vunpack.c.l.b16 %v1327_v50  ;;  %v1497_v16 = vsel %vm1456_vm3, %v1447_v48, %v1496_v13  ;;  %2062 = vmatpush.bf16.msrb.mxu2 %v10379_v42  ;;  %v10371_v29 = vld [vmem:[%s15505_s12 + $0x70] sm:$0xff]  ;;  %v10377_v50 = vld [vmem:[%s15505_s12 + $0xa0] sm:$0xff]  ;;  %v10376_v6 = vld [vmem:[%s15505_s12 + $0x98] sm:$0xff] }
  0xbd   : > { %v1491_v15 = vsel %vm1458_vm4, %v1440_v60, %v1490_v12  ;;  %v1217_v17 = vsel %vm783_vm0, %v782_v1, 0.0  ;;  %v1452_v19 = vunpack.c.l.b16 %v1328_v26  ;;  %v1498_v44 = vsel %vm1458_vm4, %v1448_v27, %v1497_v16  ;;  %2049 = vmatpush.bf16.msrb.mxu1 %v10371_v29  ;;  %v10384_v48 = vld [vmem:[%s15505_s12 + $0xd8] sm:$0xff]  ;;  %v10367_v12 = vld [vmem:[%s15505_s12 + $0x50] sm:$0xff]  ;;  %v10366_v16 = vld [vmem:[%s15505_s12 + $0x48] sm:$0xff] }
  0xbe   : > { %v1492_v21 = vsel %vm1460_vm5, %v1441_v59, %v1491_v15  ;;  %v1218_v22 = vadd.f32 %v1217_v17, %v1216_v7  ;;  %v1499_v25 = vsel %vm1460_vm5, %v1449_v4, %v1498_v44  ;;  %v10385_v59 = vld [vmem:[%s15505_s12 + $0xe0] sm:$0xff]  ;;  %v10360_v4 = vld [vmem:[%s15505_s12 + $0x18] sm:$0xff]  ;;  %v10375_v13 = vld [vmem:[%s15505_s12 + $0x90] sm:$0xff] }
  0xbf   : > { %v1493_v24 = vsel %vm1462_vm6, %v1442_v61, %v1492_v21  ;;  %v1500_v31 = vsel %vm1462_vm6, %v1450_v9, %v1499_v25  ;;  %2076 = vmatpush.bf16.msrb.mxu3 %v10386_v34  ;;  %v10361_v61 = vld [vmem:[%s15505_s12 + $0x20] sm:$0xff]  ;;  %v10368_v8 = vld [vmem:[%s15505_s12 + $0x58] sm:$0xff]  ;;  %v10359_v9 = vld [vmem:[%s15505_s12 + $0x10] sm:$0xff] }
  0xc0   : > { %v1494_v28 = vsel %vm1464_vm7, %v1443_v2, %v1493_v24  ;;  %v1219_v45 = vrot.slane %v1218_v22, 4  ;;  %v1501_v49 = vsel %vm1464_vm7, %v1451_v14, %v1500_v31  ;;  %2063 = vmatpush.bf16.msrb.mxu2 %v10378_v43  ;;  %v10358_v15 = vld [vmem:[%s15505_s12 + $0x8] sm:$0xff]  ;;  %v1346_v17 = vld [vmem:[%s15498_s5] sm:$0xf]  ;;  %v10383_v44 = vld [vmem:[%s15505_s12 + $0xd0] sm:$0xff] }
  0xc1   : > { %v1495_v30 = vsel %vm1466_vm8, %v1444_v3, %v1494_v28  ;;  %v1502_v10 = vsel %vm1466_vm8, %v1452_v19, %v1501_v49  ;;  %2050 = vmatpush.bf16.msrb.mxu1 %v10370_v57  ;;  %v11504_v24 = vperm.slane %v1346_v17, 1  ;;  %v10357_v25 = vld [vmem:[%s15505_s12] sm:$0xff]  ;;  %v10374_v31 = vld [vmem:[%s15505_s12 + $0x88] sm:$0xff]  ;;  %v11518_v49 = vperm.slane %v1346_v17, 2 }
  0xc2   : > { %v1220_v40 = vadd.f32 %v1219_v45, %v1218_v22  ;;  %v1505_v5 = vpack.c.b16 %v1502_v10, %v1495_v30  ;;  %v11502_v22 = vperm.slane %v1346_v17, 0  ;;  %v10365_v28 = vld [vmem:[%s15505_s12 + $0x40] sm:$0xff]  ;;  %v10382_v45 = vld [vmem:[%s15505_s12 + $0xc8] sm:$0xff]  ;;  %v10820_v30 = vmov 49.0  }
  0xc3   : > { %2077 = vmatpush.bf16.msrb.mxu3 %v10385_v59  ;;  %10742 = vrcp.f32 %v10820_v30  ;;  %v11520_v10 = vperm.slane %v1346_v17, 3  ;;  %v10418_v17 = vld [vmem:[%s15499_s6 + $0xd4] sm:$0xf0] }
  0xc4   : > { %v1221_v32 = vrot.slane %v1220_v40, 2  ;;  %8881 = vmatmul.msk.bf16.gmra.mxu0 %vm783_vm0, %v1505_v5  ;;  %8885 = vmatmul.msk.bf16.gmra.mxu1 %vm783_vm0, %v1505_v5 }
  0xc5   : > { %8889 = vmatmul.msk.bf16.gmra.mxu2 %vm783_vm0, %v1505_v5  ;;  %8893 = vmatmul.msk.bf16.gmra.mxu3 %vm783_vm0, %v1505_v5 }
  0xc6   : > { %v1222_v18 = vadd.f32 %v1221_v32, %v1220_v40  ;;  %2064 = vmatpush.bf16.msrb.mxu2 %v10377_v50  ;;  %2051 = vmatpush.bf16.msrb.mxu1 %v10369_v63  ;;  %v10373_v32 = vld [vmem:[%s15505_s12 + $0x80] sm:$0xff] }
  0xc7   : > { %2078 = vmatpush.bf16.msrb.mxu3 %v10384_v48  ;;  %v9154_v48 = vld [vmem:[%s15499_s6 + $0xe8] sm:$0xf] }
  0xc8   : > { %v1223_v23 = vrot.slane %v1222_v18, 1 }
  0xca   : > { %v1224_v56 = vadd.f32 %v1223_v23, %v1222_v18  ;;  %2065 = vmatpush.bf16.msrb.mxu2 %v10376_v6  ;;  %2052 = vmatpush.bf16.msrb.mxu1 %v10368_v8  ;;  %v10415_v8 = vld [vmem:[%s15499_s6 + $0xc4] sm:$0xf] }
  0xcb   : > { %2079 = vmatpush.bf16.msrb.mxu3 %v10383_v44 }
  0xcc   : > { %v1280_v35 = vmul.f32 %v11134_v47, %v1224_v56  ;;  %v10364_v47 = vld [vmem:[%s15505_s12 + $0x38] sm:$0xff]  ;;  %v10381_v56 = vld [vmem:[%s15505_s12 + $0xc0] sm:$0xff] }
  0xcd   : > { %2035 = vmatpush.bf16.msrb.mxu0 %v10364_v47 }
  0xce   : > { %v1329_v37 = vpack.c.bf16 %v1280_v35, %v1280_v35  ;;  %2053 = vmatpush.bf16.msrb.mxu1 %v10367_v12  ;;  %2066 = vmatpush.bf16.msrb.mxu2 %v10375_v13 }
  0xcf   : > { %2080 = vmatpush.bf16.msrb.mxu3 %v10382_v45 }
  0xd0   : > { %v1453_v0 = vunpack.c.l.b16 %v1329_v37 }
  0xd1   : > { %2036 = vmatpush.bf16.msrb.mxu0 %v10363_v41  ;;  %v11565_v41 = vpop.eup %10742 }
  0xd2   : > { %v1506_v39 = vpack.c.b16 %v1453_v0, %v1453_v0  ;;  %2054 = vmatpush.bf16.msrb.mxu1 %v10366_v16  ;;  %2067 = vmatpush.bf16.msrb.mxu2 %v10374_v31  ;;  %v11602_v59 = vmul.f32 49.0, %v11565_v41  ;;  %v9138_v16 = vld [vmem:[%s15499_s6 + $0xc8] sm:$0xf]  ;;  %v10411_v31 = vld [vmem:[%s15499_s6 + $0xa4] sm:$0xf]  ;;  %vm1769_vm10 = vweird.f32 %v11565_v41 }
  0xd3   : > { %2081 = vmatpush.bf16.msrb.mxu3 %v10381_v56  ;;  %v9139_v56 = vor.u32 %v10418_v17, %v9138_v16 }
  0xd4   : > { %8882 = vmatmul.msk.bf16.gmra.mxu0 %vm783_vm0, %v1506_v39  ;;  %8886 = vmatmul.msk.bf16.gmra.mxu1 %vm783_vm0, %v1506_v39 }
  0xd5   : > { %8890 = vmatmul.msk.bf16.gmra.mxu2 %vm783_vm0, %v1506_v39  ;;  %8894 = vmatmul.msk.bf16.gmra.mxu3 %vm783_vm0, %v1506_v39 }
  0xd6   : > { %2037 = vmatpush.bf16.msrb.mxu0 %v10362_v55  ;;  %2055 = vmatpush.bf16.msrb.mxu1 %v10365_v28 }
  0xd7   : > { %2068 = vmatpush.bf16.msrb.mxu2 %v10373_v32 }
  0xda   : > { %2038 = vmatpush.bf16.msrb.mxu0 %v10361_v61 }
  0xdc   : > { %v11441_v46 = vpop.f32.mrf.mxu0  ;;  %v11443_v51 = vpop.f32.mrf.mxu1 }
  0xdd   : > { %v11524_v40 = vadd.f32 %v11441_v46, %v11502_v22  ;;  %v11534_v18 = vadd.f32 %v11443_v51, %v11504_v24 }
  0xde   : > { %2039 = vmatpush.bf16.msrb.mxu0 %v10360_v4  ;;  %v10422_v4 = vld [vmem:[%s15499_s6 + $0xf4] sm:$0xf0] }
  0xdf   : > { %15634 = vst [vmem:[#allocation2_spill] sm:$0xff] %v11524_v40 }
  0xe0   : > { %15636 = vst [vmem:[#allocation4_spill] sm:$0xff] %v11534_v18 }
  0xe2   : > { %2040 = vmatpush.bf16.msrb.mxu0 %v10359_v9  ;;  %v9132_v9 = vld [vmem:[%s15499_s6 + $0xd0] sm:$0xf0] }
  0xe3   : > { %v11445_v52 = vpop.f32.mrf.mxu2  ;;  %v11447_v53 = vpop.f32.mrf.mxu3  ;;  %v9135_v28 = vor.u32 %v10415_v8, %v9132_v9  ;;  %v9106_v9 = vld [vmem:[%s15499_s6 + $0x88] sm:$0xf] }
  0xe4   : > { %v1610_v54 = vpop.f32.mrf.mxu0  ;;  %v11449_v20 = vpop.f32.mrf.mxu1  ;;  %v11556_v39 = vadd.f32 %v11445_v52, %v11518_v49  ;;  %v11560_v47 = vadd.f32 %v11447_v53, %v11520_v10 }
  0xe5   : > { %v11527_v5 = vadd.f32 %v1610_v54, %v11502_v22  ;;  %v11538_v33 = vadd.f32 %v11449_v20, %v11504_v24 }
  0xe6   : > { %2041 = vmatpush.bf16.msrb.mxu0 %v10358_v15  ;;  %15641 = vst [vmem:[#allocation9_spill] sm:$0xff] %v11556_v39  ;;  %v9155_v15 = vor.u32 %v10422_v4, %v9154_v48  ;;  %v10407_v48 = vld [vmem:[%s15499_s6 + $0x84] sm:$0xf] }
  0xe7   : > { %15635 = vst [vmem:[#allocation3_spill] sm:$0xff] %v11527_v5  ;;  %v1711_v29 = vadd.f32 %v11527_v5, %v11524_v40  ;;  %v1725_v51 = vadd.f32 %v11538_v33, %v11534_v18  ;;  %v13746_v5 = vld [vmem:[%s15503_s10 + $0x12c] sm:$0xf0] }
  0xe8   : > { %15637 = vst [vmem:[#allocation5_spill] sm:$0xff] %v11538_v33  ;;  %3065 = vmatpush.bf16.msra.mxu3 %v9155_v15  ;;  %v13741_v33 = vld [vmem:[%s15503_s10 + $0x120] sm:$0xf] }
  0xe9   : > { %15642 = vst [vmem:[#allocation10_spill] sm:$0xff] %v11560_v47 }
  0xea   : > { %2042 = vmatpush.bf16.msrb.mxu0 %v10357_v25 }
  0xeb   : > { %v1666_v58 = vpop.f32.mrf.mxu2  ;;  %v1694_v60 = vpop.f32.mrf.mxu3 }
  0xec   : > { %v11541_v23 = vadd.f32 %v1666_v58, %v11518_v49  ;;  %v11547_v35 = vadd.f32 %v1694_v60, %v11520_v10  ;;  %3066 = vmatpush.bf16.msra.mxu3 %v9139_v56 }
  0xee   : > { %15638 = vst [vmem:[#allocation6_spill] sm:$0xff] %v11541_v23  ;;  %v1738_v52 = vadd.f32 %v11541_v23, %v11556_v39  ;;  %v1751_v54 = vadd.f32 %v11547_v35, %v11560_v47  ;;  %v13751_v47 = vld [vmem:[%s15503_s10 + $0x220] sm:$0xf] }
  0xef   : > { %15639 = vst [vmem:[#allocation7_spill] sm:$0xff] %v11547_v35 }
 0x10e   : > { %v1613_v26 = vpop.f32.mrf.mxu0  ;;  %v1641_v62 = vpop.f32.mrf.mxu1 }
 0x10f   : > { %v11550_v37 = vadd.f32 %v1613_v26, %v11502_v22  ;;  %v11563_v11 = vadd.f32 %v1641_v62, %v11504_v24  ;;  %v10419_v26 = vld [vmem:[%s15499_s6 + $0xe4] sm:$0xf]  ;;  %v9148_v62 = vld [vmem:[%s15499_s6 + $0xf0] sm:$0xf0] }
 0x111   : > { %15640 = vst [vmem:[#allocation8_spill] sm:$0xff] %v11550_v37  ;;  %v1712_v20 = vadd.f32 %v1711_v29, %v11550_v37  ;;  %v1726_v50 = vadd.f32 %v1725_v51, %v11563_v11  ;;  %v9122_v51 = vld [vmem:[%s15499_s6 + $0xa8] sm:$0xf] }
 0x112   : > { %15643 = vst [vmem:[#allocation11_spill] sm:$0xff] %v11563_v11 }
 0x115   : > { %v1669_v27 = vpop.f32.mrf.mxu2  ;;  %v1697_v1 = vpop.f32.mrf.mxu3 }
 0x116   : > { %v1615_v2 = vpop.f32.mrf.mxu0  ;;  %v1643_v3 = vpop.f32.mrf.mxu1  ;;  %v11570_v43 = vadd.f32 %v1669_v27, %v11518_v49  ;;  %v11573_v34 = vadd.f32 %v1697_v1, %v11520_v10 }
 0x117   : > { %v11576_v46 = vadd.f32 %v1615_v2, %v11502_v22  ;;  %v11583_v53 = vadd.f32 %v1643_v3, %v11504_v24  ;;  %v9151_v3 = vor.u32 %v10419_v26, %v9148_v62 }
 0x118   : > { %15644 = vst [vmem:[#allocation12_spill] sm:$0xff] %v11570_v43  ;;  %v1739_v61 = vadd.f32 %v1738_v52, %v11570_v43  ;;  %v1752_v63 = vadd.f32 %v1751_v54, %v11573_v34  ;;  %v10414_v52 = vld [vmem:[%s15499_s6 + $0xb4] sm:$0xf0] }
 0x119   : > { %15645 = vst [vmem:[#allocation13_spill] sm:$0xff] %v11573_v34  ;;  %v1713_v6 = vadd.f32 %v1712_v20, %v11576_v46  ;;  %v1727_v27 = vadd.f32 %v1726_v50, %v11583_v53  ;;  %3037 = vmatpush.bf16.msra.mxu2 %v9151_v3  ;;  %v9123_v8 = vor.u32 %v10414_v52, %v9122_v51  ;;  %v10406_v52 = vld [vmem:[%s15499_s6 + $0x74] sm:$0xf0] }
 0x11a   : > { %15646 = vst [vmem:[#allocation14_spill] sm:$0xff] %v11576_v46 }
 0x11b   : > { %15647 = vst [vmem:[#allocation15_spill] sm:$0xff] %v11583_v53  ;;  %3067 = vmatpush.bf16.msra.mxu3 %v9123_v8 }
 0x11d   : > { %v1671_v7 = vpop.f32.mrf.mxu2  ;;  %v1699_v14 = vpop.f32.mrf.mxu3  ;;  %3038 = vmatpush.bf16.msra.mxu2 %v9135_v28 }
 0x11e   : > { %v11589_v55 = vadd.f32 %v1671_v7, %v11518_v49  ;;  %v11592_v57 = vadd.f32 %v1699_v14, %v11520_v10 }
 0x120   : > { %15648 = vst [vmem:[#allocation16_spill] sm:$0xff] %v11589_v55  ;;  %v1740_v12 = vadd.f32 %v1739_v61, %v11589_v55  ;;  %v1753_v13 = vadd.f32 %v1752_v63, %v11592_v57  ;;  %v9130_v63 = vld [vmem:[%s15499_s6 + $0xc0] sm:$0xf] }
 0x121   : > { %15649 = vst [vmem:[#allocation17_spill] sm:$0xff] %v11592_v57 }
 0x141   : > { %v1618_v19 = vpop.f32.mrf.mxu0  ;;  %v1646_v21 = vpop.f32.mrf.mxu1 }
 0x142   : > { %v11596_v58 = vadd.f32 %v1618_v19, %v11502_v22  ;;  %v11599_v60 = vadd.f32 %v1646_v21, %v11504_v24 }
 0x144   : > { %15650 = vst [vmem:[#allocation18_spill] sm:$0xff] %v11596_v58  ;;  %v1714_v19 = vadd.f32 %v1713_v6, %v11596_v58  ;;  %v1728_v21 = vadd.f32 %v1727_v27, %v11599_v60  ;;  %v10417_v6 = vld [vmem:[%s15499_s6 + $0xcc] sm:$0xf0]  ;;  %v9100_v27 = vld [vmem:[%s15499_s6 + $0x90] sm:$0xf0] }
 0x145   : > { %15651 = vst [vmem:[#allocation19_spill] sm:$0xff] %v11599_v60  ;;  %v9131_v15 = vor.u32 %v10417_v6, %v9130_v63 }
 0x148   : > { %v1674_v38 = vpop.f32.mrf.mxu2  ;;  %v11552_v0 = vpop.f32.mrf.mxu3 }
 0x149   : > { %v1620_v42 = vpop.f32.mrf.mxu0  ;;  %v1648_v36 = vpop.f32.mrf.mxu1  ;;  %v11646_v45 = vadd.f32 %v1674_v38, %v11518_v49  ;;  %v10421_v38 = vld [vmem:[%s15499_s6 + $0xec] sm:$0xf0]  ;;  %v11674_v20 = vadd.f32 %v11552_v0, %v11520_v10 }
 0x14a   : > { %v11618_v1 = vadd.f32 %v1620_v42, %v11502_v22  ;;  %v11621_v2 = vadd.f32 %v1648_v36, %v11504_v24  ;;  %v9116_v42 = vld [vmem:[%s15499_s6 + $0xb0] sm:$0xf0]  ;;  %v9146_v36 = vld [vmem:[%s15499_s6 + $0xe0] sm:$0xf] }
 0x14b   : > { %15654 = vst [vmem:[#allocation22_spill] sm:$0xff] %v11646_v45  ;;  %v9147_v54 = vor.u32 %v10421_v38, %v9146_v36  ;;  %v9119_v62 = vor.u32 %v10411_v31, %v9116_v42  ;;  %v1741_v3 = vadd.f32 %v1740_v12, %v11646_v45  ;;  %v9114_v12 = vld [vmem:[%s15499_s6 + $0xa0] sm:$0xf]  ;;  %v9103_v31 = vor.u32 %v10407_v48, %v9100_v27 }
 0x14c   : > { %15652 = vst [vmem:[#allocation20_spill] sm:$0xff] %v11618_v1  ;;  %v1729_v29 = vadd.f32 %v1728_v21, %v11621_v2 }
 0x14d   : > { %15653 = vst [vmem:[#allocation21_spill] sm:$0xff] %v11621_v2  ;;  %3009 = vmatpush.bf16.msra.mxu1 %v9147_v54  ;;  %3039 = vmatpush.bf16.msra.mxu2 %v9119_v62 }
 0x14e   : > { %15657 = vst [vmem:[#allocation25_spill] sm:$0xff] %v11674_v20 }
 0x150   : > { %v1676_v7 = vpop.f32.mrf.mxu2  ;;  %v1704_v14 = vpop.f32.mrf.mxu3 }
 0x151   : > { %v1623_v44 = vpop.f32.mrf.mxu0  ;;  %v1651_v25 = vpop.f32.mrf.mxu1  ;;  %v11677_v50 = vadd.f32 %v1676_v7, %v11518_v49  ;;  %v11697_v4 = vadd.f32 %v1704_v14, %v11520_v10  ;;  %v10410_v7 = vld [vmem:[%s15499_s6 + $0x94] sm:$0xf0]  ;;  %v10413_v14 = vld [vmem:[%s15499_s6 + $0xac] sm:$0xf0]  ;;  %3010 = vmatpush.bf16.msra.mxu1 %v9131_v15  ;;  %3040 = vmatpush.bf16.msra.mxu2 %v9103_v31  ;;  %v9068_v15 = vld [vmem:[%s15499_s6 + $0x50] sm:$0xf0] }
 0x152   : > { %v11649_v30 = vadd.f32 %v1623_v44, %v11502_v22  ;;  %v11652_v32 = vadd.f32 %v1651_v25, %v11504_v24  ;;  %v1715_v22 = vadd.f32 %v1714_v19, %v11618_v1  ;;  %v1766_v24 = vsub.f32 1.0, %v11602_v59  ;;  %v10405_v31 = vld [vmem:[%s15499_s6 + $0x6c] sm:$0xf0] }
 0x153   : > { %15658 = vst [vmem:[#allocation26_spill] sm:$0xff] %v11677_v50  ;;  %v1754_v19 = vadd.f32 %v1753_v13, %v11674_v20  ;;  %v1742_v21 = vadd.f32 %v1741_v3, %v11677_v50  ;;  %v10403_v13 = vld [vmem:[%s15499_s6 + $0x64] sm:$0xf]  ;;  %v9115_v54 = vor.u32 %v10413_v14, %v9114_v12  ;;  %v9074_v14 = vld [vmem:[%s15499_s6 + $0x48] sm:$0xf] }
 0x154   : > { %15655 = vst [vmem:[#allocation23_spill] sm:$0xff] %v11649_v30  ;;  %v1717_v61 = vsel %vm1716_vm9, %v11649_v30, 0.0  ;;  %v1730_v59 = vsel %vm1716_vm9, %v11652_v32, 0.0  ;;  %v1767_v28 = vmul.f32 %v11565_v41, %v1766_v24  ;;  %v9084_v24 = vld [vmem:[%s15499_s6 + $0x70] sm:$0xf0] }
 0x155   : > { %15656 = vst [vmem:[#allocation24_spill] sm:$0xff] %v11652_v32  ;;  %v1718_v26 = vadd.f32 %v1717_v61, %v1715_v22  ;;  %v1731_v0 = vadd.f32 %v1730_v59, %v1729_v29  ;;  %v1755_v51 = vadd.f32 %v1754_v19, %v11697_v4  ;;  %v9098_v61 = vld [vmem:[%s15499_s6 + $0x80] sm:$0xf]  ;;  %3011 = vmatpush.bf16.msra.mxu1 %v9115_v54  ;;  %v10402_v19 = vld [vmem:[%s15499_s6 + $0x54] sm:$0xf0] }
 0x156   : > { %15659 = vst [vmem:[#allocation27_spill] sm:$0xff] %v11697_v4  ;;  %v1768_v27 = vadd.f32 %v11565_v41, %v1767_v28  ;;  %v9082_v28 = vld [vmem:[%s15499_s6 + $0x60] sm:$0xf] }
 0x157   : > { %v1719_v16 = vrot.slane %v1718_v26, 4  ;;  %v1732_v17 = vrot.slane %v1731_v0, 4 }
 0x158   : > { %v1679_v44 = vpop.f32.mrf.mxu2  ;;  %v1707_v25 = vpop.f32.mrf.mxu3 }
 0x159   : > { %v1720_v56 = vadd.f32 %v1719_v16, %v1718_v26  ;;  %v1733_v42 = vadd.f32 %v1732_v17, %v1731_v0  ;;  %v11715_v36 = vadd.f32 %v1679_v44, %v11518_v49  ;;  %v11718_v38 = vadd.f32 %v1707_v25, %v11520_v10  ;;  %v1625_v22 = vpop.f32.mrf.mxu0  ;;  %v1653_v29 = vpop.f32.mrf.mxu1  ;;  %v9090_v10 = vld [vmem:[%s15499_s6 + $0x68] sm:$0xf]  ;;  %v10409_v0 = vld [vmem:[%s15499_s6 + $0x8c] sm:$0xf0] }
 0x15a   : > { %v9107_v49 = vor.u32 %v10410_v7, %v9106_v9  ;;  %v9087_v9 = vor.u32 %v10403_v13, %v9084_v24  ;;  %v10399_v7 = vld [vmem:[%s15499_s6 + $0x44] sm:$0xf]  ;;  %v9091_v12 = vor.u32 %v10406_v52, %v9090_v10  ;;  %v11767_v13 = vsel %vm1769_vm10, %v11565_v41, %v1768_v27  ;;  %v9052_v41 = vld [vmem:[%s15499_s6 + $0x30] sm:$0xf0] }
 0x15b   : > { %15660 = vst [vmem:[#allocation28_spill] sm:$0xff] %v11715_v36  ;;  %v1721_v59 = vrot.slane %v1720_v56, 2  ;;  %v1734_v63 = vrot.slane %v1733_v42, 2  ;;  %v1743_v6 = vsel %vm1716_vm9, %v11715_v36, 0.0  ;;  %v1756_v26 = vsel %vm1716_vm9, %v11718_v38, 0.0 }
 0x15c   : > { %15661 = vst [vmem:[#allocation29_spill] sm:$0xff] %v11718_v38  ;;  %v1744_v62 = vadd.f32 %v1743_v6, %v1742_v21  ;;  %v1757_v48 = vadd.f32 %v1756_v26, %v1755_v51  ;;  %3068 = vmatpush.bf16.msra.mxu3 %v9107_v49  ;;  %v9099_v21 = vor.u32 %v10409_v0, %v9098_v61  ;;  %v10395_v10 = vld [vmem:[%s15499_s6 + $0x24] sm:$0xf] }
 0x15d   : > { %v1722_v3 = vadd.f32 %v1721_v59, %v1720_v56  ;;  %v1735_v8 = vadd.f32 %v1734_v63, %v1733_v42  ;;  %3041 = vmatpush.bf16.msra.mxu2 %v9087_v9  ;;  %v9071_v49 = vor.u32 %v10399_v7, %v9068_v15  ;;  %v9075_v61 = vor.u32 %v10402_v19, %v9074_v14  ;;  %v9058_v59 = vld [vmem:[%s15499_s6 + $0x28] sm:$0xf]  ;;  %v10398_v63 = vld [vmem:[%s15499_s6 + $0x34] sm:$0xf0]  ;;  %v9036_v14 = vld [vmem:[%s15499_s6 + $0x10] sm:$0xf0] }
 0x15e   : > { %v1745_v16 = vrot.slane %v1744_v62, 4  ;;  %v1758_v17 = vrot.slane %v1757_v48, 4  ;;  %3012 = vmatpush.bf16.msra.mxu1 %v9099_v21  ;;  %v9083_v6 = vor.u32 %v10405_v31, %v9082_v28  ;;  %v9055_v7 = vor.u32 %v10395_v10, %v9052_v41  ;;  %v9042_v28 = vld [vmem:[%s15499_s6 + $0x8] sm:$0xf]  ;;  %v10394_v31 = vld [vmem:[%s15499_s6 + $0x14] sm:$0xf0] }
 0x15f   : > { %v1723_v44 = vrot.slane %v1722_v3, 1  ;;  %v1736_v25 = vrot.slane %v1735_v8, 1  ;;  %v9059_v15 = vor.u32 %v10398_v63, %v9058_v59  ;;  %v9043_v10 = vor.u32 %v10394_v31, %v9042_v28  ;;  %v2165_v41 = vld [vmem:[%s11774_s26 + $0x10] sm:$0xf] }
 0x160   : > { %v1746_v56 = vadd.f32 %v1745_v16, %v1744_v62  ;;  %v1759_v42 = vadd.f32 %v1758_v17, %v1757_v48  ;;  %v1681_v22 = vpop.f32.mrf.mxu2  ;;  %v1709_v29 = vpop.f32.mrf.mxu3  ;;  %3069 = vmatpush.bf16.msra.mxu3 %v9091_v12  ;;  %v2161_v62 = vld [vmem:[%s11774_s26] sm:$0xf]  ;;  %v2162_v48 = vld [vmem:[%s11774_s26 + $0x4] sm:$0xf] }
 0x161   : > { %v1724_v24 = vadd.f32 %v1723_v44, %v1722_v3  ;;  %v1737_v51 = vadd.f32 %v1736_v25, %v1735_v8  ;;  %3042 = vmatpush.bf16.msra.mxu2 %v9071_v49  ;;  %v10391_v16 = vld [vmem:[%s15499_s6 + $0x4] sm:$0xf]  ;;  %v2211_v19 = vsel %vm2210_vm11, %v2161_v62, 0.0  ;;  %v2218_v21 = vsel %vm2210_vm11, %v2162_v48, 0.0  ;;  %v2164_v22 = vld [vmem:[%s11774_s26 + $0xc] sm:$0xf] }
 0x162   : > { %v1747_v52 = vrot.slane %v1746_v56, 2  ;;  %v1760_v54 = vrot.slane %v1759_v42, 2  ;;  %3013 = vmatpush.bf16.msra.mxu1 %v9083_v6  ;;  %v2212_v29 = vrot.slane %v2211_v19, 4  ;;  %v2232_v59 = vsel %vm2210_vm11, %v2164_v22, 0.0  ;;  %v2167_v62 = vld [vmem:[%s11774_s26 + $0x18] sm:$0xf] }
 0x163   : > { %v1771_v26 = vmul.f32 %v11767_v13, %v1724_v24  ;;  %v1772_v0 = vmul.f32 %v11767_v13, %v1737_v51  ;;  %v2219_v24 = vrot.slane %v2218_v21, 4  ;;  %v2168_v48 = vld [vmem:[%s11774_s26 + $0x1c] sm:$0xf] }
 0x164   : > { %v1748_v27 = vadd.f32 %v1747_v52, %v1746_v56  ;;  %v1761_v3 = vadd.f32 %v1760_v54, %v1759_v42  ;;  %3070 = vmatpush.bf16.msra.mxu3 %v9075_v61  ;;  %v9039_v56 = vor.u32 %v10391_v16, %v9036_v14  ;;  %v2163_v42 = vld [vmem:[%s11774_s26 + $0x8] sm:$0xf]  ;;  %v2213_v63 = vadd.f32 %v2212_v29, %v2211_v19 }
 0x165   : > { %v1775_v8 = vpack.c.bf16 %v1771_v26, %v1771_v26  ;;  %v1776_v9 = vpack.c.bf16 %v1772_v0, %v1772_v0  ;;  %3043 = vmatpush.bf16.msra.mxu2 %v9055_v7  ;;  %v2225_v61 = vsel %vm2210_vm11, %v2163_v42, 0.0  ;;  %v2220_v6 = vadd.f32 %v2219_v24, %v2218_v21  ;;  %v2166_v26 = vld [vmem:[%s11774_s26 + $0x14] sm:$0xf]  ;;  %v2171_v7 = vld [vmem:[%s11774_s26 + $0x28] sm:$0xf] }
 0x166   : > { %v1749_v17 = vrot.slane %v1748_v27, 1  ;;  %v1762_v12 = vrot.slane %v1761_v3, 1  ;;  %v2239_v0 = vsel %vm2210_vm11, %v2165_v41, 0.0  ;;  %v2214_v16 = vrot.slane %v2213_v63, 2  ;;  %v2173_v21 = vld [vmem:[%s11774_s26 + $0x30] sm:$0xf] }
 0x167   : > { %2043 = vmatmul.bf16.vlgmr.msrb.gmra.mxu0 %v1775_v8  ;;  %2056 = vmatmul.bf16.vlgmr.msrb.gmra.mxu1 %v1776_v9  ;;  %v2169_v8 = vld [vmem:[%s11774_s26 + $0x20] sm:$0xf]  ;;  %v2170_v9 = vld [vmem:[%s11774_s26 + $0x24] sm:$0xf]  ;;  %v2246_v14 = vsel %vm2210_vm11, %v2166_v26, 0.0  ;;  %v2253_v19 = vsel %vm2210_vm11, %v2167_v62, 0.0 }
 0x168   : > { %v1750_v44 = vadd.f32 %v1749_v17, %v1748_v27  ;;  %v1763_v25 = vadd.f32 %v1762_v12, %v1761_v3  ;;  %3071 = vmatpush.bf16.msra.mxu3 %v9059_v15  ;;  %v2226_v27 = vrot.slane %v2225_v61, 4  ;;  %v2233_v3 = vrot.slane %v2232_v59, 4  ;;  %v2172_v15 = vld [vmem:[%s11774_s26 + $0x2c] sm:$0xf] }
 0x169   : > { %3044 = vmatpush.bf16.msra.mxu2 %v9039_v56  ;;  %v2221_v17 = vrot.slane %v2220_v6, 2  ;;  %v2240_v12 = vrot.slane %v2239_v0, 4  ;;  %v2260_v31 = vsel %vm2210_vm11, %v2168_v48, 0.0  ;;  %v2267_v56 = vsel %vm2210_vm11, %v2169_v8, 0.0 }
 0x16a   : > { %v1773_v51 = vmul.f32 %v11767_v13, %v1750_v44  ;;  %v1774_v49 = vmul.f32 %v11767_v13, %v1763_v25  ;;  %v2174_v44 = vld [vmem:[%s11774_s26 + $0x34] sm:$0xf]  ;;  %v2227_v25 = vadd.f32 %v2226_v27, %v2225_v61  ;;  %v2234_v28 = vadd.f32 %v2233_v3, %v2232_v59 }
 0x16b   : > { %v2247_v42 = vrot.slane %v2246_v14, 4  ;;  %v2274_v22 = vsel %vm2210_vm11, %v2170_v9, 0.0  ;;  %v2281_v29 = vsel %vm2210_vm11, %v2171_v7, 0.0  ;;  %v2288_v24 = vsel %vm2210_vm11, %v2172_v15, 0.0  ;;  %v2175_v9 = vld [vmem:[%s11774_s26 + $0x38] sm:$0xf] }
 0x16c   : > { %v1777_v52 = vpack.c.bf16 %v1773_v51, %v1773_v51  ;;  %v1778_v54 = vpack.c.bf16 %v1774_v49, %v1774_v49  ;;  %3072 = vmatpush.bf16.msra.mxu3 %v9043_v10  ;;  %v2215_v51 = vadd.f32 %v2214_v16, %v2213_v63  ;;  %v11830_v49 = vadd.f32 %v2221_v17, %v2220_v6  ;;  %v2176_v7 = vld [vmem:[%s11774_s26 + $0x3c] sm:$0xf] }
 0x16d   : > { %v2241_v10 = vadd.f32 %v2240_v12, %v2239_v0  ;;  %v2254_v41 = vrot.slane %v2253_v19, 4  ;;  %v2295_v61 = vsel %vm2210_vm11, %v2173_v21, 0.0  ;;  %v2302_v59 = vsel %vm2210_vm11, %v2174_v44, 0.0 }
 0x16e   : > { %2069 = vmatmul.bf16.vlgmr.msrb.gmra.mxu2 %v1777_v52  ;;  %2082 = vmatmul.bf16.vlgmr.msrb.gmra.mxu3 %v1778_v54  ;;  %v2261_v52 = vrot.slane %v2260_v31, 4  ;;  %v2268_v54 = vrot.slane %v2267_v56, 4  ;;  %v2228_v26 = vrot.slane %v2227_v25, 2  ;;  %v2275_v62 = vrot.slane %v2274_v22, 4 }
 0x16f   : > { %v2282_v48 = vrot.slane %v2281_v29, 4  ;;  %v2289_v27 = vrot.slane %v2288_v24, 4  ;;  %v2296_v3 = vrot.slane %v2295_v61, 4  ;;  %v2303_v8 = vrot.slane %v2302_v59, 4 }
 0x170   : > { %v2235_v15 = vrot.slane %v2234_v28, 2  ;;  %v2242_v63 = vrot.slane %v2241_v10, 2  ;;  %v2248_v6 = vadd.f32 %v2247_v42, %v2246_v14  ;;  %v2255_v16 = vadd.f32 %v2254_v41, %v2253_v19 }
 0x171   : > { %v2216_v0 = vrot.slane %v2215_v51, 1  ;;  %v2223_v17 = vrot.slane %v11830_v49, 1  ;;  %v2262_v12 = vadd.f32 %v2261_v52, %v2260_v31  ;;  %v2269_v38 = vadd.f32 %v2268_v54, %v2267_v56 }
 0x172   : > { %v2229_v21 = vadd.f32 %v2228_v26, %v2227_v25  ;;  %v2276_v36 = vadd.f32 %v2275_v62, %v2274_v22  ;;  %v2283_v44 = vadd.f32 %v2282_v48, %v2281_v29  ;;  %v2290_v32 = vadd.f32 %v2289_v27, %v2288_v24 }
 0x173   : > { %v2297_v30 = vadd.f32 %v2296_v3, %v2295_v61  ;;  %v2304_v4 = vadd.f32 %v2303_v8, %v2302_v59  ;;  %v2309_v50 = vsel %vm2210_vm11, %v2175_v9, 0.0  ;;  %v2316_v2 = vsel %vm2210_vm11, %v2176_v7, 0.0 }
 0x174   : > { %v2236_v1 = vadd.f32 %v2235_v15, %v2234_v28  ;;  %v2243_v20 = vadd.f32 %v2242_v63, %v2241_v10  ;;  %v2249_v45 = vrot.slane %v2248_v6, 2  ;;  %v2256_v14 = vrot.slane %v2255_v16, 2 }
 0x175   : > { %v2263_v19 = vrot.slane %v2262_v12, 2  ;;  %v2270_v42 = vrot.slane %v2269_v38, 2  ;;  %v2310_v41 = vrot.slane %v2309_v50, 4  ;;  %v2317_v60 = vrot.slane %v2316_v2, 4 }
 0x176   : > { %v2277_v31 = vrot.slane %v2276_v36, 2  ;;  %v2284_v56 = vrot.slane %v2283_v44, 2  ;;  %v2291_v25 = vrot.slane %v2290_v32, 2  ;;  %v2298_v22 = vrot.slane %v2297_v30, 2 }
 0x177   : > { %v2305_v29 = vrot.slane %v2304_v4, 2  ;;  %v2311_v24 = vadd.f32 %v2310_v41, %v2309_v50  ;;  %v2318_v52 = vadd.f32 %v2317_v60, %v2316_v2  ;;  %v2230_v54 = vrot.slane %v2229_v21, 1  ;;  %v2177_v41 = vld [vmem:[%s11774_s26 + $0x40] sm:$0xf] }
 0x178   : > { %v2250_v61 = vadd.f32 %v2249_v45, %v2248_v6  ;;  %v2257_v59 = vadd.f32 %v2256_v14, %v2255_v16  ;;  %v10821_v26 = vmov 4.0   ;;  %v2264_v28 = vadd.f32 %v2263_v19, %v2262_v12 }
 0x179   : > { %10744 = vrcp.f32 %v10821_v26  ;;  %v2271_v10 = vadd.f32 %v2270_v42, %v2269_v38  ;;  %v2312_v62 = vrot.slane %v2311_v24, 2  ;;  %v2319_v48 = vrot.slane %v2318_v52, 2  ;;  %v10393_v26 = vld [vmem:[%s15499_s6 + $0xc] sm:$0xf0] }
 0x17a   : > { %v11839_v27 = vadd.f32 %v2216_v0, %v2215_v51  ;;  %v2237_v3 = vrot.slane %v2236_v1, 1  ;;  %v2278_v8 = vadd.f32 %v2277_v31, %v2276_v36  ;;  %v2285_v9 = vadd.f32 %v2284_v56, %v2283_v44  ;;  %v9066_v51 = vld [vmem:[%s15499_s6 + $0x40] sm:$0xf] }
 0x17b   : > { %v2244_v7 = vrot.slane %v2243_v20, 1  ;;  %v2292_v15 = vadd.f32 %v2291_v25, %v2290_v32  ;;  %v2299_v63 = vadd.f32 %v2298_v22, %v2297_v30  ;;  %v2306_v58 = vadd.f32 %v2305_v29, %v2304_v4  ;;  %v10401_v32 = vld [vmem:[%s15499_s6 + $0x4c] sm:$0xf0] }
 0x17c   : > { %v2251_v50 = vrot.slane %v2250_v61, 1  ;;  %v2258_v60 = vrot.slane %v2257_v59, 1  ;;  %v2313_v2 = vadd.f32 %v2312_v62, %v2311_v24  ;;  %v2320_v45 = vadd.f32 %v2319_v48, %v2318_v52 }
 0x17d   : > { %v2224_v6 = vadd.f32 %v2223_v17, %v11830_v49  ;;  %v2231_v16 = vadd.f32 %v2230_v54, %v2229_v21  ;;  %v2265_v38 = vrot.slane %v2264_v28, 1  ;;  %v2272_v12 = vrot.slane %v2271_v10, 1  ;;  %v9050_v49 = vld [vmem:[%s15499_s6 + $0x20] sm:$0xf]  ;;  %v10397_v17 = vld [vmem:[%s15499_s6 + $0x2c] sm:$0xf0] }
 0x17e   : > { %v2238_v4 = vadd.f32 %v2237_v3, %v2236_v1  ;;  %v2279_v36 = vrot.slane %v2278_v8, 1  ;;  %v2286_v0 = vrot.slane %v2285_v9, 1  ;;  %v9067_v44 = vor.u32 %v10401_v32, %v9066_v51  ;;  %v9034_v54 = vld [vmem:[%s15499_s6] sm:$0xf]  ;;  %v2178_v3 = vld [vmem:[%s11774_s26 + $0x44] sm:$0xf] }
 0x17f   : > { %v10745_v30 = vpop.eup %10744  ;;  %v2293_v21 = vrot.slane %v2292_v15, 1  ;;  %v2300_v14 = vrot.slane %v2299_v63, 1  ;;  %v2307_v19 = vrot.slane %v2306_v58, 1  ;;  %v2245_v31 = vadd.f32 %v2244_v7, %v2243_v20  ;;  %v2179_v7 = vld [vmem:[%s11774_s26 + $0x48] sm:$0xf] }
 0x180   : > { %v2555_v42 = vmul.f32 4.0, %v10745_v30  ;;  %v2314_v1 = vrot.slane %v2313_v2, 1  ;;  %v2321_v56 = vrot.slane %v2320_v45, 1  ;;  %3014 = vmatpush.bf16.msra.mxu1 %v9067_v44  ;;  %v9051_v25 = vor.u32 %v10397_v17, %v9050_v49  ;;  %v2181_v51 = vld [vmem:[%s11774_s26 + $0x50] sm:$0xf] }
 0x181   : > { %v2252_v22 = vadd.f32 %v2251_v50, %v2250_v61  ;;  %v2259_v29 = vadd.f32 %v2258_v60, %v2257_v59  ;;  %v2266_v24 = vadd.f32 %v2265_v38, %v2264_v28  ;;  %v2273_v62 = vadd.f32 %v2272_v12, %v2271_v10  ;;  %v2180_v38 = vld [vmem:[%s11774_s26 + $0x4c] sm:$0xf] }
 0x182   : > { %v2556_v52 = vsub.f32 1.0, %v2555_v42  ;;  %v2280_v20 = vadd.f32 %v2279_v36, %v2278_v8  ;;  %v2287_v48 = vadd.f32 %v2286_v0, %v2285_v9  ;;  %v2323_v61 = vsel %vm2210_vm11, %v2177_v41, 0.0 }
 0x183   : > { %v2294_v50 = vadd.f32 %v2293_v21, %v2292_v15  ;;  %v2301_v59 = vadd.f32 %v2300_v14, %v2299_v63  ;;  %v2308_v60 = vadd.f32 %v2307_v19, %v2306_v58  ;;  %v2315_v32 = vadd.f32 %v2314_v1, %v2313_v2 }
 0x184   : > { %v2557_v28 = vmul.f32 %v10745_v30, %v2556_v52  ;;  %v2322_v44 = vadd.f32 %v2321_v56, %v2320_v45  ;;  %vm2559_vm12 = vweird.f32 %v10745_v30  ;;  %3015 = vmatpush.bf16.msra.mxu1 %v9051_v25  ;;  %v9035_v49 = vor.u32 %v10393_v26, %v9034_v54 }
 0x185   : > { %v2324_v42 = vrot.slane %v2323_v61, 4  ;;  %v2330_v10 = vsel %vm2210_vm11, %v2178_v3, 0.0  ;;  %v11868_v8 = vsel %vm2210_vm11, %v2179_v7, 0.0  ;;  %v2344_v58 = vsel %vm2210_vm11, %v2180_v38, 0.0 }
 0x186   : > { %v2558_v17 = vadd.f32 %v10745_v30, %v2557_v28  ;;  %v2331_v9 = vrot.slane %v2330_v10, 4  ;;  %v2338_v15 = vrot.slane %v11868_v8, 4  ;;  %v11873_v63 = vsel %vm2210_vm11, %v2181_v51, 0.0 }
 0x187   : > { %v11877_v45 = vadd.f32 %v2324_v42, %v2323_v61  ;;  %v2345_v12 = vrot.slane %v2344_v58, 4  ;;  %v2352_v36 = vrot.slane %v11873_v63, 4 }
 0x188   : > { %v11875_v2 = vsel %vm2559_vm12, %v10745_v30, %v2558_v17  ;;  %3016 = vmatpush.bf16.msra.mxu1 %v9035_v49 }
 0x189   : > { %v2561_v0 = vmul.f32 %v11875_v2, %v11839_v27  ;;  %v2562_v21 = vmul.f32 %v11875_v2, %v2224_v6  ;;  %v2563_v14 = vmul.f32 %v11875_v2, %v2231_v16  ;;  %v2564_v19 = vmul.f32 %v11875_v2, %v2238_v4 }
 0x18a   : > { %v2565_v41 = vmul.f32 %v11875_v2, %v2245_v31  ;;  %v2566_v30 = vmul.f32 %v11875_v2, %v2252_v22  ;;  %v2567_v1 = vmul.f32 %v11875_v2, %v2259_v29  ;;  %v2568_v56 = vmul.f32 %v11875_v2, %v2266_v24 }
 0x18b   : > { %v2569_v25 = vmul.f32 %v11875_v2, %v2273_v62  ;;  %v2570_v52 = vmul.f32 %v11875_v2, %v2280_v20  ;;  %v2571_v27 = vmul.f32 %v11875_v2, %v2287_v48  ;;  %v2572_v6 = vmul.f32 %v11875_v2, %v2294_v50 }
 0x18c   : > { %v2573_v16 = vmul.f32 %v11875_v2, %v2301_v59  ;;  %v2574_v4 = vmul.f32 %v11875_v2, %v2308_v60  ;;  %v2575_v31 = vmul.f32 %v11875_v2, %v2315_v32  ;;  %v2576_v22 = vmul.f32 %v11875_v2, %v2322_v44 }
 0x18d   : > { %v2610_v54 = vpack.c.bf16 %v2561_v0, %v2561_v0  ;;  %v2611_v29 = vpack.c.bf16 %v2562_v21, %v2562_v21  ;;  %v2612_v26 = vpack.c.bf16 %v2563_v14, %v2563_v14  ;;  %v2613_v24 = vpack.c.bf16 %v2564_v19, %v2564_v19 }
 0x18e   : > { %v2614_v3 = vpack.c.bf16 %v2565_v41, %v2565_v41  ;;  %v2615_v62 = vpack.c.bf16 %v2566_v30, %v2566_v30  ;;  %v2616_v7 = vpack.c.bf16 %v2567_v1, %v2567_v1  ;;  %v2617_v20 = vpack.c.bf16 %v2568_v56, %v2568_v56 }
 0x18f   : > { %v2618_v61 = vpack.c.bf16 %v2569_v25, %v2569_v25  ;;  %v2619_v48 = vpack.c.bf16 %v2570_v52, %v2570_v52  ;;  %v2620_v28 = vpack.c.bf16 %v2571_v27, %v2571_v27  ;;  %v2621_v50 = vpack.c.bf16 %v2572_v6, %v2572_v6 }
 0x190   : > { %v2622_v38 = vpack.c.bf16 %v2573_v16, %v2573_v16  ;;  %v2623_v59 = vpack.c.bf16 %v2574_v4, %v2574_v4  ;;  %v2624_v51 = vpack.c.bf16 %v2575_v31, %v2575_v31  ;;  %v2625_v60 = vpack.c.bf16 %v2576_v22, %v2576_v22 }
 0x191   : > { %v2750_v49 = vunpack.c.l.b16 %v2610_v54  ;;  %v2751_v32 = vunpack.c.l.b16 %v2611_v29  ;;  %v2752_v17 = vunpack.c.l.b16 %v2612_v26  ;;  %v2753_v44 = vunpack.c.l.b16 %v2613_v24 }
 0x192   : > { %v2754_v42 = vunpack.c.l.b16 %v2614_v3  ;;  %v2755_v0 = vunpack.c.l.b16 %v2615_v62  ;;  %v2756_v21 = vunpack.c.l.b16 %v2616_v7  ;;  %v2757_v14 = vunpack.c.l.b16 %v2617_v20 }
 0x193   : > { %v2758_v19 = vunpack.c.l.b16 %v2618_v61  ;;  %v2759_v41 = vunpack.c.l.b16 %v2619_v48  ;;  %v2760_v30 = vunpack.c.l.b16 %v2620_v28  ;;  %v2761_v1 = vunpack.c.l.b16 %v2621_v50  ;;  %v2183_v50 = vld [vmem:[%s11774_s26 + $0x58] sm:$0xf] }
 0x194   : > { %v2762_v56 = vunpack.c.l.b16 %v2622_v38  ;;  %v2763_v25 = vunpack.c.l.b16 %v2623_v59  ;;  %v2764_v52 = vunpack.c.l.b16 %v2624_v51  ;;  %v2765_v27 = vunpack.c.l.b16 %v2625_v60  ;;  %v2184_v38 = vld [vmem:[%s11774_s26 + $0x5c] sm:$0xf] }
 0x195   : > { %v2799_v6 = vsel %vm1454_vm2, %v2751_v32, %v2750_v49  ;;  %v2806_v16 = vsel %vm1454_vm2, %v2759_v41, %v2758_v19  ;;  %v2326_v4 = vrot.slane %v11877_v45, 2  ;;  %v2332_v31 = vadd.f32 %v2331_v9, %v2330_v10 }
 0x196   : > { %v2800_v22 = vsel %vm1456_vm3, %v2752_v17, %v2799_v6  ;;  %v2807_v54 = vsel %vm1456_vm3, %v2760_v30, %v2806_v16  ;;  %v2339_v29 = vadd.f32 %v2338_v15, %v11868_v8  ;;  %v2346_v26 = vadd.f32 %v2345_v12, %v2344_v58 }
 0x197   : > { %v2801_v24 = vsel %vm1458_vm4, %v2753_v44, %v2800_v22  ;;  %v2808_v3 = vsel %vm1458_vm4, %v2761_v1, %v2807_v54  ;;  %v2327_v62 = vadd.f32 %v2326_v4, %v11877_v45  ;;  %v2333_v7 = vrot.slane %v2332_v31, 2  ;;  %v2182_v45 = vld [vmem:[%s11774_s26 + $0x54] sm:$0xf] }
 0x198   : > { %v2802_v10 = vsel %vm1460_vm5, %v2754_v42, %v2801_v24  ;;  %v2809_v9 = vsel %vm1460_vm5, %v2762_v56, %v2808_v3  ;;  %v2340_v20 = vrot.slane %v2339_v29, 2  ;;  %v2347_v61 = vrot.slane %v2346_v26, 2  ;;  %v2185_v42 = vld [vmem:[%s11774_s26 + $0x60] sm:$0xf] }
 0x199   : > { %v2803_v48 = vsel %vm1462_vm6, %v2755_v0, %v2802_v10  ;;  %v2810_v8 = vsel %vm1462_vm6, %v2763_v25, %v2809_v9  ;;  %v2328_v15 = vrot.slane %v2327_v62, 1  ;;  %v2334_v58 = vadd.f32 %v2333_v7, %v2332_v31  ;;  %v2186_v0 = vld [vmem:[%s11774_s26 + $0x64] sm:$0xf]  ;;  %v2187_v25 = vld [vmem:[%s11774_s26 + $0x68] sm:$0xf] }
 0x19a   : > { %v2804_v12 = vsel %vm1464_vm7, %v2756_v21, %v2803_v48  ;;  %v2811_v28 = vsel %vm1464_vm7, %v2764_v52, %v2810_v8  ;;  %v2341_v59 = vadd.f32 %v2340_v20, %v2339_v29  ;;  %v2348_v51 = vadd.f32 %v2347_v61, %v2346_v26  ;;  %v2188_v52 = vld [vmem:[%s11774_s26 + $0x6c] sm:$0xf]  ;;  %v2189_v8 = vld [vmem:[%s11774_s26 + $0x70] sm:$0xf] }
 0x19b   : > { %v2805_v60 = vsel %vm1466_vm8, %v2757_v14, %v2804_v12  ;;  %v2812_v49 = vsel %vm1466_vm8, %v2765_v27, %v2811_v28  ;;  %v11919_v32 = vadd.f32 %v2328_v15, %v2327_v62  ;;  %v2335_v17 = vrot.slane %v2334_v58, 1 }
 0x19c   : > { %v11921_v44 = vpack.c.b16 %v2812_v49, %v2805_v60  ;;  %v2342_v21 = vrot.slane %v2341_v59, 1  ;;  %v2349_v19 = vrot.slane %v2348_v51, 1  ;;  %v2353_v41 = vadd.f32 %v2352_v36, %v11873_v63 }
 0x19d   : > { %v11928_v30 = vadd.f32 %v2335_v17, %v2334_v58  ;;  %v2358_v14 = vsel %vm2210_vm11, %v2182_v45, 0.0  ;;  %v2365_v1 = vsel %vm2210_vm11, %v2183_v50, 0.0  ;;  %v2372_v56 = vsel %vm2210_vm11, %v2184_v38, 0.0 }
 0x19e   : > { %3045 = vmatmul.bf16.vlgmr.msra.gmra.mxu2 %v11921_v44  ;;  %3073 = vmatmul.bf16.vlgmr.msra.gmra.mxu3 %v11921_v44  ;;  %v11937_v27 = vadd.f32 %v2342_v21, %v2341_v59  ;;  %v11939_v6 = vadd.f32 %v2349_v19, %v2348_v51  ;;  %v2354_v16 = vrot.slane %v2353_v41, 2  ;;  %v2359_v63 = vrot.slane %v2358_v14, 4 }
 0x19f   : > { %3017 = vmatmul.bf16.vlgmr.msra.gmra.mxu1 %v11921_v44  ;;  %v2366_v36 = vrot.slane %v2365_v1, 4  ;;  %v2373_v4 = vrot.slane %v2372_v56, 4  ;;  %v2379_v31 = vsel %vm2210_vm11, %v2185_v42, 0.0  ;;  %v2386_v22 = vsel %vm2210_vm11, %v2186_v0, 0.0 }
 0x1a0   : > { %v2355_v54 = vadd.f32 %v2354_v16, %v2353_v41  ;;  %v2360_v29 = vadd.f32 %v2359_v63, %v2358_v14  ;;  %v2380_v26 = vrot.slane %v2379_v31, 4  ;;  %v2387_v24 = vrot.slane %v2386_v22, 4  ;;  %v2190_v41 = vld [vmem:[%s11774_s26 + $0x74] sm:$0xf] }
 0x1a1   : > { %v2367_v3 = vadd.f32 %v2366_v36, %v2365_v1  ;;  %v2374_v62 = vadd.f32 %v2373_v4, %v2372_v56  ;;  %v2393_v7 = vsel %vm2210_vm11, %v2187_v25, 0.0  ;;  %v2400_v10 = vsel %vm2210_vm11, %v2188_v52, 0.0  ;;  %v2191_v52 = vld [vmem:[%s11774_s26 + $0x78] sm:$0xf] }
 0x1a2   : > { %v2356_v9 = vrot.slane %v2355_v54, 1  ;;  %v2361_v20 = vrot.slane %v2360_v29, 2  ;;  %v2381_v61 = vadd.f32 %v2380_v26, %v2379_v31  ;;  %v2388_v48 = vadd.f32 %v2387_v24, %v2386_v22  ;;  %v2192_v31 = vld [vmem:[%s11774_s26 + $0x7c] sm:$0xf] }
 0x1a3   : > { %v2368_v15 = vrot.slane %v2367_v3, 2  ;;  %v2375_v58 = vrot.slane %v2374_v62, 2  ;;  %v2394_v12 = vrot.slane %v2393_v7, 4  ;;  %v2401_v28 = vrot.slane %v2400_v10, 4 }
 0x1a4   : > { %v2357_v45 = vadd.f32 %v2356_v9, %v2355_v54  ;;  %v2362_v50 = vadd.f32 %v2361_v20, %v2360_v29  ;;  %v2382_v38 = vrot.slane %v2381_v61, 2  ;;  %v2389_v59 = vrot.slane %v2388_v48, 2 }
 0x1a5   : > { %v2369_v51 = vadd.f32 %v2368_v15, %v2367_v3  ;;  %v2376_v60 = vadd.f32 %v2375_v58, %v2374_v62  ;;  %v2395_v49 = vadd.f32 %v2394_v12, %v2393_v7  ;;  %v2402_v17 = vadd.f32 %v2401_v28, %v2400_v10 }
 0x1a6   : > { %v2363_v42 = vrot.slane %v2362_v50, 1  ;;  %v2383_v0 = vadd.f32 %v2382_v38, %v2381_v61  ;;  %v2390_v21 = vadd.f32 %v2389_v59, %v2388_v48  ;;  %v2407_v19 = vsel %vm2210_vm11, %v2189_v8, 0.0 }
 0x1a7   : > { %v2370_v14 = vrot.slane %v2369_v51, 1  ;;  %v2377_v1 = vrot.slane %v2376_v60, 1  ;;  %v2396_v56 = vrot.slane %v2395_v49, 2  ;;  %v2403_v25 = vrot.slane %v2402_v17, 2 }
 0x1a8   : > { %v2364_v16 = vadd.f32 %v2363_v42, %v2362_v50  ;;  %v2384_v63 = vrot.slane %v2383_v0, 1  ;;  %v2391_v36 = vrot.slane %v2390_v21, 1  ;;  %v2408_v4 = vrot.slane %v2407_v19, 4 }
 0x1a9   : > { %v2371_v22 = vadd.f32 %v2370_v14, %v2369_v51  ;;  %v2378_v54 = vadd.f32 %v2377_v1, %v2376_v60  ;;  %v2397_v29 = vadd.f32 %v2396_v56, %v2395_v49  ;;  %v2404_v26 = vadd.f32 %v2403_v25, %v2402_v17 }
 0x1aa   : > { %v2385_v24 = vadd.f32 %v2384_v63, %v2383_v0  ;;  %v2392_v3 = vadd.f32 %v2391_v36, %v2390_v21  ;;  %v2409_v62 = vadd.f32 %v2408_v4, %v2407_v19  ;;  %v2414_v7 = vsel %vm2210_vm11, %v2190_v41, 0.0 }
 0x1ab   : > { %v2398_v10 = vrot.slane %v2397_v29, 1  ;;  %v2405_v9 = vrot.slane %v2404_v26, 1  ;;  %v2415_v20 = vrot.slane %v2414_v7, 4  ;;  %v2421_v61 = vsel %vm2210_vm11, %v2191_v52, 0.0 }
 0x1ac   : > { %v2410_v48 = vrot.slane %v2409_v62, 2  ;;  %v2422_v8 = vrot.slane %v2421_v61, 4  ;;  %v2428_v15 = vsel %vm2210_vm11, %v2192_v31, 0.0  ;;  %v2577_v58 = vmul.f32 %v11875_v2, %v11919_v32 }
 0x1ad   : > { %v2399_v12 = vadd.f32 %v2398_v10, %v2397_v29  ;;  %v2406_v28 = vadd.f32 %v2405_v9, %v2404_v26  ;;  %v2416_v50 = vadd.f32 %v2415_v20, %v2414_v7  ;;  %v2429_v38 = vrot.slane %v2428_v15, 4 }
 0x1ae   : > { %v2411_v59 = vadd.f32 %v2410_v48, %v2409_v62  ;;  %v2423_v51 = vadd.f32 %v2422_v8, %v2421_v61  ;;  %v2578_v60 = vmul.f32 %v11875_v2, %v11928_v30  ;;  %v2579_v49 = vmul.f32 %v11875_v2, %v11937_v27 }
 0x1af   : > { %v2417_v17 = vrot.slane %v2416_v50, 2  ;;  %v2430_v42 = vadd.f32 %v2429_v38, %v2428_v15  ;;  %v2580_v0 = vmul.f32 %v11875_v2, %v11939_v6  ;;  %v2581_v21 = vmul.f32 %v11875_v2, %v2357_v45 }
 0x1b0   : > { %v2412_v32 = vrot.slane %v2411_v59, 1  ;;  %v2424_v19 = vrot.slane %v2423_v51, 2  ;;  %v2582_v41 = vmul.f32 %v11875_v2, %v2364_v16  ;;  %v2583_v14 = vmul.f32 %v11875_v2, %v2371_v22 }
 0x1b1   : > { %v2418_v1 = vadd.f32 %v2417_v17, %v2416_v50  ;;  %v2431_v56 = vrot.slane %v2430_v42, 2  ;;  %v2584_v30 = vmul.f32 %v11875_v2, %v2378_v54  ;;  %v2585_v25 = vmul.f32 %v11875_v2, %v2385_v24 }
 0x1b2   : > { %v2413_v27 = vadd.f32 %v2412_v32, %v2411_v59  ;;  %v2425_v52 = vadd.f32 %v2424_v19, %v2423_v51  ;;  %v2586_v63 = vmul.f32 %v11875_v2, %v2392_v3  ;;  %v2587_v6 = vmul.f32 %v11875_v2, %v2399_v12 }
 0x1b3   : > { %v2419_v36 = vrot.slane %v2418_v1, 1  ;;  %v2432_v45 = vadd.f32 %v2431_v56, %v2430_v42  ;;  %v2588_v4 = vmul.f32 %v11875_v2, %v2406_v28  ;;  %v2626_v31 = vpack.c.bf16 %v2577_v58, %v2577_v58 }
 0x1b4   : > { %v2426_v16 = vrot.slane %v2425_v52, 1  ;;  %v2589_v22 = vmul.f32 %v11875_v2, %v2413_v27  ;;  %v2627_v29 = vpack.c.bf16 %v2578_v60, %v2578_v60  ;;  %v2628_v26 = vpack.c.bf16 %v2579_v49, %v2579_v49 }
 0x1b5   : > { %v2420_v62 = vadd.f32 %v2419_v36, %v2418_v1  ;;  %v2433_v54 = vrot.slane %v2432_v45, 1  ;;  %v2629_v7 = vpack.c.bf16 %v2580_v0, %v2580_v0  ;;  %v2630_v24 = vpack.c.bf16 %v2581_v21, %v2581_v21  ;;  %v2194_v1 = vld [vmem:[%s11774_s26 + $0x84] sm:$0xf] }
 0x1b6   : > { %v2427_v10 = vadd.f32 %v2426_v16, %v2425_v52  ;;  %v2631_v9 = vpack.c.bf16 %v2582_v41, %v2582_v41  ;;  %v2632_v20 = vpack.c.bf16 %v2583_v14, %v2583_v14  ;;  %v2633_v3 = vpack.c.bf16 %v2584_v30, %v2584_v30  ;;  %v2193_v14 = vld [vmem:[%s11774_s26 + $0x80] sm:$0xf] }
 0x1b7   : > { %v2434_v61 = vadd.f32 %v2433_v54, %v2432_v45  ;;  %v2590_v48 = vmul.f32 %v11875_v2, %v2420_v62  ;;  %v2634_v8 = vpack.c.bf16 %v2585_v25, %v2585_v25  ;;  %v2635_v15 = vpack.c.bf16 %v2586_v63, %v2586_v63  ;;  %v2195_v45 = vld [vmem:[%s11774_s26 + $0x88] sm:$0xf] }
 0x1b8   : > { %v2591_v58 = vmul.f32 %v11875_v2, %v2427_v10  ;;  %v2636_v12 = vpack.c.bf16 %v2587_v6, %v2587_v6  ;;  %v2637_v28 = vpack.c.bf16 %v2588_v4, %v2588_v4  ;;  %v2638_v50 = vpack.c.bf16 %v2589_v22, %v2589_v22  ;;  %v2196_v4 = vld [vmem:[%s11774_s26 + $0x8c] sm:$0xf] }
 0x1b9   : > { %v2592_v38 = vmul.f32 %v11875_v2, %v2434_v61  ;;  %v2639_v59 = vpack.c.bf16 %v2590_v48, %v2590_v48  ;;  %v2766_v51 = vunpack.c.l.b16 %v2626_v31  ;;  %v2767_v60 = vunpack.c.l.b16 %v2627_v29 }
 0x1ba   : > { %v2640_v49 = vpack.c.bf16 %v2591_v58, %v2591_v58  ;;  %v2768_v17 = vunpack.c.l.b16 %v2628_v26  ;;  %v2769_v42 = vunpack.c.l.b16 %v2629_v7  ;;  %v2770_v0 = vunpack.c.l.b16 %v2630_v24 }
 0x1bb   : > { %v2641_v21 = vpack.c.bf16 %v2592_v38, %v2592_v38  ;;  %v2771_v32 = vunpack.c.l.b16 %v2631_v9  ;;  %v2772_v19 = vunpack.c.l.b16 %v2632_v20  ;;  %v2773_v41 = vunpack.c.l.b16 %v2633_v3 }
 0x1bc   : > { %v2774_v56 = vunpack.c.l.b16 %v2634_v8  ;;  %v2775_v30 = vunpack.c.l.b16 %v2635_v15  ;;  %v2776_v25 = vunpack.c.l.b16 %v2636_v12  ;;  %v2777_v27 = vunpack.c.l.b16 %v2637_v28  ;;  %v2197_v12 = vld [vmem:[%s11774_s26 + $0x90] sm:$0xf] }
 0x1bd   : > { %v2778_v52 = vunpack.c.l.b16 %v2638_v50  ;;  %v2779_v63 = vunpack.c.l.b16 %v2639_v59  ;;  %v2780_v6 = vunpack.c.l.b16 %v2640_v49  ;;  %v2781_v36 = vunpack.c.l.b16 %v2641_v21 }
 0x1be   : > { %v2813_v31 = vsel %vm1454_vm2, %v2767_v60, %v2766_v51  ;;  %v2820_v16 = vsel %vm1454_vm2, %v2775_v30, %v2774_v56  ;;  %v2435_v22 = vsel %vm2210_vm11, %v2193_v14, 0.0  ;;  %v2442_v29 = vsel %vm2210_vm11, %v2194_v1, 0.0  ;;  %v2198_v51 = vld [vmem:[%s11774_s26 + $0x94] sm:$0xf]  ;;  %v2200_v30 = vld [vmem:[%s11774_s26 + $0x9c] sm:$0xf] }
 0x1bf   : > { %v2814_v26 = vsel %vm1456_vm3, %v2768_v17, %v2813_v31  ;;  %v2821_v62 = vsel %vm1456_vm3, %v2776_v25, %v2820_v16  ;;  %v2436_v54 = vrot.slane %v2435_v22, 4  ;;  %v2443_v7 = vrot.slane %v2442_v29, 4  ;;  %v2202_v31 = vld [vmem:[%s11774_s26 + $0xa4] sm:$0xf] }
 0x1c0   : > { %v2815_v24 = vsel %vm1458_vm4, %v2769_v42, %v2814_v26  ;;  %v2822_v10 = vsel %vm1458_vm4, %v2777_v27, %v2821_v62  ;;  %v2449_v9 = vsel %vm2210_vm11, %v2195_v45, 0.0  ;;  %v2456_v20 = vsel %vm2210_vm11, %v2196_v4, 0.0  ;;  %v2201_v4 = vld [vmem:[%s11774_s26 + $0xa0] sm:$0xf] }
 0x1c1   : > { %v2816_v3 = vsel %vm1460_vm5, %v2770_v0, %v2815_v24  ;;  %v2823_v61 = vsel %vm1460_vm5, %v2778_v52, %v2822_v10  ;;  %v2437_v48 = vadd.f32 %v2436_v54, %v2435_v22  ;;  %v2444_v8 = vadd.f32 %v2443_v7, %v2442_v29  ;;  %v2199_v0 = vld [vmem:[%s11774_s26 + $0x98] sm:$0xf]  ;;  %v2203_v7 = vld [vmem:[%s11774_s26 + $0xa8] sm:$0xf] }
 0x1c2   : > { %v2817_v15 = vsel %vm1462_vm6, %v2771_v32, %v2816_v3  ;;  %v2824_v58 = vsel %vm1462_vm6, %v2779_v63, %v2823_v61  ;;  %v2450_v28 = vrot.slane %v2449_v9, 4  ;;  %v2457_v50 = vrot.slane %v2456_v20, 4  ;;  %v2204_v3 = vld [vmem:[%s11774_s26 + $0xac] sm:$0xf] }
 0x1c3   : > { %v2818_v38 = vsel %vm1464_vm7, %v2772_v19, %v2817_v15  ;;  %v2825_v59 = vsel %vm1464_vm7, %v2780_v6, %v2824_v58  ;;  %v2438_v60 = vrot.slane %v2437_v48, 2  ;;  %v2445_v49 = vrot.slane %v2444_v8, 2 }
 0x1c4   : > { %v2819_v17 = vsel %vm1466_vm8, %v2773_v41, %v2818_v38  ;;  %v2826_v42 = vsel %vm1466_vm8, %v2781_v36, %v2825_v59  ;;  %v2451_v21 = vadd.f32 %v2450_v28, %v2449_v9  ;;  %v2458_v32 = vadd.f32 %v2457_v50, %v2456_v20 }
 0x1c5   : > { %v11999_v14 = vpack.c.b16 %v2826_v42, %v2819_v17  ;;  %v2439_v1 = vadd.f32 %v2438_v60, %v2437_v48  ;;  %v2446_v56 = vadd.f32 %v2445_v49, %v2444_v8  ;;  %v2463_v19 = vsel %vm2210_vm11, %v2197_v12, 0.0 }
 0x1c6   : > { %v2452_v25 = vrot.slane %v2451_v21, 2  ;;  %v2459_v27 = vrot.slane %v2458_v32, 2  ;;  %v2464_v52 = vrot.slane %v2463_v19, 4  ;;  %v2470_v63 = vsel %vm2210_vm11, %v2198_v51, 0.0 }
 0x1c7   : > { %3050 = vmatmul.bf16.gmra.mxu2 %v11999_v14  ;;  %3078 = vmatmul.bf16.gmra.mxu3 %v11999_v14  ;;  %v2440_v41 = vrot.slane %v2439_v1, 1  ;;  %v2447_v6 = vrot.slane %v2446_v56, 1  ;;  %v2471_v36 = vrot.slane %v2470_v63, 4  ;;  %v2477_v45 = vsel %vm2210_vm11, %v2199_v0, 0.0 }
 0x1c8   : > { %3022 = vmatmul.bf16.gmra.mxu1 %v11999_v14  ;;  %v2453_v16 = vadd.f32 %v2452_v25, %v2451_v21  ;;  %v2460_v22 = vadd.f32 %v2459_v27, %v2458_v32  ;;  %v2465_v29 = vadd.f32 %v2464_v52, %v2463_v19  ;;  %v2478_v26 = vrot.slane %v2477_v45, 4  ;;  %v2205_v21 = vld [vmem:[%s11774_s26 + $0xb0] sm:$0xf] }
 0x1c9   : > { %v2472_v62 = vadd.f32 %v2471_v36, %v2470_v63  ;;  %v2484_v54 = vsel %vm2210_vm11, %v2200_v30, 0.0  ;;  %v12012_v24 = vadd.f32 %v2440_v41, %v2439_v1  ;;  %v2491_v8 = vsel %vm2210_vm11, %v2201_v4, 0.0  ;;  %v2206_v63 = vld [vmem:[%s11774_s26 + $0xb4] sm:$0xf]  ;;  %v2207_v41 = vld [vmem:[%s11774_s26 + $0xb8] sm:$0xf] }
 0x1ca   : > { %v2454_v10 = vrot.slane %v2453_v16, 1  ;;  %v2466_v9 = vrot.slane %v2465_v29, 2  ;;  %v2479_v20 = vadd.f32 %v2478_v26, %v2477_v45  ;;  %v2485_v48 = vrot.slane %v2484_v54, 4 }
 0x1cb   : > { %v2473_v61 = vrot.slane %v2472_v62, 2  ;;  %v2498_v15 = vsel %vm2210_vm11, %v2202_v31, 0.0  ;;  %v12017_v58 = vadd.f32 %v2447_v6, %v2446_v56  ;;  %v2461_v12 = vrot.slane %v2460_v22, 1 }
 0x1cc   : > { %v2467_v28 = vadd.f32 %v2466_v9, %v2465_v29  ;;  %v2480_v50 = vrot.slane %v2479_v20, 2  ;;  %v2486_v59 = vadd.f32 %v2485_v48, %v2484_v54  ;;  %v2492_v51 = vrot.slane %v2491_v8, 4  ;;  %v2208_v54 = vld [vmem:[%s11774_s26 + $0xbc] sm:$0xf] }
 0x1cd   : > { %v2474_v38 = vadd.f32 %v2473_v61, %v2472_v62  ;;  %v2499_v60 = vrot.slane %v2498_v15, 4  ;;  %v2505_v42 = vsel %vm2210_vm11, %v2203_v7, 0.0  ;;  %v2512_v0 = vsel %vm2210_vm11, %v2204_v3, 0.0  ;;  %v10390_v62 = vld [vmem:[%s15506_s13 + $0x8] sm:$0xff] }
 0x1ce   : > { %v2468_v49 = vrot.slane %v2467_v28, 1  ;;  %v2481_v17 = vadd.f32 %v2480_v50, %v2479_v20  ;;  %v12022_v32 = vadd.f32 %v2454_v10, %v2453_v16  ;;  %v2487_v1 = vrot.slane %v2486_v59, 2  ;;  %2115 = vmatpush.bf16.msra.mxu0 %v10390_v62 }
 0x1cf   : > { %v2493_v56 = vadd.f32 %v2492_v51, %v2491_v8  ;;  %v2500_v19 = vadd.f32 %v2499_v60, %v2498_v15  ;;  %v2462_v30 = vadd.f32 %v2461_v12, %v2460_v22  ;;  %v2475_v25 = vrot.slane %v2474_v38, 1  ;;  %v10389_v8 = vld [vmem:[%s15506_s13] sm:$0xff] }
 0x1d0   : > { %v2506_v27 = vrot.slane %v2505_v42, 4  ;;  %v2513_v52 = vrot.slane %v2512_v0, 4  ;;  %v2469_v6 = vadd.f32 %v2468_v49, %v2467_v28  ;;  %v2488_v36 = vadd.f32 %v2487_v1, %v2486_v59 }
 0x1d1   : > { %v2494_v45 = vrot.slane %v2493_v56, 2  ;;  %v2501_v4 = vrot.slane %v2500_v19, 2  ;;  %v2482_v31 = vrot.slane %v2481_v17, 1  ;;  %v2519_v16 = vsel %vm2210_vm11, %v2205_v21, 0.0 }
 0x1d2   : > { %v2507_v29 = vadd.f32 %v2506_v27, %v2505_v42  ;;  %v2514_v26 = vadd.f32 %v2513_v52, %v2512_v0  ;;  %v2489_v22 = vrot.slane %v2488_v36, 1  ;;  %v2520_v9 = vrot.slane %v2519_v16, 4  ;;  %2116 = vmatpush.bf16.msra.mxu0 %v10389_v8 }
 0x1d3   : > { %v2495_v7 = vadd.f32 %v2494_v45, %v2493_v56  ;;  %v2502_v10 = vadd.f32 %v2501_v4, %v2500_v19  ;;  %v2526_v61 = vsel %vm2210_vm11, %v2206_v63, 0.0  ;;  %v2533_v48 = vsel %vm2210_vm11, %v2207_v41, 0.0 }
 0x1d4   : > { %v2508_v20 = vrot.slane %v2507_v29, 2  ;;  %v2515_v3 = vrot.slane %v2514_v26, 2  ;;  %v2476_v15 = vadd.f32 %v2475_v25, %v2474_v38  ;;  %v2521_v50 = vadd.f32 %v2520_v9, %v2519_v16 }
 0x1d5   : > { %v2496_v12 = vrot.slane %v2495_v7, 1  ;;  %v2503_v28 = vrot.slane %v2502_v10, 1  ;;  %v2527_v60 = vrot.slane %v2526_v61, 4  ;;  %v2534_v49 = vrot.slane %v2533_v48, 4 }
 0x1d6   : > { %v2509_v59 = vadd.f32 %v2508_v20, %v2507_v29  ;;  %v2516_v51 = vadd.f32 %v2515_v3, %v2514_v26  ;;  %v2483_v42 = vadd.f32 %v2482_v31, %v2481_v17  ;;  %v2490_v0 = vadd.f32 %v2489_v22, %v2488_v36 }
 0x1d7   : > { %v2522_v21 = vrot.slane %v2521_v50, 2  ;;  %v2540_v1 = vsel %vm2210_vm11, %v2208_v54, 0.0  ;;  %v2528_v27 = vadd.f32 %v2527_v60, %v2526_v61  ;;  %v2535_v52 = vadd.f32 %v2534_v49, %v2533_v48 }
 0x1d8   : > { %v2510_v56 = vrot.slane %v2509_v59, 1  ;;  %v2517_v19 = vrot.slane %v2516_v51, 1  ;;  %v2497_v63 = vadd.f32 %v2496_v12, %v2495_v7  ;;  %v2504_v41 = vadd.f32 %v2503_v28, %v2502_v10 }
 0x1d9   : > { %v2523_v38 = vadd.f32 %v2522_v21, %v2521_v50  ;;  %v2541_v25 = vrot.slane %v2540_v1, 4  ;;  %v2529_v45 = vrot.slane %v2528_v27, 2  ;;  %v2536_v4 = vrot.slane %v2535_v52, 2 }
 0x1da   : > { %v2593_v29 = vmul.f32 %v11875_v2, %v12012_v24  ;;  %v2594_v17 = vmul.f32 %v11875_v2, %v12017_v58  ;;  %v2511_v36 = vadd.f32 %v2510_v56, %v2509_v59  ;;  %v2518_v31 = vadd.f32 %v2517_v19, %v2516_v51 }
 0x1db   : > { %v2524_v26 = vrot.slane %v2523_v38, 1  ;;  %v2542_v16 = vadd.f32 %v2541_v25, %v2540_v1  ;;  %v2530_v22 = vadd.f32 %v2529_v45, %v2528_v27  ;;  %v2537_v9 = vadd.f32 %v2536_v4, %v2535_v52 }
 0x1dc   : > { %v2595_v7 = vmul.f32 %v11875_v2, %v12022_v32  ;;  %v2596_v10 = vmul.f32 %v11875_v2, %v2462_v30  ;;  %v2597_v24 = vmul.f32 %v11875_v2, %v2469_v6  ;;  %v2598_v61 = vmul.f32 %v11875_v2, %v2476_v15 }
 0x1dd   : > { %v2525_v20 = vadd.f32 %v2524_v26, %v2523_v38  ;;  %v2543_v3 = vrot.slane %v2542_v16, 2  ;;  %v2531_v48 = vrot.slane %v2530_v22, 1  ;;  %v2538_v8 = vrot.slane %v2537_v9, 1 }
 0x1de   : > { %v2599_v12 = vmul.f32 %v11875_v2, %v2483_v42  ;;  %v2600_v50 = vmul.f32 %v11875_v2, %v2490_v0  ;;  %v2601_v59 = vmul.f32 %v11875_v2, %v2497_v63  ;;  %v2602_v32 = vmul.f32 %v11875_v2, %v2504_v41 }
 0x1df   : > { %v2544_v28 = vadd.f32 %v2543_v3, %v2542_v16  ;;  %v2532_v30 = vadd.f32 %v2531_v48, %v2530_v22  ;;  %v2539_v51 = vadd.f32 %v2538_v8, %v2537_v9  ;;  %v2603_v60 = vmul.f32 %v11875_v2, %v2511_v36 }
 0x1e0   : > { %v2604_v6 = vmul.f32 %v11875_v2, %v2518_v31  ;;  %v2605_v49 = vmul.f32 %v11875_v2, %v2525_v20  ;;  %v2642_v21 = vpack.c.bf16 %v2593_v29, %v2593_v29  ;;  %v2643_v1 = vpack.c.bf16 %v2594_v17, %v2594_v17 }
 0x1e1   : > { %v2545_v15 = vrot.slane %v2544_v28, 1  ;;  %v2606_v42 = vmul.f32 %v11875_v2, %v2532_v30  ;;  %v2607_v56 = vmul.f32 %v11875_v2, %v2539_v51  ;;  %v2644_v0 = vpack.c.bf16 %v2595_v7, %v2595_v7  ;;  %v10416_v51 = vld [vmem:[%s15499_s6 + $0xcc] sm:$0xf] }
 0x1e2   : > { %v2645_v19 = vpack.c.bf16 %v2596_v10, %v2596_v10  ;;  %v2646_v52 = vpack.c.bf16 %v2597_v24, %v2597_v24  ;;  %v2647_v63 = vpack.c.bf16 %v2598_v61, %v2598_v61  ;;  %v2648_v41 = vpack.c.bf16 %v2599_v12, %v2599_v12  ;;  %v10420_v24 = vld [vmem:[%s15499_s6 + $0xec] sm:$0xf]  ;;  %v9156_v61 = vld [vmem:[%s15499_s6 + $0xf8] sm:$0xf0] }
 0x1e3   : > { %v2546_v27 = vadd.f32 %v2545_v15, %v2544_v28  ;;  %v2650_v38 = vpack.c.bf16 %v2601_v59, %v2601_v59  ;;  %v2651_v25 = vpack.c.bf16 %v2602_v32, %v2602_v32  ;;  %v2652_v45 = vpack.c.bf16 %v2603_v60, %v2603_v60  ;;  %v9140_v60 = vld [vmem:[%s15499_s6 + $0xd8] sm:$0xf0] }
 0x1e4   : > { %v2044_v62 = vpop.f32.mrf.mxu0  ;;  %v2057_v54 = vpop.f32.mrf.mxu1  ;;  %v2653_v4 = vpack.c.bf16 %v2604_v6, %v2604_v6  ;;  %v2649_v29 = vpack.c.bf16 %v2600_v50, %v2600_v50  ;;  %v2654_v17 = vpack.c.bf16 %v2605_v49, %v2605_v49  ;;  %v2655_v16 = vpack.c.bf16 %v2606_v42, %v2606_v42  ;;  %v2209_v49 = vld [vmem:[%s11774_s26 + $0xc0] sm:$0xf]  ;;  %s13386_s26 = scalar_lea.vmem %s15720_s3, %s10718_s21 }
 0x1e5   : > { %v12046_v58 = vadd.f32 %v2057_v54, %v2044_v62  ;;  %v2608_v26 = vmul.f32 %v11875_v2, %v2546_v27  ;;  %v2656_v62 = vpack.c.bf16 %v2607_v56, %v2607_v56  ;;  %v2782_v54 = vunpack.c.l.b16 %v2642_v21 }
 0x1e6   : > { %v2783_v22 = vunpack.c.l.b16 %v2643_v1  ;;  %v2784_v9 = vunpack.c.l.b16 %v2644_v0  ;;  %v2785_v10 = vunpack.c.l.b16 %v2645_v19  ;;  %v2786_v20 = vunpack.c.l.b16 %v2646_v52 }
 0x1e7   : > { %v2657_v7 = vpack.c.bf16 %v2608_v26, %v2608_v26  ;;  %v2787_v3 = vunpack.c.l.b16 %v2647_v63  ;;  %v2790_v48 = vunpack.c.l.b16 %v2650_v38  ;;  %v2791_v8 = vunpack.c.l.b16 %v2651_v25 }
 0x1e8   : > { %v2792_v12 = vunpack.c.l.b16 %v2652_v45  ;;  %v2793_v28 = vunpack.c.l.b16 %v2653_v4  ;;  %v2788_v50 = vunpack.c.l.b16 %v2648_v41  ;;  %v2789_v59 = vunpack.c.l.b16 %v2649_v29 }
 0x1e9   : > { %v2794_v32 = vunpack.c.l.b16 %v2654_v17  ;;  %v2795_v30 = vunpack.c.l.b16 %v2655_v16  ;;  %v2796_v21 = vunpack.c.l.b16 %v2656_v62  ;;  %v2827_v1 = vsel %vm1454_vm2, %v2783_v22, %v2782_v54 }
 0x1ea   : > { %v2834_v42 = vsel %vm1454_vm2, %v2791_v8, %v2790_v48  ;;  %v9159_v56 = vor.u32 %v10420_v24, %v9156_v61  ;;  %v2797_v0 = vunpack.c.l.b16 %v2657_v7  ;;  %v2828_v19 = vsel %vm1456_vm3, %v2784_v9, %v2827_v1  ;;  %v9108_v48 = vld [vmem:[%s15499_s6 + $0x98] sm:$0xf0] }
 0x1eb   : > { %v2835_v27 = vsel %vm1456_vm3, %v2792_v12, %v2834_v42  ;;  %v2829_v63 = vsel %vm1458_vm4, %v2785_v10, %v2828_v19  ;;  %v9143_v38 = vor.u32 %v10416_v51, %v9140_v60  ;;  %v2547_v25 = vsel %vm2210_vm11, %v2209_v49, 0.0  ;;  %v9076_v49 = vld [vmem:[%s15499_s6 + $0x58] sm:$0xf0] }
 0x1ec   : > { %v2046_v36 = vpop.f32.mrf.mxu0  ;;  %v2059_v31 = vpop.f32.mrf.mxu1  ;;  %v2836_v41 = vsel %vm1458_vm4, %v2793_v28, %v2835_v27  ;;  %3093 = vmatpush.bf16.msrb.mxu0 %v9159_v56  ;;  %v2830_v45 = vsel %vm1460_vm5, %v2786_v20, %v2829_v63  ;;  %v2548_v26 = vrot.slane %v2547_v25, 4  ;;  %v10396_v56 = vld [vmem:[%s15499_s6 + $0x2c] sm:$0xf] }
 0x1ed   : > { %v2837_v4 = vsel %vm1460_vm5, %v2794_v32, %v2836_v41  ;;  %v10412_v31 = vld [vmem:[%s15499_s6 + $0xac] sm:$0xf]  ;;  %v2831_v29 = vsel %vm1462_vm6, %v2787_v3, %v2830_v45 }
 0x1ee   : > { %v2838_v17 = vsel %vm1462_vm6, %v2795_v30, %v2837_v4  ;;  %v2832_v16 = vsel %vm1464_vm7, %v2788_v50, %v2831_v29  ;;  %v2549_v22 = vadd.f32 %v2548_v26, %v2547_v25  ;;  %v10408_v3 = vld [vmem:[%s15499_s6 + $0x8c] sm:$0xf]  ;;  %v9092_v30 = vld [vmem:[%s15499_s6 + $0x78] sm:$0xf0]  ;;  %v10445_v29 = vld [vmem:[%s15507_s14 + $0xb0] sm:$0xff] }
 0x1ef   : > { %v2839_v62 = vsel %vm1464_vm7, %v2796_v21, %v2838_v17  ;;  %v2833_v9 = vsel %vm1466_vm8, %v2789_v59, %v2832_v16  ;;  %v9111_v50 = vor.u32 %v10408_v3, %v9108_v48  ;;  %v10404_v32 = vld [vmem:[%s15499_s6 + $0x6c] sm:$0xf]  ;;  %v10430_v26 = vld [vmem:[%s15507_s14 + $0x38] sm:$0xff] }
 0x1f0   : > { %v2840_v7 = vsel %vm1466_vm8, %v2797_v0, %v2839_v62  ;;  %3094 = vmatpush.bf16.msrb.mxu0 %v9143_v38  ;;  %v2550_v61 = vrot.slane %v2549_v22, 2  ;;  %v9095_v60 = vor.u32 %v10404_v32, %v9092_v30  ;;  %v10392_v27 = vld [vmem:[%s15499_s6 + $0xc] sm:$0xf]  ;;  %3437 = vmatpush.bf16.msrb.mxu1 %v10430_v26  ;;  %v10434_v3 = vld [vmem:[%s15507_s14 + $0x58] sm:$0xff]  ;;  %v10427_v32 = vld [vmem:[%s15507_s14 + $0x20] sm:$0xff] }
 0x1f1   : > { %v2070_v6 = vpop.f32.mrf.mxu2  ;;  %v2083_v15 = vpop.f32.mrf.mxu3  ;;  %v2843_v20 = vpack.c.b16 %v2840_v7, %v2833_v9  ;;  %v10436_v17 = vld [vmem:[%s15507_s14 + $0x68] sm:$0xff]  ;;  %v10435_v7 = vld [vmem:[%s15507_s14 + $0x60] sm:$0xff]  ;;  %v10442_v30 = vld [vmem:[%s15507_s14 + $0x98] sm:$0xff] }
 0x1f2   : > { %v2071_v52 = vadd.f32 %v2070_v6, %v12046_v58  ;;  %v9124_v58 = vld [vmem:[%s15499_s6 + $0xb8] sm:$0xf0]  ;;  %v2551_v28 = vadd.f32 %v2550_v61, %v2549_v22  ;;  %v10444_v22 = vld [vmem:[%s15507_s14 + $0xa8] sm:$0xff]  ;;  %v10443_v61 = vld [vmem:[%s15507_s14 + $0xa0] sm:$0xff] }
 0x1f3   : > { %v9127_v10 = vor.u32 %v10412_v31, %v9124_v58  ;;  %3055 = vmatmul.bf16.gmra.mxu2 %v2843_v20  ;;  %3083 = vmatmul.bf16.gmra.mxu3 %v2843_v20  ;;  %v10438_v31 = vld [vmem:[%s15507_s14 + $0x78] sm:$0xff] }
 0x1f4   : > { %v2084_v36 = vadd.f32 %v2083_v15, %v2071_v52  ;;  %3027 = vmatmul.bf16.gmra.mxu1 %v2843_v20  ;;  %v2552_v59 = vrot.slane %v2551_v28, 1  ;;  %v10400_v15 = vld [vmem:[%s15499_s6 + $0x4c] sm:$0xf]  ;;  %v9044_v52 = vld [vmem:[%s15499_s6 + $0x18] sm:$0xf0]  ;;  %3450 = vmatpush.bf16.msrb.mxu2 %v10438_v31 }
 0x1f5   : > { %3095 = vmatpush.bf16.msrb.mxu0 %v9127_v10  ;;  %v9079_v1 = vor.u32 %v10400_v15, %v9076_v49  ;;  %v9047_v63 = vor.u32 %v10392_v27, %v9044_v52  ;;  %v12157_v10 = vld [vmem:[%s15500_s7] sm:$0xf]  ;;  %v10432_v27 = vld [vmem:[%s15507_s14 + $0x48] sm:$0xff] }
 0x1f6   : > { %v2087_v54 = vmax.f32 %v2084_v36, 0.0  ;;  %v2553_v51 = vadd.f32 %v2552_v59, %v2551_v28  ;;  %v12172_v48 = vperm.slane %v12157_v10, 1  ;;  %v10440_v31 = vld [vmem:[%s15507_s14 + $0x88] sm:$0xff] }
 0x1f8   : > { %v2088_v24 = vpack.c.bf16 %v2087_v54, %v2087_v54  ;;  %v2609_v6 = vmul.f32 %v11875_v2, %v2553_v51  ;;  %v9060_v2 = vld [vmem:[%s15499_s6 + $0x38] sm:$0xf0]  ;;  %v10429_v54 = vld [vmem:[%s15507_s14 + $0x30] sm:$0xff] }
 0x1f9   : > { %v2072_v8 = vpop.f32.mrf.mxu2  ;;  %v2085_v12 = vpop.f32.mrf.mxu3  ;;  %3096 = vmatpush.bf16.msrb.mxu0 %v9111_v50  ;;  %v9063_v19 = vor.u32 %v10396_v56, %v9060_v2  ;;  %3438 = vmatpush.bf16.msrb.mxu1 %v10429_v54  ;;  %v10433_v51 = vld [vmem:[%s15507_s14 + $0x50] sm:$0xff]  ;;  %v10426_v56 = vld [vmem:[%s15507_s14 + $0x18] sm:$0xff] }
 0x1fa   : > { %9031 = vmatmul.msk.bf16.vlgmr.msra.gmra.mxu0 %vm2105_vm13, %v2088_v24  ;;  %v2658_v21 = vpack.c.bf16 %v2609_v6, %v2609_v6  ;;  %v10428_v24 = vld [vmem:[%s15507_s14 + $0x28] sm:$0xff]  ;;  %v12175_v8 = vperm.slane %v12157_v10, 2  ;;  %v10441_v2 = vld [vmem:[%s15507_s14 + $0x90] sm:$0xff] }
 0x1fc   : > { %v2798_v42 = vunpack.c.l.b16 %v2658_v21 }
 0x1fd   : > { %3097 = vmatpush.bf16.msrb.mxu0 %v9095_v60  ;;  %3439 = vmatpush.bf16.msrb.mxu1 %v10428_v24 }
 0x1fe   : > { %v2844_v0 = vpack.c.b16 %v2798_v42, %v2798_v42 }
 0x201   : > { %3098 = vmatpush.bf16.msrb.mxu0 %v9079_v1  ;;  %3440 = vmatpush.bf16.msrb.mxu1 %v10427_v32 }
 0x203   : > { %3060 = vmatmul.bf16.gmra.mxu2 %v2844_v0  ;;  %3088 = vmatmul.bf16.gmra.mxu3 %v2844_v0 }
 0x204   : > { %3032 = vmatmul.bf16.gmra.mxu1 %v2844_v0 }
 0x205   : > { %3099 = vmatpush.bf16.msrb.mxu0 %v9063_v19  ;;  %3441 = vmatpush.bf16.msrb.mxu1 %v10426_v56 }
 0x209   : > { %3100 = vmatpush.bf16.msrb.mxu0 %v9047_v63 }
 0x20c   : > { %3101 = vmatmul.bf16.vlgmr.msrb.gmra.mxu0 %v11921_v44  ;;  %v10446_v44 = vld [vmem:[%s15507_s14 + $0xb8] sm:$0xff] }
 0x20d   : > { %3463 = vmatpush.bf16.msrb.mxu3 %v10446_v44 }
 0x211   : > { %3464 = vmatpush.bf16.msrb.mxu3 %v10445_v29  ;;  %v10424_v29 = vld [vmem:[%s15507_s14 + $0x8] sm:$0xff] }
 0x215   : > { %3465 = vmatpush.bf16.msrb.mxu3 %v10444_v22 }
 0x219   : > { %3466 = vmatpush.bf16.msrb.mxu3 %v10443_v61 }
 0x21c   : > { %3106 = vmatmul.bf16.gmra.mxu0 %v11999_v14  ;;  %v3018_v41 = vpop.f32.mrf.mxu1  ;;  %v10437_v14 = vld [vmem:[%s15507_s14 + $0x70] sm:$0xff] }
 0x21d   : > { %3451 = vmatpush.bf16.msrb.mxu2 %v10437_v14  ;;  %3467 = vmatpush.bf16.msrb.mxu3 %v10442_v30  ;;  %v10431_v14 = vld [vmem:[%s15507_s14 + $0x40] sm:$0xff]  ;;  %v10453_v30 = vld [vmem:[%s15507_s14 + $0xf0] sm:$0xff] }
 0x221   : > { %v3046_v38 = vpop.f32.mrf.mxu2  ;;  %v3074_v25 = vpop.f32.mrf.mxu3  ;;  %3452 = vmatpush.bf16.msrb.mxu2 %v10436_v17  ;;  %3468 = vmatpush.bf16.msrb.mxu3 %v10441_v2  ;;  %v10439_v17 = vld [vmem:[%s15507_s14 + $0x80] sm:$0xff] }
 0x222   : > { %v12193_v60 = vadd.f32 %v3046_v38, %v12172_v48  ;;  %v12196_v6 = vadd.f32 %v3074_v25, %v12175_v8 }
 0x224   : > { %v3020_v45 = vpop.f32.mrf.mxu1  ;;  %15665 = vst [vmem:[#allocation32_spill] sm:$0xff] %v12193_v60 }
 0x225   : > { %3453 = vmatpush.bf16.msrb.mxu2 %v10435_v7  ;;  %15666 = vst [vmem:[#allocation33_spill] sm:$0xff] %v12196_v6  ;;  %3469 = vmatpush.bf16.msrb.mxu3 %v10440_v31 }
 0x229   : > { %v3048_v4 = vpop.f32.mrf.mxu2  ;;  %v3076_v36 = vpop.f32.mrf.mxu3  ;;  %3454 = vmatpush.bf16.msrb.mxu2 %v10434_v3  ;;  %3470 = vmatpush.bf16.msrb.mxu3 %v10439_v17 }
 0x22a   : > { %v12199_v15 = vadd.f32 %v3048_v4, %v12172_v48  ;;  %v12202_v49 = vadd.f32 %v3076_v36, %v12175_v8  ;;  %v10425_v36 = vld [vmem:[%s15507_s14 + $0x10] sm:$0xff] }
 0x22b   : > { %3442 = vmatpush.bf16.msrb.mxu1 %v10425_v36 }
 0x22c   : > { %3111 = vmatmul.bf16.gmra.mxu0 %v2843_v20  ;;  %v12160_v20 = vperm.slane %v12157_v10, 0  ;;  %15667 = vst [vmem:[#allocation34_spill] sm:$0xff] %v12199_v15  ;;  %v3134_v52 = vadd.f32 %v12199_v15, %v12193_v60  ;;  %v3147_v63 = vadd.f32 %v12202_v49, %v12196_v6 }
 0x22d   : > { %15668 = vst [vmem:[#allocation35_spill] sm:$0xff] %v12202_v49  ;;  %3455 = vmatpush.bf16.msrb.mxu2 %v10433_v51 }
 0x22e   : > { %v12178_v50 = vadd.f32 %v3018_v41, %v12160_v20  ;;  %v12181_v59 = vadd.f32 %v3020_v45, %v12160_v20 }
 0x22f   : > { %3443 = vmatpush.bf16.msrb.mxu1 %v10424_v29 }
 0x230   : > { %15663 = vst [vmem:[#allocation30_spill] sm:$0xff] %v12178_v50  ;;  %v3121_v21 = vadd.f32 %v12181_v59, %v12178_v50 }
 0x231   : > { %15664 = vst [vmem:[#allocation31_spill] sm:$0xff] %v12181_v59  ;;  %3456 = vmatpush.bf16.msrb.mxu2 %v10432_v27 }
 0x235   : > { %3457 = vmatpush.bf16.msrb.mxu2 %v10431_v14  ;;  %v10451_v14 = vld [vmem:[%s15507_s14 + $0xe0] sm:$0xff] }
 0x23c   : > { %3116 = vmatmul.bf16.gmra.mxu0 %v2844_v0 }
 0x245   : > { %v3023_v58 = vpop.f32.mrf.mxu1 }
 0x246   : > { %v12207_v1 = vadd.f32 %v3023_v58, %v12160_v20 }
 0x248   : > { %15669 = vst [vmem:[#allocation36_spill] sm:$0xff] %v12207_v1  ;;  %v3122_v25 = vadd.f32 %v3121_v21, %v12207_v1 }
 0x24a   : > { %v3051_v16 = vpop.f32.mrf.mxu2  ;;  %v3079_v62 = vpop.f32.mrf.mxu3 }
 0x24b   : > { %v12223_v41 = vadd.f32 %v3051_v16, %v12172_v48  ;;  %v12226_v38 = vadd.f32 %v3079_v62, %v12175_v8  ;;  %v10454_v16 = vld [vmem:[%s15507_s14 + $0xf8] sm:$0xff] }
 0x24c   : > { %3476 = vmatpush.bf16.msra.mxu0 %v10454_v16 }
 0x24d   : > { %v3025_v9 = vpop.f32.mrf.mxu1  ;;  %15670 = vst [vmem:[#allocation37_spill] sm:$0xff] %v12223_v41  ;;  %v3135_v62 = vadd.f32 %v3134_v52, %v12223_v41  ;;  %v3148_v54 = vadd.f32 %v3147_v63, %v12226_v38 }
 0x24e   : > { %15671 = vst [vmem:[#allocation38_spill] sm:$0xff] %v12226_v38  ;;  %v12230_v45 = vadd.f32 %v3025_v9, %v12160_v20 }
 0x250   : > { %15672 = vst [vmem:[#allocation39_spill] sm:$0xff] %v12230_v45  ;;  %v3123_v7 = vadd.f32 %v3122_v25, %v12230_v45  ;;  %3477 = vmatpush.bf16.msra.mxu0 %v10453_v30 }
 0x252   : > { %v3053_v12 = vpop.f32.mrf.mxu2  ;;  %v3081_v28 = vpop.f32.mrf.mxu3 }
 0x253   : > { %v12253_v22 = vadd.f32 %v3053_v12, %v12172_v48  ;;  %v12256_v9 = vadd.f32 %v3081_v28, %v12175_v8  ;;  %v10423_v28 = vld [vmem:[%s15507_s14] sm:$0xff] }
 0x254   : > { %3444 = vmatpush.bf16.msrb.mxu1 %v10423_v28 }
 0x255   : > { %15673 = vst [vmem:[#allocation40_spill] sm:$0xff] %v12253_v22  ;;  %v3136_v32 = vadd.f32 %v3135_v62, %v12253_v22  ;;  %v3149_v12 = vadd.f32 %v3148_v54, %v12256_v9 }
 0x256   : > { %15674 = vst [vmem:[#allocation41_spill] sm:$0xff] %v12256_v9 }
 0x271   : > { %v3028_v42 = vpop.f32.mrf.mxu1 }
 0x272   : > { %v12260_v24 = vadd.f32 %v3028_v42, %v12160_v20 }
 0x274   : > { %15675 = vst [vmem:[#allocation42_spill] sm:$0xff] %v12260_v24  ;;  %v3124_v42 = vadd.f32 %v3123_v7, %v12260_v24 }
 0x276   : > { %v3056_v58 = vpop.f32.mrf.mxu2  ;;  %v3084_v44 = vpop.f32.mrf.mxu3 }
 0x277   : > { %v2118_v0 = vpop.f32.mrf.mxu0  ;;  %v12271_v51 = vadd.f32 %v3056_v58, %v12172_v48  ;;  %v12274_v21 = vadd.f32 %v3084_v44, %v12175_v8 }
 0x278   : > { %v2122_v19 = vmax.f32 %v2118_v0, 0.0 }
 0x279   : > { %v3030_v61 = vpop.f32.mrf.mxu1  ;;  %15676 = vst [vmem:[#allocation43_spill] sm:$0xff] %v12271_v51  ;;  %v3137_v63 = vadd.f32 %v3136_v32, %v12271_v51  ;;  %v3150_v25 = vadd.f32 %v3149_v12, %v12274_v21  ;;  %v10491_v51 = vld [vmem:[%s15501_s8 + $0x10c] sm:$0xf0] }
 0x27a   : > { %v2123_v4 = vsub.f32 0.0, %v2122_v19  ;;  %15677 = vst [vmem:[#allocation44_spill] sm:$0xff] %v12274_v21  ;;  %v12278_v56 = vadd.f32 %v3030_v61, %v12160_v20  ;;  %v10452_v19 = vld [vmem:[%s15507_s14 + $0xe8] sm:$0xff]  ;;  %v9427_v21 = vld [vmem:[%s15501_s8 + $0x100] sm:$0xf] }
 0x27b   : > { %3478 = vmatpush.bf16.msra.mxu0 %v10452_v19  ;;  %v9428_v22 = vor.u32 %v10491_v51, %v9427_v21 }
 0x27c   : > { %v2124_v26 = vmul.f32 1.442695, %v2123_v4  ;;  %15678 = vst [vmem:[#allocation45_spill] sm:$0xff] %v12278_v56  ;;  %v3125_v4 = vadd.f32 %v3124_v42, %v12278_v56 }
 0x27e   : > { %10746 = vpow2.f32 %v2124_v26  ;;  %v3058_v2 = vpop.f32.mrf.mxu2  ;;  %v3086_v0 = vpop.f32.mrf.mxu3 }
 0x27f   : > { %v2120_v3 = vpop.f32.mrf.mxu0  ;;  %v12287_v31 = vadd.f32 %v3058_v2, %v12172_v48  ;;  %v12290_v58 = vadd.f32 %v3086_v0, %v12175_v8  ;;  %3479 = vmatpush.bf16.msra.mxu0 %v10451_v14 }
 0x281   : > { %v3033_v36 = vpop.f32.mrf.mxu1  ;;  %15679 = vst [vmem:[#allocation46_spill] sm:$0xff] %v12287_v31  ;;  %v3138_v17 = vadd.f32 %v3137_v63, %v12287_v31  ;;  %v3151_v16 = vadd.f32 %v3150_v25, %v12290_v58 }
 0x282   : > { %15680 = vst [vmem:[#allocation47_spill] sm:$0xff] %v12290_v58  ;;  %v12293_v44 = vadd.f32 %v3033_v36, %v12160_v20 }
 0x284   : > { %v10747_v27 = vpop.eup %10746  ;;  %15681 = vst [vmem:[#allocation48_spill] sm:$0xff] %v12293_v44  ;;  %v3126_v26 = vsel %vm1716_vm9, %v12293_v44, 0.0 }
 0x285   : > { %v2126_v52 = vadd.f32 1.0, %v10747_v27  ;;  %v3127_v29 = vadd.f32 %v3126_v26, %v3125_v4 }
 0x286   : > { %v3061_v62 = vpop.f32.mrf.mxu2  ;;  %v3089_v54 = vpop.f32.mrf.mxu3 }
 0x287   : > { %10748 = vrcp.f32 %v2126_v52  ;;  %v12303_v20 = vadd.f32 %v3061_v62, %v12172_v48  ;;  %v12306_v7 = vadd.f32 %v3089_v54, %v12175_v8  ;;  %v3128_v61 = vrot.slane %v3127_v29, 4  ;;  %v10450_v48 = vld [vmem:[%s15507_s14 + $0xd8] sm:$0xff] }
 0x288   : > { %3480 = vmatpush.bf16.msra.mxu0 %v10450_v48 }
 0x289   : > { %15682 = vst [vmem:[#allocation49_spill] sm:$0xff] %v12303_v20  ;;  %v3102_v32 = vpop.f32.mrf.mxu0  ;;  %v3139_v12 = vsel %vm1716_vm9, %v12303_v20, 0.0  ;;  %v3152_v28 = vsel %vm1716_vm9, %v12306_v7, 0.0  ;;  %v3129_v30 = vadd.f32 %v3128_v61, %v3127_v29  ;;  %v3035_v42 = vpop.f32.mrf.mxu1 }
 0x28a   : > { %15683 = vst [vmem:[#allocation50_spill] sm:$0xff] %v12306_v7  ;;  %v3140_v2 = vadd.f32 %v3139_v12, %v3138_v17  ;;  %v3153_v0 = vadd.f32 %v3152_v28, %v3151_v16  ;;  %v10449_v12 = vld [vmem:[%s15507_s14 + $0xd0] sm:$0xff]  ;;  %v12480_v7 = vld [vmem:[%s12409_s25 + $0x1c] sm:$0x3] }
 0x28b   : > { %v3130_v27 = vrot.slane %v3129_v30, 2  ;;  %v3765_v21 = vperm.slane %v12480_v7, 0 }
 0x28c   : > { %v3141_v8 = vrot.slane %v3140_v2, 4  ;;  %v3154_v52 = vrot.slane %v3153_v0, 4  ;;  %3481 = vmatpush.bf16.msra.mxu0 %v10449_v12 }
 0x28d   : > { %v10749_v3 = vpop.eup %10748  ;;  %v3131_v63 = vadd.f32 %v3130_v27, %v3129_v30 }
 0x28e   : > { %v2128_v19 = vadd.f32 1.0, %v10749_v3  ;;  %v3142_v25 = vadd.f32 %v3141_v8, %v3140_v2  ;;  %v3155_v4 = vadd.f32 %v3154_v52, %v3153_v0  ;;  %v3063_v36 = vpop.f32.mrf.mxu2  ;;  %v3091_v14 = vpop.f32.mrf.mxu3 }
 0x28f   : > { %v3132_v26 = vrot.slane %v3131_v63, 1  ;;  %v10447_v36 = vld [vmem:[%s15507_s14 + $0xc0] sm:$0xff]  ;;  %v2696_v14 = vperm.slane %v12157_v10, 3  ;;  %v10519_v10 = vld [vmem:[%s15501_s8 + $0x1ec] sm:$0xf0] }
 0x290   : > { %10721 = vpush %v2128_v19  ;;  %v3143_v29 = vrot.slane %v3142_v25, 2  ;;  %v3156_v62 = vrot.slane %v3155_v4, 2 }
 0x291   : > { %v3104_v17 = vpop.f32.mrf.mxu0  ;;  %v3133_v16 = vadd.f32 %v3132_v26, %v3131_v63 }
 0x292   : > { %v3144_v54 = vadd.f32 %v3143_v29, %v3142_v25  ;;  %v3157_v61 = vadd.f32 %v3156_v62, %v3155_v4  ;;  %v10448_v4 = vld [vmem:[%s15507_s14 + $0xc8] sm:$0xff]  ;;  %v12328_v26 = vadd.f32 %v3104_v17, %v2696_v14  ;;  %v9411_v29 = vld [vmem:[%s15501_s8 + $0xe0] sm:$0xf]  ;;  %v10487_v62 = vld [vmem:[%s15501_s8 + $0xec] sm:$0xf0] }
 0x293   : > { %v3173_v3 = vmul.f32 %v3133_v16, %v11767_v13  ;;  %3482 = vmatpush.bf16.msra.mxu0 %v10448_v4  ;;  %v9539_v16 = vld [vmem:[%s15501_s8 + $0x1e0] sm:$0xf]  ;;  %v10511_v4 = vld [vmem:[%s15501_s8 + $0x1ac] sm:$0xf0] }
 0x294   : > { %v3145_v28 = vrot.slane %v3144_v54, 1  ;;  %v3158_v30 = vrot.slane %v3157_v61, 1  ;;  %15684 = vst [vmem:[#allocation51_spill] sm:$0xff] %v12328_v26  ;;  %v9395_v17 = vld [vmem:[%s15501_s8 + $0xc0] sm:$0xf] }
 0x295   : > { %v3177_v42 = vpack.c.bf16 %v3173_v3, %v3173_v3  ;;  %v12348_v3 = vadd.f32 %v3102_v32, %v2696_v14 }
 0x296   : > { %v3146_v2 = vadd.f32 %v3145_v28, %v3144_v54  ;;  %v3159_v0 = vadd.f32 %v3158_v30, %v3157_v61  ;;  %v9412_v54 = vor.u32 %v10487_v62, %v9411_v29  ;;  %v10483_v61 = vld [vmem:[%s15501_s8 + $0xcc] sm:$0xf0]  ;;  %v9540_v30 = vor.u32 %v10519_v10, %v9539_v16  ;;  %v9363_v10 = vld [vmem:[%s15501_s8 + $0x80] sm:$0xf] }
 0x297   : > { %3445 = vmatmul.bf16.vlgmr.msrb.gmra.mxu1 %v3177_v42  ;;  %3483 = vmatpush.bf16.msra.mxu0 %v10447_v36  ;;  %15685 = vst [vmem:[#allocation52_spill] sm:$0xff] %v12348_v3  ;;  %v9523_v42 = vld [vmem:[%s15501_s8 + $0x1c0] sm:$0xf] }
 0x298   : > { %v3174_v19 = vmul.f32 %v3146_v2, %v11767_v13  ;;  %v3175_v27 = vmul.f32 %v3159_v0, %v11767_v13  ;;  %v10515_v2 = vld [vmem:[%s15501_s8 + $0x1cc] sm:$0xf0]  ;;  %4805 = vmatpush.bf16.msra.mxu2 %v9412_v54  ;;  %v9396_v0 = vor.u32 %v10483_v61, %v9395_v17  ;;  %4833 = vmatpush.bf16.msra.mxu3 %v9540_v30 }
 0x299   : > { %v3107_v48 = vpop.f32.mrf.mxu0  ;;  %v9524_v32 = vor.u32 %v10515_v2, %v9523_v42  ;;  %v10475_v17 = vld [vmem:[%s15501_s8 + $0x8c] sm:$0xf0] }
 0x29a   : > { %v3178_v8 = vpack.c.bf16 %v3174_v19, %v3174_v19  ;;  %v3179_v52 = vpack.c.bf16 %v3175_v27, %v3175_v27  ;;  %v12350_v12 = vadd.f32 %v3107_v48, %v2696_v14  ;;  %v3160_v19 = vadd.f32 %v12328_v26, %v12348_v3  ;;  %v9379_v48 = vld [vmem:[%s15501_s8 + $0xa0] sm:$0xf]  ;;  %v10507_v61 = vld [vmem:[%s15501_s8 + $0x18c] sm:$0xf0] }
 0x29b   : > { %v9364_v2 = vor.u32 %v10475_v17, %v9363_v10  ;;  %v10471_v17 = vld [vmem:[%s15501_s8 + $0x6c] sm:$0xf0]  ;;  %v3961_v3 = vpack.c.bf16 %v3765_v21, %v3765_v21 }
 0x29c   : > { %3458 = vmatmul.bf16.vlgmr.msrb.gmra.mxu2 %v3178_v8  ;;  %3471 = vmatmul.bf16.vlgmr.msrb.gmra.mxu3 %v3179_v52  ;;  %15686 = vst [vmem:[#allocation53_spill] sm:$0xff] %v12350_v12  ;;  %v10479_v8 = vld [vmem:[%s15501_s8 + $0xac] sm:$0xf0]  ;;  %v9507_v52 = vld [vmem:[%s15501_s8 + $0x1a0] sm:$0xf] }
 0x29d   : > { %4806 = vmatpush.bf16.msra.mxu2 %v9396_v0  ;;  %v9380_v29 = vor.u32 %v10479_v8, %v9379_v48  ;;  %4834 = vmatpush.bf16.msra.mxu3 %v9524_v32  ;;  %v9508_v54 = vor.u32 %v10511_v4, %v9507_v52 }
 0x2a1   : > { %v3109_v63 = vpop.f32.mrf.mxu0  ;;  %4807 = vmatpush.bf16.msra.mxu2 %v9380_v29  ;;  %4835 = vmatpush.bf16.msra.mxu3 %v9508_v54  ;;  %v9347_v54 = vld [vmem:[%s15501_s8 + $0x60] sm:$0xf] }
 0x2a2   : > { %v12360_v27 = vadd.f32 %v3109_v63, %v2696_v14  ;;  %v3161_v63 = vadd.f32 %v3160_v19, %v12350_v12 }
 0x2a4   : > { %15687 = vst [vmem:[#allocation54_spill] sm:$0xff] %v12360_v27  ;;  %v3162_v62 = vadd.f32 %v3161_v63, %v12360_v27 }
 0x2a5   : > { %4808 = vmatpush.bf16.msra.mxu2 %v9364_v2 }
 0x2a9   : > { %v3112_v25 = vpop.f32.mrf.mxu0 }
 0x2aa   : > { %v12375_v36 = vadd.f32 %v3112_v25, %v2696_v14  ;;  %v9491_v25 = vld [vmem:[%s15501_s8 + $0x180] sm:$0xf] }
 0x2ab   : > { %v9492_v19 = vor.u32 %v10507_v61, %v9491_v25  ;;  %v9348_v25 = vor.u32 %v10471_v17, %v9347_v54  ;;  %v9475_v61 = vld [vmem:[%s15501_s8 + $0x160] sm:$0xf]  ;;  %v10463_v17 = vld [vmem:[%s15501_s8 + $0x2c] sm:$0xf0] }
 0x2ac   : > { %15688 = vst [vmem:[#allocation55_spill] sm:$0xff] %v12375_v36  ;;  %v9315_v54 = vld [vmem:[%s15501_s8 + $0x20] sm:$0xf] }
 0x2ad   : > { %4836 = vmatpush.bf16.msra.mxu3 %v9492_v19  ;;  %4809 = vmatpush.bf16.msra.mxu2 %v9348_v25  ;;  %v10467_v19 = vld [vmem:[%s15501_s8 + $0x4c] sm:$0xf0]  ;;  %v12457_v25 = vld [vmem:[%s12409_s25 + $0xe] sm:$0x3] }
 0x2b1   : > { %v3114_v28 = vpop.f32.mrf.mxu0 }
 0x2b2   : > { %v12378_v16 = vadd.f32 %v3114_v28, %v2696_v14  ;;  %v3163_v28 = vadd.f32 %v3162_v62, %v12375_v36  ;;  %v10459_v36 = vld [vmem:[%s15501_s8 + $0xc] sm:$0xf0] }
 0x2b4   : > { %15689 = vst [vmem:[#allocation56_spill] sm:$0xff] %v12378_v16  ;;  %v3164_v0 = vadd.f32 %v3163_v28, %v12378_v16  ;;  %v10503_v28 = vld [vmem:[%s15501_s8 + $0x16c] sm:$0xf0] }
 0x2b5   : > { %v9476_v2 = vor.u32 %v10503_v28, %v9475_v61  ;;  %v12460_v61 = vld [vmem:[%s12409_s25 + $0x10] sm:$0x3]  ;;  %v12463_v28 = vld [vmem:[%s12409_s25 + $0x12] sm:$0x3] }
 0x2b6   : > { %v3753_v45 = vperm.slane %v12460_v61, 0  ;;  %v3755_v12 = vperm.slane %v12463_v28, 0 }
 0x2b7   : > { %4837 = vmatpush.bf16.msra.mxu3 %v9476_v2  ;;  %v12466_v2 = vld [vmem:[%s12409_s25 + $0x14] sm:$0x3] }
 0x2b8   : > { %v3757_v38 = vperm.slane %v12466_v2, 0  ;;  %v3949_v41 = vpack.c.bf16 %v3753_v45, %v3753_v45  ;;  %v3951_v1 = vpack.c.bf16 %v3755_v12, %v3755_v12 }
 0x2b9   : > { %v3117_v30 = vpop.f32.mrf.mxu0 }
 0x2ba   : > { %v12393_v42 = vadd.f32 %v3117_v30, %v2696_v14  ;;  %v3953_v26 = vpack.c.bf16 %v3757_v38, %v3757_v38 }
 0x2bc   : > { %15690 = vst [vmem:[#allocation57_spill] sm:$0xff] %v12393_v42  ;;  %v3165_v32 = vsel %vm1716_vm9, %v12393_v42, 0.0  ;;  %v12477_v42 = vld [vmem:[%s12409_s25 + $0x1a] sm:$0x3]  ;;  %v4223_v45 = vunpack.c.l.b16 %v3953_v26 }
 0x2bd   : > { %v3166_v48 = vadd.f32 %v3165_v32, %v3164_v0  ;;  %v9331_v0 = vld [vmem:[%s15501_s8 + $0x40] sm:$0xf]  ;;  %v3763_v51 = vperm.slane %v12477_v42, 0 }
 0x2be   : > { %v12424_v32 = vld [vmem:[%s12409_s25 + $0x2] sm:$0x3] }
 0x2bf   : > { %v3167_v8 = vrot.slane %v3166_v48, 4  ;;  %v3959_v59 = vpack.c.bf16 %v3763_v51, %v3763_v51  ;;  %v3740_v26 = vperm.slane %v12424_v32, 1 }
 0x2c1   : > { %v3168_v52 = vadd.f32 %v3167_v8, %v3166_v48  ;;  %v3119_v4 = vpop.f32.mrf.mxu0  ;;  %v9332_v48 = vor.u32 %v10467_v19, %v9331_v0  ;;  %v9459_v8 = vld [vmem:[%s15501_s8 + $0x140] sm:$0xf]  ;;  %v3739_v19 = vperm.slane %v12424_v32, 0 }
 0x2c2   : > { %v12433_v4 = vld [vmem:[%s12409_s25] sm:$0x3] }
 0x2c3   : > { %v3169_v63 = vrot.slane %v3168_v52, 2  ;;  %4810 = vmatpush.bf16.msra.mxu2 %v9332_v48  ;;  %v3737_v0 = vperm.slane %v12433_v4, 0  ;;  %v9316_v48 = vor.u32 %v10463_v17, %v9315_v54  ;;  %v10495_v54 = vld [vmem:[%s15501_s8 + $0x12c] sm:$0xf0]  ;;  %v9299_v17 = vld [vmem:[%s15501_s8] sm:$0xf]  ;;  %v3935_v31 = vpack.c.bf16 %v3739_v19, %v3739_v19 }
 0x2c4   : > { %v12506_v19 = vld [vmem:[%s12409_s25 + $0x1e] sm:$0x3] }
 0x2c5   : > { %v3170_v62 = vadd.f32 %v3169_v63, %v3168_v52  ;;  %v10499_v52 = vld [vmem:[%s15501_s8 + $0x14c] sm:$0xf0]  ;;  %v12494_v58 = vpack.c.bf16 %v3737_v0, %v3737_v0  ;;  %v9300_v0 = vor.u32 %v10459_v36, %v9299_v17  ;;  %v3767_v36 = vperm.slane %v12506_v19, 0 }
 0x2c6   : > { %v9460_v63 = vor.u32 %v10499_v52, %v9459_v8  ;;  %v12471_v8 = vld [vmem:[%s12409_s25 + $0x16] sm:$0x3]  ;;  %v12474_v52 = vld [vmem:[%s12409_s25 + $0x18] sm:$0x3]  ;;  %v4205_v50 = vunpack.c.l.b16 %v3935_v31 }
 0x2c7   : > { %v3171_v14 = vrot.slane %v3170_v62, 1  ;;  %4811 = vmatpush.bf16.msra.mxu2 %v9316_v48  ;;  %v3963_v6 = vpack.c.bf16 %v3767_v36, %v3767_v36  ;;  %v4203_v60 = vunpack.c.l.b16 %v12494_v58 }
 0x2c8   : > { %4838 = vmatpush.bf16.msra.mxu3 %v9460_v63  ;;  %v9443_v63 = vld [vmem:[%s15501_s8 + $0x120] sm:$0xf]  ;;  %v4301_v51 = vrot.slane %v4205_v50, 7 }
 0x2c9   : > { %v3172_v30 = vadd.f32 %v3171_v14, %v3170_v62  ;;  %v12436_v62 = vld [vmem:[%s12409_s25 + $0x4] sm:$0x3]  ;;  %v12439_v14 = vld [vmem:[%s12409_s25 + $0x6] sm:$0x3]  ;;  %v9444_v56 = vor.u32 %v10495_v54, %v9443_v63  ;;  %v3751_v54 = vperm.slane %v12457_v25, 0 }
 0x2ca   : > { %v3741_v20 = vperm.slane %v12436_v62, 0  ;;  %v3743_v44 = vperm.slane %v12439_v14, 0 }
 0x2cb   : > { %v3176_v29 = vmul.f32 %v3172_v30, %v11767_v13  ;;  %v12442_v30 = vld [vmem:[%s12409_s25 + $0x8] sm:$0x3]  ;;  %4812 = vmatpush.bf16.msra.mxu2 %v9300_v0  ;;  %v3947_v17 = vpack.c.bf16 %v3751_v54, %v3751_v54  ;;  %v4221_v54 = vunpack.c.l.b16 %v3951_v1 }
 0x2cc   : > { %v3745_v16 = vperm.slane %v12442_v30, 0  ;;  %v3937_v24 = vpack.c.bf16 %v3741_v20, %v3741_v20  ;;  %v3939_v27 = vpack.c.bf16 %v3743_v44, %v3743_v44  ;;  %4839 = vmatpush.bf16.msra.mxu3 %v9444_v56  ;;  %v3759_v44 = vperm.slane %v12471_v8, 0 }
 0x2cd   : > { %v3180_v10 = vpack.c.bf16 %v3176_v29, %v3176_v29  ;;  %v12445_v29 = vld [vmem:[%s12409_s25 + $0xa] sm:$0x3]  ;;  %v3761_v20 = vperm.slane %v12474_v52, 0 }
 0x2ce   : > { %v3941_v9 = vpack.c.bf16 %v3745_v16, %v3745_v16  ;;  %v3747_v48 = vperm.slane %v12445_v29, 0  ;;  %v3955_v49 = vpack.c.bf16 %v3759_v44, %v3759_v44  ;;  %v4207_v57 = vunpack.c.l.b16 %v3937_v24 }
 0x2cf   : > { %3484 = vmatmul.bf16.vlgmr.msra.gmra.mxu0 %v3180_v10  ;;  %v12448_v10 = vld [vmem:[%s12409_s25 + $0xc] sm:$0x3]  ;;  %v3957_v15 = vpack.c.bf16 %v3761_v20, %v3761_v20  ;;  %v4209_v55 = vunpack.c.l.b16 %v3939_v27  ;;  %v4229_v44 = vunpack.c.l.b16 %v3959_v59  ;;  %v4233_v20 = vunpack.c.l.b16 %v3963_v6 }
 0x2d0   : > { %v3749_v63 = vperm.slane %v12448_v10, 0  ;;  %v3943_v56 = vpack.c.bf16 %v3747_v48, %v3747_v48  ;;  %4840 = vmatpush.bf16.msra.mxu3 %v9428_v22  ;;  %v4211_v0 = vunpack.c.l.b16 %v3941_v9  ;;  %v4217_v48 = vunpack.c.l.b16 %v3947_v17 }
 0x2d1   : > { %v4225_v12 = vunpack.c.l.b16 %v3955_v49  ;;  %v4227_v38 = vunpack.c.l.b16 %v3957_v15  ;;  %v4231_v22 = vunpack.c.l.b16 %v3961_v3  ;;  %v4303_v21 = vrot.slane %v4207_v57, 6 }
 0x2d2   : > { %v3945_v16 = vpack.c.bf16 %v3749_v63, %v3749_v63  ;;  %v4213_v53 = vunpack.c.l.b16 %v3943_v56  ;;  %v4219_v63 = vunpack.c.l.b16 %v3949_v41  ;;  %v4305_v36 = vrot.slane %v4209_v55, 5 }
 0x2d3   : > { %v4307_v34 = vrot.slane %v4211_v0, 4  ;;  %v4313_v27 = vrot.slane %v4217_v48, 1  ;;  %v4329_v9 = vrot.slane %v4221_v54, 7  ;;  %v4302_v56 = vsel %vm1454_vm2, %v4301_v51, %v4203_v60 }
 0x2d4   : > { %v4215_v46 = vunpack.c.l.b16 %v3945_v16  ;;  %v4309_v31 = vrot.slane %v4213_v53, 3  ;;  %v4331_v16 = vrot.slane %v4223_v45, 6  ;;  %v4333_v41 = vrot.slane %v4225_v12, 5 }
 0x2d5   : > { %v4335_v1 = vrot.slane %v4227_v38, 4  ;;  %v4304_v49 = vsel %vm1456_vm3, %v4303_v21, %v4302_v56  ;;  %v4330_v59 = vsel %vm1454_vm2, %v4329_v9, %v4219_v63  ;;  %v4337_v15 = vrot.slane %v4229_v44, 3 }
 0x2d6   : > { %v4311_v24 = vrot.slane %v4215_v46, 2  ;;  %v4339_v6 = vrot.slane %v4231_v22, 2  ;;  %v4306_v57 = vsel %vm1458_vm4, %v4305_v36, %v4304_v49  ;;  %v4332_v55 = vsel %vm1456_vm3, %v4331_v16, %v4330_v59 }
 0x2d7   : > { %v4341_v50 = vrot.slane %v4233_v20, 1  ;;  %v3738_v46 = vperm.slane %v12433_v4, 1  ;;  %v4308_v53 = vsel %vm1460_vm5, %v4307_v34, %v4306_v57  ;;  %v4334_v60 = vsel %vm1458_vm4, %v4333_v41, %v4332_v55 }
 0x2d8   : > { %v3742_v3 = vperm.slane %v12436_v62, 1  ;;  %v4310_v17 = vsel %vm1462_vm6, %v4309_v31, %v4308_v53  ;;  %v4336_v0 = vsel %vm1460_vm5, %v4335_v1, %v4334_v60  ;;  %v3744_v48 = vperm.slane %v12439_v14, 1 }
 0x2d9   : > { %v3746_v63 = vperm.slane %v12442_v30, 1  ;;  %v4312_v54 = vsel %vm1464_vm7, %v4311_v24, %v4310_v17  ;;  %v4338_v4 = vsel %vm1462_vm6, %v4337_v15, %v4336_v0  ;;  %v3748_v34 = vperm.slane %v12445_v29, 1 }
 0x2da   : > { %v3750_v45 = vperm.slane %v12448_v10, 1  ;;  %v4314_v32 = vsel %vm1466_vm8, %v4313_v27, %v4312_v54  ;;  %v4340_v62 = vsel %vm1464_vm7, %v4339_v6, %v4338_v4  ;;  %v3752_v12 = vperm.slane %v12457_v25, 1 }
 0x2db   : > { %v3754_v38 = vperm.slane %v12460_v61, 1  ;;  %v4342_v14 = vsel %vm1466_vm8, %v4341_v50, %v4340_v62  ;;  %v3756_v30 = vperm.slane %v12463_v28, 1  ;;  %v3758_v22 = vperm.slane %v12466_v2, 1 }
 0x2dc   : > { %v3760_v20 = vperm.slane %v12471_v8, 1  ;;  %v12546_v29 = vpack.c.b16 %v4342_v14, %v4314_v32  ;;  %v3762_v10 = vperm.slane %v12474_v52, 1  ;;  %v3764_v51 = vperm.slane %v12477_v42, 1  ;;  %v12556_v14 = vld [vmem:[%s12409_s25 + $0x22] sm:$0x3] }
 0x2dd   : > { %v3766_v21 = vperm.slane %v12480_v7, 1  ;;  %v3768_v25 = vperm.slane %v12506_v19, 1  ;;  %v3934_v61 = vpack.c.bf16 %v3738_v46, %v3738_v46  ;;  %v3936_v36 = vpack.c.bf16 %v3740_v26, %v3740_v26 }
 0x2de   : > { %v3938_v31 = vpack.c.bf16 %v3742_v3, %v3742_v3  ;;  %4813 = vmatmul.bf16.vlgmr.msra.gmra.mxu2 %v12546_v29  ;;  %v3940_v28 = vpack.c.bf16 %v3744_v48, %v3744_v48  ;;  %v3942_v2 = vpack.c.bf16 %v3746_v63, %v3746_v63  ;;  %v3944_v8 = vpack.c.bf16 %v3748_v34, %v3748_v34 }
 0x2df   : > { %v3946_v9 = vpack.c.bf16 %v3750_v45, %v3750_v45  ;;  %v3948_v16 = vpack.c.bf16 %v3752_v12, %v3752_v12  ;;  %v3950_v52 = vpack.c.bf16 %v3754_v38, %v3754_v38  ;;  %v3952_v41 = vpack.c.bf16 %v3756_v30, %v3756_v30  ;;  %v12559_v30 = vld [vmem:[%s12409_s25 + $0x24] sm:$0x3] }
 0x2e0   : > { %v3954_v42 = vpack.c.bf16 %v3758_v22, %v3758_v22  ;;  %v3956_v1 = vpack.c.bf16 %v3760_v20, %v3760_v20  ;;  %v3958_v7 = vpack.c.bf16 %v3762_v10, %v3762_v10  ;;  %v3960_v49 = vpack.c.bf16 %v3764_v51, %v3764_v51 }
 0x2e1   : > { %v3962_v59 = vpack.c.bf16 %v3766_v21, %v3766_v21  ;;  %v3964_v15 = vpack.c.bf16 %v3768_v25, %v3768_v25  ;;  %v4204_v6 = vunpack.c.l.b16 %v3934_v61  ;;  %v4206_v57 = vunpack.c.l.b16 %v3936_v36  ;;  %v12563_v21 = vld [vmem:[%s12409_s25 + $0x20] sm:$0x3] }
 0x2e2   : > { %v4208_v55 = vunpack.c.l.b16 %v3938_v31  ;;  %v4210_v50 = vunpack.c.l.b16 %v3940_v28  ;;  %v4212_v46 = vunpack.c.l.b16 %v3942_v2  ;;  %v4214_v53 = vunpack.c.l.b16 %v3944_v8 }
 0x2e3   : > { %v4216_v60 = vunpack.c.l.b16 %v3946_v9  ;;  %v4218_v26 = vunpack.c.l.b16 %v3948_v16  ;;  %v4222_v3 = vunpack.c.l.b16 %v3952_v41  ;;  %v4224_v17 = vunpack.c.l.b16 %v3954_v42  ;;  %v12572_v9 = vld [vmem:[%s12409_s25 + $0x28] sm:$0x3]  ;;  %v12578_v16 = vld [vmem:[%s12409_s25 + $0x32] sm:$0x3] }
 0x2e4   : > { %v4226_v0 = vunpack.c.l.b16 %v3956_v1  ;;  %v4228_v48 = vunpack.c.l.b16 %v3958_v7  ;;  %v4230_v63 = vunpack.c.l.b16 %v3960_v49  ;;  %v4232_v54 = vunpack.c.l.b16 %v3962_v59  ;;  %v12583_v1 = vld [vmem:[%s12409_s25 + $0x2a] sm:$0x3]  ;;  %v12586_v7 = vld [vmem:[%s12409_s25 + $0x2c] sm:$0x3]  ;;  %v12589_v49 = vld [vmem:[%s12409_s25 + $0x34] sm:$0x3] }
 0x2e5   : > { %v4234_v4 = vunpack.c.l.b16 %v3964_v15  ;;  %v4315_v34 = vrot.slane %v4206_v57, 7  ;;  %v4317_v62 = vrot.slane %v4208_v55, 6  ;;  %v4319_v12 = vrot.slane %v4210_v50, 5  ;;  %v12595_v57 = vld [vmem:[%s12409_s25 + $0x2e] sm:$0x3] }
 0x2e6   : > { %v4321_v38 = vrot.slane %v4212_v46, 4  ;;  %v4325_v20 = vrot.slane %v4216_v60, 2  ;;  %v4327_v10 = vrot.slane %v4218_v26, 1  ;;  %v4343_v51 = vrot.slane %v4222_v3, 7  ;;  %v12598_v55 = vld [vmem:[%s12409_s25 + $0x36] sm:$0x3] }
 0x2e7   : > { %v4316_v22 = vsel %vm1454_vm2, %v4315_v34, %v4204_v6  ;;  %v4345_v61 = vrot.slane %v4224_v17, 6  ;;  %v4347_v36 = vrot.slane %v4226_v0, 5  ;;  %v4349_v31 = vrot.slane %v4228_v48, 4  ;;  %v12605_v26 = vld [vmem:[%s12409_s25 + $0x38] sm:$0x3] }
 0x2e8   : > { %v4318_v25 = vsel %vm1456_vm3, %v4317_v62, %v4316_v22  ;;  %v4351_v2 = vrot.slane %v4230_v63, 3  ;;  %v4353_v8 = vrot.slane %v4232_v54, 2  ;;  %v4355_v42 = vrot.slane %v4234_v4, 1  ;;  %v12615_v63 = vld [vmem:[%s12409_s25 + $0x3c] sm:$0x3] }
 0x2e9   : > { %v3769_v59 = vperm.slane %v12563_v21, 0  ;;  %v3771_v50 = vperm.slane %v12556_v14, 0  ;;  %v3773_v46 = vperm.slane %v12559_v30, 0  ;;  %v3777_v17 = vperm.slane %v12572_v9, 0  ;;  %v12618_v54 = vld [vmem:[%s12409_s25 + $0x3e] sm:$0x3] }
 0x2ea   : > { %v3779_v4 = vperm.slane %v12583_v1, 0  ;;  %v3781_v34 = vperm.slane %v12586_v7, 0  ;;  %v3791_v22 = vperm.slane %v12598_v55, 0 }
 0x314   : > { %v3446_v58 = vpop.f32.mrf.mxu1 }
 0x31c   : > { %v3448_v44 = vpop.f32.mrf.mxu1 }
 0x31d   : > { %v4323_v44 = vrot.slane %v4214_v53, 3 }
 0x31f   : > { %v3459_v24 = vpop.f32.mrf.mxu2  ;;  %v3472_v27 = vpop.f32.mrf.mxu3 }
 0x320   : > { %v3460_v56 = vadd.f32 %v3459_v24, %v3446_v58  ;;  %v4220_v58 = vunpack.c.l.b16 %v3950_v52  ;;  %v12567_v24 = vld [vmem:[%s12409_s25 + $0x26] sm:$0x3] }
 0x321   : > { %v3775_v3 = vperm.slane %v12567_v24, 0 }
 0x322   : > { %v12553_v19 = vadd.f32 %v3472_v27, %v3460_v56  ;;  %v4320_v27 = vsel %vm1458_vm4, %v4319_v12, %v4318_v25  ;;  %v4344_v28 = vsel %vm1454_vm2, %v4343_v51, %v4220_v58  ;;  %v12575_v56 = vld [vmem:[%s12409_s25 + $0x30] sm:$0x3]  ;;  %v12608_v58 = vld [vmem:[%s12409_s25 + $0x3a] sm:$0x3]  ;;  %v3787_v12 = vperm.slane %v12578_v16, 0 }
 0x323   : > { %v4322_v52 = vsel %vm1460_vm5, %v4321_v38, %v4320_v27  ;;  %v4346_v41 = vsel %vm1456_vm3, %v4345_v61, %v4344_v28  ;;  %v3785_v62 = vperm.slane %v12575_v56, 0  ;;  %v3795_v51 = vperm.slane %v12608_v58, 0 }
 0x324   : > { %v4324_v15 = vsel %vm1462_vm6, %v4323_v44, %v4322_v52  ;;  %v4348_v6 = vsel %vm1458_vm4, %v4347_v36, %v4346_v41  ;;  %v3789_v44 = vperm.slane %v12589_v49, 0  ;;  %v3797_v25 = vperm.slane %v12615_v63, 0 }
 0x325   : > { %v4326_v53 = vsel %vm1464_vm7, %v4325_v20, %v4324_v15  ;;  %v4350_v60 = vsel %vm1460_vm5, %v4349_v31, %v4348_v6  ;;  %v3793_v20 = vperm.slane %v12605_v26, 0  ;;  %v3799_v61 = vperm.slane %v12618_v54, 0 }
 0x326   : > { %v4328_v0 = vsel %vm1466_vm8, %v4327_v10, %v4326_v53  ;;  %v4352_v48 = vsel %vm1462_vm6, %v4351_v2, %v4350_v60  ;;  %v3965_v36 = vpack.c.bf16 %v3769_v59, %v3769_v59  ;;  %v3967_v31 = vpack.c.bf16 %v3771_v50, %v3771_v50 }
 0x327   : > { %v3461_v45 = vpop.f32.mrf.mxu2  ;;  %v3474_v32 = vpop.f32.mrf.mxu3  ;;  %v3969_v27 = vpack.c.bf16 %v3773_v46, %v3773_v46  ;;  %v3971_v28 = vpack.c.bf16 %v3775_v3, %v3775_v3  ;;  %v3973_v2 = vpack.c.bf16 %v3777_v17, %v3777_v17  ;;  %v3977_v52 = vpack.c.bf16 %v3781_v34, %v3781_v34 }
 0x328   : > { %v4354_v45 = vsel %vm1464_vm7, %v4353_v8, %v4352_v48  ;;  %v3783_v32 = vperm.slane %v12595_v57, 0  ;;  %v3975_v8 = vpack.c.bf16 %v3779_v4, %v3779_v4  ;;  %v3983_v15 = vpack.c.bf16 %v3787_v12, %v3787_v12 }
 0x329   : > { %v4356_v38 = vsel %vm1466_vm8, %v4355_v42, %v4354_v45  ;;  %v3981_v42 = vpack.c.bf16 %v3785_v62, %v3785_v62  ;;  %v3985_v6 = vpack.c.bf16 %v3789_v44, %v3789_v44  ;;  %v3987_v53 = vpack.c.bf16 %v3791_v22, %v3791_v22 }
 0x32a   : > { %v12630_v10 = vpack.c.b16 %v4356_v38, %v4328_v0  ;;  %v3979_v41 = vpack.c.bf16 %v3783_v32, %v3783_v32  ;;  %v3989_v60 = vpack.c.bf16 %v3793_v20, %v3793_v20  ;;  %v3991_v0 = vpack.c.bf16 %v3795_v51, %v3795_v51 }
 0x32b   : > { %v3993_v48 = vpack.c.bf16 %v3797_v25, %v3797_v25  ;;  %v3995_v45 = vpack.c.bf16 %v3799_v61, %v3799_v61  ;;  %v4235_v38 = vunpack.c.l.b16 %v3965_v36  ;;  %v4237_v43 = vunpack.c.l.b16 %v3967_v31 }
 0x32c   : > { %4841 = vmatmul.bf16.vlgmr.msra.gmra.mxu3 %v12630_v10  ;;  %v4239_v59 = vunpack.c.l.b16 %v3969_v27  ;;  %v4241_v50 = vunpack.c.l.b16 %v3971_v28  ;;  %v4243_v46 = vunpack.c.l.b16 %v3973_v2  ;;  %v4245_v3 = vunpack.c.l.b16 %v3975_v8 }
 0x32d   : > { %v4247_v11 = vunpack.c.l.b16 %v3977_v52  ;;  %v4249_v37 = vunpack.c.l.b16 %v3979_v41  ;;  %v4251_v17 = vunpack.c.l.b16 %v3981_v42  ;;  %v4253_v4 = vunpack.c.l.b16 %v3983_v15  ;;  %v10456_v42 = vld [vmem:[%s15508_s15 + $0x8] sm:$0xff] }
 0x32e   : > { %v4255_v34 = vunpack.c.l.b16 %v3985_v6  ;;  %v4257_v32 = vunpack.c.l.b16 %v3987_v53  ;;  %v4259_v62 = vunpack.c.l.b16 %v3989_v60  ;;  %v4261_v12 = vunpack.c.l.b16 %v3991_v0  ;;  %3516 = vmatpush.bf16.msra.mxu1 %v10456_v42 }
 0x32f   : > { %v4263_v44 = vunpack.c.l.b16 %v3993_v48  ;;  %v4265_v22 = vunpack.c.l.b16 %v3995_v45  ;;  %v4357_v20 = vrot.slane %v4237_v43, 7  ;;  %v4359_v51 = vrot.slane %v4239_v59, 6  ;;  %v10455_v48 = vld [vmem:[%s15508_s15] sm:$0xff] }
 0x330   : > { %v4361_v25 = vrot.slane %v4241_v50, 5  ;;  %v4363_v61 = vrot.slane %v4243_v46, 4  ;;  %v4365_v36 = vrot.slane %v4245_v3, 3  ;;  %v4367_v31 = vrot.slane %v4247_v11, 2 }
 0x331   : > { %v4369_v27 = vrot.slane %v4249_v37, 1  ;;  %v4385_v28 = vrot.slane %v4253_v4, 7  ;;  %v4358_v2 = vsel %vm1454_vm2, %v4357_v20, %v4235_v38  ;;  %v4387_v8 = vrot.slane %v4255_v34, 6 }
 0x332   : > { %v4389_v52 = vrot.slane %v4257_v32, 5  ;;  %v4391_v41 = vrot.slane %v4259_v62, 4  ;;  %v4360_v15 = vsel %vm1456_vm3, %v4359_v51, %v4358_v2  ;;  %v4393_v6 = vrot.slane %v4261_v12, 3  ;;  %3517 = vmatpush.bf16.msra.mxu1 %v10455_v48 }
 0x333   : > { %v4386_v43 = vsel %vm1454_vm2, %v4385_v28, %v4251_v17  ;;  %v4395_v53 = vrot.slane %v4263_v44, 2  ;;  %v4362_v60 = vsel %vm1458_vm4, %v4361_v25, %v4360_v15  ;;  %v4397_v11 = vrot.slane %v4265_v22, 1 }
 0x334   : > { %v4388_v37 = vsel %vm1456_vm3, %v4387_v8, %v4386_v43  ;;  %v3770_v0 = vperm.slane %v12563_v21, 1  ;;  %v4364_v45 = vsel %vm1460_vm5, %v4363_v61, %v4362_v60  ;;  %v3772_v59 = vperm.slane %v12556_v14, 1 }
 0x335   : > { %v4390_v38 = vsel %vm1458_vm4, %v4389_v52, %v4388_v37  ;;  %v3774_v50 = vperm.slane %v12559_v30, 1  ;;  %v4366_v46 = vsel %vm1462_vm6, %v4365_v36, %v4364_v45  ;;  %v3776_v17 = vperm.slane %v12567_v24, 1 }
 0x336   : > { %v4392_v3 = vsel %vm1460_vm5, %v4391_v41, %v4390_v38  ;;  %v3778_v21 = vperm.slane %v12572_v9, 1  ;;  %v4368_v4 = vsel %vm1464_vm7, %v4367_v31, %v4366_v46  ;;  %v3780_v32 = vperm.slane %v12583_v1, 1  ;;  %v10485_v46 = vld [vmem:[%s15501_s8 + $0xe4] sm:$0xf] }
 0x337   : > { %v4394_v34 = vsel %vm1462_vm6, %v4393_v6, %v4392_v3  ;;  %v3782_v62 = vperm.slane %v12586_v7, 1  ;;  %v4370_v14 = vsel %vm1466_vm8, %v4369_v27, %v4368_v4  ;;  %v3784_v12 = vperm.slane %v12595_v57, 1  ;;  %v9413_v3 = vld [vmem:[%s15501_s8 + $0xf0] sm:$0xf0] }
 0x338   : > { %v4396_v30 = vsel %vm1464_vm7, %v4395_v53, %v4394_v34  ;;  %v3786_v44 = vperm.slane %v12575_v56, 1  ;;  %v3788_v9 = vperm.slane %v12578_v16, 1  ;;  %v3790_v22 = vperm.slane %v12589_v49, 1 }
 0x339   : > { %v4398_v24 = vsel %vm1466_vm8, %v4397_v11, %v4396_v30  ;;  %v3792_v20 = vperm.slane %v12598_v55, 1  ;;  %v3794_v7 = vperm.slane %v12605_v26, 1  ;;  %v3796_v51 = vperm.slane %v12608_v58, 1 }
 0x33a   : > { %v12668_v1 = vpack.c.b16 %v4398_v24, %v4370_v14  ;;  %v3798_v25 = vperm.slane %v12615_v63, 1  ;;  %v3800_v57 = vperm.slane %v12618_v54, 1  ;;  %v3966_v56 = vpack.c.bf16 %v3770_v0, %v3770_v0  ;;  %v12690_v24 = vld [vmem:[%s15501_s8 + $0xa4] sm:$0xf] }
 0x33b   : > { %v3968_v61 = vpack.c.bf16 %v3772_v59, %v3772_v59  ;;  %v3970_v36 = vpack.c.bf16 %v3774_v50, %v3774_v50  ;;  %v3972_v16 = vpack.c.bf16 %v3776_v17, %v3776_v17  ;;  %v3974_v31 = vpack.c.bf16 %v3778_v21, %v3778_v21 }
 0x33c   : > { %4818 = vmatmul.bf16.gmra.mxu2 %v12668_v1  ;;  %v3976_v49 = vpack.c.bf16 %v3780_v32, %v3780_v32  ;;  %v3978_v27 = vpack.c.bf16 %v3782_v62, %v3782_v62  ;;  %v3980_v55 = vpack.c.bf16 %v3784_v12, %v3784_v12  ;;  %v3982_v28 = vpack.c.bf16 %v3786_v44, %v3786_v44  ;;  %v10481_v32 = vld [vmem:[%s15501_s8 + $0xc4] sm:$0xf]  ;;  %v9397_v62 = vld [vmem:[%s15501_s8 + $0xd0] sm:$0xf0] }
 0x33d   : > { %v3984_v2 = vpack.c.bf16 %v3788_v9, %v3788_v9  ;;  %v3986_v8 = vpack.c.bf16 %v3790_v22, %v3790_v22  ;;  %v3988_v26 = vpack.c.bf16 %v3792_v20, %v3792_v20  ;;  %v3990_v52 = vpack.c.bf16 %v3794_v7, %v3794_v7  ;;  %v12693_v9 = vld [vmem:[%s12409_s25 + $0x42] sm:$0x3] }
 0x33e   : > { %v3992_v58 = vpack.c.bf16 %v3796_v51, %v3796_v51  ;;  %v3994_v41 = vpack.c.bf16 %v3798_v25, %v3798_v25  ;;  %v3996_v63 = vpack.c.bf16 %v3800_v57, %v3800_v57  ;;  %v4236_v42 = vunpack.c.l.b16 %v3966_v56  ;;  %v12699_v25 = vld [vmem:[%s15501_s8 + $0xb0] sm:$0xf0] }
 0x33f   : > { %v4238_v54 = vunpack.c.l.b16 %v3968_v61  ;;  %v4240_v15 = vunpack.c.l.b16 %v3970_v36  ;;  %v4242_v43 = vunpack.c.l.b16 %v3972_v16  ;;  %v4244_v6 = vunpack.c.l.b16 %v3974_v31  ;;  %v12703_v16 = vld [vmem:[%s12409_s25 + $0x40] sm:$0x3] }
 0x340   : > { %v4246_v53 = vunpack.c.l.b16 %v3976_v49  ;;  %v4248_v60 = vunpack.c.l.b16 %v3978_v27  ;;  %v4250_v37 = vunpack.c.l.b16 %v3980_v55  ;;  %v4252_v11 = vunpack.c.l.b16 %v3982_v28  ;;  %v12708_v28 = vld [vmem:[%s12409_s25 + $0x44] sm:$0x3] }
 0x341   : > { %v4254_v0 = vunpack.c.l.b16 %v3984_v2  ;;  %v4256_v48 = vunpack.c.l.b16 %v3986_v8  ;;  %v4258_v45 = vunpack.c.l.b16 %v3988_v26  ;;  %v4260_v38 = vunpack.c.l.b16 %v3990_v52  ;;  %v12711_v2 = vld [vmem:[%s12409_s25 + $0x46] sm:$0x3] }
 0x342   : > { %v4262_v59 = vunpack.c.l.b16 %v3992_v58  ;;  %v4264_v50 = vunpack.c.l.b16 %v3994_v41  ;;  %v4266_v17 = vunpack.c.l.b16 %v3996_v63  ;;  %v4371_v21 = vrot.slane %v4238_v54, 7  ;;  %v12718_v41 = vld [vmem:[%s12409_s25 + $0x48] sm:$0x3]  ;;  %v12721_v63 = vld [vmem:[%s12409_s25 + $0x4a] sm:$0x3] }
 0x343   : > { %v4373_v4 = vrot.slane %v4240_v15, 6  ;;  %v4375_v34 = vrot.slane %v4242_v43, 5  ;;  %v4377_v14 = vrot.slane %v4244_v6, 4  ;;  %v4379_v30 = vrot.slane %v4246_v53, 3  ;;  %v12727_v54 = vld [vmem:[%s12409_s25 + $0x52] sm:$0x3] }
 0x344   : > { %v4381_v12 = vrot.slane %v4248_v60, 2  ;;  %v4383_v44 = vrot.slane %v4250_v37, 1  ;;  %v4372_v22 = vsel %vm1454_vm2, %v4371_v21, %v4236_v42  ;;  %v4399_v20 = vrot.slane %v4254_v0, 7  ;;  %v12724_v42 = vld [vmem:[%s12409_s25 + $0x50] sm:$0x3] }
 0x345   : > { %v4401_v7 = vrot.slane %v4256_v48, 6  ;;  %v4403_v51 = vrot.slane %v4258_v45, 5  ;;  %v4374_v57 = vsel %vm1456_vm3, %v4373_v4, %v4372_v22  ;;  %v4405_v56 = vrot.slane %v4260_v38, 4  ;;  %v12730_v15 = vld [vmem:[%s12409_s25 + $0x54] sm:$0x3] }
 0x346   : > { %v4407_v61 = vrot.slane %v4262_v59, 3  ;;  %v4409_v36 = vrot.slane %v4264_v50, 2  ;;  %v4376_v31 = vsel %vm1458_vm4, %v4375_v34, %v4374_v57  ;;  %v4400_v49 = vsel %vm1454_vm2, %v4399_v20, %v4252_v11  ;;  %v12735_v53 = vld [vmem:[%s12409_s25 + $0x4c] sm:$0x3]  ;;  %v12738_v60 = vld [vmem:[%s12409_s25 + $0x4e] sm:$0x3] }
 0x347   : > { %v4411_v27 = vrot.slane %v4266_v17, 1  ;;  %v9416_v55 = vor.u32 %v10485_v46, %v9413_v3  ;;  %v4378_v8 = vsel %vm1460_vm5, %v4377_v14, %v4376_v31  ;;  %v4402_v26 = vsel %vm1456_vm3, %v4401_v7, %v4400_v49  ;;  %v12745_v45 = vld [vmem:[%s12409_s25 + $0x56] sm:$0x3]  ;;  %v12748_v38 = vld [vmem:[%s12409_s25 + $0x58] sm:$0x3] }
 0x348   : > { %v9400_v52 = vor.u32 %v10481_v32, %v9397_v62  ;;  %v9384_v58 = vor.u32 %v12690_v24, %v12699_v25  ;;  %v4380_v43 = vsel %vm1462_vm6, %v4379_v30, %v4378_v8  ;;  %v4404_v6 = vsel %vm1458_vm4, %v4403_v51, %v4402_v26  ;;  %v12755_v17 = vld [vmem:[%s12409_s25 + $0x5a] sm:$0x3]  ;;  %v12758_v21 = vld [vmem:[%s12409_s25 + $0x5c] sm:$0x3]  ;;  %v12764_v62 = vld [vmem:[%s12409_s25 + $0x5e] sm:$0x3] }
 0x349   : > { %4861 = vmatpush.bf16.msrb.mxu0 %v9416_v55  ;;  %v3801_v37 = vperm.slane %v12703_v16, 0  ;;  %v3803_v11 = vperm.slane %v12693_v9, 0  ;;  %v4382_v0 = vsel %vm1464_vm7, %v4381_v12, %v4380_v43  ;;  %v4406_v48 = vsel %vm1460_vm5, %v4405_v56, %v4404_v6 }
 0x34a   : > { %v3805_v59 = vperm.slane %v12708_v28, 0  ;;  %v3807_v50 = vperm.slane %v12711_v2, 0  ;;  %v4384_v46 = vsel %vm1466_vm8, %v4383_v44, %v4382_v0  ;;  %v4408_v3 = vsel %vm1462_vm6, %v4407_v61, %v4406_v48 }
 0x34b   : > { %v3809_v4 = vperm.slane %v12718_v41, 0  ;;  %v3811_v34 = vperm.slane %v12721_v63, 0  ;;  %v4410_v32 = vsel %vm1464_vm7, %v4409_v36, %v4408_v3  ;;  %v3813_v14 = vperm.slane %v12735_v53, 0 }
 0x34c   : > { %v3815_v30 = vperm.slane %v12738_v60, 0  ;;  %v3817_v12 = vperm.slane %v12724_v42, 0  ;;  %v4412_v44 = vsel %vm1466_vm8, %v4411_v27, %v4410_v32  ;;  %v3819_v24 = vperm.slane %v12727_v54, 0 }
 0x34d   : > { %4862 = vmatpush.bf16.msrb.mxu0 %v9400_v52  ;;  %v3821_v22 = vperm.slane %v12730_v15, 0  ;;  %v3823_v20 = vperm.slane %v12745_v45, 0  ;;  %v12773_v7 = vpack.c.b16 %v4412_v44, %v4384_v46  ;;  %v3825_v51 = vperm.slane %v12748_v38, 0 }
 0x34e   : > { %v3827_v25 = vperm.slane %v12755_v17, 0  ;;  %v3829_v57 = vperm.slane %v12758_v21, 0  ;;  %v3831_v56 = vperm.slane %v12764_v62, 0  ;;  %v3997_v61 = vpack.c.bf16 %v3801_v37, %v3801_v37 }
 0x34f   : > { %v3999_v36 = vpack.c.bf16 %v3803_v11, %v3803_v11  ;;  %v4001_v31 = vpack.c.bf16 %v3805_v59, %v3805_v59  ;;  %4846 = vmatmul.bf16.gmra.mxu3 %v12773_v7  ;;  %v4003_v49 = vpack.c.bf16 %v3807_v50, %v3807_v50  ;;  %v4005_v27 = vpack.c.bf16 %v3809_v4, %v3809_v4 }
 0x350   : > { %v4007_v55 = vpack.c.bf16 %v3811_v34, %v3811_v34  ;;  %v4009_v8 = vpack.c.bf16 %v3813_v14, %v3813_v14  ;;  %v4011_v26 = vpack.c.bf16 %v3815_v30, %v3815_v30  ;;  %v4013_v52 = vpack.c.bf16 %v3817_v12, %v3817_v12 }
 0x351   : > { %4863 = vmatpush.bf16.msrb.mxu0 %v9384_v58  ;;  %v4015_v43 = vpack.c.bf16 %v3819_v24, %v3819_v24  ;;  %v4017_v6 = vpack.c.bf16 %v3821_v22, %v3821_v22  ;;  %v4019_v0 = vpack.c.bf16 %v3823_v20, %v3823_v20  ;;  %v4021_v48 = vpack.c.bf16 %v3825_v51, %v3825_v51  ;;  %v10517_v20 = vld [vmem:[%s15501_s8 + $0x1e4] sm:$0xf] }
 0x352   : > { %v4023_v46 = vpack.c.bf16 %v3827_v25, %v3827_v25  ;;  %v4025_v3 = vpack.c.bf16 %v3829_v57, %v3829_v57  ;;  %v4027_v32 = vpack.c.bf16 %v3831_v56, %v3831_v56  ;;  %v4267_v44 = vunpack.c.l.b16 %v3997_v61  ;;  %v9541_v61 = vld [vmem:[%s15501_s8 + $0x1f0] sm:$0xf0] }
 0x353   : > { %v4269_v37 = vunpack.c.l.b16 %v3999_v36  ;;  %v4271_v11 = vunpack.c.l.b16 %v4001_v31  ;;  %v4273_v59 = vunpack.c.l.b16 %v4003_v49  ;;  %v4275_v35 = vunpack.c.l.b16 %v4005_v27  ;;  %v12786_v36 = vpop.f32.mrf.mxu0 }
 0x354   : > { %v4277_v23 = vunpack.c.l.b16 %v4007_v55  ;;  %v4279_v50 = vunpack.c.l.b16 %v4009_v8  ;;  %v4281_v4 = vunpack.c.l.b16 %v4011_v26  ;;  %v4283_v34 = vunpack.c.l.b16 %v4013_v52  ;;  %v9419_v8 = vld [vmem:[%s15501_s8 + $0xe8] sm:$0xf] }
 0x355   : > { %v4285_v14 = vunpack.c.l.b16 %v4015_v43  ;;  %v4287_v58 = vunpack.c.l.b16 %v4017_v6  ;;  %v4289_v30 = vunpack.c.l.b16 %v4019_v0  ;;  %v4291_v12 = vunpack.c.l.b16 %v4021_v48  ;;  %v10488_v0 = vld [vmem:[%s15501_s8 + $0xf4] sm:$0xf0] }
 0x356   : > { %v4293_v24 = vunpack.c.l.b16 %v4023_v46  ;;  %v4295_v22 = vunpack.c.l.b16 %v4025_v3  ;;  %v4297_v51 = vunpack.c.l.b16 %v4027_v32  ;;  %v4413_v25 = vrot.slane %v4269_v37, 7 }
 0x357   : > { %v4415_v57 = vrot.slane %v4271_v11, 6  ;;  %v4417_v56 = vrot.slane %v4273_v59, 5  ;;  %v4419_v31 = vrot.slane %v4275_v35, 4  ;;  %v4421_v49 = vrot.slane %v4277_v23, 3 }
 0x358   : > { %v4423_v27 = vrot.slane %v4279_v50, 2  ;;  %v4425_v55 = vrot.slane %v4281_v4, 1  ;;  %v4414_v26 = vsel %vm1454_vm2, %v4413_v25, %v4267_v44  ;;  %v4441_v52 = vrot.slane %v4285_v14, 7 }
 0x359   : > { %v4443_v43 = vrot.slane %v4287_v58, 6  ;;  %v4445_v6 = vrot.slane %v4289_v30, 5  ;;  %v4416_v48 = vsel %vm1456_vm3, %v4415_v57, %v4414_v26  ;;  %v4447_v46 = vrot.slane %v4291_v12, 4 }
 0x35a   : > { %v4449_v35 = vrot.slane %v4293_v24, 3  ;;  %v4451_v23 = vrot.slane %v4295_v22, 2  ;;  %v4418_v3 = vsel %vm1458_vm4, %v4417_v56, %v4416_v48  ;;  %v4442_v32 = vsel %vm1454_vm2, %v4441_v52, %v4283_v34 }
 0x35b   : > { %v4453_v37 = vrot.slane %v4297_v51, 1  ;;  %v9544_v11 = vor.u32 %v10517_v20, %v9541_v61  ;;  %v4420_v44 = vsel %vm1460_vm5, %v4419_v31, %v4418_v3  ;;  %v4444_v59 = vsel %vm1456_vm3, %v4443_v43, %v4442_v32 }
 0x35c   : > { %v9420_v50 = vor.u32 %v10488_v0, %v9419_v8  ;;  %v3802_v4 = vperm.slane %v12703_v16, 1  ;;  %v4422_v14 = vsel %vm1462_vm6, %v4421_v49, %v4420_v44  ;;  %v4446_v58 = vsel %vm1458_vm4, %v4445_v6, %v4444_v59 }
 0x35d   : > { %4889 = vmatpush.bf16.msrb.mxu1 %v9544_v11  ;;  %v3804_v30 = vperm.slane %v12693_v9, 1  ;;  %v3806_v12 = vperm.slane %v12708_v28, 1  ;;  %v4424_v34 = vsel %vm1464_vm7, %v4423_v27, %v4422_v14  ;;  %v4448_v24 = vsel %vm1460_vm5, %v4447_v46, %v4446_v58  ;;  %v3487_v9 = vpop.f32.mrf.mxu0 }
 0x35e   : > { %4917 = vmatpush.bf16.msrb.mxu2 %v9420_v50  ;;  %v3808_v22 = vperm.slane %v12711_v2, 1  ;;  %v3810_v20 = vperm.slane %v12718_v41, 1  ;;  %v4426_v16 = vsel %vm1466_vm8, %v4425_v55, %v4424_v34  ;;  %v4450_v51 = vsel %vm1462_vm6, %v4449_v35, %v4448_v24  ;;  %v9547_v9 = vld [vmem:[%s15501_s8 + $0x1e8] sm:$0xf] }
 0x35f   : > { %v3812_v25 = vperm.slane %v12721_v63, 1  ;;  %v3814_v57 = vperm.slane %v12735_v53, 1  ;;  %v4452_v28 = vsel %vm1464_vm7, %v4451_v23, %v4450_v51  ;;  %v3816_v56 = vperm.slane %v12738_v60, 1 }
 0x360   : > { %v3818_v61 = vperm.slane %v12724_v42, 1  ;;  %v3820_v31 = vperm.slane %v12727_v54, 1  ;;  %v4454_v2 = vsel %vm1466_vm8, %v4453_v37, %v4452_v28  ;;  %v3822_v41 = vperm.slane %v12730_v15, 1  ;;  %v10520_v28 = vld [vmem:[%s15501_s8 + $0x1f4] sm:$0xf0] }
 0x361   : > { %v3824_v49 = vperm.slane %v12745_v45, 1  ;;  %v3826_v27 = vperm.slane %v12748_v38, 1  ;;  %v12821_v63 = vpack.c.b16 %v4454_v2, %v4426_v16  ;;  %v3828_v53 = vperm.slane %v12755_v17, 1 }
 0x362   : > { %v3830_v55 = vperm.slane %v12758_v21, 1  ;;  %v3832_v60 = vperm.slane %v12764_v62, 1  ;;  %v3998_v8 = vpack.c.bf16 %v3802_v4, %v3802_v4  ;;  %v4000_v42 = vpack.c.bf16 %v3804_v30, %v3804_v30 }
 0x363   : > { %v4002_v26 = vpack.c.bf16 %v3806_v12, %v3806_v12  ;;  %v4004_v54 = vpack.c.bf16 %v3808_v22, %v3808_v22  ;;  %4823 = vmatmul.bf16.gmra.mxu2 %v12821_v63  ;;  %v4006_v52 = vpack.c.bf16 %v3810_v20, %v3810_v20  ;;  %v4008_v15 = vpack.c.bf16 %v3812_v25, %v3812_v25  ;;  %v10473_v22 = vld [vmem:[%s15501_s8 + $0x84] sm:$0xf]  ;;  %v9365_v20 = vld [vmem:[%s15501_s8 + $0x90] sm:$0xf0] }
 0x364   : > { %v4010_v43 = vpack.c.bf16 %v3814_v57, %v3814_v57  ;;  %v4012_v45 = vpack.c.bf16 %v3816_v56, %v3816_v56  ;;  %v4014_v6 = vpack.c.bf16 %v3818_v61, %v3818_v61  ;;  %v4016_v38 = vpack.c.bf16 %v3820_v31, %v3820_v31  ;;  %v10513_v56 = vld [vmem:[%s15501_s8 + $0x1c4] sm:$0xf]  ;;  %v9525_v61 = vld [vmem:[%s15501_s8 + $0x1d0] sm:$0xf0] }
 0x365   : > { %v4018_v0 = vpack.c.bf16 %v3822_v41, %v3822_v41  ;;  %v4020_v48 = vpack.c.bf16 %v3824_v49, %v3824_v49  ;;  %v4022_v46 = vpack.c.bf16 %v3826_v27, %v3826_v27  ;;  %v4024_v17 = vpack.c.bf16 %v3828_v53, %v3828_v53  ;;  %v9403_v27 = vld [vmem:[%s15501_s8 + $0xc8] sm:$0xf]  ;;  %v10484_v53 = vld [vmem:[%s15501_s8 + $0xd4] sm:$0xf0] }
 0x366   : > { %v4026_v35 = vpack.c.bf16 %v3830_v55, %v3830_v55  ;;  %v4028_v21 = vpack.c.bf16 %v3832_v60, %v3832_v60  ;;  %v4268_v23 = vunpack.c.l.b16 %v3998_v8  ;;  %v4270_v62 = vunpack.c.l.b16 %v4000_v42 }
 0x367   : > { %v4272_v3 = vunpack.c.l.b16 %v4002_v26  ;;  %v4274_v32 = vunpack.c.l.b16 %v4004_v54  ;;  %v4276_v37 = vunpack.c.l.b16 %v4006_v52  ;;  %v4278_v11 = vunpack.c.l.b16 %v4008_v15  ;;  %v10469_v26 = vld [vmem:[%s15501_s8 + $0x64] sm:$0xf] }
 0x368   : > { %v4280_v44 = vunpack.c.l.b16 %v4010_v43  ;;  %v4282_v59 = vunpack.c.l.b16 %v4012_v45  ;;  %v4284_v50 = vunpack.c.l.b16 %v4014_v6  ;;  %v4286_v4 = vunpack.c.l.b16 %v4016_v38  ;;  %v9349_v45 = vld [vmem:[%s15501_s8 + $0x70] sm:$0xf0]  ;;  %v9531_v6 = vld [vmem:[%s15501_s8 + $0x1c8] sm:$0xf] }
 0x369   : > { %v4288_v14 = vunpack.c.l.b16 %v4018_v0  ;;  %v4290_v58 = vunpack.c.l.b16 %v4020_v48  ;;  %v4292_v30 = vunpack.c.l.b16 %v4022_v46  ;;  %v4294_v12 = vunpack.c.l.b16 %v4024_v17  ;;  %v10516_v17 = vld [vmem:[%s15501_s8 + $0x1d4] sm:$0xf0] }
 0x36a   : > { %v4296_v34 = vunpack.c.l.b16 %v4026_v35  ;;  %v4298_v24 = vunpack.c.l.b16 %v4028_v21  ;;  %v4427_v16 = vrot.slane %v4270_v62, 7  ;;  %v4429_v51 = vrot.slane %v4272_v3, 6  ;;  %v12869_v35 = vld [vmem:[%s12409_s25 + $0x60] sm:$0x3]  ;;  %s10722_s25 = spop %10721 }
 0x36b   : > { %v4431_v25 = vrot.slane %v4274_v32, 5  ;;  %v4433_v57 = vrot.slane %v4276_v37, 4  ;;  %v4435_v31 = vrot.slane %v4278_v11, 3  ;;  %v4437_v2 = vrot.slane %v4280_v44, 2  ;;  %v10509_v32 = vld [vmem:[%s15501_s8 + $0x1a4] sm:$0xf] }
 0x36c   : > { %v4439_v41 = vrot.slane %v4282_v59, 1  ;;  %v4455_v49 = vrot.slane %v4286_v4, 7  ;;  %v4428_v55 = vsel %vm1454_vm2, %v4427_v16, %v4268_v23  ;;  %v4457_v60 = vrot.slane %v4288_v14, 6  ;;  %v9509_v37 = vld [vmem:[%s15501_s8 + $0x1b0] sm:$0xf0] }
 0x36d   : > { %v4459_v8 = vrot.slane %v4290_v58, 5  ;;  %v4461_v42 = vrot.slane %v4292_v30, 4  ;;  %v4430_v54 = vsel %vm1456_vm3, %v4429_v51, %v4428_v55  ;;  %v4463_v15 = vrot.slane %v4294_v12, 3  ;;  %v9387_v4 = vld [vmem:[%s15501_s8 + $0xa8] sm:$0xf] }
 0x36e   : > { %v4456_v52 = vsel %vm1454_vm2, %v4455_v49, %v4284_v50  ;;  %v4465_v43 = vrot.slane %v4296_v34, 2  ;;  %v4432_v38 = vsel %vm1458_vm4, %v4431_v25, %v4430_v54  ;;  %v4467_v48 = vrot.slane %v4298_v24, 1  ;;  %v10480_v14 = vld [vmem:[%s15501_s8 + $0xb4] sm:$0xf0]  ;;  %v10465_v58 = vld [vmem:[%s15501_s8 + $0x44] sm:$0xf] }
 0x36f   : > { %v4458_v0 = vsel %vm1456_vm3, %v4457_v60, %v4456_v52  ;;  %v9368_v46 = vor.u32 %v10473_v22, %v9365_v20  ;;  %v4434_v21 = vsel %vm1460_vm5, %v4433_v57, %v4432_v38  ;;  %v9548_v62 = vor.u32 %v10520_v28, %v9547_v9  ;;  %v9333_v24 = vld [vmem:[%s15501_s8 + $0x50] sm:$0xf0]  ;;  %v9515_v22 = vld [vmem:[%s15501_s8 + $0x1a8] sm:$0xf]  ;;  %v10512_v9 = vld [vmem:[%s15501_s8 + $0x1b4] sm:$0xf0] }
 0x370   : > { %v4460_v23 = vsel %vm1458_vm4, %v4459_v8, %v4458_v0  ;;  %v9528_v3 = vor.u32 %v10513_v56, %v9525_v61  ;;  %v4436_v11 = vsel %vm1462_vm6, %v4435_v31, %v4434_v21  ;;  %v9404_v59 = vor.u32 %v10484_v53, %v9403_v27  ;;  %v10505_v28 = vld [vmem:[%s15501_s8 + $0x184] sm:$0xf]  ;;  %v9493_v56 = vld [vmem:[%s15501_s8 + $0x190] sm:$0xf0]  ;;  %v9499_v8 = vld [vmem:[%s15501_s8 + $0x188] sm:$0xf] }
 0x371   : > { %v4462_v44 = vsel %vm1460_vm5, %v4461_v42, %v4460_v23  ;;  %4864 = vmatpush.bf16.msrb.mxu0 %v9368_v46  ;;  %v9352_v50 = vor.u32 %v10469_v26, %v9349_v45  ;;  %v4438_v30 = vsel %vm1464_vm7, %v4437_v2, %v4436_v11  ;;  %4945 = vmatpush.bf16.msrb.mxu3 %v9548_v62  ;;  %v3833_v20 = vperm.slane %v12869_v35, 0  ;;  %v10461_v27 = vld [vmem:[%s15501_s8 + $0x24] sm:$0xf]  ;;  %v9317_v60 = vld [vmem:[%s15501_s8 + $0x30] sm:$0xf0] }
 0x372   : > { %v4464_v12 = vsel %vm1462_vm6, %v4463_v15, %v4462_v44  ;;  %4890 = vmatpush.bf16.msrb.mxu1 %v9528_v3  ;;  %v9532_v34 = vor.u32 %v10516_v17, %v9531_v6  ;;  %v4440_v16 = vsel %vm1466_vm8, %v4439_v41, %v4438_v30  ;;  %4918 = vmatpush.bf16.msrb.mxu2 %v9404_v59  ;;  %v10508_v42 = vld [vmem:[%s15501_s8 + $0x194] sm:$0xf0]  ;;  %v10501_v15 = vld [vmem:[%s15501_s8 + $0x164] sm:$0xf]  ;;  %v3834_v45 = vperm.slane %v12869_v35, 1 }
 0x373   : > { %v4466_v51 = vsel %vm1464_vm7, %v4465_v43, %v4464_v12  ;;  %v3486_v25 = vadd.f32 %v12786_v36, %v12553_v19  ;;  %v9512_v57 = vor.u32 %v10509_v32, %v9509_v37  ;;  %v9388_v31 = vor.u32 %v10480_v14, %v9387_v4  ;;  %v9371_v19 = vld [vmem:[%s15501_s8 + $0x88] sm:$0xf]  ;;  %v10476_v36 = vld [vmem:[%s15501_s8 + $0x94] sm:$0xf0]  ;;  %v9477_v43 = vld [vmem:[%s15501_s8 + $0x170] sm:$0xf0] }
 0x374   : > { %v4468_v61 = vsel %vm1466_vm8, %v4467_v48, %v4466_v51  ;;  %v9336_v49 = vor.u32 %v10465_v58, %v9333_v24  ;;  %v9516_v53 = vor.u32 %v10512_v9, %v9515_v22  ;;  %v9496_v55 = vor.u32 %v10505_v28, %v9493_v56  ;;  %v9355_v38 = vld [vmem:[%s15501_s8 + $0x68] sm:$0xf]  ;;  %v10472_v0 = vld [vmem:[%s15501_s8 + $0x74] sm:$0xf0]  ;;  %v10457_v46 = vld [vmem:[%s15501_s8 + $0x4] sm:$0xf] }
 0x375   : > { %v12919_v2 = vpack.c.b16 %v4468_v61, %v4440_v16  ;;  %4865 = vmatpush.bf16.msrb.mxu0 %v9352_v50  ;;  %v3489_v41 = vmax.f32 %v3486_v25, 0.0  ;;  %4946 = vmatpush.bf16.msrb.mxu3 %v9532_v34  ;;  %v4029_v26 = vpack.c.bf16 %v3833_v20, %v3833_v20  ;;  %v9372_v52 = vor.u32 %v10476_v36, %v9371_v19  ;;  %v9301_v23 = vld [vmem:[%s15501_s8 + $0x10] sm:$0xf0]  ;;  %v9483_v62 = vld [vmem:[%s15501_s8 + $0x168] sm:$0xf] }
 0x376   : > { %4891 = vmatpush.bf16.msrb.mxu1 %v9512_v57  ;;  %4919 = vmatpush.bf16.msrb.mxu2 %v9388_v31  ;;  %v9320_v48 = vor.u32 %v10461_v27, %v9317_v60  ;;  %v9500_v17 = vor.u32 %v10508_v42, %v9499_v8  ;;  %v9480_v21 = vor.u32 %v10501_v15, %v9477_v43  ;;  %v10504_v3 = vld [vmem:[%s15501_s8 + $0x174] sm:$0xf0]  ;;  %v10497_v11 = vld [vmem:[%s15501_s8 + $0x144] sm:$0xf]  ;;  %v9461_v44 = vld [vmem:[%s15501_s8 + $0x150] sm:$0xf0] }
 0x377   : > { %4851 = vmatmul.bf16.gmra.mxu3 %v12919_v2  ;;  %v3490_v54 = vpack.c.bf16 %v3489_v41, %v3489_v41  ;;  %v4299_v6 = vunpack.c.l.b16 %v4029_v26  ;;  %v9356_v32 = vor.u32 %v10472_v0, %v9355_v38  ;;  %v4030_v37 = vpack.c.bf16 %v3834_v45, %v3834_v45  ;;  %v9339_v59 = vld [vmem:[%s15501_s8 + $0x48] sm:$0xf]  ;;  %v10468_v50 = vld [vmem:[%s15501_s8 + $0x54] sm:$0xf0]  ;;  %v10486_v4 = vld [vmem:[%s15501_s8 + $0xec] sm:$0xf] }
 0x378   : > { %v9421_v14 = vld [vmem:[%s15501_s8 + $0xf8] sm:$0xf0]  ;;  %v9304_v58 = vor.u32 %v10457_v46, %v9301_v23  ;;  %v9484_v30 = vor.u32 %v10504_v3, %v9483_v62  ;;  %v9464_v12 = vor.u32 %v10497_v11, %v9461_v44  ;;  %v9467_v34 = vld [vmem:[%s15501_s8 + $0x148] sm:$0xf]  ;;  %v9340_v22 = vor.u32 %v10468_v50, %v9339_v59  ;;  %v10500_v20 = vld [vmem:[%s15501_s8 + $0x154] sm:$0xf0] }
 0x379   : > { %4866 = vmatpush.bf16.msrb.mxu0 %v9336_v49  ;;  %9296 = vmatmul.msk.bf16.vlgmr.msra.gmra.mxu1 %vm2105_vm13, %v3490_v54  ;;  %v12951_v35 = vpack.c.b16 %v4299_v6, %v4299_v6  ;;  %v4300_v24 = vunpack.c.l.b16 %v4030_v37  ;;  %v10493_v16 = vld [vmem:[%s15501_s8 + $0x124] sm:$0xf]  ;;  %v9445_v51 = vld [vmem:[%s15501_s8 + $0x130] sm:$0xf0]  ;;  %v9424_v25 = vor.u32 %v10486_v4, %v9421_v14  ;;  %v9323_v57 = vld [vmem:[%s15501_s8 + $0x28] sm:$0xf]  ;;  %v9468_v61 = vor.u32 %v10500_v20, %v9467_v34 }
 0x37a   : > { %4947 = vmatpush.bf16.msrb.mxu3 %v9516_v53  ;;  %4892 = vmatpush.bf16.msrb.mxu1 %v9496_v55  ;;  %v10464_v9 = vld [vmem:[%s15501_s8 + $0x34] sm:$0xf0]  ;;  %v10482_v28 = vld [vmem:[%s15501_s8 + $0xcc] sm:$0xf]  ;;  %v9405_v56 = vld [vmem:[%s15501_s8 + $0xd8] sm:$0xf0]  ;;  %v9448_v31 = vor.u32 %v10493_v16, %v9445_v51 }
 0x37b   : > { %4920 = vmatpush.bf16.msrb.mxu2 %v9372_v52  ;;  %v9451_v19 = vld [vmem:[%s15501_s8 + $0x128] sm:$0xf]  ;;  %v10496_v36 = vld [vmem:[%s15501_s8 + $0x134] sm:$0xf0]  ;;  %v13011_v41 = vpack.c.b16 %v4300_v24, %v4300_v24  ;;  %v9324_v49 = vor.u32 %v10464_v9, %v9323_v57  ;;  %v10489_v27 = vld [vmem:[%s15501_s8 + $0x104] sm:$0xf]  ;;  %v9408_v26 = vor.u32 %v10482_v28, %v9405_v56 }
 0x37c   : > { %4828 = vmatmul.bf16.gmra.mxu2 %v12951_v35  ;;  %v9429_v53 = vld [vmem:[%s15501_s8 + $0x110] sm:$0xf0]  ;;  %v9307_v55 = vld [vmem:[%s15501_s8 + $0x8] sm:$0xf]  ;;  %v10460_v60 = vld [vmem:[%s15501_s8 + $0x14] sm:$0xf0]  ;;  %v9452_v15 = vor.u32 %v10496_v36, %v9451_v19 }
 0x37d   : > { %4867 = vmatpush.bf16.msrb.mxu0 %v9320_v48  ;;  %v10518_v8 = vld [vmem:[%s15501_s8 + $0x1ec] sm:$0xf]  ;;  %v9549_v42 = vld [vmem:[%s15501_s8 + $0x1f8] sm:$0xf0]  ;;  %v9432_v43 = vor.u32 %v10489_v27, %v9429_v53  ;;  %v9308_v45 = vor.u32 %v10460_v60, %v9307_v55  ;;  %v9435_v6 = vld [vmem:[%s15501_s8 + $0x108] sm:$0xf] }
 0x37e   : > { %4948 = vmatpush.bf16.msrb.mxu3 %v9500_v17  ;;  %4893 = vmatpush.bf16.msrb.mxu1 %v9480_v21  ;;  %v10478_v54 = vld [vmem:[%s15501_s8 + $0xac] sm:$0xf]  ;;  %v9389_v52 = vld [vmem:[%s15501_s8 + $0xb8] sm:$0xf0]  ;;  %v10492_v38 = vld [vmem:[%s15501_s8 + $0x114] sm:$0xf0]  ;;  %v9552_v0 = vor.u32 %v10518_v8, %v9549_v42  ;;  %v4814_v8 = vpop.f32.mrf.mxu2 }
 0x37f   : > { %4921 = vmatpush.bf16.msrb.mxu2 %v9356_v32  ;;  %v10514_v48 = vld [vmem:[%s15501_s8 + $0x1cc] sm:$0xf]  ;;  %v9533_v46 = vld [vmem:[%s15501_s8 + $0x1d8] sm:$0xf0]  ;;  %v9392_v17 = vor.u32 %v10478_v54, %v9389_v52  ;;  %v9436_v62 = vor.u32 %v10492_v38, %v9435_v6 }
 0x380   : > { %v10474_v21 = vld [vmem:[%s15501_s8 + $0x8c] sm:$0xf]  ;;  %v9373_v23 = vld [vmem:[%s15501_s8 + $0x98] sm:$0xf0]  ;;  %v9536_v3 = vor.u32 %v10514_v48, %v9533_v46 }
 0x381   : > { %4868 = vmatpush.bf16.msrb.mxu0 %v9304_v58  ;;  %v10510_v32 = vld [vmem:[%s15501_s8 + $0x1ac] sm:$0xf]  ;;  %v9517_v37 = vld [vmem:[%s15501_s8 + $0x1b8] sm:$0xf0]  ;;  %v9376_v11 = vor.u32 %v10474_v21, %v9373_v23 }
 0x382   : > { %4949 = vmatpush.bf16.msrb.mxu3 %v9484_v30  ;;  %4894 = vmatpush.bf16.msrb.mxu1 %v9464_v12  ;;  %v10470_v44 = vld [vmem:[%s15501_s8 + $0x6c] sm:$0xf]  ;;  %v9357_v59 = vld [vmem:[%s15501_s8 + $0x78] sm:$0xf0]  ;;  %v9520_v50 = vor.u32 %v10510_v32, %v9517_v37 }
 0x383   : > { %4922 = vmatpush.bf16.msrb.mxu2 %v9340_v22  ;;  %v10506_v4 = vld [vmem:[%s15501_s8 + $0x18c] sm:$0xf]  ;;  %v9501_v14 = vld [vmem:[%s15501_s8 + $0x198] sm:$0xf0]  ;;  %v9360_v58 = vor.u32 %v10470_v44, %v9357_v59 }
 0x384   : > { %4869 = vmatmul.bf16.vlgmr.msrb.gmra.mxu0 %v12546_v29  ;;  %v9504_v30 = vor.u32 %v10506_v4, %v9501_v14  ;;  %v10502_v12 = vld [vmem:[%s15501_s8 + $0x16c] sm:$0xf]  ;;  %v9485_v34 = vld [vmem:[%s15501_s8 + $0x178] sm:$0xf0]  ;;  %v10521_v14 = vld [vmem:[%s15509_s16] sm:$0xff] }
 0x385   : > { %4973 = vmatpush.bf16.msra.mxu0 %v9424_v25  ;;  %v9488_v24 = vor.u32 %v10502_v12, %v9485_v34  ;;  %v10466_v22 = vld [vmem:[%s15501_s8 + $0x4c] sm:$0xf]  ;;  %v9341_v20 = vld [vmem:[%s15501_s8 + $0x58] sm:$0xf0] }
 0x386   : > { %4950 = vmatpush.bf16.msrb.mxu3 %v9468_v61  ;;  %4895 = vmatpush.bf16.msrb.mxu1 %v9448_v31  ;;  %v10498_v16 = vld [vmem:[%s15501_s8 + $0x14c] sm:$0xf]  ;;  %v9344_v51 = vor.u32 %v10466_v22, %v9341_v20  ;;  %v9469_v25 = vld [vmem:[%s15501_s8 + $0x158] sm:$0xf0]  ;;  %v4816_v42 = vpop.f32.mrf.mxu2 }
 0x387   : > { %4856 = vmatmul.bf16.gmra.mxu3 %v13011_v41  ;;  %4923 = vmatpush.bf16.msrb.mxu2 %v9324_v49  ;;  %v10462_v57 = vld [vmem:[%s15501_s8 + $0x2c] sm:$0xf]  ;;  %v9325_v9 = vld [vmem:[%s15501_s8 + $0x38] sm:$0xf0]  ;;  %v9472_v56 = vor.u32 %v10498_v16, %v9469_v25 }
 0x388   : > { %v9328_v28 = vor.u32 %v10462_v57, %v9325_v9  ;;  %v10494_v61 = vld [vmem:[%s15501_s8 + $0x12c] sm:$0xf]  ;;  %v9453_v31 = vld [vmem:[%s15501_s8 + $0x138] sm:$0xf0] }
 0x389   : > { %4974 = vmatpush.bf16.msra.mxu0 %v9408_v26  ;;  %v9456_v19 = vor.u32 %v10494_v61, %v9453_v31  ;;  %v10458_v36 = vld [vmem:[%s15501_s8 + $0xc] sm:$0xf]  ;;  %v9309_v49 = vld [vmem:[%s15501_s8 + $0x18] sm:$0xf0] }
 0x38a   : > { %4951 = vmatpush.bf16.msrb.mxu3 %v9452_v15  ;;  %4896 = vmatpush.bf16.msrb.mxu1 %v9432_v43  ;;  %v9312_v27 = vor.u32 %v10458_v36, %v9309_v49  ;;  %v10490_v53 = vld [vmem:[%s15501_s8 + $0x10c] sm:$0xf]  ;;  %v9437_v55 = vld [vmem:[%s15501_s8 + $0x118] sm:$0xf0] }
 0x38b   : > { %4924 = vmatpush.bf16.msrb.mxu2 %v9308_v45  ;;  %v9440_v60 = vor.u32 %v10490_v53, %v9437_v55  ;;  %v10528_v15 = vld [vmem:[%s15509_s16 + $0x38] sm:$0xff]  ;;  %v10522_v37 = vld [vmem:[%s15509_s16 + $0x8] sm:$0xff] }
 0x38d   : > { %4975 = vmatpush.bf16.msra.mxu0 %v9392_v17  ;;  %4897 = vmatmul.bf16.vlgmr.msrb.gmra.mxu1 %v12630_v10  ;;  %v10523_v17 = vld [vmem:[%s15509_s16 + $0x10] sm:$0xff] }
 0x38e   : > { %5001 = vmatpush.bf16.msra.mxu1 %v9552_v0  ;;  %4952 = vmatpush.bf16.msrb.mxu3 %v9436_v62  ;;  %v10524_v0 = vld [vmem:[%s15509_s16 + $0x18] sm:$0xff] }
 0x38f   : > { %4925 = vmatmul.bf16.vlgmr.msrb.gmra.mxu2 %v12546_v29 }
 0x390   : > { %5345 = vmatpush.bf16.msra.mxu2 %v10528_v15 }
 0x391   : > { %4976 = vmatpush.bf16.msra.mxu0 %v9376_v11 }
 0x392   : > { %5002 = vmatpush.bf16.msra.mxu1 %v9536_v3 }
 0x394   : > { %4874 = vmatmul.bf16.gmra.mxu0 %v12668_v1 }
 0x395   : > { %4977 = vmatpush.bf16.msra.mxu0 %v9360_v58 }
 0x396   : > { %5003 = vmatpush.bf16.msra.mxu1 %v9520_v50 }
 0x397   : > { %4953 = vmatmul.bf16.vlgmr.msrb.gmra.mxu3 %v12630_v10 }
 0x399   : > { %4978 = vmatpush.bf16.msra.mxu0 %v9344_v51 }
 0x39a   : > { %5004 = vmatpush.bf16.msra.mxu1 %v9504_v30 }
 0x39d   : > { %4902 = vmatmul.bf16.gmra.mxu1 %v12773_v7  ;;  %4979 = vmatpush.bf16.msra.mxu0 %v9328_v28 }
 0x39e   : > { %5005 = vmatpush.bf16.msra.mxu1 %v9488_v24 }
 0x39f   : > { %4930 = vmatmul.bf16.gmra.mxu2 %v12668_v1 }
 0x3a1   : > { %4980 = vmatpush.bf16.msra.mxu0 %v9312_v27 }
 0x3a2   : > { %5006 = vmatpush.bf16.msra.mxu1 %v9472_v56 }
 0x3a4   : > { %4879 = vmatmul.bf16.gmra.mxu0 %v12821_v63 }
 0x3a6   : > { %5007 = vmatpush.bf16.msra.mxu1 %v9456_v19 }
 0x3a7   : > { %4958 = vmatmul.bf16.gmra.mxu3 %v12773_v7 }
 0x3aa   : > { %5008 = vmatpush.bf16.msra.mxu1 %v9440_v60 }
 0x3ad   : > { %4907 = vmatmul.bf16.gmra.mxu1 %v12919_v2 }
 0x3af   : > { %4935 = vmatmul.bf16.gmra.mxu2 %v12821_v63  ;;  %v4842_v26 = vpop.f32.mrf.mxu3 }
 0x3b4   : > { %4884 = vmatmul.bf16.gmra.mxu0 %v12951_v35 }
 0x3b7   : > { %4963 = vmatmul.bf16.gmra.mxu3 %v12919_v2  ;;  %v4844_v52 = vpop.f32.mrf.mxu3 }
 0x3bd   : > { %4912 = vmatmul.bf16.gmra.mxu1 %v13011_v41 }
 0x3bf   : > { %4940 = vmatmul.bf16.gmra.mxu2 %v12951_v35  ;;  %v4819_v54 = vpop.f32.mrf.mxu2 }
 0x3c4   : > { %4981 = vmatmul.bf16.vlgmr.msra.gmra.mxu0 %v12546_v29  ;;  %v10527_v29 = vld [vmem:[%s15509_s16 + $0x30] sm:$0xff] }
 0x3c5   : > { %5346 = vmatpush.bf16.msra.mxu2 %v10527_v29 }
 0x3c7   : > { %4968 = vmatmul.bf16.gmra.mxu3 %v13011_v41  ;;  %v4821_v43 = vpop.f32.mrf.mxu2 }
 0x3cd   : > { %5009 = vmatmul.bf16.vlgmr.msra.gmra.mxu1 %v12630_v10 }
 0x3d2   : > { %v4847_v10 = vpop.f32.mrf.mxu3 }
 0x3d4   : > { %4986 = vmatmul.bf16.gmra.mxu0 %v12668_v1  ;;  %v10526_v1 = vld [vmem:[%s15509_s16 + $0x28] sm:$0xff] }
 0x3d5   : > { %5347 = vmatpush.bf16.msra.mxu2 %v10526_v1 }
 0x3da   : > { %v4849_v38 = vpop.f32.mrf.mxu3 }
 0x3dd   : > { %5014 = vmatmul.bf16.gmra.mxu1 %v12773_v7  ;;  %v13149_v7 = vld [vmem:[%s15502_s9] sm:$0xf] }
 0x3de   : > { %v4097_v6 = vperm.slane %v13149_v7, 0 }
 0x3e0   : > { %v4815_v48 = vadd.f32 %v4814_v8, %v4097_v6  ;;  %v4817_v46 = vadd.f32 %v4816_v42, %v4097_v6  ;;  %v4820_v62 = vadd.f32 %v4819_v54, %v4097_v6  ;;  %v4822_v59 = vadd.f32 %v4821_v43, %v4097_v6 }
 0x3e2   : > { %v13163_v23 = vadd.f32 %v4842_v26, %v4815_v48  ;;  %v13172_v44 = vadd.f32 %v4847_v10, %v4820_v62  ;;  %v13179_v30 = vadd.f32 %v4849_v38, %v4822_v59  ;;  %v10536_v10 = vld [vmem:[%s15509_s16 + $0x78] sm:$0xff]  ;;  %v10533_v59 = vld [vmem:[%s15509_s16 + $0x60] sm:$0xff] }
 0x3e3   : > { %5358 = vmatpush.bf16.msra.mxu3 %v10536_v10  ;;  %v10544_v62 = vld [vmem:[%s15509_s16 + $0xb8] sm:$0xff] }
 0x3e4   : > { %4991 = vmatmul.bf16.gmra.mxu0 %v12821_v63  ;;  %v10525_v63 = vld [vmem:[%s15509_s16 + $0x20] sm:$0xff]  ;;  %15692 = vst [vmem:[#allocation58_spill] sm:$0xff] %v13163_v23 }
 0x3e5   : > { %5348 = vmatpush.bf16.msra.mxu2 %v10525_v63  ;;  %15694 = vst [vmem:[#allocation60_spill] sm:$0xff] %v13172_v44  ;;  %5371 = vmatpush.bf16.msrb.mxu0 %v10544_v62 }
 0x3e6   : > { %v4824_v45 = vpop.f32.mrf.mxu2  ;;  %15695 = vst [vmem:[#allocation61_spill] sm:$0xff] %v13179_v30 }
 0x3e7   : > { %v4825_v12 = vadd.f32 %v4824_v45, %v4097_v6 }
 0x3e9   : > { %5349 = vmatpush.bf16.msra.mxu2 %v10524_v0 }
 0x3ed   : > { %5019 = vmatmul.bf16.gmra.mxu1 %v12919_v2  ;;  %v13165_v2 = vadd.f32 %v4844_v52, %v4817_v46  ;;  %5350 = vmatpush.bf16.msra.mxu2 %v10523_v17  ;;  %v10535_v46 = vld [vmem:[%s15509_s16 + $0x70] sm:$0xff] }
 0x3ee   : > { %v4826_v21 = vpop.f32.mrf.mxu2  ;;  %5359 = vmatpush.bf16.msra.mxu3 %v10535_v46 }
 0x3ef   : > { %15693 = vst [vmem:[#allocation59_spill] sm:$0xff] %v13165_v2  ;;  %v4827_v51 = vadd.f32 %v4826_v21, %v4097_v6  ;;  %v10534_v21 = vld [vmem:[%s15509_s16 + $0x68] sm:$0xff] }
 0x3f1   : > { %5351 = vmatpush.bf16.msra.mxu2 %v10522_v37 }
 0x3f2   : > { %5360 = vmatpush.bf16.msra.mxu3 %v10534_v21 }
 0x3f4   : > { %4996 = vmatmul.bf16.gmra.mxu0 %v12951_v35  ;;  %v5029_v35 = vadd.f32 %v13165_v2, %v13163_v23 }
 0x3f5   : > { %5352 = vmatpush.bf16.msra.mxu2 %v10521_v14  ;;  %v10542_v14 = vld [vmem:[%s15509_s16 + $0xa8] sm:$0xff] }
 0x3f6   : > { %v3519_v3 = vpop.f32.mrf.mxu1  ;;  %v5030_v58 = vadd.f32 %v5029_v35, %v13172_v44  ;;  %5361 = vmatpush.bf16.msra.mxu3 %v10533_v59  ;;  %v10538_v59 = vld [vmem:[%s15509_s16 + $0x88] sm:$0xff] }
 0x3f7   : > { %v3523_v32 = vmax.f32 %v3519_v3, 0.0 }
 0x3f8   : > { %v5031_v20 = vadd.f32 %v5030_v58, %v13179_v30  ;;  %v4098_v58 = vperm.slane %v13149_v7, 1 }
 0x3f9   : > { %v3524_v11 = vsub.f32 0.0, %v3523_v32 }
 0x3fa   : > { %v4852_v50 = vpop.f32.mrf.mxu3 }
 0x3fb   : > { %v3525_v4 = vmul.f32 1.442695, %v3524_v11  ;;  %v13184_v16 = vadd.f32 %v4852_v50, %v4825_v12  ;;  %v10543_v50 = vld [vmem:[%s15509_s16 + $0xb0] sm:$0xff] }
 0x3fc   : > { %5372 = vmatpush.bf16.msrb.mxu0 %v10543_v50 }
 0x3fd   : > { %10750 = vpow2.f32 %v3525_v4  ;;  %5024 = vmatmul.bf16.gmra.mxu1 %v13011_v41  ;;  %15696 = vst [vmem:[#allocation62_spill] sm:$0xff] %v13184_v16  ;;  %v5032_v41 = vadd.f32 %v5031_v20, %v13184_v16  ;;  %v10532_v4 = vld [vmem:[%s15509_s16 + $0x58] sm:$0xff] }
 0x3fe   : > { %v3521_v34 = vpop.f32.mrf.mxu1  ;;  %5362 = vmatpush.bf16.msra.mxu3 %v10532_v4 }
 0x3ff   : > { %v4829_v24 = vpop.f32.mrf.mxu2 }
 0x400   : > { %v4830_v56 = vadd.f32 %v4829_v24, %v4097_v6  ;;  %5373 = vmatpush.bf16.msrb.mxu0 %v10542_v14  ;;  %v10552_v14 = vld [vmem:[%s15509_s16 + $0xf8] sm:$0xff] }
 0x401   : > { %v13181_v22 = vpop.f32.mrf.mxu0  ;;  %5384 = vmatpush.bf16.msrb.mxu1 %v10552_v14  ;;  %v10548_v14 = vld [vmem:[%s15509_s16 + $0xd8] sm:$0xff] }
 0x402   : > { %v4854_v25 = vpop.f32.mrf.mxu3 }
 0x403   : > { %v10751_v57 = vpop.eup %10750  ;;  %v13187_v28 = vadd.f32 %v4854_v25, %v4827_v51  ;;  %v4871_v51 = vadd.f32 %v13181_v22, %v4098_v58 }
 0x404   : > { %v3527_v9 = vadd.f32 1.0, %v10751_v57 }
 0x405   : > { %15697 = vst [vmem:[#allocation63_spill] sm:$0xff] %v13187_v28  ;;  %v5033_v19 = vadd.f32 %v5032_v41, %v13187_v28  ;;  %v10531_v41 = vld [vmem:[%s15509_s16 + $0x50] sm:$0xff] }
 0x406   : > { %10752 = vrcp.f32 %v3527_v9  ;;  %v13222_v9 = vperm.slane %v13149_v7, 2  ;;  %5363 = vmatpush.bf16.msra.mxu3 %v10531_v41 }
 0x407   : > { %v4831_v61 = vpop.f32.mrf.mxu2 }
 0x409   : > { %v4872_v31 = vpop.f32.mrf.mxu0 }
 0x40a   : > { %v4857_v36 = vpop.f32.mrf.mxu3  ;;  %v4898_v49 = vpop.f32.mrf.mxu1  ;;  %v4873_v25 = vadd.f32 %v4872_v31, %v4098_v58 }
 0x40b   : > { %v13190_v27 = vadd.f32 %v4857_v36, %v4830_v56  ;;  %v10541_v56 = vld [vmem:[%s15509_s16 + $0xa0] sm:$0xff] }
 0x40c   : > { %v10753_v53 = vpop.eup %10752  ;;  %5374 = vmatpush.bf16.msrb.mxu0 %v10541_v56 }
 0x40d   : > { %15698 = vst [vmem:[#allocation64_spill] sm:$0xff] %v13190_v27  ;;  %v5034_v55 = vsel %vm1716_vm9, %v13190_v27, 0.0  ;;  %v3529_v60 = vadd.f32 1.0, %v10753_v53 }
 0x40e   : > { %v5035_v8 = vadd.f32 %v5034_v55, %v5033_v19  ;;  %v13232_v19 = vadd.f32 %v4898_v49, %v4871_v51  ;;  %v10540_v49 = vld [vmem:[%s15509_s16 + $0x98] sm:$0xff] }
 0x40f   : > { %10723 = vpush %v3529_v60 }
 0x410   : > { %v5036_v42 = vrot.slane %v5035_v8, 4  ;;  %15700 = vst [vmem:[#allocation66_spill] sm:$0xff] %v13232_v19  ;;  %5375 = vmatpush.bf16.msrb.mxu0 %v10540_v49 }
 0x411   : > { %v4875_v26 = vpop.f32.mrf.mxu0 }
 0x412   : > { %v4926_v54 = vpop.f32.mrf.mxu2  ;;  %v5037_v52 = vadd.f32 %v5036_v42, %v5035_v8  ;;  %v4859_v15 = vpop.f32.mrf.mxu3  ;;  %v4876_v57 = vadd.f32 %v4875_v26, %v4098_v58 }
 0x413   : > { %v4900_v43 = vpop.f32.mrf.mxu1  ;;  %v4927_v22 = vadd.f32 %v4926_v54, %v13222_v9 }
 0x414   : > { %v5038_v29 = vrot.slane %v5037_v52, 2  ;;  %v13230_v61 = vadd.f32 %v4900_v43, %v4873_v25 }
 0x416   : > { %v5039_v1 = vadd.f32 %v5038_v29, %v5037_v52  ;;  %15699 = vst [vmem:[#allocation65_spill] sm:$0xff] %v13230_v61  ;;  %v10530_v52 = vld [vmem:[%s15509_s16 + $0x48] sm:$0xff]  ;;  %v5042_v54 = vadd.f32 %v13230_v61, %v13232_v19  ;;  %v5545_v19 = vld [vmem:[%s13386_s26 + $0xbc] sm:$0xf] }
 0x417   : > { %5364 = vmatpush.bf16.msra.mxu3 %v10530_v52 }
 0x418   : > { %v5040_v45 = vrot.slane %v5039_v1, 1 }
 0x419   : > { %v4877_v63 = vpop.f32.mrf.mxu0 }
 0x41a   : > { %v4928_v6 = vpop.f32.mrf.mxu2  ;;  %v5041_v38 = vadd.f32 %v5040_v45, %v5039_v1  ;;  %v4954_v0 = vpop.f32.mrf.mxu3  ;;  %v4878_v55 = vadd.f32 %v4877_v63, %v4098_v58 }
 0x41b   : > { %v4903_v48 = vpop.f32.mrf.mxu1  ;;  %v4929_v60 = vadd.f32 %v4928_v6, %v13222_v9  ;;  %v13248_v43 = vadd.f32 %v4954_v0, %v4927_v22  ;;  %v10529_v6 = vld [vmem:[%s15509_s16 + $0x40] sm:$0xff] }
 0x41c   : > { %v5081_v17 = vmul.f32 %v5041_v38, %v11767_v13  ;;  %v13235_v31 = vadd.f32 %v4903_v48, %v4876_v57  ;;  %v10539_v38 = vld [vmem:[%s15509_s16 + $0x90] sm:$0xff]  ;;  %5365 = vmatpush.bf16.msra.mxu3 %v10529_v6 }
 0x41d   : > { %15703 = vst [vmem:[#allocation69_spill] sm:$0xff] %v13248_v43  ;;  %5376 = vmatpush.bf16.msrb.mxu0 %v10539_v38  ;;  %v10551_v57 = vld [vmem:[%s15509_s16 + $0xf0] sm:$0xff] }
 0x41e   : > { %v5085_v3 = vpack.c.bf16 %v5081_v17, %v5081_v17  ;;  %15701 = vst [vmem:[#allocation67_spill] sm:$0xff] %v13235_v31  ;;  %v5043_v29 = vadd.f32 %v5042_v54, %v13235_v31  ;;  %5385 = vmatpush.bf16.msrb.mxu1 %v10551_v57  ;;  %v10547_v57 = vld [vmem:[%s15509_s16 + $0xd0] sm:$0xff] }
 0x420   : > { %5353 = vmatmul.bf16.vlgmr.msra.gmra.mxu2 %v5085_v3 }
 0x421   : > { %v4880_v32 = vpop.f32.mrf.mxu0  ;;  %5377 = vmatpush.bf16.msrb.mxu0 %v10538_v59 }
 0x422   : > { %v4931_v37 = vpop.f32.mrf.mxu2  ;;  %v4956_v11 = vpop.f32.mrf.mxu3  ;;  %v4881_v8 = vadd.f32 %v4880_v32, %v4098_v58 }
 0x423   : > { %v4905_v35 = vpop.f32.mrf.mxu1  ;;  %v13251_v10 = vadd.f32 %v4956_v11, %v4929_v60  ;;  %v4932_v1 = vadd.f32 %v4931_v37, %v13222_v9 }
 0x424   : > { %v13246_v15 = vadd.f32 %v4905_v35, %v4878_v55 }
 0x425   : > { %15704 = vst [vmem:[#allocation70_spill] sm:$0xff] %v13251_v10  ;;  %v5055_v62 = vadd.f32 %v13251_v10, %v13248_v43 }
 0x426   : > { %15702 = vst [vmem:[#allocation68_spill] sm:$0xff] %v13246_v15  ;;  %v5044_v0 = vadd.f32 %v5043_v29, %v13246_v15 }
 0x429   : > { %v4882_v12 = vpop.f32.mrf.mxu0 }
 0x42a   : > { %v4933_v34 = vpop.f32.mrf.mxu2  ;;  %v4959_v24 = vpop.f32.mrf.mxu3  ;;  %v4883_v45 = vadd.f32 %v4882_v12, %v4098_v58 }
 0x42b   : > { %v4908_v20 = vpop.f32.mrf.mxu1  ;;  %v13267_v3 = vadd.f32 %v4959_v24, %v4932_v1  ;;  %v4934_v32 = vadd.f32 %v4933_v34, %v13222_v9 }
 0x42c   : > { %v13254_v63 = vadd.f32 %v4908_v20, %v4881_v8 }
 0x42d   : > { %15707 = vst [vmem:[#allocation73_spill] sm:$0xff] %v13267_v3  ;;  %v5056_v34 = vadd.f32 %v5055_v62, %v13267_v3 }
 0x42e   : > { %15705 = vst [vmem:[#allocation71_spill] sm:$0xff] %v13254_v63  ;;  %v5045_v37 = vadd.f32 %v5044_v0, %v13254_v63 }
 0x431   : > { %v4885_v36 = vpop.f32.mrf.mxu0 }
 0x432   : > { %v4936_v53 = vpop.f32.mrf.mxu2  ;;  %v4961_v42 = vpop.f32.mrf.mxu3  ;;  %v4886_v48 = vadd.f32 %v4885_v36, %v4098_v58  ;;  %v10537_v58 = vld [vmem:[%s15509_s16 + $0x80] sm:$0xff] }
 0x433   : > { %v4910_v26 = vpop.f32.mrf.mxu1  ;;  %v13286_v24 = vadd.f32 %v4961_v42, %v4934_v32  ;;  %v4937_v20 = vadd.f32 %v4936_v53, %v13222_v9  ;;  %5378 = vmatpush.bf16.msrb.mxu0 %v10537_v58  ;;  %v10550_v53 = vld [vmem:[%s15509_s16 + $0xe8] sm:$0xff] }
 0x434   : > { %v13263_v46 = vadd.f32 %v4910_v26, %v4883_v45  ;;  %5386 = vmatpush.bf16.msrb.mxu1 %v10550_v53 }
 0x435   : > { %15709 = vst [vmem:[#allocation75_spill] sm:$0xff] %v13286_v24  ;;  %v5057_v22 = vadd.f32 %v5056_v34, %v13286_v24 }
 0x436   : > { %15706 = vst [vmem:[#allocation72_spill] sm:$0xff] %v13263_v46  ;;  %v5046_v4 = vadd.f32 %v5045_v37, %v13263_v46 }
 0x439   : > { %v4887_v17 = vpop.f32.mrf.mxu0 }
 0x43a   : > { %v4938_v21 = vpop.f32.mrf.mxu2  ;;  %v4964_v11 = vpop.f32.mrf.mxu3  ;;  %v10549_v17 = vld [vmem:[%s15509_s16 + $0xe0] sm:$0xff] }
 0x43b   : > { %v4913_v35 = vpop.f32.mrf.mxu1  ;;  %v13293_v36 = vadd.f32 %v4964_v11, %v4937_v20  ;;  %v4939_v55 = vadd.f32 %v4938_v21, %v13222_v9  ;;  %5387 = vmatpush.bf16.msrb.mxu1 %v10549_v17 }
 0x43c   : > { %v13274_v50 = vadd.f32 %v4913_v35, %v4886_v48 }
 0x43d   : > { %15710 = vst [vmem:[#allocation76_spill] sm:$0xff] %v13293_v36  ;;  %v5058_v52 = vadd.f32 %v5057_v22, %v13293_v36 }
 0x43e   : > { %15708 = vst [vmem:[#allocation74_spill] sm:$0xff] %v13274_v50  ;;  %v5047_v12 = vsel %vm1716_vm9, %v13274_v50, 0.0 }
 0x43f   : > { %v5048_v51 = vadd.f32 %v5047_v12, %v5046_v4  ;;  %5388 = vmatpush.bf16.msrb.mxu1 %v10548_v14 }
 0x440   : > { %s10724_s3 = spop %10723 }
 0x441   : > { %v5049_v25 = vrot.slane %v5048_v51, 4  ;;  %v4982_v56 = vpop.f32.mrf.mxu0 }
 0x442   : > { %v4941_v41 = vpop.f32.mrf.mxu2  ;;  %v4966_v8 = vpop.f32.mrf.mxu3 }
 0x443   : > { %v5050_v60 = vadd.f32 %v5049_v25, %v5048_v51  ;;  %v4915_v42 = vpop.f32.mrf.mxu1  ;;  %v13300_v54 = vadd.f32 %v4966_v8, %v4939_v55  ;;  %v4942_v29 = vadd.f32 %v4941_v41, %v13222_v9  ;;  %5389 = vmatpush.bf16.msrb.mxu1 %v10547_v57 }
 0x445   : > { %v5051_v26 = vrot.slane %v5050_v60, 2  ;;  %15711 = vst [vmem:[#allocation77_spill] sm:$0xff] %v13300_v54  ;;  %v5059_v38 = vadd.f32 %v5058_v52, %v13300_v54 }
 0x447   : > { %v5052_v49 = vadd.f32 %v5051_v26, %v5050_v60  ;;  %v4100_v26 = vperm.slane %v13149_v7, 3 }
 0x449   : > { %v5053_v1 = vrot.slane %v5052_v49, 1  ;;  %v4984_v45 = vpop.f32.mrf.mxu0 }
 0x44a   : > { %v4943_v6 = vpop.f32.mrf.mxu2  ;;  %v4969_v48 = vpop.f32.mrf.mxu3 }
 0x44b   : > { %v5010_v0 = vpop.f32.mrf.mxu1  ;;  %v13307_v21 = vadd.f32 %v4969_v48, %v4942_v29  ;;  %v5054_v62 = vadd.f32 %v5053_v1, %v5052_v49  ;;  %v10546_v49 = vld [vmem:[%s15509_s16 + $0xc8] sm:$0xff]  ;;  %v4983_v29 = vadd.f32 %v4982_v56, %v4100_v26  ;;  %v4985_v1 = vadd.f32 %v4984_v45, %v4100_v26 }
 0x44c   : > { %5390 = vmatpush.bf16.msrb.mxu1 %v10546_v49  ;;  %v9788_v49 = vld [vmem:[%s15503_s10 + $0xc0] sm:$0xf] }
 0x44d   : > { %15712 = vst [vmem:[#allocation78_spill] sm:$0xff] %v13307_v21  ;;  %v5060_v32 = vsel %vm1716_vm9, %v13307_v21, 0.0  ;;  %v5082_v9 = vmul.f32 %v5054_v62, %v11767_v13  ;;  %v13328_v62 = vadd.f32 %v5010_v0, %v4983_v29 }
 0x44e   : > { %v5061_v37 = vadd.f32 %v5060_v32, %v5059_v38  ;;  %v10545_v38 = vld [vmem:[%s15509_s16 + $0xc0] sm:$0xff] }
 0x44f   : > { %v5086_v34 = vpack.c.bf16 %v5082_v9, %v5082_v9  ;;  %15714 = vst [vmem:[#allocation80_spill] sm:$0xff] %v13328_v62 }
 0x450   : > { %v5062_v11 = vrot.slane %v5061_v37, 4  ;;  %5391 = vmatpush.bf16.msrb.mxu1 %v10545_v38 }
 0x451   : > { %v4987_v35 = vpop.f32.mrf.mxu0  ;;  %5366 = vmatmul.bf16.vlgmr.msra.gmra.mxu3 %v5086_v34 }
 0x452   : > { %v5063_v59 = vadd.f32 %v5062_v11, %v5061_v37  ;;  %v4971_v58 = vpop.f32.mrf.mxu3  ;;  %v4988_v6 = vadd.f32 %v4987_v35, %v4100_v26 }
 0x453   : > { %v5012_v4 = vpop.f32.mrf.mxu1 }
 0x454   : > { %v5064_v12 = vrot.slane %v5063_v59, 2  ;;  %v13326_v48 = vadd.f32 %v5012_v4, %v4985_v1 }
 0x456   : > { %v5065_v20 = vadd.f32 %v5064_v12, %v5063_v59  ;;  %15713 = vst [vmem:[#allocation79_spill] sm:$0xff] %v13326_v48  ;;  %v5068_v56 = vadd.f32 %v13326_v48, %v13328_v62 }
 0x458   : > { %v5066_v51 = vrot.slane %v5065_v20, 1 }
 0x459   : > { %v4989_v25 = vpop.f32.mrf.mxu0 }
 0x45a   : > { %v5067_v41 = vadd.f32 %v5066_v51, %v5065_v20  ;;  %v4990_v32 = vadd.f32 %v4989_v25, %v4100_v26 }
 0x45b   : > { %v5015_v22 = vpop.f32.mrf.mxu1 }
 0x45c   : > { %v5083_v55 = vmul.f32 %v5067_v41, %v11767_v13  ;;  %v13330_v7 = vadd.f32 %v5015_v22, %v4988_v6  ;;  %v10581_v6 = vld [vmem:[%s15503_s10 + $0xcc] sm:$0xf0] }
 0x45e   : > { %v5087_v60 = vpack.c.bf16 %v5083_v55, %v5083_v55  ;;  %15715 = vst [vmem:[#allocation81_spill] sm:$0xff] %v13330_v7  ;;  %v5069_v11 = vadd.f32 %v5068_v56, %v13330_v7  ;;  %v10577_v56 = vld [vmem:[%s15503_s10 + $0xac] sm:$0xf0] }
 0x460   : > { %5379 = vmatmul.bf16.vlgmr.msrb.gmra.mxu0 %v5087_v60 }
 0x461   : > { %v4992_v8 = vpop.f32.mrf.mxu0 }
 0x462   : > { %v4993_v37 = vadd.f32 %v4992_v8, %v4100_v26 }
 0x463   : > { %v5017_v42 = vpop.f32.mrf.mxu1 }
 0x464   : > { %v13334_v45 = vadd.f32 %v5017_v42, %v4990_v32 }
 0x466   : > { %15716 = vst [vmem:[#allocation82_spill] sm:$0xff] %v13334_v45  ;;  %v5070_v0 = vadd.f32 %v5069_v11, %v13334_v45  ;;  %v9756_v11 = vld [vmem:[%s15503_s10 + $0x80] sm:$0xf] }
 0x469   : > { %v4994_v53 = vpop.f32.mrf.mxu0 }
 0x46a   : > { %v4995_v35 = vadd.f32 %v4994_v53, %v4100_v26 }
 0x46b   : > { %v5020_v52 = vpop.f32.mrf.mxu1 }
 0x46c   : > { %v13337_v59 = vadd.f32 %v5020_v52, %v4993_v37  ;;  %v10585_v52 = vld [vmem:[%s15503_s10 + $0xec] sm:$0xf0] }
 0x46e   : > { %15717 = vst [vmem:[#allocation83_spill] sm:$0xff] %v13337_v59  ;;  %v5071_v12 = vadd.f32 %v5070_v0, %v13337_v59 }
 0x471   : > { %v4997_v17 = vpop.f32.mrf.mxu0 }
 0x472   : > { %v4998_v4 = vadd.f32 %v4997_v17, %v4100_v26  ;;  %v9804_v26 = vld [vmem:[%s15503_s10 + $0xe0] sm:$0xf]  ;;  %v9789_v17 = vor.u32 %v10581_v6, %v9788_v49  ;;  %v13422_v49 = vld [vmem:[%s13386_s26 + $0x14] sm:$0xf] }
 0x473   : > { %v5022_v9 = vpop.f32.mrf.mxu1  ;;  %v9805_v1 = vor.u32 %v10585_v52, %v9804_v26  ;;  %v13416_v26 = vld [vmem:[%s13386_s26 + $0xc] sm:$0xf]  ;;  %v13419_v52 = vld [vmem:[%s13386_s26 + $0x10] sm:$0xf]  ;;  %v13431_v6 = vld [vmem:[%s13386_s26 + $0x20] sm:$0xf] }
 0x474   : > { %v13340_v14 = vadd.f32 %v5022_v9, %v4995_v35  ;;  %v9772_v9 = vld [vmem:[%s15503_s10 + $0xa0] sm:$0xf] }
 0x475   : > { %7771 = vmatpush.bf16.msrb.mxu3 %v9805_v1  ;;  %v9773_v35 = vor.u32 %v10577_v56, %v9772_v9  ;;  %v13428_v1 = vld [vmem:[%s13386_s26 + $0x1c] sm:$0xf] }
 0x476   : > { %15718 = vst [vmem:[#allocation84_spill] sm:$0xff] %v13340_v14  ;;  %v5072_v51 = vadd.f32 %v5071_v12, %v13340_v14  ;;  %v10569_v12 = vld [vmem:[%s15503_s10 + $0x6c] sm:$0xf0] }
 0x479   : > { %v4999_v58 = vpop.f32.mrf.mxu0  ;;  %7772 = vmatpush.bf16.msrb.mxu3 %v9789_v17  ;;  %v13437_v17 = vld [vmem:[%s13386_s26 + $0x28] sm:$0xf] }
 0x47a   : > { %v9740_v58 = vld [vmem:[%s15503_s10 + $0x60] sm:$0xf] }
 0x47b   : > { %v5025_v34 = vpop.f32.mrf.mxu1 }
 0x47c   : > { %v13343_v20 = vadd.f32 %v5025_v34, %v4998_v4  ;;  %v10573_v4 = vld [vmem:[%s15503_s10 + $0x8c] sm:$0xf0]  ;;  %v9741_v34 = vor.u32 %v10569_v12, %v9740_v58 }
 0x47d   : > { %7773 = vmatpush.bf16.msrb.mxu3 %v9773_v35  ;;  %v9757_v0 = vor.u32 %v10573_v4, %v9756_v11  ;;  %v13443_v11 = vld [vmem:[%s13386_s26 + $0x30] sm:$0xf]  ;;  %v13446_v35 = vld [vmem:[%s13386_s26 + $0x34] sm:$0xf]  ;;  %v13449_v4 = vld [vmem:[%s13386_s26 + $0x38] sm:$0xf] }
 0x47e   : > { %15719 = vst [vmem:[#allocation85_spill] sm:$0xff] %v13343_v20  ;;  %v5073_v25 = vsel %vm1716_vm9, %v13343_v20, 0.0  ;;  %v5685_v20 = vperm.slane %v13437_v17, 0  ;;  %v5693_v50 = vperm.slane %v13443_v11, 0  ;;  %v5697_v27 = vperm.slane %v13446_v35, 0 }
 0x47f   : > { %v5074_v57 = vadd.f32 %v5073_v25, %v5072_v51  ;;  %v9724_v51 = vld [vmem:[%s15503_s10 + $0x40] sm:$0xf]  ;;  %v10565_v25 = vld [vmem:[%s15503_s10 + $0x4c] sm:$0xf0]  ;;  %v5701_v14 = vperm.slane %v13449_v4, 0 }
 0x480   : > { %v6077_v7 = vpack.c.bf16 %v5685_v20, %v5685_v20  ;;  %v6085_v31 = vpack.c.bf16 %v5693_v50, %v5693_v50  ;;  %v6089_v44 = vpack.c.bf16 %v5697_v27, %v5697_v27 }
 0x481   : > { %v5075_v41 = vrot.slane %v5074_v57, 4  ;;  %7774 = vmatpush.bf16.msrb.mxu3 %v9757_v0  ;;  %v13452_v0 = vld [vmem:[%s13386_s26 + $0x3c] sm:$0xf]  ;;  %v6093_v48 = vpack.c.bf16 %v5701_v14, %v5701_v14 }
 0x482   : > { %v5705_v54 = vperm.slane %v13452_v0, 0  ;;  %v6615_v50 = vunpack.c.l.b16 %v6085_v31  ;;  %v6619_v27 = vunpack.c.l.b16 %v6089_v44  ;;  %v13481_v44 = vld [vmem:[%s13386_s26 + $0x4c] sm:$0xf] }
 0x483   : > { %v5076_v22 = vadd.f32 %v5075_v41, %v5074_v57  ;;  %v5027_v55 = vpop.f32.mrf.mxu1  ;;  %v9708_v57 = vld [vmem:[%s15503_s10 + $0x20] sm:$0xf]  ;;  %v10561_v41 = vld [vmem:[%s15503_s10 + $0x2c] sm:$0xf0] }
 0x484   : > { %v10557_v55 = vld [vmem:[%s15503_s10 + $0xc] sm:$0xf0]  ;;  %v9709_v9 = vor.u32 %v10561_v41, %v9708_v57  ;;  %v5665_v57 = vperm.slane %v13422_v49, 0  ;;  %v6097_v10 = vpack.c.bf16 %v5705_v54, %v5705_v54  ;;  %v6623_v54 = vunpack.c.l.b16 %v6093_v48 }
 0x485   : > { %v5077_v60 = vrot.slane %v5076_v22, 2  ;;  %7775 = vmatpush.bf16.msrb.mxu3 %v9741_v34 }
 0x486   : > { %v6057_v16 = vpack.c.bf16 %v5665_v57, %v5665_v57 }
 0x487   : > { %v5078_v8 = vadd.f32 %v5077_v60, %v5076_v22  ;;  %v9692_v22 = vld [vmem:[%s15503_s10] sm:$0xf] }
 0x488   : > { %v13407_v60 = vld [vmem:[%s13386_s26] sm:$0xf]  ;;  %v9693_v56 = vor.u32 %v10557_v55, %v9692_v22  ;;  %v5673_v22 = vperm.slane %v13428_v1, 0  ;;  %v5677_v55 = vperm.slane %v13431_v6, 0 }
 0x489   : > { %v5079_v42 = vrot.slane %v5078_v8, 1  ;;  %v5645_v58 = vperm.slane %v13407_v60, 0 }
 0x48a   : > { %v6065_v24 = vpack.c.bf16 %v5673_v22, %v5673_v22  ;;  %v6069_v15 = vpack.c.bf16 %v5677_v55, %v5677_v55  ;;  %v6607_v55 = vunpack.c.l.b16 %v6077_v7 }
 0x48b   : > { %v5080_v53 = vadd.f32 %v5079_v42, %v5078_v8  ;;  %v13410_v8 = vld [vmem:[%s13386_s26 + $0x4] sm:$0xf]  ;;  %v13413_v42 = vld [vmem:[%s13386_s26 + $0x8] sm:$0xf]  ;;  %v6037_v46 = vpack.c.bf16 %v5645_v58, %v5645_v58 }
 0x48c   : > { %v5649_v12 = vperm.slane %v13410_v8, 0  ;;  %v5653_v34 = vperm.slane %v13413_v42, 0  ;;  %v6595_v57 = vunpack.c.l.b16 %v6065_v24  ;;  %v13478_v24 = vld [vmem:[%s13386_s26 + $0x48] sm:$0xf]  ;;  %v6821_v14 = vrot.slane %v6607_v55, 6 }
 0x48d   : > { %v5084_v29 = vmul.f32 %v5080_v53, %v11767_v13  ;;  %v9725_v53 = vor.u32 %v10565_v25, %v9724_v51  ;;  %v5657_v51 = vperm.slane %v13416_v26, 0  ;;  %v5661_v25 = vperm.slane %v13419_v52, 0  ;;  %v5520_v55 = vld [vmem:[%s13386_s26 + $0x58] sm:$0xf] }
 0x48e   : > { %v6041_v28 = vpack.c.bf16 %v5649_v12, %v5649_v12  ;;  %v6045_v59 = vpack.c.bf16 %v5653_v34, %v5653_v34  ;;  %v6567_v61 = vunpack.c.l.b16 %v6037_v46  ;;  %v13471_v46 = vld [vmem:[%s13386_s26 + $0x40] sm:$0xf]  ;;  %v6775_v31 = vrot.slane %v6595_v57, 1 }
 0x48f   : > { %v5088_v38 = vpack.c.bf16 %v5084_v29, %v5084_v29  ;;  %v13425_v29 = vld [vmem:[%s13386_s26 + $0x18] sm:$0xf]  ;;  %7776 = vmatpush.bf16.msrb.mxu3 %v9725_v53  ;;  %v6049_v36 = vpack.c.bf16 %v5657_v51, %v5657_v51  ;;  %v6053_v63 = vpack.c.bf16 %v5661_v25, %v5661_v25  ;;  %v6587_v51 = vunpack.c.l.b16 %v6057_v16 }
 0x490   : > { %v5669_v41 = vperm.slane %v13425_v29, 0  ;;  %v6575_v58 = vunpack.c.l.b16 %v6045_v59 }
 0x491   : > { %5392 = vmatmul.bf16.vlgmr.msrb.gmra.mxu1 %v5088_v38  ;;  %v13434_v38 = vld [vmem:[%s13386_s26 + $0x24] sm:$0xf]  ;;  %v6579_v12 = vunpack.c.l.b16 %v6049_v36  ;;  %v6583_v34 = vunpack.c.l.b16 %v6053_v63 }
 0x492   : > { %v5681_v53 = vperm.slane %v13434_v38, 0  ;;  %v6061_v45 = vpack.c.bf16 %v5669_v41, %v5669_v41  ;;  %v6599_v41 = vunpack.c.l.b16 %v6069_v15  ;;  %v6765_v63 = vrot.slane %v6575_v58, 6 }
 0x493   : > { %7777 = vmatpush.bf16.msrb.mxu3 %v9709_v9  ;;  %v6571_v9 = vunpack.c.l.b16 %v6041_v28  ;;  %v6767_v16 = vrot.slane %v6579_v12, 5  ;;  %v6769_v36 = vrot.slane %v6583_v34, 4  ;;  %v6771_v15 = vrot.slane %v6587_v51, 3  ;;  %v5519_v34 = vld [vmem:[%s13386_s26 + $0x54] sm:$0xf]  ;;  %v10553_v51 = vld [vmem:[%s15510_s17] sm:$0xff] }
 0x494   : > { %v6073_v30 = vpack.c.bf16 %v5681_v53, %v5681_v53  ;;  %v6591_v25 = vunpack.c.l.b16 %v6061_v45  ;;  %v13474_v45 = vld [vmem:[%s13386_s26 + $0x44] sm:$0xf]  ;;  %v6827_v58 = vrot.slane %v6619_v27, 3  ;;  %v6829_v12 = vrot.slane %v6623_v54, 2 }
 0x495   : > { %v6763_v59 = vrot.slane %v6571_v9, 7  ;;  %v6825_v9 = vrot.slane %v6615_v50, 4  ;;  %v5709_v50 = vperm.slane %v13471_v46, 0  ;;  %v5717_v46 = vperm.slane %v13478_v24, 0 }
 0x496   : > { %v6603_v22 = vunpack.c.l.b16 %v6073_v30 }
 0x497   : > { %7778 = vmatpush.bf16.msrb.mxu3 %v9693_v56  ;;  %v6764_v48 = vsel %vm1454_vm2, %v6763_v59, %v6567_v61  ;;  %v5522_v59 = vld [vmem:[%s13386_s26 + $0x60] sm:$0xf]  ;;  %v6109_v62 = vpack.c.bf16 %v5717_v46, %v5717_v46 }
 0x498   : > { %v6819_v7 = vrot.slane %v6603_v22, 7  ;;  %v6766_v53 = vsel %vm1456_vm3, %v6765_v63, %v6764_v48  ;;  %v5523_v63 = vld [vmem:[%s13386_s26 + $0x64] sm:$0xf]  ;;  %v5525_v48 = vld [vmem:[%s13386_s26 + $0x6c] sm:$0xf]  ;;  %v5741_v2 = vperm.slane %v5522_v59, 0 }
 0x49a   : > { %v6820_v57 = vsel %vm1454_vm2, %v6819_v7, %v6599_v41 }
 0x4a3   : > { %v13361_v32 = vpop.f32.mrf.mxu2 }
 0x4ab   : > { %v5356_v37 = vpop.f32.mrf.mxu2 }
 0x4ac   : > { %v13440_v37 = vld [vmem:[%s13386_s26 + $0x2c] sm:$0xf] }
 0x4ad   : > { %v5689_v21 = vperm.slane %v13440_v37, 0 }
 0x4af   : > { %v6081_v3 = vpack.c.bf16 %v5689_v21, %v5689_v21  ;;  %v6627_v21 = vunpack.c.l.b16 %v6097_v10  ;;  %v10554_v10 = vld [vmem:[%s15510_s17 + $0x8] sm:$0xff] }
 0x4b0   : > { %5424 = vmatpush.bf16.msrb.mxu2 %v10554_v10  ;;  %v5713_v10 = vperm.slane %v13474_v45, 0  ;;  %v5729_v45 = vperm.slane %v5519_v34, 0 }
 0x4b1   : > { %v6611_v20 = vunpack.c.l.b16 %v6081_v3  ;;  %v6773_v3 = vrot.slane %v6591_v25, 2  ;;  %v6768_v25 = vsel %vm1458_vm4, %v6767_v16, %v6766_v53  ;;  %v6831_v22 = vrot.slane %v6627_v21, 1  ;;  %v5524_v21 = vld [vmem:[%s13386_s26 + $0x68] sm:$0xf]  ;;  %v5527_v53 = vld [vmem:[%s13386_s26 + $0x74] sm:$0xf] }
 0x4b2   : > { %v6770_v54 = vsel %vm1460_vm5, %v6769_v36, %v6768_v25  ;;  %v5761_v34 = vperm.slane %v5527_v53, 0 }
 0x4b3   : > { %v6823_v56 = vrot.slane %v6611_v20, 5  ;;  %v5521_v20 = vld [vmem:[%s13386_s26 + $0x5c] sm:$0xf]  ;;  %v6772_v16 = vsel %vm1462_vm6, %v6771_v15, %v6770_v54 }
 0x4b4   : > { %v6774_v36 = vsel %vm1464_vm7, %v6773_v3, %v6772_v16  ;;  %5425 = vmatpush.bf16.msrb.mxu2 %v10553_v51  ;;  %v5529_v54 = vld [vmem:[%s13386_s26 + $0x7c] sm:$0xf]  ;;  %v5737_v24 = vperm.slane %v5521_v20, 0  ;;  %v5745_v3 = vperm.slane %v5523_v63, 0  ;;  %v5749_v16 = vperm.slane %v5524_v21, 0 }
 0x4b5   : > { %v6776_v25 = vsel %vm1466_vm8, %v6775_v31, %v6774_v36  ;;  %v5769_v31 = vperm.slane %v5529_v54, 0  ;;  %v6101_v36 = vpack.c.bf16 %v5709_v50, %v5709_v50  ;;  %v6133_v21 = vpack.c.bf16 %v5741_v2, %v5741_v2 }
 0x4b6   : > { %v6129_v63 = vpack.c.bf16 %v5737_v24, %v5737_v24 }
 0x4b7   : > { %v6631_v54 = vunpack.c.l.b16 %v6101_v36 }
 0x4d4   : > { %v5367_v28 = vpop.f32.mrf.mxu3 }
 0x4d5   : > { %v5368_v30 = vadd.f32 %v5367_v28, %v13361_v32  ;;  %v5518_v32 = vld [vmem:[%s13386_s26 + $0x50] sm:$0xf]  ;;  %v6822_v28 = vsel %vm1456_vm3, %v6821_v14, %v6820_v57  ;;  %v5528_v57 = vld [vmem:[%s13386_s26 + $0x78] sm:$0xf] }
 0x4d6   : > { %v6824_v41 = vsel %vm1458_vm4, %v6823_v56, %v6822_v28  ;;  %v5526_v14 = vld [vmem:[%s13386_s26 + $0x70] sm:$0xf]  ;;  %v5733_v28 = vperm.slane %v5520_v55, 0 }
 0x4d7   : > { %v6826_v7 = vsel %vm1460_vm5, %v6825_v9, %v6824_v41  ;;  %v5753_v41 = vperm.slane %v5525_v48, 0  ;;  %v6141_v48 = vpack.c.bf16 %v5749_v16, %v5749_v16 }
 0x4d8   : > { %v6828_v56 = vsel %vm1462_vm6, %v6827_v58, %v6826_v7  ;;  %v6105_v7 = vpack.c.bf16 %v5713_v10, %v5713_v10  ;;  %v6125_v59 = vpack.c.bf16 %v5733_v28, %v5733_v28 }
 0x4d9   : > { %v6671_v28 = vunpack.c.l.b16 %v6141_v48 }
 0x4da   : > { %v6635_v50 = vunpack.c.l.b16 %v6105_v7 }
 0x4dc   : > { %v5369_v15 = vpop.f32.mrf.mxu3 }
 0x4dd   : > { %v5380_v61 = vpop.f32.mrf.mxu0  ;;  %v5765_v15 = vperm.slane %v5528_v57, 0  ;;  %v6161_v57 = vpack.c.bf16 %v5769_v31, %v5769_v31 }
 0x4de   : > { %v13498_v27 = vadd.f32 %v5380_v61, %v5368_v30  ;;  %v5721_v30 = vperm.slane %v13481_v44, 0  ;;  %v5725_v61 = vperm.slane %v5518_v32, 0  ;;  %v6830_v44 = vsel %vm1464_vm7, %v6829_v12, %v6828_v56 }
 0x4df   : > { %v6832_v9 = vsel %vm1466_vm8, %v6831_v22, %v6830_v44  ;;  %v5757_v32 = vperm.slane %v5526_v14, 0  ;;  %v6121_v12 = vpack.c.bf16 %v5729_v45, %v5729_v45  ;;  %v6137_v22 = vpack.c.bf16 %v5745_v3, %v5745_v3 }
 0x4e0   : > { %v13521_v51 = vpack.c.b16 %v6832_v9, %v6776_v25  ;;  %v6113_v55 = vpack.c.bf16 %v5721_v30, %v5721_v30  ;;  %v6117_v20 = vpack.c.bf16 %v5725_v61, %v5725_v61  ;;  %v6145_v14 = vpack.c.bf16 %v5753_v41, %v5753_v41 }
 0x4e1   : > { %v6149_v53 = vpack.c.bf16 %v5757_v32, %v5757_v32  ;;  %v6153_v25 = vpack.c.bf16 %v5761_v34, %v5761_v34  ;;  %v6157_v56 = vpack.c.bf16 %v5765_v15, %v5765_v15  ;;  %v6639_v44 = vunpack.c.l.b16 %v6109_v62  ;;  %v9932_v34 = vld [vmem:[%s15503_s10 + $0x1e0] sm:$0xf]  ;;  %v10617_v62 = vld [vmem:[%s15503_s10 + $0x1ec] sm:$0xf0] }
 0x4e2   : > { %7779 = vmatmul.bf16.vlgmr.msrb.gmra.mxu3 %v13521_v51  ;;  %v6643_v10 = vunpack.c.l.b16 %v6113_v55  ;;  %v6647_v46 = vunpack.c.l.b16 %v6117_v20  ;;  %v6651_v30 = vunpack.c.l.b16 %v6121_v12  ;;  %v6655_v61 = vunpack.c.l.b16 %v6125_v59  ;;  %v10060_v55 = vld [vmem:[%s15503_s10 + $0x2e0] sm:$0xf]  ;;  %v10649_v20 = vld [vmem:[%s15503_s10 + $0x2ec] sm:$0xf0] }
 0x4e3   : > { %v6659_v9 = vunpack.c.l.b16 %v6129_v63  ;;  %v6667_v45 = vunpack.c.l.b16 %v6137_v22  ;;  %v6675_v24 = vunpack.c.l.b16 %v6145_v14  ;;  %v6679_v2 = vunpack.c.l.b16 %v6149_v53  ;;  %v13539_v12 = vld [vmem:[%s15503_s10 + $0x1c0] sm:$0xf]  ;;  %v13544_v59 = vld [vmem:[%s15503_s10 + $0x1cc] sm:$0xf0] }
 0x4e4   : > { %v6683_v3 = vunpack.c.l.b16 %v6153_v25  ;;  %v6687_v16 = vunpack.c.l.b16 %v6157_v56  ;;  %v6691_v41 = vunpack.c.l.b16 %v6161_v57  ;;  %v6875_v32 = vrot.slane %v6635_v50, 7  ;;  %v13550_v14 = vld [vmem:[%s15503_s10 + $0x2c0] sm:$0xf]  ;;  %v13555_v53 = vld [vmem:[%s15503_s10 + $0x2cc] sm:$0xf0] }
 0x4e5   : > { %v5382_v58 = vpop.f32.mrf.mxu0  ;;  %v6877_v15 = vrot.slane %v6639_v44, 6  ;;  %v6879_v31 = vrot.slane %v6643_v10, 5  ;;  %v6881_v36 = vrot.slane %v6647_v46, 4  ;;  %v6883_v7 = vrot.slane %v6651_v30, 3  ;;  %v10188_v25 = vld [vmem:[%s15503_s10 + $0x3e0] sm:$0xf] }
 0x4e6   : > { %v6663_v58 = vunpack.c.l.b16 %v6133_v21  ;;  %v6876_v63 = vsel %vm1454_vm2, %v6875_v32, %v6631_v54  ;;  %v6885_v21 = vrot.slane %v6655_v61, 2  ;;  %v6887_v22 = vrot.slane %v6659_v9, 1  ;;  %v10681_v56 = vld [vmem:[%s15503_s10 + $0x3ec] sm:$0xf0]  ;;  %v13567_v10 = vld [vmem:[%s15503_s10 + $0x1a0] sm:$0xf] }
 0x4e7   : > { %v6931_v48 = vrot.slane %v6667_v45, 7  ;;  %v6878_v57 = vsel %vm1456_vm3, %v6877_v15, %v6876_v63  ;;  %v6933_v54 = vrot.slane %v6671_v28, 6  ;;  %v6935_v50 = vrot.slane %v6675_v24, 5  ;;  %v13572_v46 = vld [vmem:[%s15503_s10 + $0x1ac] sm:$0xf0] }
 0x4e8   : > { %v6937_v44 = vrot.slane %v6679_v2, 4  ;;  %v13577_v30 = vld [vmem:[%s15503_s10 + $0x2a0] sm:$0xf]  ;;  %v13582_v61 = vld [vmem:[%s15503_s10 + $0x2ac] sm:$0xf0]  ;;  %v6880_v9 = vsel %vm1458_vm4, %v6879_v31, %v6878_v57  ;;  %v6939_v28 = vrot.slane %v6683_v3, 3  ;;  %v9933_v57 = vor.u32 %v10617_v62, %v9932_v34 }
 0x4e9   : > { %v6932_v45 = vsel %vm1454_vm2, %v6931_v48, %v6663_v58  ;;  %v6941_v24 = vrot.slane %v6687_v16, 2  ;;  %v10172_v2 = vld [vmem:[%s15503_s10 + $0x3c0] sm:$0xf]  ;;  %v10677_v32 = vld [vmem:[%s15503_s10 + $0x3cc] sm:$0xf0]  ;;  %v6882_v15 = vsel %vm1460_vm5, %v6881_v36, %v6880_v9  ;;  %v6943_v31 = vrot.slane %v6691_v41, 1 }
 0x4ea   : > { %v6934_v63 = vsel %vm1456_vm3, %v6933_v54, %v6932_v45  ;;  %v13597_v58 = vld [vmem:[%s15503_s10 + $0x180] sm:$0xf]  ;;  %v13602_v3 = vld [vmem:[%s15503_s10 + $0x18c] sm:$0xf0]  ;;  %v6884_v16 = vsel %vm1462_vm6, %v6883_v7, %v6882_v15  ;;  %v10061_v36 = vor.u32 %v10649_v20, %v10060_v55  ;;  %v9917_v34 = vor.u32 %v13544_v59, %v13539_v12  ;;  %v5531_v48 = vld [vmem:[%s13386_s26 + $0x84] sm:$0xf]  ;;  %7799 = vmatpush.bf16.msra.mxu0 %v9933_v57 }
 0x4eb   : > { %v6936_v41 = vsel %vm1458_vm4, %v6935_v50, %v6934_v63  ;;  %v5530_v62 = vld [vmem:[%s13386_s26 + $0x80] sm:$0xf]  ;;  %v5532_v54 = vld [vmem:[%s13386_s26 + $0x88] sm:$0xf]  ;;  %v6886_v9 = vsel %vm1464_vm7, %v6885_v21, %v6884_v16  ;;  %v10045_v7 = vor.u32 %v13555_v53, %v13550_v14  ;;  %v10189_v50 = vor.u32 %v10681_v56, %v10188_v25  ;;  %v5533_v55 = vld [vmem:[%s13386_s26 + $0x8c] sm:$0xf] }
 0x4ec   : > { %v6938_v45 = vsel %vm1460_vm5, %v6937_v44, %v6936_v41  ;;  %v5534_v20 = vld [vmem:[%s13386_s26 + $0x90] sm:$0xf]  ;;  %v5538_v15 = vld [vmem:[%s13386_s26 + $0xa0] sm:$0xf]  ;;  %v5539_v12 = vld [vmem:[%s13386_s26 + $0xa4] sm:$0xf]  ;;  %v6888_v63 = vsel %vm1466_vm8, %v6887_v22, %v6886_v9  ;;  %7827 = vmatpush.bf16.msra.mxu1 %v10061_v36  ;;  %v9901_v44 = vor.u32 %v13572_v46, %v13567_v10  ;;  %v10029_v14 = vor.u32 %v13582_v61, %v13577_v30 }
 0x4ed   : > { %v5540_v59 = vld [vmem:[%s13386_s26 + $0xa8] sm:$0xf]  ;;  %v6940_v21 = vsel %vm1462_vm6, %v6939_v28, %v6938_v45  ;;  %v5535_v53 = vld [vmem:[%s13386_s26 + $0x94] sm:$0xf]  ;;  %v5536_v25 = vld [vmem:[%s13386_s26 + $0x98] sm:$0xf]  ;;  %7855 = vmatpush.bf16.msra.mxu2 %v10189_v50  ;;  %v10173_v41 = vor.u32 %v10677_v32, %v10172_v2  ;;  %v9885_v22 = vor.u32 %v13602_v3, %v13597_v58 }
 0x4ee   : > { %v5541_v56 = vld [vmem:[%s13386_s26 + $0xac] sm:$0xf]  ;;  %v5542_v57 = vld [vmem:[%s13386_s26 + $0xb0] sm:$0xf]  ;;  %v6942_v16 = vsel %vm1464_vm7, %v6941_v24, %v6940_v21  ;;  %v5537_v28 = vld [vmem:[%s13386_s26 + $0x9c] sm:$0xf]  ;;  %7800 = vmatpush.bf16.msra.mxu0 %v9917_v34 }
 0x4ef   : > { %v5543_v36 = vld [vmem:[%s13386_s26 + $0xb4] sm:$0xf]  ;;  %v5773_v9 = vperm.slane %v5530_v62, 0  ;;  %v6944_v10 = vsel %vm1466_vm8, %v6943_v31, %v6942_v16  ;;  %v5544_v46 = vld [vmem:[%s13386_s26 + $0xb8] sm:$0xf]  ;;  %v5777_v45 = vperm.slane %v5531_v48, 0 }
 0x4f0   : > { %v5781_v30 = vperm.slane %v5532_v54, 0  ;;  %v5785_v61 = vperm.slane %v5533_v55, 0  ;;  %v13637_v43 = vpack.c.b16 %v6944_v10, %v6888_v63  ;;  %v5789_v23 = vperm.slane %v5534_v20, 0  ;;  %7828 = vmatpush.bf16.msra.mxu1 %v10045_v7 }
 0x4f1   : > { %v5793_v24 = vperm.slane %v5535_v53, 0  ;;  %v5797_v50 = vperm.slane %v5536_v25, 0  ;;  %v5801_v2 = vperm.slane %v5537_v28, 0  ;;  %v5805_v32 = vperm.slane %v5538_v15, 0  ;;  %7856 = vmatpush.bf16.msra.mxu2 %v10173_v41 }
 0x4f2   : > { %v5809_v58 = vperm.slane %v5539_v12, 0  ;;  %v5813_v3 = vperm.slane %v5540_v59, 0  ;;  %7784 = vmatmul.bf16.gmra.mxu3 %v13637_v43  ;;  %v5817_v31 = vperm.slane %v5541_v56, 0  ;;  %v5821_v62 = vperm.slane %v5542_v57, 0  ;;  %7801 = vmatpush.bf16.msra.mxu0 %v9901_v44 }
 0x4f3   : > { %v5825_v48 = vperm.slane %v5543_v36, 0  ;;  %v5829_v54 = vperm.slane %v5544_v46, 0  ;;  %v5833_v55 = vperm.slane %v5545_v19, 0  ;;  %v6165_v63 = vpack.c.bf16 %v5773_v9, %v5773_v9 }
 0x4f4   : > { %v6169_v21 = vpack.c.bf16 %v5777_v45, %v5777_v45  ;;  %v6173_v34 = vpack.c.bf16 %v5781_v30, %v5781_v30  ;;  %v6177_v20 = vpack.c.bf16 %v5785_v61, %v5785_v61  ;;  %v6181_v53 = vpack.c.bf16 %v5789_v23, %v5789_v23  ;;  %7829 = vmatpush.bf16.msra.mxu1 %v10029_v14 }
 0x4f5   : > { %v6185_v25 = vpack.c.bf16 %v5793_v24, %v5793_v24  ;;  %v6189_v7 = vpack.c.bf16 %v5797_v50, %v5797_v50  ;;  %v6193_v15 = vpack.c.bf16 %v5801_v2, %v5801_v2  ;;  %v6197_v12 = vpack.c.bf16 %v5805_v32, %v5805_v32 }
 0x4f6   : > { %v6201_v59 = vpack.c.bf16 %v5809_v58, %v5809_v58  ;;  %v6205_v16 = vpack.c.bf16 %v5813_v3, %v5813_v3  ;;  %v6209_v28 = vpack.c.bf16 %v5817_v31, %v5817_v31  ;;  %v6213_v41 = vpack.c.bf16 %v5821_v62, %v5821_v62  ;;  %7802 = vmatpush.bf16.msra.mxu0 %v9885_v22  ;;  %v10012_v3 = vld [vmem:[%s15503_s10 + $0x280] sm:$0xf]  ;;  %v10637_v22 = vld [vmem:[%s15503_s10 + $0x28c] sm:$0xf0] }
 0x4f7   : > { %v6217_v56 = vpack.c.bf16 %v5825_v48, %v5825_v48  ;;  %v6221_v57 = vpack.c.bf16 %v5829_v54, %v5829_v54  ;;  %v6225_v36 = vpack.c.bf16 %v5833_v55, %v5833_v55  ;;  %v6695_v10 = vunpack.c.l.b16 %v6165_v63  ;;  %v10156_v55 = vld [vmem:[%s15503_s10 + $0x3a0] sm:$0xf]  ;;  %v10673_v63 = vld [vmem:[%s15503_s10 + $0x3ac] sm:$0xf0] }
 0x4f8   : > { %v6699_v19 = vunpack.c.l.b16 %v6169_v21  ;;  %v6703_v9 = vunpack.c.l.b16 %v6173_v34  ;;  %v6707_v46 = vunpack.c.l.b16 %v6177_v20  ;;  %v6711_v44 = vunpack.c.l.b16 %v6181_v53  ;;  %v10583_v21 = vld [vmem:[%s15503_s10 + $0xe4] sm:$0xf]  ;;  %v9806_v34 = vld [vmem:[%s15503_s10 + $0xf0] sm:$0xf0] }
 0x4f9   : > { %v6715_v45 = vunpack.c.l.b16 %v6185_v25  ;;  %v6719_v23 = vunpack.c.l.b16 %v6189_v7  ;;  %v6723_v30 = vunpack.c.l.b16 %v6193_v15  ;;  %v6727_v61 = vunpack.c.l.b16 %v6197_v12  ;;  %v9868_v15 = vld [vmem:[%s15503_s10 + $0x160] sm:$0xf]  ;;  %v10601_v12 = vld [vmem:[%s15503_s10 + $0x16c] sm:$0xf0] }
 0x4fa   : > { %v6731_v14 = vunpack.c.l.b16 %v6201_v59  ;;  %v6735_v24 = vunpack.c.l.b16 %v6205_v16  ;;  %v6739_v50 = vunpack.c.l.b16 %v6209_v28  ;;  %v6743_v2 = vunpack.c.l.b16 %v6213_v41  ;;  %v13668_v59 = vld [vmem:[%s15503_s10 + $0x260] sm:$0xf]  ;;  %v13673_v16 = vld [vmem:[%s15503_s10 + $0x26c] sm:$0xf0] }
 0x4fb   : > { %v6747_v32 = vunpack.c.l.b16 %v6217_v56  ;;  %v6751_v58 = vunpack.c.l.b16 %v6221_v57  ;;  %v6755_v31 = vunpack.c.l.b16 %v6225_v36  ;;  %v6987_v62 = vrot.slane %v6699_v19, 7  ;;  %v13679_v36 = vld [vmem:[%s15503_s10 + $0x380] sm:$0xf]  ;;  %v13684_v19 = vld [vmem:[%s15503_s10 + $0x38c] sm:$0xf0] }
 0x4fc   : > { %v6989_v48 = vrot.slane %v6703_v9, 6  ;;  %v6991_v54 = vrot.slane %v6707_v46, 5  ;;  %v6993_v20 = vrot.slane %v6711_v44, 4  ;;  %v6995_v53 = vrot.slane %v6715_v45, 3 }
 0x4fd   : > { %v6997_v25 = vrot.slane %v6719_v23, 2  ;;  %v6999_v7 = vrot.slane %v6723_v30, 1  ;;  %v6988_v28 = vsel %vm1454_vm2, %v6987_v62, %v6695_v10  ;;  %v7043_v41 = vrot.slane %v6731_v14, 7  ;;  %v10579_v10 = vld [vmem:[%s15503_s10 + $0xc4] sm:$0xf] }
 0x4fe   : > { %v7045_v56 = vrot.slane %v6735_v24, 6  ;;  %v7047_v57 = vrot.slane %v6739_v50, 5  ;;  %v6990_v9 = vsel %vm1456_vm3, %v6989_v48, %v6988_v28  ;;  %v7049_v46 = vrot.slane %v6743_v2, 4  ;;  %v9790_v23 = vld [vmem:[%s15503_s10 + $0xd0] sm:$0xf0] }
 0x4ff   : > { %v7051_v44 = vrot.slane %v6747_v32, 3  ;;  %v7053_v45 = vrot.slane %v6751_v58, 2  ;;  %v13696_v30 = vld [vmem:[%s15503_s10 + $0x140] sm:$0xf]  ;;  %v13701_v14 = vld [vmem:[%s15503_s10 + $0x14c] sm:$0xf0]  ;;  %v6992_v24 = vsel %vm1458_vm4, %v6991_v54, %v6990_v9  ;;  %v7044_v50 = vsel %vm1454_vm2, %v7043_v41, %v6727_v61 }
 0x500   : > { %v7055_v2 = vrot.slane %v6755_v31, 1  ;;  %v10013_v32 = vor.u32 %v10637_v22, %v10012_v3  ;;  %v13708_v58 = vld [vmem:[%s15503_s10 + $0x240] sm:$0xf]  ;;  %v13713_v62 = vld [vmem:[%s15503_s10 + $0x24c] sm:$0xf0]  ;;  %v6994_v54 = vsel %vm1460_vm5, %v6993_v20, %v6992_v24  ;;  %v7046_v28 = vsel %vm1456_vm3, %v7045_v56, %v7044_v50 }
 0x501   : > { %v13718_v48 = vld [vmem:[%s15503_s10 + $0x360] sm:$0xf]  ;;  %v13723_v61 = vld [vmem:[%s15503_s10 + $0x36c] sm:$0xf0]  ;;  %v13728_v3 = vld [vmem:[%s15503_s10 + $0xa4] sm:$0xf]  ;;  %v10157_v41 = vor.u32 %v10673_v63, %v10156_v55  ;;  %v9809_v9 = vor.u32 %v10583_v21, %v9806_v34  ;;  %v6996_v20 = vsel %vm1462_vm6, %v6995_v53, %v6994_v54  ;;  %v7048_v55 = vsel %vm1458_vm4, %v7047_v57, %v7046_v28 }
 0x502   : > { %v13733_v22 = vld [vmem:[%s15503_s10 + $0xb0] sm:$0xf0]  ;;  %v5546_v31 = vld [vmem:[%s13386_s26 + $0xc0] sm:$0xf]  ;;  %7830 = vmatpush.bf16.msra.mxu1 %v10013_v32  ;;  %v9869_v63 = vor.u32 %v10601_v12, %v9868_v15  ;;  %v9997_v21 = vor.u32 %v13673_v16, %v13668_v59  ;;  %v13760_v34 = vld [vmem:[%s15503_s10 + $0x22c] sm:$0xf0]  ;;  %v6998_v15 = vsel %vm1464_vm7, %v6997_v25, %v6996_v20  ;;  %v7050_v12 = vsel %vm1460_vm5, %v7049_v46, %v7048_v55 }
 0x503   : > { %v13765_v56 = vld [vmem:[%s15503_s10 + $0x340] sm:$0xf]  ;;  %v13770_v53 = vld [vmem:[%s15503_s10 + $0x34c] sm:$0xf0]  ;;  %7857 = vmatpush.bf16.msra.mxu2 %v10157_v41  ;;  %7883 = vmatpush.bf16.msra.mxu3 %v9809_v9  ;;  %v10141_v59 = vor.u32 %v13684_v19, %v13679_v36  ;;  %v13779_v16 = vld [vmem:[%s15503_s10 + $0x84] sm:$0xf]  ;;  %v7000_v25 = vsel %vm1466_vm8, %v6999_v7, %v6998_v15  ;;  %v7052_v46 = vsel %vm1462_vm6, %v7051_v44, %v7050_v12 }
 0x504   : > { %v13784_v57 = vld [vmem:[%s15503_s10 + $0x90] sm:$0xf0]  ;;  %v5837_v24 = vperm.slane %v5546_v31, 0  ;;  %7803 = vmatpush.bf16.msra.mxu0 %v9869_v63  ;;  %v9793_v50 = vor.u32 %v10579_v10, %v9790_v23  ;;  %v9853_v36 = vor.u32 %v13701_v14, %v13696_v30  ;;  %v13793_v19 = vld [vmem:[%s15503_s10 + $0x100] sm:$0xf]  ;;  %v7054_v44 = vsel %vm1464_vm7, %v7053_v45, %v7052_v46 }
 0x505   : > { %v13798_v32 = vld [vmem:[%s15503_s10 + $0x10c] sm:$0xf0]  ;;  %v13803_v7 = vld [vmem:[%s15503_s10 + $0x200] sm:$0xf]  ;;  %v9981_v10 = vor.u32 %v13713_v62, %v13708_v58  ;;  %v10125_v23 = vor.u32 %v13723_v61, %v13718_v48  ;;  %v9777_v30 = vor.u32 %v13728_v3, %v13733_v22  ;;  %v7056_v58 = vsel %vm1466_vm8, %v7055_v2, %v7054_v44 }
 0x506   : > { %v13815_v14 = vld [vmem:[%s15503_s10 + $0x20c] sm:$0xf0]  ;;  %v13820_v31 = vld [vmem:[%s15503_s10 + $0x320] sm:$0xf]  ;;  %7831 = vmatpush.bf16.msra.mxu1 %v9997_v21  ;;  %v9837_v62 = vor.u32 %v13746_v5, %v13741_v33  ;;  %v9965_v48 = vor.u32 %v13760_v34, %v13751_v47  ;;  %v10109_v61 = vor.u32 %v13770_v53, %v13765_v56  ;;  %v13834_v22 = vpack.c.b16 %v7056_v58, %v7000_v25 }
 0x507   : > { %v13825_v45 = vld [vmem:[%s15503_s10 + $0x32c] sm:$0xf0]  ;;  %7858 = vmatpush.bf16.msra.mxu2 %v10141_v59  ;;  %7884 = vmatpush.bf16.msra.mxu3 %v9793_v50  ;;  %v9761_v54 = vor.u32 %v13779_v16, %v13784_v57  ;;  %v9821_v2 = vor.u32 %v13798_v32, %v13793_v19  ;;  %v5646_v28 = vperm.slane %v13407_v60, 1  ;;  %v6229_v33 = vpack.c.bf16 %v5837_v24, %v5837_v24 }
 0x508   : > { %7804 = vmatpush.bf16.msra.mxu0 %v9853_v36  ;;  %v9949_v47 = vor.u32 %v13815_v14, %v13803_v7  ;;  %v10093_v41 = vor.u32 %v13825_v45, %v13820_v31  ;;  %7789 = vmatmul.bf16.gmra.mxu3 %v13834_v22  ;;  %v5650_v9 = vperm.slane %v13410_v8, 1  ;;  %v5654_v20 = vperm.slane %v13413_v42, 1 }
 0x509   : > { %v5658_v55 = vperm.slane %v13416_v26, 1  ;;  %v5662_v63 = vperm.slane %v13419_v52, 1  ;;  %v5666_v34 = vperm.slane %v13422_v49, 1  ;;  %v5670_v56 = vperm.slane %v13425_v29, 1 }
 0x50a   : > { %7832 = vmatpush.bf16.msra.mxu1 %v9981_v10  ;;  %v5674_v53 = vperm.slane %v13428_v1, 1  ;;  %v5678_v15 = vperm.slane %v13431_v6, 1  ;;  %v5682_v12 = vperm.slane %v13434_v38, 1  ;;  %v5686_v59 = vperm.slane %v13437_v17, 1 }
 0x50b   : > { %7859 = vmatpush.bf16.msra.mxu2 %v10125_v23  ;;  %7885 = vmatpush.bf16.msra.mxu3 %v9777_v30  ;;  %v5690_v24 = vperm.slane %v13440_v37, 1  ;;  %v5694_v25 = vperm.slane %v13443_v11, 1  ;;  %v5698_v46 = vperm.slane %v13446_v35, 1  ;;  %v5702_v50 = vperm.slane %v13449_v4, 1 }
 0x50c   : > { %7805 = vmatpush.bf16.msra.mxu0 %v9837_v62  ;;  %v5706_v36 = vperm.slane %v13452_v0, 1  ;;  %v6038_v19 = vpack.c.bf16 %v5646_v28, %v5646_v28  ;;  %v6042_v32 = vpack.c.bf16 %v5650_v9, %v5650_v9  ;;  %v6046_v7 = vpack.c.bf16 %v5654_v20, %v5654_v20 }
 0x50d   : > { %v6050_v44 = vpack.c.bf16 %v5658_v55, %v5658_v55  ;;  %v5647_v10 = vperm.slane %v13407_v60, 2  ;;  %v6054_v30 = vpack.c.bf16 %v5662_v63, %v5662_v63  ;;  %v6058_v14 = vpack.c.bf16 %v5666_v34, %v5666_v34 }
 0x50e   : > { %v5393_v3 = vpop.f32.mrf.mxu1  ;;  %7833 = vmatpush.bf16.msra.mxu1 %v9965_v48  ;;  %v6062_v31 = vpack.c.bf16 %v5670_v56, %v5670_v56  ;;  %v6568_v45 = vunpack.c.l.b16 %v6038_v19  ;;  %v6066_v58 = vpack.c.bf16 %v5674_v53, %v5674_v53  ;;  %v6070_v62 = vpack.c.bf16 %v5678_v15, %v5678_v15 }
 0x50f   : > { %v5394_v5 = vadd.f32 %v5393_v3, %v13498_v27  ;;  %v6759_v27 = vunpack.c.l.b16 %v6229_v33  ;;  %7860 = vmatpush.bf16.msra.mxu2 %v10109_v61  ;;  %7886 = vmatpush.bf16.msra.mxu3 %v9761_v54  ;;  %v6074_v3 = vpack.c.bf16 %v5682_v12, %v5682_v12  ;;  %v6078_v28 = vpack.c.bf16 %v5686_v59, %v5686_v59 }
 0x510   : > { %7806 = vmatpush.bf16.msra.mxu0 %v9821_v2  ;;  %v6086_v33 = vpack.c.bf16 %v5694_v25, %v5694_v25  ;;  %v6090_v48 = vpack.c.bf16 %v5698_v46, %v5698_v46  ;;  %v6094_v9 = vpack.c.bf16 %v5702_v50, %v5702_v50  ;;  %v6098_v20 = vpack.c.bf16 %v5706_v36, %v5706_v36 }
 0x511   : > { %v5397_v21 = vmax.f32 %v5394_v5, 0.0  ;;  %v13857_v57 = vpack.c.b16 %v6759_v27, %v6759_v27  ;;  %v6082_v5 = vpack.c.bf16 %v5690_v24, %v5690_v24  ;;  %v6572_v55 = vunpack.c.l.b16 %v6042_v32 }
 0x512   : > { %7834 = vmatpush.bf16.msra.mxu1 %v9949_v47  ;;  %v6580_v27 = vunpack.c.l.b16 %v6050_v44  ;;  %v6584_v61 = vunpack.c.l.b16 %v6054_v30  ;;  %v6588_v54 = vunpack.c.l.b16 %v6058_v14  ;;  %v6592_v63 = vunpack.c.l.b16 %v6062_v31  ;;  %v9742_v44 = vld [vmem:[%s15503_s10 + $0x70] sm:$0xf0] }
 0x513   : > { %v5398_v16 = vpack.c.bf16 %v5397_v21, %v5397_v21  ;;  %v6576_v21 = vunpack.c.l.b16 %v6046_v7  ;;  %7861 = vmatpush.bf16.msra.mxu2 %v10093_v41  ;;  %v6596_v34 = vunpack.c.l.b16 %v6066_v58  ;;  %v6600_v56 = vunpack.c.l.b16 %v6070_v62  ;;  %v10567_v41 = vld [vmem:[%s15503_s10 + $0x64] sm:$0xf] }
 0x514   : > { %v6604_v2 = vunpack.c.l.b16 %v6074_v3  ;;  %v6608_v53 = vunpack.c.l.b16 %v6078_v28  ;;  %v6612_v15 = vunpack.c.l.b16 %v6082_v5  ;;  %v6616_v12 = vunpack.c.l.b16 %v6086_v33 }
 0x515   : > { %9689 = vmatmul.msk.bf16.vlgmr.msrb.gmra.mxu2 %vm2105_vm13, %v5398_v16  ;;  %v6620_v59 = vunpack.c.l.b16 %v6090_v48  ;;  %v6624_v16 = vunpack.c.l.b16 %v6094_v9  ;;  %v6628_v24 = vunpack.c.l.b16 %v6098_v20  ;;  %v6777_v25 = vrot.slane %v6572_v55, 7 }
 0x516   : > { %v5395_v23 = vpop.f32.mrf.mxu1  ;;  %v6779_v46 = vrot.slane %v6576_v21, 6  ;;  %v6781_v47 = vrot.slane %v6580_v27, 5  ;;  %v6783_v50 = vrot.slane %v6584_v61, 4  ;;  %v6785_v36 = vrot.slane %v6588_v54, 3 }
 0x517   : > { %v6787_v19 = vrot.slane %v6592_v63, 2  ;;  %v6789_v32 = vrot.slane %v6596_v34, 1  ;;  %v6833_v7 = vrot.slane %v6604_v2, 7  ;;  %v6778_v23 = vsel %vm1454_vm2, %v6777_v25, %v6568_v45 }
 0x518   : > { %v6835_v30 = vrot.slane %v6608_v53, 6  ;;  %v6837_v14 = vrot.slane %v6612_v15, 5  ;;  %v6839_v31 = vrot.slane %v6616_v12, 4  ;;  %7794 = vmatmul.bf16.gmra.mxu3 %v13857_v57  ;;  %v6780_v58 = vsel %vm1456_vm3, %v6779_v46, %v6778_v23 }
 0x519   : > { %v6834_v62 = vsel %vm1454_vm2, %v6833_v7, %v6600_v56  ;;  %v6841_v3 = vrot.slane %v6620_v59, 3  ;;  %v6843_v28 = vrot.slane %v6624_v16, 2  ;;  %v6782_v5 = vsel %vm1458_vm4, %v6781_v47, %v6780_v58 }
 0x51a   : > { %v6836_v33 = vsel %vm1456_vm3, %v6835_v30, %v6834_v62  ;;  %v6845_v48 = vrot.slane %v6628_v24, 1  ;;  %v9745_v9 = vor.u32 %v10567_v41, %v9742_v44  ;;  %v6784_v20 = vsel %vm1460_vm5, %v6783_v50, %v6782_v5 }
 0x51b   : > { %v6838_v45 = vsel %vm1458_vm4, %v6837_v14, %v6836_v33  ;;  %v5651_v55 = vperm.slane %v13410_v8, 2  ;;  %v5655_v21 = vperm.slane %v13413_v42, 2  ;;  %v6786_v27 = vsel %vm1462_vm6, %v6785_v36, %v6784_v20  ;;  %v10076_v20 = vld [vmem:[%s15503_s10 + $0x300] sm:$0xf] }
 0x51c   : > { %v6840_v61 = vsel %vm1460_vm5, %v6839_v31, %v6838_v45  ;;  %7887 = vmatpush.bf16.msra.mxu3 %v9745_v9  ;;  %v5659_v54 = vperm.slane %v13416_v26, 2  ;;  %v5663_v63 = vperm.slane %v13419_v52, 2  ;;  %v6788_v34 = vsel %vm1464_vm7, %v6787_v19, %v6786_v27 }
 0x51d   : > { %v6842_v56 = vsel %vm1462_vm6, %v6841_v3, %v6840_v61  ;;  %v5667_v2 = vperm.slane %v13422_v49, 2  ;;  %v5671_v53 = vperm.slane %v13425_v29, 2  ;;  %v6790_v8 = vsel %vm1466_vm8, %v6789_v32, %v6788_v34  ;;  %v10653_v61 = vld [vmem:[%s15503_s10 + $0x30c] sm:$0xf0] }
 0x51e   : > { %v6844_v42 = vsel %vm1464_vm7, %v6843_v28, %v6842_v56  ;;  %v5675_v15 = vperm.slane %v13428_v1, 2  ;;  %v5679_v12 = vperm.slane %v13431_v6, 2  ;;  %v5683_v52 = vperm.slane %v13434_v38, 2 }
 0x51f   : > { %v6846_v26 = vsel %vm1466_vm8, %v6845_v48, %v6844_v42  ;;  %v5687_v59 = vperm.slane %v13437_v17, 2  ;;  %v5691_v16 = vperm.slane %v13440_v37, 2  ;;  %v5695_v49 = vperm.slane %v13443_v11, 2 }
 0x520   : > { %v13898_v24 = vpack.c.b16 %v6846_v26, %v6790_v8  ;;  %v5699_v29 = vperm.slane %v13446_v35, 2  ;;  %v5703_v25 = vperm.slane %v13449_v4, 2  ;;  %v5707_v1 = vperm.slane %v13452_v0, 2 }
 0x521   : > { %v6039_v6 = vpack.c.bf16 %v5647_v10, %v5647_v10  ;;  %v6043_v46 = vpack.c.bf16 %v5651_v55, %v5651_v55  ;;  %v6047_v38 = vpack.c.bf16 %v5655_v21, %v5655_v21  ;;  %v6051_v17 = vpack.c.bf16 %v5659_v54, %v5659_v54 }
 0x522   : > { %7807 = vmatmul.bf16.vlgmr.msra.gmra.mxu0 %v13898_v24  ;;  %v6055_v37 = vpack.c.bf16 %v5663_v63, %v5663_v63  ;;  %v6059_v47 = vpack.c.bf16 %v5667_v2, %v5667_v2  ;;  %v6063_v50 = vpack.c.bf16 %v5671_v53, %v5671_v53  ;;  %v6067_v41 = vpack.c.bf16 %v5675_v15, %v5675_v15  ;;  %v10563_v2 = vld [vmem:[%s15503_s10 + $0x44] sm:$0xf] }
 0x523   : > { %v6071_v11 = vpack.c.bf16 %v5679_v12, %v5679_v12  ;;  %v6075_v36 = vpack.c.bf16 %v5683_v52, %v5683_v52  ;;  %v6079_v35 = vpack.c.bf16 %v5687_v59, %v5687_v59  ;;  %v6083_v19 = vpack.c.bf16 %v5691_v16, %v5691_v16  ;;  %v9726_v12 = vld [vmem:[%s15503_s10 + $0x50] sm:$0xf0] }
 0x524   : > { %v6087_v4 = vpack.c.bf16 %v5695_v49, %v5695_v49  ;;  %v6091_v32 = vpack.c.bf16 %v5699_v29, %v5699_v29  ;;  %v6095_v0 = vpack.c.bf16 %v5703_v25, %v5703_v25  ;;  %v6099_v7 = vpack.c.bf16 %v5707_v1, %v5707_v1 }
 0x525   : > { %v6569_v60 = vunpack.c.l.b16 %v6039_v6  ;;  %v6573_v44 = vunpack.c.l.b16 %v6043_v46  ;;  %v6577_v10 = vunpack.c.l.b16 %v6047_v38  ;;  %v6581_v23 = vunpack.c.l.b16 %v6051_v17  ;;  %v10762_v17 = vld [vmem:[%s13386_s26] sm:$0xf] }
 0x526   : > { %v6585_v30 = vunpack.c.l.b16 %v6055_v37  ;;  %v6589_v14 = vunpack.c.l.b16 %v6059_v47  ;;  %v6593_v31 = vunpack.c.l.b16 %v6063_v50  ;;  %v6597_v58 = vunpack.c.l.b16 %v6067_v41  ;;  %v10763_v41 = vld [vmem:[%s13386_s26 + $0x4] sm:$0xf] }
 0x527   : > { %v6601_v62 = vunpack.c.l.b16 %v6071_v11  ;;  %v6605_v3 = vunpack.c.l.b16 %v6075_v36  ;;  %v6609_v28 = vunpack.c.l.b16 %v6079_v35  ;;  %v6613_v5 = vunpack.c.l.b16 %v6083_v19  ;;  %v10764_v36 = vld [vmem:[%s13386_s26 + $0x8] sm:$0xf] }
 0x528   : > { %v6617_v33 = vunpack.c.l.b16 %v6087_v4  ;;  %v6621_v48 = vunpack.c.l.b16 %v6091_v32  ;;  %v6625_v9 = vunpack.c.l.b16 %v6095_v0  ;;  %v6629_v45 = vunpack.c.l.b16 %v6099_v7  ;;  %v10765_v32 = vld [vmem:[%s13386_s26 + $0xc] sm:$0xf]  ;;  %v10766_v7 = vld [vmem:[%s13386_s26 + $0x10] sm:$0xf] }
 0x529   : > { %v6791_v55 = vrot.slane %v6573_v44, 7  ;;  %v6793_v21 = vrot.slane %v6577_v10, 6  ;;  %v6795_v27 = vrot.slane %v6581_v23, 5  ;;  %v6797_v54 = vrot.slane %v6585_v30, 4  ;;  %v10767_v23 = vld [vmem:[%s13386_s26 + $0x14] sm:$0xf] }
 0x52a   : > { %v6799_v63 = vrot.slane %v6589_v14, 3  ;;  %v6801_v34 = vrot.slane %v6593_v31, 2  ;;  %v6803_v56 = vrot.slane %v6597_v58, 1  ;;  %v6847_v8 = vrot.slane %v6605_v3, 7  ;;  %v10768_v14 = vld [vmem:[%s13386_s26 + $0x18] sm:$0xf] }
 0x52b   : > { %v6792_v53 = vsel %vm1454_vm2, %v6791_v55, %v6569_v60  ;;  %v6849_v42 = vrot.slane %v6609_v28, 6  ;;  %v6851_v15 = vrot.slane %v6613_v5, 5  ;;  %v6853_v52 = vrot.slane %v6617_v33, 4  ;;  %v10770_v28 = vld [vmem:[%s13386_s26 + $0x20] sm:$0xf] }
 0x52c   : > { %v6794_v26 = vsel %vm1456_vm3, %v6793_v21, %v6792_v53  ;;  %v6855_v59 = vrot.slane %v6621_v48, 3  ;;  %v6857_v16 = vrot.slane %v6625_v9, 2  ;;  %v6848_v29 = vsel %vm1454_vm2, %v6847_v8, %v6601_v62  ;;  %v10769_v62 = vld [vmem:[%s13386_s26 + $0x1c] sm:$0xf]  ;;  %v10771_v33 = vld [vmem:[%s13386_s26 + $0x24] sm:$0xf] }
 0x52d   : > { %v6796_v49 = vsel %vm1458_vm4, %v6795_v27, %v6794_v26  ;;  %v6859_v25 = vrot.slane %v6629_v45, 1  ;;  %v10077_v1 = vor.u32 %v10653_v61, %v10076_v20  ;;  %v6850_v46 = vsel %vm1456_vm3, %v6849_v42, %v6848_v29  ;;  %v10772_v20 = vld [vmem:[%s13386_s26 + $0x28] sm:$0xf]  ;;  %v10773_v55 = vld [vmem:[%s13386_s26 + $0x2c] sm:$0xf] }
 0x52e   : > { %v6798_v6 = vsel %vm1460_vm5, %v6797_v54, %v6796_v49  ;;  %v9729_v38 = vor.u32 %v10563_v2, %v9726_v12  ;;  %v5648_v37 = vperm.slane %v10762_v17, 3  ;;  %v6852_v50 = vsel %vm1458_vm4, %v6851_v15, %v6850_v46  ;;  %v10774_v27 = vld [vmem:[%s13386_s26 + $0x30] sm:$0xf]  ;;  %v10777_v53 = vld [vmem:[%s13386_s26 + $0x3c] sm:$0xf] }
 0x52f   : > { %v6800_v47 = vsel %vm1462_vm6, %v6799_v63, %v6798_v6  ;;  %7862 = vmatpush.bf16.msra.mxu2 %v10077_v1  ;;  %v5652_v11 = vperm.slane %v10763_v41, 3  ;;  %v5656_v35 = vperm.slane %v10764_v36, 3  ;;  %v6854_v4 = vsel %vm1460_vm5, %v6853_v52, %v6852_v50  ;;  %v10775_v63 = vld [vmem:[%s13386_s26 + $0x34] sm:$0xf] }
 0x530   : > { %v6802_v19 = vsel %vm1464_vm7, %v6801_v34, %v6800_v47  ;;  %7888 = vmatpush.bf16.msra.mxu3 %v9729_v38  ;;  %v5660_v0 = vperm.slane %v10765_v32, 3  ;;  %v5664_v60 = vperm.slane %v10766_v7, 3  ;;  %v6856_v10 = vsel %vm1462_vm6, %v6855_v59, %v6854_v4 }
 0x531   : > { %v6804_v44 = vsel %vm1466_vm8, %v6803_v56, %v6802_v19  ;;  %v5668_v30 = vperm.slane %v10767_v23, 3  ;;  %v5672_v31 = vperm.slane %v10768_v14, 3  ;;  %v6858_v58 = vsel %vm1464_vm7, %v6857_v16, %v6856_v10  ;;  %v10776_v56 = vld [vmem:[%s13386_s26 + $0x38] sm:$0xf]  ;;  %v10679_v14 = vld [vmem:[%s15503_s10 + $0x3e4] sm:$0xf] }
 0x532   : > { %v5676_v3 = vperm.slane %v10769_v62, 3  ;;  %v5680_v5 = vperm.slane %v10770_v28, 3  ;;  %v5684_v48 = vperm.slane %v10771_v33, 3  ;;  %v6860_v9 = vsel %vm1466_vm8, %v6859_v25, %v6858_v58  ;;  %v9710_v33 = vld [vmem:[%s15503_s10 + $0x30] sm:$0xf0] }
 0x533   : > { %v5688_v45 = vperm.slane %v10772_v20, 3  ;;  %v5692_v21 = vperm.slane %v10773_v55, 3  ;;  %v5696_v61 = vperm.slane %v10774_v27, 3  ;;  %v13947_v54 = vpack.c.b16 %v6860_v9, %v6804_v44  ;;  %v9934_v9 = vld [vmem:[%s15503_s10 + $0x1f0] sm:$0xf0] }
 0x534   : > { %v5700_v34 = vperm.slane %v10775_v63, 3  ;;  %v5704_v2 = vperm.slane %v10776_v56, 3  ;;  %v5708_v8 = vperm.slane %v10777_v53, 3  ;;  %v6040_v42 = vpack.c.bf16 %v5648_v37, %v5648_v37  ;;  %v10647_v27 = vld [vmem:[%s15503_s10 + $0x2e4] sm:$0xf] }
 0x535   : > { %v6044_v15 = vpack.c.bf16 %v5652_v11, %v5652_v11  ;;  %v6048_v12 = vpack.c.bf16 %v5656_v35, %v5656_v35  ;;  %v6052_v26 = vpack.c.bf16 %v5660_v0, %v5660_v0  ;;  %7835 = vmatmul.bf16.vlgmr.msra.gmra.mxu1 %v13947_v54  ;;  %v6056_v52 = vpack.c.bf16 %v5664_v60, %v5664_v60 }
 0x536   : > { %v6060_v59 = vpack.c.bf16 %v5668_v30, %v5668_v30  ;;  %v6064_v16 = vpack.c.bf16 %v5672_v31, %v5672_v31  ;;  %v6068_v49 = vpack.c.bf16 %v5676_v3, %v5676_v3  ;;  %v6072_v29 = vpack.c.bf16 %v5680_v5, %v5680_v5  ;;  %v10190_v31 = vld [vmem:[%s15503_s10 + $0x3f0] sm:$0xf0]  ;;  %v10559_v5 = vld [vmem:[%s15503_s10 + $0x24] sm:$0xf] }
 0x537   : > { %v6076_v25 = vpack.c.bf16 %v5684_v48, %v5684_v48  ;;  %v6080_v1 = vpack.c.bf16 %v5688_v45, %v5688_v45  ;;  %v6084_v6 = vpack.c.bf16 %v5692_v21, %v5692_v21  ;;  %v6088_v46 = vpack.c.bf16 %v5696_v61, %v5696_v61  ;;  %v10615_v48 = vld [vmem:[%s15503_s10 + $0x1e4] sm:$0xf] }
 0x538   : > { %v6092_v38 = vpack.c.bf16 %v5700_v34, %v5700_v34  ;;  %v6096_v17 = vpack.c.bf16 %v5704_v2, %v5704_v2  ;;  %v6100_v47 = vpack.c.bf16 %v5708_v8, %v5708_v8  ;;  %v6570_v50 = vunpack.c.l.b16 %v6040_v42  ;;  %v10062_v2 = vld [vmem:[%s15503_s10 + $0x2f0] sm:$0xf0] }
 0x539   : > { %v6574_v41 = vunpack.c.l.b16 %v6044_v15  ;;  %v6578_v37 = vunpack.c.l.b16 %v6048_v12  ;;  %v6582_v11 = vunpack.c.l.b16 %v6052_v26  ;;  %v6586_v36 = vunpack.c.l.b16 %v6056_v52  ;;  %v10555_v12 = vld [vmem:[%s15503_s10 + $0x4] sm:$0xf]  ;;  %v9694_v26 = vld [vmem:[%s15503_s10 + $0x10] sm:$0xf0] }
 0x53a   : > { %v6590_v35 = vunpack.c.l.b16 %v6060_v59  ;;  %v6594_v19 = vunpack.c.l.b16 %v6064_v16  ;;  %v6598_v4 = vunpack.c.l.b16 %v6068_v49  ;;  %v6602_v32 = vunpack.c.l.b16 %v6072_v29  ;;  %v10675_v29 = vld [vmem:[%s15503_s10 + $0x3c4] sm:$0xf] }
 0x53b   : > { %v6606_v0 = vunpack.c.l.b16 %v6076_v25  ;;  %v6610_v7 = vunpack.c.l.b16 %v6080_v1  ;;  %v6614_v60 = vunpack.c.l.b16 %v6084_v6  ;;  %v6618_v44 = vunpack.c.l.b16 %v6088_v46  ;;  %v10174_v25 = vld [vmem:[%s15503_s10 + $0x3d0] sm:$0xf0] }
 0x53c   : > { %v6622_v10 = vunpack.c.l.b16 %v6092_v38  ;;  %v6626_v23 = vunpack.c.l.b16 %v6096_v17  ;;  %v6630_v30 = vunpack.c.l.b16 %v6100_v47  ;;  %v6805_v58 = vrot.slane %v6574_v41, 7 }
 0x53d   : > { %v6807_v62 = vrot.slane %v6578_v37, 6  ;;  %v6809_v3 = vrot.slane %v6582_v11, 5  ;;  %v6811_v28 = vrot.slane %v6586_v36, 4  ;;  %v6813_v20 = vrot.slane %v6590_v35, 3  ;;  %v14001_v35 = vld [vmem:[%s13386_s26 + $0x40] sm:$0xf] }
 0x53e   : > { %v6815_v45 = vrot.slane %v6594_v19, 2  ;;  %v6817_v55 = vrot.slane %v6598_v4, 1  ;;  %v6861_v21 = vrot.slane %v6606_v0, 7  ;;  %v6806_v61 = vsel %vm1454_vm2, %v6805_v58, %v6570_v50  ;;  %v14007_v0 = vld [vmem:[%s13386_s26 + $0x44] sm:$0xf] }
 0x53f   : > { %v6863_v63 = vrot.slane %v6610_v7, 6  ;;  %v6865_v34 = vrot.slane %v6614_v60, 5  ;;  %v6867_v56 = vrot.slane %v6618_v44, 4  ;;  %v6808_v53 = vsel %vm1456_vm3, %v6807_v62, %v6806_v61  ;;  %v14011_v60 = vld [vmem:[%s13386_s26 + $0x48] sm:$0xf] }
 0x540   : > { %v6862_v8 = vsel %vm1454_vm2, %v6861_v21, %v6602_v32  ;;  %v6869_v42 = vrot.slane %v6622_v10, 3  ;;  %v6871_v15 = vrot.slane %v6626_v23, 2  ;;  %v6810_v52 = vsel %vm1458_vm4, %v6809_v3, %v6808_v53  ;;  %v14016_v23 = vld [vmem:[%s13386_s26 + $0x4c] sm:$0xf]  ;;  %v14024_v58 = vld [vmem:[%s13386_s26 + $0x54] sm:$0xf] }
 0x541   : > { %v6864_v59 = vsel %vm1456_vm3, %v6863_v63, %v6862_v8  ;;  %v6873_v16 = vrot.slane %v6630_v30, 1  ;;  %v10193_v49 = vor.u32 %v10679_v14, %v10190_v31  ;;  %v6812_v1 = vsel %vm1460_vm5, %v6811_v28, %v6810_v52  ;;  %v14020_v14 = vld [vmem:[%s13386_s26 + $0x50] sm:$0xf]  ;;  %v14030_v28 = vld [vmem:[%s13386_s26 + $0x58] sm:$0xf] }
 0x542   : > { %v6866_v6 = vsel %vm1458_vm4, %v6865_v34, %v6864_v59  ;;  %v9713_v46 = vor.u32 %v10559_v5, %v9710_v33  ;;  %v9937_v38 = vor.u32 %v10615_v48, %v9934_v9  ;;  %v6814_v17 = vsel %vm1462_vm6, %v6813_v20, %v6812_v1  ;;  %v14034_v33 = vld [vmem:[%s13386_s26 + $0x5c] sm:$0xf]  ;;  %v14038_v9 = vld [vmem:[%s13386_s26 + $0x60] sm:$0xf]  ;;  %v14046_v21 = vld [vmem:[%s13386_s26 + $0x68] sm:$0xf] }
 0x543   : > { %v6868_v47 = vsel %vm1460_vm5, %v6867_v56, %v6866_v6  ;;  %7967 = vmatpush.bf16.msrb.mxu2 %v10193_v49  ;;  %v10065_v50 = vor.u32 %v10647_v27, %v10062_v2  ;;  %v9697_v41 = vor.u32 %v10555_v12, %v9694_v26  ;;  %v6816_v37 = vsel %vm1464_vm7, %v6815_v45, %v6814_v17  ;;  %v14042_v45 = vld [vmem:[%s13386_s26 + $0x64] sm:$0xf]  ;;  %v14050_v61 = vld [vmem:[%s13386_s26 + $0x6c] sm:$0xf]  ;;  %v14054_v34 = vld [vmem:[%s13386_s26 + $0x70] sm:$0xf] }
 0x544   : > { %v6870_v11 = vsel %vm1462_vm6, %v6869_v42, %v6868_v47  ;;  %7889 = vmatpush.bf16.msra.mxu3 %v9713_v46  ;;  %7911 = vmatpush.bf16.msrb.mxu0 %v9937_v38  ;;  %v10177_v36 = vor.u32 %v10675_v29, %v10174_v25  ;;  %v5710_v19 = vperm.slane %v14001_v35, 1  ;;  %v6818_v4 = vsel %vm1466_vm8, %v6817_v55, %v6816_v37  ;;  %v14059_v2 = vld [vmem:[%s13386_s26 + $0x74] sm:$0xf]  ;;  %v14063_v8 = vld [vmem:[%s13386_s26 + $0x78] sm:$0xf] }
 0x545   : > { %v6872_v32 = vsel %vm1464_vm7, %v6871_v15, %v6870_v11  ;;  %7939 = vmatpush.bf16.msrb.mxu1 %v10065_v50  ;;  %v5714_v7 = vperm.slane %v14007_v0, 1  ;;  %v5718_v44 = vperm.slane %v14011_v60, 1  ;;  %v5722_v30 = vperm.slane %v14016_v23, 1  ;;  %v14067_v15 = vld [vmem:[%s13386_s26 + $0x7c] sm:$0xf] }
 0x546   : > { %v6874_v10 = vsel %vm1466_vm8, %v6873_v16, %v6872_v32  ;;  %v5726_v31 = vperm.slane %v14020_v14, 1  ;;  %v5730_v62 = vperm.slane %v14024_v58, 1  ;;  %v5734_v5 = vperm.slane %v14030_v28, 1 }
 0x547   : > { %v14027_v3 = vpack.c.b16 %v6874_v10, %v6818_v4  ;;  %7968 = vmatpush.bf16.msrb.mxu2 %v10177_v36  ;;  %v5738_v48 = vperm.slane %v14034_v33, 1  ;;  %v5742_v20 = vperm.slane %v14038_v9, 1  ;;  %v5746_v55 = vperm.slane %v14042_v45, 1 }
 0x548   : > { %7890 = vmatpush.bf16.msra.mxu3 %v9697_v41  ;;  %v5750_v27 = vperm.slane %v14046_v21, 1  ;;  %v5754_v63 = vperm.slane %v14050_v61, 1  ;;  %v5758_v56 = vperm.slane %v14054_v34, 1  ;;  %v5762_v53 = vperm.slane %v14059_v2, 1 }
 0x549   : > { %7863 = vmatmul.bf16.vlgmr.msra.gmra.mxu2 %v14027_v3  ;;  %v5766_v42 = vperm.slane %v14063_v8, 1  ;;  %v5770_v12 = vperm.slane %v14067_v15, 1  ;;  %v6102_v26 = vpack.c.bf16 %v5710_v19, %v5710_v19  ;;  %v6106_v52 = vpack.c.bf16 %v5714_v7, %v5714_v7 }
 0x54a   : > { %v6110_v59 = vpack.c.bf16 %v5718_v44, %v5718_v44  ;;  %v6114_v16 = vpack.c.bf16 %v5722_v30, %v5722_v30  ;;  %v6118_v49 = vpack.c.bf16 %v5726_v31, %v5726_v31  ;;  %v6122_v29 = vpack.c.bf16 %v5730_v62, %v5730_v62 }
 0x54b   : > { %7891 = vmatmul.bf16.vlgmr.msra.gmra.mxu3 %v13521_v51  ;;  %v6126_v25 = vpack.c.bf16 %v5734_v5, %v5734_v5  ;;  %v6130_v1 = vpack.c.bf16 %v5738_v48, %v5738_v48  ;;  %v6134_v6 = vpack.c.bf16 %v5742_v20, %v5742_v20  ;;  %v6138_v46 = vpack.c.bf16 %v5746_v55, %v5746_v55 }
 0x54c   : > { %v6142_v38 = vpack.c.bf16 %v5750_v27, %v5750_v27  ;;  %v6146_v17 = vpack.c.bf16 %v5754_v63, %v5754_v63  ;;  %v6150_v47 = vpack.c.bf16 %v5758_v56, %v5758_v56  ;;  %v6154_v50 = vpack.c.bf16 %v5762_v53, %v5762_v53 }
 0x54d   : > { %v6158_v41 = vpack.c.bf16 %v5766_v42, %v5766_v42  ;;  %v6162_v37 = vpack.c.bf16 %v5770_v12, %v5770_v12  ;;  %v6632_v11 = vunpack.c.l.b16 %v6102_v26  ;;  %v6636_v36 = vunpack.c.l.b16 %v6106_v52  ;;  %v10611_v26 = vld [vmem:[%s15503_s10 + $0x1c4] sm:$0xf] }
 0x54e   : > { %v6640_v19 = vunpack.c.l.b16 %v6110_v59  ;;  %v6644_v4 = vunpack.c.l.b16 %v6114_v16  ;;  %v6648_v32 = vunpack.c.l.b16 %v6118_v49  ;;  %v6652_v7 = vunpack.c.l.b16 %v6122_v29  ;;  %v9918_v29 = vld [vmem:[%s15503_s10 + $0x1d0] sm:$0xf0] }
 0x54f   : > { %v6656_v44 = vunpack.c.l.b16 %v6126_v25  ;;  %v6660_v10 = vunpack.c.l.b16 %v6130_v1  ;;  %v6664_v30 = vunpack.c.l.b16 %v6134_v6  ;;  %v6668_v31 = vunpack.c.l.b16 %v6138_v46 }
 0x550   : > { %v6672_v62 = vunpack.c.l.b16 %v6142_v38  ;;  %v6676_v5 = vunpack.c.l.b16 %v6146_v17  ;;  %v6680_v48 = vunpack.c.l.b16 %v6150_v47  ;;  %v6684_v20 = vunpack.c.l.b16 %v6154_v50 }
 0x551   : > { %v6688_v55 = vunpack.c.l.b16 %v6158_v41  ;;  %v6692_v27 = vunpack.c.l.b16 %v6162_v37  ;;  %v6889_v63 = vrot.slane %v6636_v36, 7  ;;  %v6891_v56 = vrot.slane %v6640_v19, 6 }
 0x552   : > { %v6893_v53 = vrot.slane %v6644_v4, 5  ;;  %v6895_v42 = vrot.slane %v6648_v32, 4  ;;  %v6897_v12 = vrot.slane %v6652_v7, 3  ;;  %v6899_v59 = vrot.slane %v6656_v44, 2 }
 0x553   : > { %v6890_v52 = vsel %vm1454_vm2, %v6889_v63, %v6632_v11  ;;  %v6901_v16 = vrot.slane %v6660_v10, 1  ;;  %v6945_v49 = vrot.slane %v6668_v31, 7  ;;  %v6947_v1 = vrot.slane %v6672_v62, 6 }
 0x554   : > { %v6892_v25 = vsel %vm1456_vm3, %v6891_v56, %v6890_v52  ;;  %v6949_v6 = vrot.slane %v6676_v5, 5  ;;  %v6951_v46 = vrot.slane %v6680_v48, 4  ;;  %v6953_v47 = vrot.slane %v6684_v20, 3 }
 0x555   : > { %v6894_v38 = vsel %vm1458_vm4, %v6893_v53, %v6892_v25  ;;  %v6946_v17 = vsel %vm1454_vm2, %v6945_v49, %v6664_v30  ;;  %v6955_v50 = vrot.slane %v6688_v55, 2  ;;  %v6957_v11 = vrot.slane %v6692_v27, 1 }
 0x556   : > { %v6896_v41 = vsel %vm1460_vm5, %v6895_v42, %v6894_v38  ;;  %v6948_v37 = vsel %vm1456_vm3, %v6947_v1, %v6946_v17  ;;  %v9921_v36 = vor.u32 %v10611_v26, %v9918_v29  ;;  %v5711_v32 = vperm.slane %v14001_v35, 2 }
 0x557   : > { %v6898_v19 = vsel %vm1462_vm6, %v6897_v12, %v6896_v41  ;;  %v6950_v4 = vsel %vm1458_vm4, %v6949_v6, %v6948_v37  ;;  %v5715_v7 = vperm.slane %v14007_v0, 2  ;;  %v5719_v30 = vperm.slane %v14011_v60, 2 }
 0x558   : > { %v6900_v44 = vsel %vm1464_vm7, %v6899_v59, %v6898_v19  ;;  %v6952_v10 = vsel %vm1460_vm5, %v6951_v46, %v6950_v4  ;;  %7912 = vmatpush.bf16.msrb.mxu0 %v9921_v36  ;;  %v5723_v31 = vperm.slane %v14016_v23, 2  ;;  %v5727_v48 = vperm.slane %v14020_v14, 2 }
 0x559   : > { %v6902_v62 = vsel %vm1466_vm8, %v6901_v16, %v6900_v44  ;;  %v6954_v5 = vsel %vm1462_vm6, %v6953_v47, %v6952_v10  ;;  %v5731_v20 = vperm.slane %v14024_v58, 2  ;;  %v5735_v27 = vperm.slane %v14030_v28, 2 }
 0x55a   : > { %v6956_v55 = vsel %vm1464_vm7, %v6955_v50, %v6954_v5  ;;  %v5739_v63 = vperm.slane %v14034_v33, 2  ;;  %v5743_v56 = vperm.slane %v14038_v9, 2  ;;  %v5747_v42 = vperm.slane %v14042_v45, 2 }
 0x55b   : > { %v6958_v53 = vsel %vm1466_vm8, %v6957_v11, %v6956_v55  ;;  %v5751_v12 = vperm.slane %v14046_v21, 2  ;;  %v5755_v26 = vperm.slane %v14050_v61, 2  ;;  %7896 = vmatmul.bf16.gmra.mxu3 %v13637_v43  ;;  %v5759_v59 = vperm.slane %v14054_v34, 2 }
 0x55c   : > { %v14104_v52 = vpack.c.b16 %v6958_v53, %v6902_v62  ;;  %v5763_v16 = vperm.slane %v14059_v2, 2  ;;  %v5767_v49 = vperm.slane %v14063_v8, 2  ;;  %v5771_v29 = vperm.slane %v14067_v15, 2 }
 0x55d   : > { %v6103_v25 = vpack.c.bf16 %v5711_v32, %v5711_v32  ;;  %v6107_v1 = vpack.c.bf16 %v5715_v7, %v5715_v7  ;;  %v6111_v6 = vpack.c.bf16 %v5719_v30, %v5719_v30  ;;  %v6115_v46 = vpack.c.bf16 %v5723_v31, %v5723_v31 }
 0x55e   : > { %7812 = vmatmul.bf16.gmra.mxu0 %v14104_v52  ;;  %v6119_v38 = vpack.c.bf16 %v5727_v48, %v5727_v48  ;;  %v6123_v17 = vpack.c.bf16 %v5731_v20, %v5731_v20  ;;  %v6127_v47 = vpack.c.bf16 %v5735_v27, %v5735_v27  ;;  %v6131_v50 = vpack.c.bf16 %v5739_v63, %v5739_v63 }
 0x55f   : > { %v6135_v41 = vpack.c.bf16 %v5743_v56, %v5743_v56  ;;  %v6139_v37 = vpack.c.bf16 %v5747_v42, %v5747_v42  ;;  %v6143_v11 = vpack.c.bf16 %v5751_v12, %v5751_v12  ;;  %v6147_v36 = vpack.c.bf16 %v5755_v26, %v5755_v26 }
 0x560   : > { %v6151_v19 = vpack.c.bf16 %v5759_v59, %v5759_v59  ;;  %v6155_v4 = vpack.c.bf16 %v5763_v16, %v5763_v16  ;;  %v6159_v44 = vpack.c.bf16 %v5767_v49, %v5767_v49  ;;  %v6163_v10 = vpack.c.bf16 %v5771_v29, %v5771_v29  ;;  %v10643_v29 = vld [vmem:[%s15503_s10 + $0x2c4] sm:$0xf] }
 0x561   : > { %v6633_v62 = vunpack.c.l.b16 %v6103_v25  ;;  %v6637_v5 = vunpack.c.l.b16 %v6107_v1  ;;  %v6641_v32 = vunpack.c.l.b16 %v6111_v6  ;;  %v6645_v7 = vunpack.c.l.b16 %v6115_v46 }
 0x562   : > { %v6649_v30 = vunpack.c.l.b16 %v6119_v38  ;;  %v6653_v55 = vunpack.c.l.b16 %v6123_v17  ;;  %v6657_v53 = vunpack.c.l.b16 %v6127_v47  ;;  %v6661_v31 = vunpack.c.l.b16 %v6131_v50  ;;  %v10046_v38 = vld [vmem:[%s15503_s10 + $0x2d0] sm:$0xf0] }
 0x563   : > { %v6665_v48 = vunpack.c.l.b16 %v6135_v41  ;;  %v6669_v20 = vunpack.c.l.b16 %v6139_v37  ;;  %v6673_v27 = vunpack.c.l.b16 %v6143_v11  ;;  %v6677_v63 = vunpack.c.l.b16 %v6147_v36 }
 0x564   : > { %v6681_v56 = vunpack.c.l.b16 %v6151_v19  ;;  %v6685_v42 = vunpack.c.l.b16 %v6155_v4  ;;  %v6689_v12 = vunpack.c.l.b16 %v6159_v44  ;;  %v6693_v26 = vunpack.c.l.b16 %v6163_v10 }
 0x565   : > { %v6903_v59 = vrot.slane %v6637_v5, 7  ;;  %v6905_v16 = vrot.slane %v6641_v32, 6  ;;  %v6907_v49 = vrot.slane %v6645_v7, 5  ;;  %v6909_v25 = vrot.slane %v6649_v30, 4 }
 0x566   : > { %v6911_v1 = vrot.slane %v6653_v55, 3  ;;  %v6913_v6 = vrot.slane %v6657_v53, 2  ;;  %v6915_v46 = vrot.slane %v6661_v31, 1  ;;  %v6959_v47 = vrot.slane %v6669_v20, 7 }
 0x567   : > { %v6904_v17 = vsel %vm1454_vm2, %v6903_v59, %v6633_v62  ;;  %v6961_v50 = vrot.slane %v6673_v27, 6  ;;  %v6963_v41 = vrot.slane %v6677_v63, 5  ;;  %v6965_v11 = vrot.slane %v6681_v56, 4 }
 0x568   : > { %v6906_v37 = vsel %vm1456_vm3, %v6905_v16, %v6904_v17  ;;  %v6967_v36 = vrot.slane %v6685_v42, 3  ;;  %v6969_v19 = vrot.slane %v6689_v12, 2  ;;  %v6960_v44 = vsel %vm1454_vm2, %v6959_v47, %v6665_v48 }
 0x569   : > { %v6908_v4 = vsel %vm1458_vm4, %v6907_v49, %v6906_v37  ;;  %v6971_v10 = vrot.slane %v6693_v26, 1  ;;  %v10049_v5 = vor.u32 %v10643_v29, %v10046_v38  ;;  %v6962_v7 = vsel %vm1456_vm3, %v6961_v50, %v6960_v44 }
 0x56a   : > { %v6910_v32 = vsel %vm1460_vm5, %v6909_v25, %v6908_v4  ;;  %v5712_v62 = vperm.slane %v14001_v35, 3  ;;  %v5716_v30 = vperm.slane %v14007_v0, 3  ;;  %v6964_v53 = vsel %vm1458_vm4, %v6963_v41, %v6962_v7 }
 0x56b   : > { %v6912_v55 = vsel %vm1462_vm6, %v6911_v1, %v6910_v32  ;;  %7940 = vmatpush.bf16.msrb.mxu1 %v10049_v5  ;;  %v5720_v31 = vperm.slane %v14011_v60, 3  ;;  %v5724_v20 = vperm.slane %v14016_v23, 3  ;;  %7901 = vmatmul.bf16.gmra.mxu3 %v13834_v22  ;;  %v6966_v27 = vsel %vm1460_vm5, %v6965_v11, %v6964_v53 }
 0x56c   : > { %v6914_v48 = vsel %vm1464_vm7, %v6913_v6, %v6912_v55  ;;  %v5728_v63 = vperm.slane %v14020_v14, 3  ;;  %v5732_v35 = vperm.slane %v14024_v58, 3  ;;  %v6968_v56 = vsel %vm1462_vm6, %v6967_v36, %v6966_v27  ;;  %v10158_v27 = vld [vmem:[%s15503_s10 + $0x3b0] sm:$0xf0] }
 0x56d   : > { %v6916_v0 = vsel %vm1466_vm8, %v6915_v46, %v6914_v48  ;;  %v5736_v42 = vperm.slane %v14030_v28, 3  ;;  %v5740_v60 = vperm.slane %v14034_v33, 3  ;;  %v6970_v23 = vsel %vm1464_vm7, %v6969_v19, %v6968_v56  ;;  %v10671_v48 = vld [vmem:[%s15503_s10 + $0x3a4] sm:$0xf] }
 0x56e   : > { %v5744_v12 = vperm.slane %v14038_v9, 3  ;;  %v5748_v26 = vperm.slane %v14042_v45, 3  ;;  %v5752_v59 = vperm.slane %v14046_v21, 3  ;;  %v6972_v14 = vsel %vm1466_vm8, %v6971_v10, %v6970_v23 }
 0x56f   : > { %v5756_v58 = vperm.slane %v14050_v61, 3  ;;  %v5760_v16 = vperm.slane %v14054_v34, 3  ;;  %v5764_v49 = vperm.slane %v14059_v2, 3  ;;  %v14146_v29 = vpack.c.b16 %v6972_v14, %v6916_v0  ;;  %v10639_v14 = vld [vmem:[%s15503_s10 + $0x2a4] sm:$0xf] }
 0x570   : > { %v5768_v28 = vperm.slane %v14063_v8, 3  ;;  %v5772_v33 = vperm.slane %v14067_v15, 3  ;;  %v6104_v25 = vpack.c.bf16 %v5712_v62, %v5712_v62  ;;  %v6108_v9 = vpack.c.bf16 %v5716_v30, %v5716_v30 }
 0x571   : > { %v6112_v1 = vpack.c.bf16 %v5720_v31, %v5720_v31  ;;  %v6116_v45 = vpack.c.bf16 %v5724_v20, %v5724_v20  ;;  %v6120_v6 = vpack.c.bf16 %v5728_v63, %v5728_v63  ;;  %7840 = vmatmul.bf16.gmra.mxu1 %v14146_v29  ;;  %v6124_v21 = vpack.c.bf16 %v5732_v35, %v5732_v35 }
 0x572   : > { %v6128_v46 = vpack.c.bf16 %v5736_v42, %v5736_v42  ;;  %v6132_v61 = vpack.c.bf16 %v5740_v60, %v5740_v60  ;;  %v6136_v38 = vpack.c.bf16 %v5744_v12, %v5744_v12  ;;  %v6140_v34 = vpack.c.bf16 %v5748_v26, %v5748_v26  ;;  %v10607_v42 = vld [vmem:[%s15503_s10 + $0x1a4] sm:$0xf]  ;;  %v9902_v60 = vld [vmem:[%s15503_s10 + $0x1b0] sm:$0xf0] }
 0x573   : > { %v6144_v17 = vpack.c.bf16 %v5752_v59, %v5752_v59  ;;  %v6148_v2 = vpack.c.bf16 %v5756_v58, %v5756_v58  ;;  %v6152_v47 = vpack.c.bf16 %v5760_v16, %v5760_v16  ;;  %v6156_v50 = vpack.c.bf16 %v5764_v49, %v5764_v49 }
 0x574   : > { %v6160_v41 = vpack.c.bf16 %v5768_v28, %v5768_v28  ;;  %v6164_v8 = vpack.c.bf16 %v5772_v33, %v5772_v33  ;;  %v6634_v37 = vunpack.c.l.b16 %v6104_v25  ;;  %v6638_v15 = vunpack.c.l.b16 %v6108_v9  ;;  %v10030_v33 = vld [vmem:[%s15503_s10 + $0x2b0] sm:$0xf0] }
 0x575   : > { %v6642_v11 = vunpack.c.l.b16 %v6112_v1  ;;  %v6646_v36 = vunpack.c.l.b16 %v6116_v45  ;;  %v6650_v19 = vunpack.c.l.b16 %v6120_v6  ;;  %v6654_v4 = vunpack.c.l.b16 %v6124_v21  ;;  %v10667_v6 = vld [vmem:[%s15503_s10 + $0x384] sm:$0xf]  ;;  %v10142_v21 = vld [vmem:[%s15503_s10 + $0x390] sm:$0xf0] }
 0x576   : > { %v6658_v44 = vunpack.c.l.b16 %v6128_v46  ;;  %v6662_v10 = vunpack.c.l.b16 %v6132_v61  ;;  %v6666_v5 = vunpack.c.l.b16 %v6136_v38  ;;  %v6670_v32 = vunpack.c.l.b16 %v6140_v34 }
 0x577   : > { %v6674_v7 = vunpack.c.l.b16 %v6144_v17  ;;  %v6678_v62 = vunpack.c.l.b16 %v6148_v2  ;;  %v6682_v30 = vunpack.c.l.b16 %v6152_v47  ;;  %v6686_v55 = vunpack.c.l.b16 %v6156_v50 }
 0x578   : > { %v6690_v53 = vunpack.c.l.b16 %v6160_v41  ;;  %v6694_v31 = vunpack.c.l.b16 %v6164_v8  ;;  %v6917_v20 = vrot.slane %v6638_v15, 7  ;;  %v6919_v63 = vrot.slane %v6642_v11, 6  ;;  %v14187_v15 = vld [vmem:[%s13386_s26 + $0x80] sm:$0xf] }
 0x579   : > { %v6921_v35 = vrot.slane %v6646_v36, 5  ;;  %v6923_v0 = vrot.slane %v6650_v19, 4  ;;  %v6925_v56 = vrot.slane %v6654_v4, 3  ;;  %v6927_v12 = vrot.slane %v6658_v44, 2  ;;  %v14193_v4 = vld [vmem:[%s13386_s26 + $0x84] sm:$0xf] }
 0x57a   : > { %v6918_v23 = vsel %vm1454_vm2, %v6917_v20, %v6634_v37  ;;  %v6929_v26 = vrot.slane %v6662_v10, 1  ;;  %v6973_v59 = vrot.slane %v6670_v32, 7  ;;  %v6975_v16 = vrot.slane %v6674_v7, 6  ;;  %v14197_v10 = vld [vmem:[%s13386_s26 + $0x88] sm:$0xf] }
 0x57b   : > { %v6920_v58 = vsel %vm1456_vm3, %v6919_v63, %v6918_v23  ;;  %v6977_v49 = vrot.slane %v6678_v62, 5  ;;  %v6979_v28 = vrot.slane %v6682_v30, 4  ;;  %7906 = vmatmul.bf16.gmra.mxu3 %v13857_v57  ;;  %v6981_v1 = vrot.slane %v6686_v55, 3  ;;  %v14202_v7 = vld [vmem:[%s13386_s26 + $0x8c] sm:$0xf] }
 0x57c   : > { %v6922_v25 = vsel %vm1458_vm4, %v6921_v35, %v6920_v58  ;;  %v6974_v9 = vsel %vm1454_vm2, %v6973_v59, %v6666_v5  ;;  %v6983_v45 = vrot.slane %v6690_v53, 2  ;;  %v6985_v38 = vrot.slane %v6694_v31, 1  ;;  %v14206_v30 = vld [vmem:[%s13386_s26 + $0x90] sm:$0xf]  ;;  %v14210_v53 = vld [vmem:[%s13386_s26 + $0x94] sm:$0xf] }
 0x57d   : > { %v6924_v46 = vsel %vm1460_vm5, %v6923_v0, %v6922_v25  ;;  %v6976_v61 = vsel %vm1456_vm3, %v6975_v16, %v6974_v9  ;;  %v10161_v34 = vor.u32 %v10671_v48, %v10158_v27  ;;  %v9905_v47 = vor.u32 %v10607_v42, %v9902_v60  ;;  %v14215_v48 = vld [vmem:[%s13386_s26 + $0x98] sm:$0xf]  ;;  %v14219_v63 = vld [vmem:[%s13386_s26 + $0x9c] sm:$0xf]  ;;  %v14223_v0 = vld [vmem:[%s13386_s26 + $0xa0] sm:$0xf] }
 0x57e   : > { %v6926_v17 = vsel %vm1462_vm6, %v6925_v56, %v6924_v46  ;;  %v6978_v2 = vsel %vm1458_vm4, %v6977_v49, %v6976_v61  ;;  %v10033_v50 = vor.u32 %v10639_v14, %v10030_v33  ;;  %v10145_v37 = vor.u32 %v10667_v6, %v10142_v21  ;;  %v14229_v60 = vld [vmem:[%s13386_s26 + $0xa4] sm:$0xf]  ;;  %v14237_v59 = vld [vmem:[%s13386_s26 + $0xac] sm:$0xf]  ;;  %v14241_v58 = vld [vmem:[%s13386_s26 + $0xb0] sm:$0xf] }
 0x57f   : > { %v6928_v41 = vsel %vm1464_vm7, %v6927_v12, %v6926_v17  ;;  %v6980_v8 = vsel %vm1460_vm5, %v6979_v28, %v6978_v2  ;;  %7969 = vmatpush.bf16.msrb.mxu2 %v10161_v34  ;;  %v5774_v11 = vperm.slane %v14187_v15, 1  ;;  %7913 = vmatpush.bf16.msrb.mxu0 %v9905_v47  ;;  %v5778_v44 = vperm.slane %v14193_v4, 1  ;;  %v14233_v12 = vld [vmem:[%s13386_s26 + $0xa8] sm:$0xf]  ;;  %v14245_v49 = vld [vmem:[%s13386_s26 + $0xb4] sm:$0xf] }
 0x580   : > { %v6930_v36 = vsel %vm1466_vm8, %v6929_v26, %v6928_v41  ;;  %v6982_v19 = vsel %vm1462_vm6, %v6981_v1, %v6980_v8  ;;  %7941 = vmatpush.bf16.msrb.mxu1 %v10033_v50  ;;  %v5782_v5 = vperm.slane %v14197_v10, 1  ;;  %v5786_v62 = vperm.slane %v14202_v7, 1  ;;  %v14249_v33 = vld [vmem:[%s13386_s26 + $0xb8] sm:$0xf]  ;;  %v14253_v9 = vld [vmem:[%s13386_s26 + $0xbc] sm:$0xf] }
 0x581   : > { %v6984_v32 = vsel %vm1464_vm7, %v6983_v45, %v6982_v19  ;;  %v5790_v55 = vperm.slane %v14206_v30, 1  ;;  %v5794_v31 = vperm.slane %v14210_v53, 1  ;;  %v5798_v27 = vperm.slane %v14215_v48, 1 }
 0x582   : > { %v6986_v20 = vsel %vm1466_vm8, %v6985_v38, %v6984_v32  ;;  %v5802_v35 = vperm.slane %v14219_v63, 1  ;;  %v5806_v56 = vperm.slane %v14223_v0, 1  ;;  %v5810_v23 = vperm.slane %v14229_v60, 1 }
 0x583   : > { %v14226_v42 = vpack.c.b16 %v6986_v20, %v6930_v36  ;;  %7970 = vmatpush.bf16.msrb.mxu2 %v10145_v37  ;;  %v5814_v26 = vperm.slane %v14233_v12, 1  ;;  %v5818_v14 = vperm.slane %v14237_v59, 1  ;;  %v5822_v16 = vperm.slane %v14241_v58, 1 }
 0x584   : > { %v5826_v28 = vperm.slane %v14245_v49, 1  ;;  %v5830_v25 = vperm.slane %v14249_v33, 1  ;;  %v5834_v1 = vperm.slane %v14253_v9, 1  ;;  %v6166_v45 = vpack.c.bf16 %v5774_v11, %v5774_v11 }
 0x585   : > { %7868 = vmatmul.bf16.gmra.mxu2 %v14226_v42  ;;  %v6170_v6 = vpack.c.bf16 %v5778_v44, %v5778_v44  ;;  %v6174_v21 = vpack.c.bf16 %v5782_v5, %v5782_v5  ;;  %v6178_v46 = vpack.c.bf16 %v5786_v62, %v5786_v62  ;;  %v6182_v61 = vpack.c.bf16 %v5790_v55, %v5790_v55 }
 0x586   : > { %v6186_v38 = vpack.c.bf16 %v5794_v31, %v5794_v31  ;;  %v6190_v34 = vpack.c.bf16 %v5798_v27, %v5798_v27  ;;  %v6194_v17 = vpack.c.bf16 %v5802_v35, %v5802_v35  ;;  %v6198_v2 = vpack.c.bf16 %v5806_v56, %v5806_v56 }
 0x587   : > { %v6202_v47 = vpack.c.bf16 %v5810_v23, %v5810_v23  ;;  %v6206_v50 = vpack.c.bf16 %v5814_v26, %v5814_v26  ;;  %v6210_v41 = vpack.c.bf16 %v5818_v14, %v5818_v14  ;;  %v6214_v8 = vpack.c.bf16 %v5822_v16, %v5822_v16 }
 0x588   : > { %v6218_v37 = vpack.c.bf16 %v5826_v28, %v5826_v28  ;;  %v6222_v36 = vpack.c.bf16 %v5830_v25, %v5830_v25  ;;  %v6226_v19 = vpack.c.bf16 %v5834_v1, %v5834_v1  ;;  %v6696_v32 = vunpack.c.l.b16 %v6166_v45  ;;  %v10603_v45 = vld [vmem:[%s15503_s10 + $0x184] sm:$0xf] }
 0x589   : > { %v6700_v20 = vunpack.c.l.b16 %v6170_v6  ;;  %v6704_v39 = vunpack.c.l.b16 %v6174_v21  ;;  %v6708_v18 = vunpack.c.l.b16 %v6178_v46  ;;  %v6712_v11 = vunpack.c.l.b16 %v6182_v61 }
 0x58a   : > { %v6716_v44 = vunpack.c.l.b16 %v6186_v38  ;;  %v6720_v5 = vunpack.c.l.b16 %v6190_v34  ;;  %v6724_v62 = vunpack.c.l.b16 %v6194_v17  ;;  %v6728_v55 = vunpack.c.l.b16 %v6198_v2  ;;  %v9886_v38 = vld [vmem:[%s15503_s10 + $0x190] sm:$0xf0] }
 0x58b   : > { %v6732_v31 = vunpack.c.l.b16 %v6202_v47  ;;  %v6736_v27 = vunpack.c.l.b16 %v6206_v50  ;;  %v6740_v35 = vunpack.c.l.b16 %v6210_v41  ;;  %v6744_v56 = vunpack.c.l.b16 %v6214_v8 }
 0x58c   : > { %v6748_v23 = vunpack.c.l.b16 %v6218_v37  ;;  %v6752_v26 = vunpack.c.l.b16 %v6222_v36  ;;  %v6756_v14 = vunpack.c.l.b16 %v6226_v19  ;;  %v7001_v16 = vrot.slane %v6700_v20, 7 }
 0x58d   : > { %v7003_v28 = vrot.slane %v6704_v39, 6  ;;  %v7005_v25 = vrot.slane %v6708_v18, 5  ;;  %v7007_v1 = vrot.slane %v6712_v11, 4  ;;  %v7009_v6 = vrot.slane %v6716_v44, 3 }
 0x58e   : > { %v7011_v21 = vrot.slane %v6720_v5, 2  ;;  %v7013_v46 = vrot.slane %v6724_v62, 1  ;;  %v7057_v61 = vrot.slane %v6732_v31, 7  ;;  %v7002_v34 = vsel %vm1454_vm2, %v7001_v16, %v6696_v32 }
 0x58f   : > { %v7059_v17 = vrot.slane %v6736_v27, 6  ;;  %v7061_v2 = vrot.slane %v6740_v35, 5  ;;  %v7063_v47 = vrot.slane %v6744_v56, 4  ;;  %v7004_v18 = vsel %vm1456_vm3, %v7003_v28, %v7002_v34 }
 0x590   : > { %v7058_v39 = vsel %vm1454_vm2, %v7057_v61, %v6728_v55  ;;  %v7065_v50 = vrot.slane %v6748_v23, 3  ;;  %v7067_v41 = vrot.slane %v6752_v26, 2  ;;  %v7006_v8 = vsel %vm1458_vm4, %v7005_v25, %v7004_v18 }
 0x591   : > { %v7060_v37 = vsel %vm1456_vm3, %v7059_v17, %v7058_v39  ;;  %v7069_v36 = vrot.slane %v6756_v14, 1  ;;  %v9889_v19 = vor.u32 %v10603_v45, %v9886_v38  ;;  %v7008_v20 = vsel %vm1460_vm5, %v7007_v1, %v7006_v8 }
 0x592   : > { %v7062_v11 = vsel %vm1458_vm4, %v7061_v2, %v7060_v37  ;;  %v5775_v32 = vperm.slane %v14187_v15, 2  ;;  %v5779_v44 = vperm.slane %v14193_v4, 2  ;;  %v7010_v5 = vsel %vm1462_vm6, %v7009_v6, %v7008_v20 }
 0x593   : > { %v7064_v62 = vsel %vm1460_vm5, %v7063_v47, %v7062_v11  ;;  %7914 = vmatpush.bf16.msrb.mxu0 %v9889_v19  ;;  %v5783_v55 = vperm.slane %v14197_v10, 2  ;;  %v5787_v31 = vperm.slane %v14202_v7, 2  ;;  %v7012_v27 = vsel %vm1464_vm7, %v7011_v21, %v7010_v5 }
 0x594   : > { %v7066_v35 = vsel %vm1462_vm6, %v7065_v50, %v7064_v62  ;;  %v5791_v56 = vperm.slane %v14206_v30, 2  ;;  %v5795_v23 = vperm.slane %v14210_v53, 2  ;;  %v7014_v26 = vsel %vm1466_vm8, %v7013_v46, %v7012_v27 }
 0x595   : > { %v7068_v14 = vsel %vm1464_vm7, %v7067_v41, %v7066_v35  ;;  %v5799_v16 = vperm.slane %v14215_v48, 2  ;;  %v5803_v28 = vperm.slane %v14219_v63, 2  ;;  %v5807_v1 = vperm.slane %v14223_v0, 2 }
 0x596   : > { %v7070_v25 = vsel %vm1466_vm8, %v7069_v36, %v7068_v14  ;;  %v5811_v45 = vperm.slane %v14229_v60, 2  ;;  %v5815_v6 = vperm.slane %v14233_v12, 2  ;;  %v5819_v61 = vperm.slane %v14237_v59, 2 }
 0x597   : > { %v14288_v21 = vpack.c.b16 %v7070_v25, %v7014_v26  ;;  %v5823_v46 = vperm.slane %v14241_v58, 2  ;;  %v5827_v38 = vperm.slane %v14245_v49, 2  ;;  %v5831_v34 = vperm.slane %v14249_v33, 2 }
 0x598   : > { %v5835_v17 = vperm.slane %v14253_v9, 2  ;;  %v6167_v2 = vpack.c.bf16 %v5775_v32, %v5775_v32  ;;  %v6171_v47 = vpack.c.bf16 %v5779_v44, %v5779_v44  ;;  %v6175_v18 = vpack.c.bf16 %v5783_v55, %v5783_v55 }
 0x599   : > { %7817 = vmatmul.bf16.gmra.mxu0 %v14288_v21  ;;  %v6179_v39 = vpack.c.bf16 %v5787_v31, %v5787_v31  ;;  %v6183_v50 = vpack.c.bf16 %v5791_v56, %v5791_v56  ;;  %v6187_v41 = vpack.c.bf16 %v5795_v23, %v5795_v23  ;;  %v6191_v8 = vpack.c.bf16 %v5799_v16, %v5799_v16 }
 0x59a   : > { %v6195_v37 = vpack.c.bf16 %v5803_v28, %v5803_v28  ;;  %v6199_v36 = vpack.c.bf16 %v5807_v1, %v5807_v1  ;;  %v6203_v19 = vpack.c.bf16 %v5811_v45, %v5811_v45  ;;  %v6207_v20 = vpack.c.bf16 %v5815_v6, %v5815_v6 }
 0x59b   : > { %v6211_v11 = vpack.c.bf16 %v5819_v61, %v5819_v61  ;;  %v6215_v5 = vpack.c.bf16 %v5823_v46, %v5823_v46  ;;  %v6219_v62 = vpack.c.bf16 %v5827_v38, %v5827_v38  ;;  %v6223_v27 = vpack.c.bf16 %v5831_v34, %v5831_v34 }
 0x59c   : > { %v6227_v35 = vpack.c.bf16 %v5835_v17, %v5835_v17  ;;  %v6697_v26 = vunpack.c.l.b16 %v6167_v2  ;;  %v6701_v14 = vunpack.c.l.b16 %v6171_v47  ;;  %v6705_v32 = vunpack.c.l.b16 %v6175_v18  ;;  %v10635_v18 = vld [vmem:[%s15503_s10 + $0x284] sm:$0xf] }
 0x59d   : > { %v6709_v44 = vunpack.c.l.b16 %v6179_v39  ;;  %v6713_v25 = vunpack.c.l.b16 %v6183_v50  ;;  %v6717_v40 = vunpack.c.l.b16 %v6187_v41  ;;  %v6721_v55 = vunpack.c.l.b16 %v6191_v8 }
 0x59e   : > { %v6725_v31 = vunpack.c.l.b16 %v6195_v37  ;;  %v6729_v56 = vunpack.c.l.b16 %v6199_v36  ;;  %v6733_v23 = vunpack.c.l.b16 %v6203_v19  ;;  %v6737_v16 = vunpack.c.l.b16 %v6207_v20  ;;  %v10014_v37 = vld [vmem:[%s15503_s10 + $0x290] sm:$0xf0] }
 0x59f   : > { %v6741_v28 = vunpack.c.l.b16 %v6211_v11  ;;  %v6745_v1 = vunpack.c.l.b16 %v6215_v5  ;;  %v6749_v45 = vunpack.c.l.b16 %v6219_v62  ;;  %v6753_v6 = vunpack.c.l.b16 %v6223_v27 }
 0x5a0   : > { %v6757_v61 = vunpack.c.l.b16 %v6227_v35  ;;  %v7015_v46 = vrot.slane %v6701_v14, 7  ;;  %v7017_v38 = vrot.slane %v6705_v32, 6  ;;  %v7019_v34 = vrot.slane %v6709_v44, 5 }
 0x5a1   : > { %v7021_v17 = vrot.slane %v6713_v25, 4  ;;  %v7023_v2 = vrot.slane %v6717_v40, 3  ;;  %v7025_v47 = vrot.slane %v6721_v55, 2  ;;  %v7027_v50 = vrot.slane %v6725_v31, 1 }
 0x5a2   : > { %v7016_v39 = vsel %vm1454_vm2, %v7015_v46, %v6697_v26  ;;  %v7071_v41 = vrot.slane %v6733_v23, 7  ;;  %v7073_v8 = vrot.slane %v6737_v16, 6  ;;  %v7075_v19 = vrot.slane %v6741_v28, 5 }
 0x5a3   : > { %v7018_v36 = vsel %vm1456_vm3, %v7017_v38, %v7016_v39  ;;  %v7077_v20 = vrot.slane %v6745_v1, 4  ;;  %v7079_v11 = vrot.slane %v6749_v45, 3  ;;  %v7081_v62 = vrot.slane %v6753_v6, 2 }
 0x5a4   : > { %v7020_v40 = vsel %vm1458_vm4, %v7019_v34, %v7018_v36  ;;  %v7072_v5 = vsel %vm1454_vm2, %v7071_v41, %v6729_v56  ;;  %v7083_v27 = vrot.slane %v6757_v61, 1  ;;  %v10017_v14 = vor.u32 %v10635_v18, %v10014_v37 }
 0x5a5   : > { %v7022_v35 = vsel %vm1460_vm5, %v7021_v17, %v7020_v40  ;;  %v7074_v26 = vsel %vm1456_vm3, %v7073_v8, %v7072_v5  ;;  %v5776_v32 = vperm.slane %v14187_v15, 3  ;;  %v5780_v55 = vperm.slane %v14193_v4, 3 }
 0x5a6   : > { %v7024_v44 = vsel %vm1462_vm6, %v7023_v2, %v7022_v35  ;;  %v7076_v25 = vsel %vm1458_vm4, %v7075_v19, %v7074_v26  ;;  %v5784_v31 = vperm.slane %v14197_v10, 3  ;;  %7942 = vmatpush.bf16.msrb.mxu1 %v10017_v14  ;;  %v5788_v16 = vperm.slane %v14202_v7, 3 }
 0x5a7   : > { %v7026_v23 = vsel %vm1464_vm7, %v7025_v47, %v7024_v44  ;;  %v7078_v56 = vsel %vm1460_vm5, %v7077_v20, %v7076_v25  ;;  %v5792_v28 = vperm.slane %v14206_v30, 3  ;;  %v5796_v45 = vperm.slane %v14210_v53, 3 }
 0x5a8   : > { %v7028_v1 = vsel %vm1466_vm8, %v7027_v50, %v7026_v23  ;;  %v7080_v15 = vsel %vm1462_vm6, %v7079_v11, %v7078_v56  ;;  %v5800_v6 = vperm.slane %v14215_v48, 3  ;;  %v5804_v10 = vperm.slane %v14219_v63, 3  ;;  %v10663_v23 = vld [vmem:[%s15503_s10 + $0x364] sm:$0xf]  ;;  %v10126_v56 = vld [vmem:[%s15503_s10 + $0x370] sm:$0xf0] }
 0x5a9   : > { %v7082_v4 = vsel %vm1464_vm7, %v7081_v62, %v7080_v15  ;;  %v5808_v61 = vperm.slane %v14223_v0, 3  ;;  %v5812_v46 = vperm.slane %v14229_v60, 3  ;;  %v5816_v30 = vperm.slane %v14233_v12, 3 }
 0x5aa   : > { %v7084_v7 = vsel %vm1466_vm8, %v7083_v27, %v7082_v4  ;;  %v5820_v38 = vperm.slane %v14237_v59, 3  ;;  %v5824_v34 = vperm.slane %v14241_v58, 3  ;;  %v5828_v53 = vperm.slane %v14245_v49, 3 }
 0x5ab   : > { %v14329_v17 = vpack.c.b16 %v7084_v7, %v7028_v1  ;;  %v5832_v48 = vperm.slane %v14249_v33, 3  ;;  %v5836_v63 = vperm.slane %v14253_v9, 3  ;;  %v6168_v2 = vpack.c.bf16 %v5776_v32, %v5776_v32  ;;  %v10631_v7 = vld [vmem:[%s15503_s10 + $0x264] sm:$0xf] }
 0x5ac   : > { %v6172_v0 = vpack.c.bf16 %v5780_v55, %v5780_v55  ;;  %v6176_v47 = vpack.c.bf16 %v5784_v31, %v5784_v31  ;;  %v6180_v60 = vpack.c.bf16 %v5788_v16, %v5788_v16  ;;  %v6184_v18 = vpack.c.bf16 %v5792_v28, %v5792_v28 }
 0x5ad   : > { %7845 = vmatmul.bf16.gmra.mxu1 %v14329_v17  ;;  %v6188_v12 = vpack.c.bf16 %v5796_v45, %v5796_v45  ;;  %v6192_v39 = vpack.c.bf16 %v5800_v6, %v5800_v6  ;;  %v6196_v59 = vpack.c.bf16 %v5804_v10, %v5804_v10  ;;  %v6200_v50 = vpack.c.bf16 %v5808_v61, %v5808_v61  ;;  %v10599_v45 = vld [vmem:[%s15503_s10 + $0x164] sm:$0xf]  ;;  %v9870_v6 = vld [vmem:[%s15503_s10 + $0x170] sm:$0xf0] }
 0x5ae   : > { %v6204_v58 = vpack.c.bf16 %v5812_v46, %v5812_v46  ;;  %v6208_v41 = vpack.c.bf16 %v5816_v30, %v5816_v30  ;;  %v6212_v8 = vpack.c.bf16 %v5820_v38, %v5820_v38  ;;  %v6216_v37 = vpack.c.bf16 %v5824_v34, %v5824_v34 }
 0x5af   : > { %v6220_v49 = vpack.c.bf16 %v5828_v53, %v5828_v53  ;;  %v6224_v36 = vpack.c.bf16 %v5832_v48, %v5832_v48  ;;  %v6228_v33 = vpack.c.bf16 %v5836_v63, %v5836_v63  ;;  %v6698_v19 = vunpack.c.l.b16 %v6168_v2  ;;  %v9998_v48 = vld [vmem:[%s15503_s10 + $0x270] sm:$0xf0] }
 0x5b0   : > { %v6702_v9 = vunpack.c.l.b16 %v6172_v0  ;;  %v6706_v20 = vunpack.c.l.b16 %v6176_v47  ;;  %v6710_v11 = vunpack.c.l.b16 %v6180_v60  ;;  %v6714_v40 = vunpack.c.l.b16 %v6184_v18  ;;  %v10659_v60 = vld [vmem:[%s15503_s10 + $0x344] sm:$0xf]  ;;  %v10110_v18 = vld [vmem:[%s15503_s10 + $0x350] sm:$0xf0] }
 0x5b1   : > { %v6718_v5 = vunpack.c.l.b16 %v6188_v12  ;;  %v6722_v62 = vunpack.c.l.b16 %v6192_v39  ;;  %v6726_v27 = vunpack.c.l.b16 %v6196_v59  ;;  %v6730_v35 = vunpack.c.l.b16 %v6200_v50 }
 0x5b2   : > { %v6734_v26 = vunpack.c.l.b16 %v6204_v58  ;;  %v6738_v14 = vunpack.c.l.b16 %v6208_v41  ;;  %v6742_v32 = vunpack.c.l.b16 %v6212_v8  ;;  %v6746_v44 = vunpack.c.l.b16 %v6216_v37  ;;  %v10595_v58 = vld [vmem:[%s15503_s10 + $0x144] sm:$0xf]  ;;  %v9854_v41 = vld [vmem:[%s15503_s10 + $0x150] sm:$0xf0] }
 0x5b3   : > { %v6750_v25 = vunpack.c.l.b16 %v6220_v49  ;;  %v6754_v55 = vunpack.c.l.b16 %v6224_v36  ;;  %v6758_v31 = vunpack.c.l.b16 %v6228_v33  ;;  %v7029_v16 = vrot.slane %v6702_v9, 7  ;;  %v9812_v33 = vld [vmem:[%s15503_s10 + $0xe8] sm:$0xf] }
 0x5b4   : > { %v7031_v28 = vrot.slane %v6706_v20, 6  ;;  %v7033_v1 = vrot.slane %v6710_v11, 5  ;;  %v7035_v15 = vrot.slane %v6714_v40, 4  ;;  %v7037_v4 = vrot.slane %v6718_v5, 3  ;;  %v14381_v40 = vld [vmem:[%s13386_s26 + $0xc0] sm:$0xf] }
 0x5b5   : > { %v7039_v10 = vrot.slane %v6722_v62, 2  ;;  %v7041_v61 = vrot.slane %v6726_v27, 1  ;;  %v7085_v46 = vrot.slane %v6734_v26, 7  ;;  %v7030_v30 = vsel %vm1454_vm2, %v7029_v16, %v6698_v19  ;;  %v10586_v19 = vld [vmem:[%s15503_s10 + $0xf4] sm:$0xf0] }
 0x5b6   : > { %v7087_v38 = vrot.slane %v6738_v14, 6  ;;  %v7089_v34 = vrot.slane %v6742_v32, 5  ;;  %v7091_v53 = vrot.slane %v6746_v44, 4  ;;  %v7032_v63 = vsel %vm1456_vm3, %v7031_v28, %v7030_v30  ;;  %v10627_v62 = vld [vmem:[%s15503_s10 + $0x244] sm:$0xf] }
 0x5b7   : > { %v7086_v2 = vsel %vm1454_vm2, %v7085_v46, %v6730_v35  ;;  %v7093_v0 = vrot.slane %v6750_v25, 3  ;;  %v7095_v47 = vrot.slane %v6754_v55, 2  ;;  %v7034_v12 = vsel %vm1458_vm4, %v7033_v1, %v7032_v63  ;;  %v9982_v27 = vld [vmem:[%s15503_s10 + $0x250] sm:$0xf0]  ;;  %v9796_v44 = vld [vmem:[%s15503_s10 + $0xc8] sm:$0xf] }
 0x5b8   : > { %v7088_v39 = vsel %vm1456_vm3, %v7087_v38, %v7086_v2  ;;  %v7097_v59 = vrot.slane %v6758_v31, 1  ;;  %v10129_v50 = vor.u32 %v10663_v23, %v10126_v56  ;;  %v7036_v8 = vsel %vm1460_vm5, %v7035_v15, %v7034_v12  ;;  %v10582_v25 = vld [vmem:[%s15503_s10 + $0xd4] sm:$0xf0]  ;;  %v10655_v16 = vld [vmem:[%s15503_s10 + $0x324] sm:$0xf] }
 0x5b9   : > { %v7090_v37 = vsel %vm1458_vm4, %v7089_v34, %v7088_v39  ;;  %v9873_v49 = vor.u32 %v10599_v45, %v9870_v6  ;;  %v10001_v36 = vor.u32 %v10631_v7, %v9998_v48  ;;  %v7038_v9 = vsel %vm1462_vm6, %v7037_v4, %v7036_v8  ;;  %v10094_v28 = vld [vmem:[%s15503_s10 + $0x330] sm:$0xf0]  ;;  %v10591_v1 = vld [vmem:[%s15503_s10 + $0x124] sm:$0xf]  ;;  %v9780_v38 = vld [vmem:[%s15503_s10 + $0xa8] sm:$0xf] }
 0x5ba   : > { %v7092_v20 = vsel %vm1460_vm5, %v7091_v53, %v7090_v37  ;;  %7971 = vmatpush.bf16.msrb.mxu2 %v10129_v50  ;;  %v10113_v11 = vor.u32 %v10659_v60, %v10110_v18  ;;  %v5838_v5 = vperm.slane %v14381_v40, 1  ;;  %v7040_v35 = vsel %vm1464_vm7, %v7039_v10, %v7038_v9  ;;  %v9838_v4 = vld [vmem:[%s15503_s10 + $0x130] sm:$0xf0]  ;;  %v10623_v10 = vld [vmem:[%s15503_s10 + $0x224] sm:$0xf] }
 0x5bb   : > { %v7094_v26 = vsel %vm1462_vm6, %v7093_v0, %v7092_v20  ;;  %7915 = vmatpush.bf16.msrb.mxu0 %v9873_v49  ;;  %7943 = vmatpush.bf16.msrb.mxu1 %v10001_v36  ;;  %v9857_v14 = vor.u32 %v10595_v58, %v9854_v41  ;;  %v5839_v32 = vperm.slane %v14381_v40, 2  ;;  %v7042_v55 = vsel %vm1466_vm8, %v7041_v61, %v7040_v35  ;;  %v9966_v61 = vld [vmem:[%s15503_s10 + $0x230] sm:$0xf0]  ;;  %v10578_v48 = vld [vmem:[%s15503_s10 + $0xb4] sm:$0xf0] }
 0x5bc   : > { %v7096_v31 = vsel %vm1464_vm7, %v7095_v47, %v7094_v26  ;;  %v6230_v23 = vpack.c.bf16 %v5838_v5, %v5838_v5  ;;  %v9813_v56 = vor.u32 %v10586_v19, %v9812_v33  ;;  %v9985_v6 = vor.u32 %v10627_v62, %v9982_v27  ;;  %v10587_v63 = vld [vmem:[%s15503_s10 + $0x104] sm:$0xf]  ;;  %v9822_v2 = vld [vmem:[%s15503_s10 + $0x110] sm:$0xf0]  ;;  %v9764_v50 = vld [vmem:[%s15503_s10 + $0x88] sm:$0xf] }
 0x5bd   : > { %v7098_v15 = vsel %vm1466_vm8, %v7097_v59, %v7096_v31  ;;  %v6231_v45 = vpack.c.bf16 %v5839_v32, %v5839_v32  ;;  %v9797_v30 = vor.u32 %v10582_v25, %v9796_v44  ;;  %v10097_v53 = vor.u32 %v10655_v16, %v10094_v28  ;;  %v10651_v12 = vld [vmem:[%s15503_s10 + $0x304] sm:$0xf]  ;;  %v10078_v39 = vld [vmem:[%s15503_s10 + $0x310] sm:$0xf0]  ;;  %v10196_v8 = vld [vmem:[%s15503_s10 + $0x3e8] sm:$0xf] }
 0x5be   : > { %v14420_v46 = vpack.c.b16 %v7098_v15, %v7042_v55  ;;  %7972 = vmatpush.bf16.msrb.mxu2 %v10113_v11  ;;  %v6760_v7 = vunpack.c.l.b16 %v6230_v23  ;;  %7995 = vmatpush.bf16.msrb.mxu3 %v9813_v56  ;;  %v5840_v47 = vperm.slane %v14381_v40, 3  ;;  %v9841_v60 = vor.u32 %v10591_v1, %v9838_v4  ;;  %v10619_v58 = vld [vmem:[%s15503_s10 + $0x204] sm:$0xf]  ;;  %v9950_v41 = vld [vmem:[%s15503_s10 + $0x210] sm:$0xf0]  ;;  %v14493_v23 = vpop.f32.mrf.mxu3 }
 0x5bf   : > { %7916 = vmatpush.bf16.msrb.mxu0 %v9857_v14  ;;  %v6761_v34 = vunpack.c.l.b16 %v6231_v45  ;;  %7944 = vmatpush.bf16.msrb.mxu1 %v9985_v6  ;;  %v9969_v18 = vor.u32 %v10623_v10, %v9966_v61  ;;  %v9781_v37 = vor.u32 %v10578_v48, %v9780_v38  ;;  %v10682_v49 = vld [vmem:[%s15503_s10 + $0x3f4] sm:$0xf0]  ;;  %v9940_v36 = vld [vmem:[%s15503_s10 + $0x1e8] sm:$0xf]  ;;  %v10081_v9 = vor.u32 %v10651_v12, %v10078_v39 }
 0x5c0   : > { %7873 = vmatmul.bf16.gmra.mxu2 %v14420_v46  ;;  %v14435_v0 = vpack.c.b16 %v6760_v7, %v6760_v7  ;;  %v10618_v33 = vld [vmem:[%s15503_s10 + $0x1f4] sm:$0xf0]  ;;  %v10068_v20 = vld [vmem:[%s15503_s10 + $0x2e8] sm:$0xf]  ;;  %v6232_v40 = vpack.c.bf16 %v5840_v47, %v5840_v47  ;;  %v9825_v5 = vor.u32 %v10587_v63, %v9822_v2  ;;  %v9953_v62 = vor.u32 %v10619_v58, %v9950_v41 }
 0x5c1   : > { %v14444_v59 = vpack.c.b16 %v6761_v34, %v6761_v34  ;;  %v10574_v19 = vld [vmem:[%s15503_s10 + $0x94] sm:$0xf0]  ;;  %v9748_v27 = vld [vmem:[%s15503_s10 + $0x68] sm:$0xf]  ;;  %v10197_v35 = vor.u32 %v10682_v49, %v10196_v8  ;;  %v9941_v26 = vor.u32 %v10618_v33, %v9940_v36 }
 0x5c2   : > { %7822 = vmatmul.bf16.gmra.mxu0 %v14435_v0  ;;  %7996 = vmatpush.bf16.msrb.mxu3 %v9797_v30  ;;  %v10650_v11 = vld [vmem:[%s15503_s10 + $0x2f4] sm:$0xf0]  ;;  %v10180_v14 = vld [vmem:[%s15503_s10 + $0x3c8] sm:$0xf]  ;;  %v9765_v32 = vor.u32 %v10574_v19, %v9764_v50  ;;  %v6762_v1 = vunpack.c.l.b16 %v6232_v40 }
 0x5c3   : > { %7850 = vmatmul.bf16.gmra.mxu1 %v14444_v59  ;;  %7973 = vmatpush.bf16.msrb.mxu2 %v10097_v53  ;;  %v10069_v44 = vor.u32 %v10650_v11, %v10068_v20  ;;  %v10678_v25 = vld [vmem:[%s15503_s10 + $0x3d4] sm:$0xf0]  ;;  %v9924_v55 = vld [vmem:[%s15503_s10 + $0x1c8] sm:$0xf] }
 0x5c4   : > { %7917 = vmatpush.bf16.msrb.mxu0 %v9841_v60  ;;  %7945 = vmatpush.bf16.msrb.mxu1 %v9969_v18  ;;  %v10614_v31 = vld [vmem:[%s15503_s10 + $0x1d4] sm:$0xf0]  ;;  %v10052_v16 = vld [vmem:[%s15503_s10 + $0x2c8] sm:$0xf]  ;;  %v10181_v15 = vor.u32 %v10678_v25, %v10180_v14  ;;  %v14510_v7 = vpack.c.b16 %v6762_v1, %v6762_v1 }
 0x5c5   : > { %v10570_v56 = vld [vmem:[%s15503_s10 + $0x74] sm:$0xf0]  ;;  %v9925_v45 = vor.u32 %v10614_v31, %v9924_v55  ;;  %v9732_v10 = vld [vmem:[%s15503_s10 + $0x48] sm:$0xf] }
 0x5c6   : > { %7997 = vmatpush.bf16.msrb.mxu3 %v9781_v37  ;;  %v10646_v28 = vld [vmem:[%s15503_s10 + $0x2d4] sm:$0xf0]  ;;  %v9749_v6 = vor.u32 %v10570_v56, %v9748_v27  ;;  %v9716_v38 = vld [vmem:[%s15503_s10 + $0x28] sm:$0xf]  ;;  %v14528_v2 = vpop.f32.mrf.mxu3 }
 0x5c7   : > { %7974 = vmatpush.bf16.msrb.mxu2 %v10081_v9  ;;  %v10053_v4 = vor.u32 %v10646_v28, %v10052_v16  ;;  %v10566_v61 = vld [vmem:[%s15503_s10 + $0x54] sm:$0xf0]  ;;  %v10164_v53 = vld [vmem:[%s15503_s10 + $0x3a8] sm:$0xf] }
 0x5c8   : > { %7918 = vmatpush.bf16.msrb.mxu0 %v9825_v5  ;;  %7946 = vmatpush.bf16.msrb.mxu1 %v9953_v62  ;;  %v9733_v30 = vor.u32 %v10566_v61, %v9732_v10  ;;  %v10562_v34 = vld [vmem:[%s15503_s10 + $0x34] sm:$0xf0]  ;;  %v9908_v63 = vld [vmem:[%s15503_s10 + $0x1a8] sm:$0xf] }
 0x5c9   : > { %v10674_v48 = vld [vmem:[%s15503_s10 + $0x3b4] sm:$0xf0]  ;;  %v9700_v47 = vld [vmem:[%s15503_s10 + $0x8] sm:$0xf]  ;;  %v9717_v58 = vor.u32 %v10562_v34, %v9716_v38  ;;  %v10580_v34 = vld [vmem:[%s15503_s10 + $0xcc] sm:$0xf] }
 0x5ca   : > { %7998 = vmatpush.bf16.msrb.mxu3 %v9765_v32  ;;  %v10558_v60 = vld [vmem:[%s15503_s10 + $0x14] sm:$0xf0]  ;;  %v10165_v18 = vor.u32 %v10674_v48, %v10164_v53  ;;  %v10036_v39 = vld [vmem:[%s15503_s10 + $0x2a8] sm:$0xf]  ;;  %v9798_v48 = vld [vmem:[%s15503_s10 + $0xd8] sm:$0xf0] }
 0x5cb   : > { %8079 = vmatpush.bf16.msra.mxu2 %v10197_v35  ;;  %v10610_v12 = vld [vmem:[%s15503_s10 + $0x1b4] sm:$0xf0]  ;;  %v10148_v37 = vld [vmem:[%s15503_s10 + $0x388] sm:$0xf]  ;;  %v9701_v5 = vor.u32 %v10558_v60, %v9700_v47  ;;  %v10576_v60 = vld [vmem:[%s15503_s10 + $0xac] sm:$0xf] }
 0x5cc   : > { %8023 = vmatpush.bf16.msra.mxu0 %v9941_v26  ;;  %8051 = vmatpush.bf16.msra.mxu1 %v10069_v44  ;;  %v10642_v50 = vld [vmem:[%s15503_s10 + $0x2b4] sm:$0xf0]  ;;  %v9909_v41 = vor.u32 %v10610_v12, %v9908_v63  ;;  %v9892_v36 = vld [vmem:[%s15503_s10 + $0x188] sm:$0xf]  ;;  %v9801_v63 = vor.u32 %v10580_v34, %v9798_v48  ;;  %v9718_v34 = vld [vmem:[%s15503_s10 + $0x38] sm:$0xf0] }
 0x5cd   : > { %v10037_v8 = vor.u32 %v10642_v50, %v10036_v39  ;;  %v10670_v49 = vld [vmem:[%s15503_s10 + $0x394] sm:$0xf0]  ;;  %v10020_v9 = vld [vmem:[%s15503_s10 + $0x288] sm:$0xf]  ;;  %v10198_v48 = vld [vmem:[%s15503_s10 + $0x3f8] sm:$0xf0] }
 0x5ce   : > { %7999 = vmatpush.bf16.msrb.mxu3 %v9749_v6  ;;  %v10149_v33 = vor.u32 %v10670_v49, %v10148_v37  ;;  %v10606_v19 = vld [vmem:[%s15503_s10 + $0x194] sm:$0xf0]  ;;  %v14565_v62 = vpop.f32.mrf.mxu3  ;;  %v10132_v27 = vld [vmem:[%s15503_s10 + $0x368] sm:$0xf]  ;;  %v10584_v6 = vld [vmem:[%s15503_s10 + $0xec] sm:$0xf] }
 0x5cf   : > { %8080 = vmatpush.bf16.msra.mxu2 %v10181_v15  ;;  %v10638_v20 = vld [vmem:[%s15503_s10 + $0x294] sm:$0xf0]  ;;  %v9893_v11 = vor.u32 %v10606_v19, %v9892_v36  ;;  %v9876_v26 = vld [vmem:[%s15503_s10 + $0x168] sm:$0xf] }
 0x5d0   : > { %8024 = vmatpush.bf16.msra.mxu0 %v9925_v45  ;;  %8052 = vmatpush.bf16.msra.mxu1 %v10053_v4  ;;  %v10021_v40 = vor.u32 %v10638_v20, %v10020_v9  ;;  %v10666_v35 = vld [vmem:[%s15503_s10 + $0x374] sm:$0xf0]  ;;  %v10004_v25 = vld [vmem:[%s15503_s10 + $0x268] sm:$0xf]  ;;  %v9814_v4 = vld [vmem:[%s15503_s10 + $0xf8] sm:$0xf0] }
 0x5d1   : > { %7878 = vmatmul.bf16.gmra.mxu2 %v14510_v7  ;;  %v10133_v32 = vor.u32 %v10666_v35, %v10132_v27  ;;  %v10602_v44 = vld [vmem:[%s15503_s10 + $0x174] sm:$0xf0]  ;;  %v10116_v16 = vld [vmem:[%s15503_s10 + $0x348] sm:$0xf]  ;;  %v9817_v61 = vor.u32 %v10584_v6, %v9814_v4  ;;  %v10572_v20 = vld [vmem:[%s15503_s10 + $0x8c] sm:$0xf] }
 0x5d2   : > { %7919 = vmatmul.bf16.vlgmr.msrb.gmra.mxu0 %v13898_v24  ;;  %8000 = vmatpush.bf16.msrb.mxu3 %v9733_v30  ;;  %v10634_v55 = vld [vmem:[%s15503_s10 + $0x274] sm:$0xf0]  ;;  %v9877_v31 = vor.u32 %v10602_v44, %v9876_v26  ;;  %v9860_v1 = vld [vmem:[%s15503_s10 + $0x148] sm:$0xf]  ;;  %v10564_v6 = vld [vmem:[%s15503_s10 + $0x4c] sm:$0xf] }
 0x5d3   : > { %7947 = vmatmul.bf16.vlgmr.msrb.gmra.mxu1 %v13947_v54  ;;  %8081 = vmatpush.bf16.msra.mxu2 %v10165_v18  ;;  %v10005_v56 = vor.u32 %v10634_v55, %v10004_v25  ;;  %v10662_v28 = vld [vmem:[%s15503_s10 + $0x354] sm:$0xf0]  ;;  %v9988_v30 = vld [vmem:[%s15503_s10 + $0x248] sm:$0xf]  ;;  %v9782_v18 = vld [vmem:[%s15503_s10 + $0xb8] sm:$0xf0] }
 0x5d4   : > { %8025 = vmatpush.bf16.msra.mxu0 %v9909_v41  ;;  %8053 = vmatpush.bf16.msra.mxu1 %v10037_v8  ;;  %v10117_v15 = vor.u32 %v10662_v28, %v10116_v16  ;;  %v10598_v45 = vld [vmem:[%s15503_s10 + $0x154] sm:$0xf0]  ;;  %v10100_v12 = vld [vmem:[%s15503_s10 + $0x328] sm:$0xf]  ;;  %v5427_v41 = vpop.f32.mrf.mxu2  ;;  %v10568_v16 = vld [vmem:[%s15503_s10 + $0x6c] sm:$0xf] }
 0x5d5   : > { %v9861_v10 = vor.u32 %v10598_v45, %v9860_v1  ;;  %v10630_v38 = vld [vmem:[%s15503_s10 + $0x254] sm:$0xf0]  ;;  %v9844_v50 = vld [vmem:[%s15503_s10 + $0x128] sm:$0xf]  ;;  %v5431_v36 = vmax.f32 %v5427_v41, 0.0 }
 0x5d6   : > { %8001 = vmatpush.bf16.msrb.mxu3 %v9717_v58  ;;  %v14578_v14 = vpop.f32.mrf.mxu3  ;;  %v9989_v53 = vor.u32 %v10630_v38, %v9988_v30  ;;  %v10658_v39 = vld [vmem:[%s15503_s10 + $0x334] sm:$0xf0]  ;;  %v9785_v58 = vor.u32 %v10576_v60, %v9782_v18  ;;  %v9828_v35 = vld [vmem:[%s15503_s10 + $0x108] sm:$0xf]  ;;  %v9750_v1 = vld [vmem:[%s15503_s10 + $0x78] sm:$0xf0] }
 0x5d7   : > { %8082 = vmatpush.bf16.msra.mxu2 %v10149_v33  ;;  %v10101_v37 = vor.u32 %v10658_v39, %v10100_v12  ;;  %v10594_v49 = vld [vmem:[%s15503_s10 + $0x134] sm:$0xf0]  ;;  %v9972_v33 = vld [vmem:[%s15503_s10 + $0x228] sm:$0xf]  ;;  %v9753_v45 = vor.u32 %v10568_v16, %v9750_v1  ;;  %v9734_v4 = vld [vmem:[%s15503_s10 + $0x58] sm:$0xf0] }
 0x5d8   : > { %8026 = vmatpush.bf16.msra.mxu0 %v9893_v11  ;;  %8054 = vmatpush.bf16.msra.mxu1 %v10021_v40  ;;  %v9845_v19 = vor.u32 %v10594_v49, %v9844_v50  ;;  %v10626_v9 = vld [vmem:[%s15503_s10 + $0x234] sm:$0xf0]  ;;  %v9766_v11 = vld [vmem:[%s15503_s10 + $0x98] sm:$0xf0]  ;;  %v5432_v40 = vsub.f32 0.0, %v5431_v36  ;;  %v9737_v30 = vor.u32 %v10564_v6, %v9734_v4 }
 0x5d9   : > { %v9769_v27 = vor.u32 %v10572_v20, %v9766_v11  ;;  %v10590_v26 = vld [vmem:[%s15503_s10 + $0x114] sm:$0xf0]  ;;  %v10084_v44 = vld [vmem:[%s15503_s10 + $0x308] sm:$0xf]  ;;  %v10560_v38 = vld [vmem:[%s15503_s10 + $0x2c] sm:$0xf] }
 0x5da   : > { %8002 = vmatpush.bf16.msrb.mxu3 %v9701_v5  ;;  %v9973_v5 = vor.u32 %v10626_v9, %v9972_v33  ;;  %v10654_v25 = vld [vmem:[%s15503_s10 + $0x314] sm:$0xf0]  ;;  %v9956_v55 = vld [vmem:[%s15503_s10 + $0x208] sm:$0xf]  ;;  %v10616_v60 = vld [vmem:[%s15503_s10 + $0x1ec] sm:$0xf]  ;;  %v14728_v9 = vpop.f32.mrf.mxu0 }
 0x5db   : > { %8083 = vmatpush.bf16.msra.mxu2 %v10133_v32  ;;  %v9829_v32 = vor.u32 %v10590_v26, %v9828_v35  ;;  %v9942_v39 = vld [vmem:[%s15503_s10 + $0x1f8] sm:$0xf0]  ;;  %v10556_v36 = vld [vmem:[%s15503_s10 + $0xc] sm:$0xf] }
 0x5dc   : > { %8027 = vmatpush.bf16.msra.mxu0 %v9877_v31  ;;  %8055 = vmatpush.bf16.msra.mxu1 %v10005_v56  ;;  %v10085_v31 = vor.u32 %v10654_v25, %v10084_v44  ;;  %v10622_v56 = vld [vmem:[%s15503_s10 + $0x214] sm:$0xf0]  ;;  %v10070_v41 = vld [vmem:[%s15503_s10 + $0x2f8] sm:$0xf0]  ;;  %v10644_v44 = vld [vmem:[%s15503_s10 + $0x2cc] sm:$0xf] }
 0x5dd   : > { %8003 = vmatmul.bf16.vlgmr.msrb.gmra.mxu3 %v13521_v51  ;;  %v9957_v28 = vor.u32 %v10622_v56, %v9956_v55  ;;  %v9702_v33 = vld [vmem:[%s15503_s10 + $0x18] sm:$0xf0]  ;;  %v10608_v6 = vld [vmem:[%s15503_s10 + $0x1ac] sm:$0xf] }
 0x5de   : > { %8107 = vmatpush.bf16.msra.mxu3 %v9817_v61  ;;  %v14621_v47 = vpop.f32.mrf.mxu3  ;;  %v9705_v20 = vor.u32 %v10556_v36, %v9702_v33  ;;  %v10182_v11 = vld [vmem:[%s15503_s10 + $0x3d8] sm:$0xf0] }
 0x5df   : > { %8084 = vmatpush.bf16.msra.mxu2 %v10117_v15  ;;  %v5433_v15 = vmul.f32 1.442695, %v5432_v40  ;;  %v10612_v40 = vld [vmem:[%s15503_s10 + $0x1cc] sm:$0xf]  ;;  %v10054_v25 = vld [vmem:[%s15503_s10 + $0x2d8] sm:$0xf0] }
 0x5e0   : > { %8028 = vmatpush.bf16.msra.mxu0 %v9861_v10  ;;  %8056 = vmatpush.bf16.msra.mxu1 %v9989_v53  ;;  %v5429_v10 = vpop.f32.mrf.mxu2  ;;  %v10680_v53 = vld [vmem:[%s15503_s10 + $0x3ec] sm:$0xf]  ;;  %v10057_v55 = vor.u32 %v10644_v44, %v10054_v25 }
 0x5e1   : > { %7975 = vmatmul.bf16.vlgmr.msrb.gmra.mxu2 %v14027_v3  ;;  %10754 = vpow2.f32 %v5433_v15  ;;  %v10201_v12 = vor.u32 %v10680_v53, %v10198_v48  ;;  %v10672_v15 = vld [vmem:[%s15503_s10 + $0x3ac] sm:$0xf]  ;;  %v9910_v10 = vld [vmem:[%s15503_s10 + $0x1b8] sm:$0xf0] }
 0x5e2   : > { %7924 = vmatmul.bf16.gmra.mxu0 %v14104_v52  ;;  %8108 = vmatpush.bf16.msra.mxu3 %v9801_v63  ;;  %v9721_v63 = vor.u32 %v10560_v38, %v9718_v34  ;;  %v14750_v16 = vpop.f32.mrf.mxu0  ;;  %v10640_v38 = vld [vmem:[%s15503_s10 + $0x2ac] sm:$0xf]  ;;  %v10038_v34 = vld [vmem:[%s15503_s10 + $0x2b8] sm:$0xf0]  ;;  %v9913_v53 = vor.u32 %v10608_v6, %v9910_v10 }
 0x5e3   : > { %7952 = vmatmul.bf16.gmra.mxu1 %v14146_v29  ;;  %8085 = vmatpush.bf16.msra.mxu2 %v10101_v37  ;;  %v9945_v37 = vor.u32 %v10616_v60, %v9942_v39  ;;  %v10041_v48 = vor.u32 %v10640_v38, %v10038_v34  ;;  %v10150_v60 = vld [vmem:[%s15503_s10 + $0x398] sm:$0xf0]  ;;  %v10596_v6 = vld [vmem:[%s15503_s10 + $0x14c] sm:$0xf] }
 0x5e4   : > { %8029 = vmatpush.bf16.msra.mxu0 %v9845_v19  ;;  %8057 = vmatpush.bf16.msra.mxu1 %v9973_v5  ;;  %v10676_v19 = vld [vmem:[%s15503_s10 + $0x3cc] sm:$0xf]  ;;  %v9926_v5 = vld [vmem:[%s15503_s10 + $0x1d8] sm:$0xf0] }
 0x5e5   : > { %v10185_v35 = vor.u32 %v10676_v19, %v10182_v11  ;;  %v9929_v26 = vor.u32 %v10612_v40, %v9926_v5  ;;  %v9894_v39 = vld [vmem:[%s15503_s10 + $0x198] sm:$0xf0]  ;;  %v10600_v40 = vld [vmem:[%s15503_s10 + $0x16c] sm:$0xf] }
 0x5e6   : > { %v14640_v8 = vpop.f32.mrf.mxu3  ;;  %8109 = vmatpush.bf16.msra.mxu3 %v9785_v58  ;;  %v10648_v58 = vld [vmem:[%s15503_s10 + $0x2ec] sm:$0xf]  ;;  %v10134_v11 = vld [vmem:[%s15503_s10 + $0x378] sm:$0xf0] }
 0x5e7   : > { %8086 = vmatpush.bf16.msra.mxu2 %v10085_v31  ;;  %v10755_v18 = vpop.eup %10754  ;;  %v10073_v49 = vor.u32 %v10648_v58, %v10070_v41  ;;  %v10022_v58 = vld [vmem:[%s15503_s10 + $0x298] sm:$0xf0] }
 0x5e8   : > { %8030 = vmatpush.bf16.msra.mxu0 %v9829_v32  ;;  %8058 = vmatpush.bf16.msra.mxu1 %v9957_v28  ;;  %v5435_v32 = vadd.f32 1.0, %v10755_v18  ;;  %v10604_v18 = vld [vmem:[%s15503_s10 + $0x18c] sm:$0xf]  ;;  %v14801_v19 = vpop.f32.mrf.mxu2  ;;  %v10690_v34 = vld [vmem:[%s15511_s18 + $0x38] sm:$0xff] }
 0x5e9   : > { %v9897_v41 = vor.u32 %v10604_v18, %v9894_v39  ;;  %v10628_v18 = vld [vmem:[%s15503_s10 + $0x24c] sm:$0xf] }
 0x5ea   : > { %8110 = vmatpush.bf16.msra.mxu3 %v9769_v27  ;;  %v14739_v27 = vpop.f32.mrf.mxu1  ;;  %10756 = vrcp.f32 %v5435_v32 }
 0x5eb   : > { %8191 = vmatpush.bf16.msrb.mxu2 %v10201_v12 }
 0x5ec   : > { %8135 = vmatpush.bf16.msrb.mxu0 %v9945_v37  ;;  %8163 = vmatpush.bf16.msrb.mxu1 %v10073_v49  ;;  %v14795_v49 = vpop.f32.mrf.mxu0 }
 0x5ed   : > { %8008 = vmatmul.bf16.gmra.mxu3 %v13637_v43 }
 0x5ee   : > { %v14689_v61 = vpop.f32.mrf.mxu3  ;;  %8111 = vmatpush.bf16.msra.mxu3 %v9753_v45  ;;  %v10166_v45 = vld [vmem:[%s15503_s10 + $0x3b8] sm:$0xf0] }
 0x5ef   : > { %8192 = vmatpush.bf16.msrb.mxu2 %v10185_v35  ;;  %v10169_v4 = vor.u32 %v10672_v15, %v10166_v45  ;;  %v10118_v45 = vld [vmem:[%s15503_s10 + $0x358] sm:$0xf0] }
 0x5f0   : > { %8136 = vmatpush.bf16.msrb.mxu0 %v9929_v26  ;;  %8164 = vmatpush.bf16.msrb.mxu1 %v10057_v55  ;;  %v10757_v56 = vpop.eup %10756  ;;  %v14825_v25 = vpop.f32.mrf.mxu2  ;;  %v10632_v55 = vld [vmem:[%s15503_s10 + $0x26c] sm:$0xf] }
 0x5f1   : > { %7980 = vmatmul.bf16.gmra.mxu2 %v14226_v42  ;;  %v5437_v28 = vadd.f32 1.0, %v10757_v56  ;;  %v10006_v56 = vld [vmem:[%s15503_s10 + $0x278] sm:$0xf0] }
 0x5f2   : > { %7929 = vmatmul.bf16.gmra.mxu0 %v14288_v21  ;;  %8112 = vmatpush.bf16.msra.mxu3 %v9737_v30  ;;  %v14752_v1 = vpop.f32.mrf.mxu1  ;;  %v10009_v15 = vor.u32 %v10632_v55, %v10006_v56  ;;  %v10687_v56 = vld [vmem:[%s15511_s18 + $0x20] sm:$0xff] }
 0x5f3   : > { %7957 = vmatmul.bf16.gmra.mxu1 %v14329_v17  ;;  %10725 = vpush %v5437_v28  ;;  %8193 = vmatpush.bf16.msrb.mxu2 %v10169_v4  ;;  %v10660_v28 = vld [vmem:[%s15503_s10 + $0x34c] sm:$0xf]  ;;  %v9862_v4 = vld [vmem:[%s15503_s10 + $0x158] sm:$0xf0] }
 0x5f4   : > { %8137 = vmatpush.bf16.msrb.mxu0 %v9913_v53  ;;  %8165 = vmatpush.bf16.msrb.mxu1 %v10041_v48  ;;  %v14814_v5 = vpop.f32.mrf.mxu0  ;;  %v10121_v10 = vor.u32 %v10660_v28, %v10118_v45  ;;  %v9865_v38 = vor.u32 %v10596_v6, %v9862_v4  ;;  %v10588_v28 = vld [vmem:[%s15503_s10 + $0x10c] sm:$0xf] }
 0x5f6   : > { %v7797_v50 = vpop.f32.mrf.mxu3  ;;  %8113 = vmatpush.bf16.msra.mxu3 %v9721_v63  ;;  %v10668_v63 = vld [vmem:[%s15503_s10 + $0x38c] sm:$0xf] }
 0x5f7   : > { %v10153_v12 = vor.u32 %v10668_v63, %v10150_v60  ;;  %v10636_v50 = vld [vmem:[%s15503_s10 + $0x28c] sm:$0xf]  ;;  %v10689_v60 = vld [vmem:[%s15511_s18 + $0x30] sm:$0xff] }
 0x5f8   : > { %v10025_v37 = vor.u32 %v10636_v50, %v10022_v58  ;;  %8138 = vmatpush.bf16.msrb.mxu0 %v9897_v41  ;;  %v10656_v58 = vld [vmem:[%s15503_s10 + $0x32c] sm:$0xf] }
 0x5f9   : > { %8194 = vmatpush.bf16.msrb.mxu2 %v10153_v12  ;;  %v9990_v12 = vld [vmem:[%s15503_s10 + $0x258] sm:$0xf0]  ;;  %v10592_v41 = vld [vmem:[%s15503_s10 + $0x12c] sm:$0xf] }
 0x5fa   : > { %8114 = vmatpush.bf16.msra.mxu3 %v9705_v20  ;;  %v14797_v36 = vpop.f32.mrf.mxu1  ;;  %8166 = vmatpush.bf16.msrb.mxu1 %v10025_v37  ;;  %v10664_v20 = vld [vmem:[%s15503_s10 + $0x36c] sm:$0xf]  ;;  %v9993_v50 = vor.u32 %v10628_v18, %v9990_v12  ;;  %v10686_v18 = vld [vmem:[%s15511_s18 + $0x18] sm:$0xff] }
 0x5fb   : > { %v10137_v35 = vor.u32 %v10664_v20, %v10134_v11  ;;  %v9846_v20 = vld [vmem:[%s15503_s10 + $0x138] sm:$0xf0]  ;;  %v10688_v11 = vld [vmem:[%s15511_s18 + $0x28] sm:$0xff] }
 0x5fd   : > { %8013 = vmatmul.bf16.gmra.mxu3 %v13834_v22  ;;  %8195 = vmatpush.bf16.msrb.mxu2 %v10137_v35  ;;  %v10624_v35 = vld [vmem:[%s15503_s10 + $0x22c] sm:$0xf] }
 0x5fe   : > { %v14747_v31 = vpop.f32.mrf.mxu3  ;;  %8167 = vmatpush.bf16.msrb.mxu1 %v10009_v15  ;;  %8535 = vmatpush.bf16.msrb.mxu3 %v10690_v34  ;;  %v9830_v15 = vld [vmem:[%s15503_s10 + $0x118] sm:$0xf0]  ;;  %v14910_v34 = vld [vmem:[%s15504_s11] sm:$0xf] }
 0x5ff   : > { %v9833_v6 = vor.u32 %v10588_v28, %v9830_v15 }
 0x601   : > { %7985 = vmatmul.bf16.gmra.mxu2 %v14420_v46 }
 0x602   : > { %7934 = vmatmul.bf16.gmra.mxu0 %v14435_v0  ;;  %v14820_v26 = vpop.f32.mrf.mxu1  ;;  %8196 = vmatpush.bf16.msrb.mxu2 %v10121_v10  ;;  %v10620_v10 = vld [vmem:[%s15503_s10 + $0x20c] sm:$0xf] }
 0x603   : > { %7962 = vmatmul.bf16.gmra.mxu1 %v14444_v59  ;;  %8536 = vmatpush.bf16.msrb.mxu3 %v10689_v60 }
 0x604   : > { %8168 = vmatpush.bf16.msrb.mxu1 %v9993_v50  ;;  %v6363_v50 = vperm.slane %v14910_v34, 0 }
 0x606   : > { %v14767_v30 = vpop.f32.mrf.mxu3 }
 0x607   : > { %8537 = vmatpush.bf16.msrb.mxu3 %v10688_v11  ;;  %v7781_v11 = vadd.f32 %v14493_v23, %v6363_v50  ;;  %v7791_v23 = vadd.f32 %v14621_v47, %v6363_v50 }
 0x608   : > { %v14864_v39 = vpop.f32.mrf.mxu2 }
 0x609   : > { %v7809_v28 = vadd.f32 %v14728_v9, %v7781_v11  ;;  %v7793_v9 = vadd.f32 %v14640_v8, %v6363_v50 }
 0x60b   : > { %8538 = vmatpush.bf16.msrb.mxu3 %v10687_v56  ;;  %v10684_v56 = vld [vmem:[%s15511_s18 + $0x8] sm:$0xff] }
 0x60d   : > { %8018 = vmatmul.bf16.gmra.mxu3 %v13857_v57 }
 0x60e   : > { %v14799_v33 = vpop.f32.mrf.mxu3 }
 0x60f   : > { %8539 = vmatpush.bf16.msrb.mxu3 %v10686_v18  ;;  %v7796_v18 = vadd.f32 %v14689_v61, %v6363_v50 }
 0x610   : > { %v7871_v12 = vpop.f32.mrf.mxu2 }
 0x611   : > { %7990 = vmatmul.bf16.gmra.mxu2 %v14510_v7 }
 0x612   : > { %8031 = vmatmul.bf16.vlgmr.msra.gmra.mxu0 %v13898_v24 }
 0x613   : > { %8059 = vmatmul.bf16.vlgmr.msra.gmra.mxu1 %v13947_v54 }
 0x616   : > { %v14823_v44 = vpop.f32.mrf.mxu3  ;;  %v14848_v53 = vpop.f32.mrf.mxu0 }
 0x61d   : > { %8115 = vmatmul.bf16.vlgmr.msra.gmra.mxu3 %v13521_v51  ;;  %v9878_v51 = vld [vmem:[%s15503_s10 + $0x178] sm:$0xf0] }
 0x61e   : > { %v9881_v32 = vor.u32 %v10600_v40, %v9878_v51  ;;  %v14852_v63 = vpop.f32.mrf.mxu3  ;;  %v9849_v40 = vor.u32 %v10592_v41, %v9846_v20  ;;  %v9974_v51 = vld [vmem:[%s15503_s10 + $0x238] sm:$0xf0]  ;;  %v7820_v45 = vpop.f32.mrf.mxu0  ;;  %v10685_v20 = vld [vmem:[%s15511_s18 + $0x10] sm:$0xff] }
 0x61f   : > { %8540 = vmatpush.bf16.msrb.mxu3 %v10685_v20 }
 0x620   : > { %8139 = vmatpush.bf16.msrb.mxu0 %v9881_v32  ;;  %v9977_v32 = vor.u32 %v10624_v35, %v9974_v51  ;;  %v7786_v35 = vadd.f32 %v14565_v62, %v6363_v50 }
 0x621   : > { %8087 = vmatmul.bf16.vlgmr.msra.gmra.mxu2 %v14027_v3 }
 0x622   : > { %8036 = vmatmul.bf16.gmra.mxu0 %v14104_v52  ;;  %8169 = vmatpush.bf16.msrb.mxu1 %v9977_v32  ;;  %v7814_v62 = vadd.f32 %v14795_v49, %v7786_v35  ;;  %v7819_v49 = vadd.f32 %v14848_v53, %v7791_v23 }
 0x623   : > { %8064 = vmatmul.bf16.gmra.mxu1 %v14146_v29  ;;  %8541 = vmatpush.bf16.msrb.mxu3 %v10684_v56 }
 0x624   : > { %8140 = vmatpush.bf16.msrb.mxu0 %v9865_v38  ;;  %v9958_v38 = vld [vmem:[%s15503_s10 + $0x218] sm:$0xf0]  ;;  %v7842_v47 = vadd.f32 %v14797_v36, %v7814_v62  ;;  %s10726_s26 = spop %10725 }
 0x625   : > { %v9961_v60 = vor.u32 %v10620_v10, %v9958_v38  ;;  %v10683_v10 = vld [vmem:[%s15511_s18] sm:$0xff]  ;;  %v7837_v38 = vadd.f32 %v14739_v27, %v7809_v28 }
 0x626   : > { %v14890_v55 = vpop.f32.mrf.mxu3 }
 0x627   : > { %8170 = vmatpush.bf16.msrb.mxu1 %v9961_v60  ;;  %8542 = vmatpush.bf16.msrb.mxu3 %v10683_v10  ;;  %v14956_v8 = vadd.f32 %v14801_v19, %v7837_v38 }
 0x628   : > { %8141 = vmatpush.bf16.msrb.mxu0 %v9849_v40  ;;  %v7783_v40 = vadd.f32 %v14528_v2, %v6363_v50 }
 0x629   : > { %15722 = vst [vmem:[#allocation87_spill] sm:$0xff] %v14956_v8 }
 0x62a   : > { %v14850_v48 = vpop.f32.mrf.mxu1  ;;  %v7811_v2 = vadd.f32 %v14750_v16, %v7783_v40 }
 0x62b   : > { %v7847_v36 = vadd.f32 %v14850_v48, %v7819_v49 }
 0x62c   : > { %8142 = vmatpush.bf16.msrb.mxu0 %v9833_v6 }
 0x62d   : > { %8120 = vmatmul.bf16.gmra.mxu3 %v13637_v43  ;;  %v10102_v43 = vld [vmem:[%s15503_s10 + $0x338] sm:$0xf0] }
 0x62e   : > { %v10105_v37 = vor.u32 %v10656_v58, %v10102_v43  ;;  %v10652_v58 = vld [vmem:[%s15503_s10 + $0x30c] sm:$0xf]  ;;  %v10086_v43 = vld [vmem:[%s15503_s10 + $0x318] sm:$0xf0] }
 0x62f   : > { %v10089_v41 = vor.u32 %v10652_v58, %v10086_v43 }
 0x630   : > { %8197 = vmatpush.bf16.msrb.mxu2 %v10105_v37  ;;  %v14922_v37 = vpop.f32.mrf.mxu3 }
 0x631   : > { %8092 = vmatmul.bf16.gmra.mxu2 %v14226_v42 }
 0x632   : > { %8041 = vmatmul.bf16.gmra.mxu0 %v14288_v21  ;;  %v7848_v4 = vpop.f32.mrf.mxu1 }
 0x633   : > { %8069 = vmatmul.bf16.gmra.mxu1 %v14329_v17 }
 0x634   : > { %8198 = vmatpush.bf16.msrb.mxu2 %v10089_v41 }
 0x638   : > { %v7909_v6 = vpop.f32.mrf.mxu3 }
 0x63d   : > { %8125 = vmatmul.bf16.gmra.mxu3 %v13834_v22  ;;  %v7788_v22 = vadd.f32 %v14578_v14, %v6363_v50  ;;  %v7839_v14 = vadd.f32 %v14752_v1, %v7811_v2  ;;  %v14960_v1 = vadd.f32 %v14864_v39, %v7842_v47 }
 0x63f   : > { %v7823_v51 = vpop.f32.mrf.mxu0  ;;  %v7816_v16 = vadd.f32 %v14814_v5, %v7788_v22  ;;  %v14953_v43 = vadd.f32 %v14825_v25, %v7839_v14  ;;  %15723 = vst [vmem:[#allocation88_spill] sm:$0xff] %v14960_v1  ;;  %v7821_v5 = vadd.f32 %v7820_v45, %v7793_v9  ;;  %v10698_v14 = vld [vmem:[%s15511_s18 + $0x78] sm:$0xff] }
 0x640   : > { %v7851_v32 = vpop.f32.mrf.mxu1  ;;  %v7824_v41 = vadd.f32 %v7823_v51, %v7796_v18  ;;  %8548 = vmatpush.bf16.msra.mxu0 %v10698_v14 }
 0x641   : > { %8097 = vmatmul.bf16.gmra.mxu2 %v14420_v46  ;;  %15721 = vst [vmem:[#allocation86_spill] sm:$0xff] %v14953_v43  ;;  %v7844_v27 = vadd.f32 %v14820_v26, %v7816_v16  ;;  %v8219_v61 = vadd.f32 %v14953_v43, %v14956_v8  ;;  %v7849_v25 = vadd.f32 %v7848_v4, %v7821_v5  ;;  %v10695_v5 = vld [vmem:[%s15511_s18 + $0x60] sm:$0xff]  ;;  %v15804_v43 = vld [vmem:[#allocation47_spill] sm:$0xff] }
 0x642   : > { %8046 = vmatmul.bf16.gmra.mxu0 %v14435_v0  ;;  %v7852_v39 = vadd.f32 %v7851_v32, %v7824_v41  ;;  %v15808_v8 = vld [vmem:[#allocation50_spill] sm:$0xff] }
 0x643   : > { %v7874_v15 = vpop.f32.mrf.mxu2  ;;  %8074 = vmatmul.bf16.gmra.mxu1 %v14444_v59  ;;  %v14965_v50 = vadd.f32 %v7871_v12, %v7844_v27  ;;  %v8220_v19 = vadd.f32 %v8219_v61, %v14960_v1  ;;  %v10696_v27 = vld [vmem:[%s15511_s18 + $0x68] sm:$0xff]  ;;  %v10694_v61 = vld [vmem:[%s15511_s18 + $0x58] sm:$0xff]  ;;  %v15800_v1 = vld [vmem:[#allocation44_spill] sm:$0xff] }
 0x644   : > { %v14969_v20 = vadd.f32 %v7874_v15, %v7847_v36 }
 0x645   : > { %15724 = vst [vmem:[#allocation89_spill] sm:$0xff] %v14965_v50  ;;  %v8221_v45 = vadd.f32 %v8220_v19, %v14965_v50  ;;  %v6364_v19 = vperm.slane %v14910_v34, 1  ;;  %v15796_v50 = vld [vmem:[#allocation41_spill] sm:$0xff] }
 0x646   : > { %15725 = vst [vmem:[#allocation90_spill] sm:$0xff] %v14969_v20 }
 0x647   : > { %v7825_v60 = vpop.f32.mrf.mxu0 }
 0x648   : > { %v7853_v58 = vpop.f32.mrf.mxu1 }
 0x64b   : > { %v7876_v53 = vpop.f32.mrf.mxu2 }
 0x64c   : > { %v14977_v11 = vadd.f32 %v7876_v53, %v7849_v25  ;;  %v7893_v25 = vadd.f32 %v14747_v31, %v6364_v19  ;;  %v7903_v31 = vadd.f32 %v14852_v63, %v6364_v19 }
 0x64d   : > { %8130 = vmatmul.bf16.gmra.mxu3 %v13857_v57  ;;  %v8222_v57 = vadd.f32 %v8221_v45, %v14969_v20  ;;  %v7898_v45 = vadd.f32 %v14799_v33, %v6364_v19 }
 0x64e   : > { %15726 = vst [vmem:[#allocation91_spill] sm:$0xff] %v14977_v11 }
 0x64f   : > { %v14971_v26 = vpop.f32.mrf.mxu0  ;;  %v8223_v40 = vadd.f32 %v8222_v57, %v14977_v11  ;;  %v15787_v11 = vld [vmem:[#allocation34_spill] sm:$0xff] }
 0x650   : > { %v14974_v48 = vpop.f32.mrf.mxu1 }
 0x651   : > { %8102 = vmatmul.bf16.gmra.mxu2 %v14510_v7 }
 0x652   : > { %8143 = vmatmul.bf16.vlgmr.msrb.gmra.mxu0 %v13898_v24 }
 0x653   : > { %8171 = vmatmul.bf16.vlgmr.msrb.gmra.mxu1 %v13947_v54 }
 0x654   : > { %v7879_v12 = vpop.f32.mrf.mxu2 }
 0x655   : > { %v14982_v4 = vadd.f32 %v7879_v12, %v7852_v39  ;;  %v7895_v39 = vadd.f32 %v14767_v30, %v6364_v19 }
 0x657   : > { %15727 = vst [vmem:[#allocation92_spill] sm:$0xff] %v14982_v4  ;;  %v8224_v35 = vsel %vm1716_vm9, %v14982_v4, 0.0  ;;  %v7922_v32 = vpop.f32.mrf.mxu0 }
 0x658   : > { %v8225_v51 = vadd.f32 %v8224_v35, %v8223_v40  ;;  %v14987_v56 = vpop.f32.mrf.mxu1  ;;  %v10692_v35 = vld [vmem:[%s15511_s18 + $0x48] sm:$0xff]  ;;  %v7923_v30 = vadd.f32 %v7922_v32, %v7895_v39  ;;  %v7908_v32 = vadd.f32 %v14922_v37, %v6364_v19 }
 0x65a   : > { %v8226_v28 = vrot.slane %v8225_v51, 4 }
 0x65c   : > { %v8227_v22 = vadd.f32 %v8226_v28, %v8225_v51  ;;  %v7881_v23 = vpop.f32.mrf.mxu2  ;;  %v7900_v51 = vadd.f32 %v14823_v44, %v6364_v19  ;;  %v7921_v28 = vadd.f32 %v14971_v26, %v7893_v25  ;;  %v7951_v26 = vadd.f32 %v14987_v56, %v7923_v30 }
 0x65d   : > { %v7905_v23 = vadd.f32 %v14890_v55, %v6364_v19 }
 0x65e   : > { %v8228_v24 = vrot.slane %v8227_v22, 2  ;;  %v7949_v44 = vadd.f32 %v14974_v48, %v7921_v28 }
 0x65f   : > { %v7925_v62 = vpop.f32.mrf.mxu0 }
 0x660   : > { %v8229_v2 = vadd.f32 %v8228_v24, %v8227_v22  ;;  %v7953_v54 = vpop.f32.mrf.mxu1  ;;  %v14990_v15 = vpop.f32.mrf.mxu3  ;;  %v7926_v33 = vadd.f32 %v7925_v62, %v7898_v45 }
 0x661   : > { %8199 = vmatmul.bf16.vlgmr.msrb.gmra.mxu2 %v14027_v3 }
 0x662   : > { %v8230_v6 = vrot.slane %v8229_v2, 1  ;;  %8148 = vmatmul.bf16.gmra.mxu0 %v14104_v52  ;;  %v10697_v52 = vld [vmem:[%s15511_s18 + $0x70] sm:$0xff]  ;;  %v7954_v24 = vadd.f32 %v7953_v54, %v7926_v33 }
 0x663   : > { %8176 = vmatmul.bf16.gmra.mxu1 %v14146_v29  ;;  %8549 = vmatpush.bf16.msra.mxu0 %v10697_v52 }
 0x664   : > { %v8231_v10 = vadd.f32 %v8230_v6, %v8229_v2  ;;  %v14993_v9 = vpop.f32.mrf.mxu2 }
 0x666   : > { %v8271_v38 = vmul.f32 %v8231_v10, %v11767_v13  ;;  %v15051_v10 = vadd.f32 %v14993_v9, %v7949_v44 }
 0x667   : > { %v7927_v16 = vpop.f32.mrf.mxu0  ;;  %8550 = vmatpush.bf16.msra.mxu0 %v10696_v27 }
 0x668   : > { %v8275_v47 = vpack.c.bf16 %v8271_v38, %v8271_v38  ;;  %v7955_v3 = vpop.f32.mrf.mxu1  ;;  %v15000_v49 = vpop.f32.mrf.mxu3  ;;  %15729 = vst [vmem:[#allocation94_spill] sm:$0xff] %v15051_v10 }
 0x66a   : > { %8543 = vmatmul.bf16.vlgmr.msrb.gmra.mxu3 %v8275_v47 }
 0x66b   : > { %8551 = vmatpush.bf16.msra.mxu0 %v10695_v5 }
 0x66c   : > { %v7978_v60 = vpop.f32.mrf.mxu2 }
 0x66d   : > { %v15048_v6 = vadd.f32 %v7978_v60, %v7951_v26 }
 0x66f   : > { %v7930_v29 = vpop.f32.mrf.mxu0  ;;  %8552 = vmatpush.bf16.msra.mxu0 %v10694_v61  ;;  %15728 = vst [vmem:[#allocation93_spill] sm:$0xff] %v15048_v6  ;;  %v8232_v47 = vadd.f32 %v15048_v6, %v15051_v10  ;;  %v15803_v6 = vld [vmem:[#allocation46_spill] sm:$0xff]  ;;  %v15807_v10 = vld [vmem:[#allocation49_spill] sm:$0xff] }
 0x670   : > { %v7958_v18 = vpop.f32.mrf.mxu1  ;;  %v15006_v58 = vpop.f32.mrf.mxu3  ;;  %v7931_v2 = vadd.f32 %v7930_v29, %v7903_v31 }
 0x671   : > { %8204 = vmatmul.bf16.gmra.mxu2 %v14226_v42 }
 0x672   : > { %8153 = vmatmul.bf16.gmra.mxu0 %v14288_v21  ;;  %v7959_v48 = vadd.f32 %v7958_v18, %v7931_v2 }
 0x673   : > { %8181 = vmatmul.bf16.gmra.mxu1 %v14329_v17  ;;  %v10693_v17 = vld [vmem:[%s15511_s18 + $0x50] sm:$0xff] }
 0x674   : > { %v7981_v36 = vpop.f32.mrf.mxu2  ;;  %8553 = vmatpush.bf16.msra.mxu0 %v10693_v17 }
 0x675   : > { %v15053_v38 = vadd.f32 %v7981_v36, %v7954_v24 }
 0x677   : > { %v7932_v53 = vpop.f32.mrf.mxu0  ;;  %15730 = vst [vmem:[#allocation95_spill] sm:$0xff] %v15053_v38  ;;  %v8233_v37 = vadd.f32 %v8232_v47, %v15053_v38  ;;  %v15799_v38 = vld [vmem:[#allocation43_spill] sm:$0xff] }
 0x678   : > { %v7960_v42 = vpop.f32.mrf.mxu1  ;;  %v15016_v41 = vpop.f32.mrf.mxu3  ;;  %8554 = vmatpush.bf16.msra.mxu0 %v10692_v35  ;;  %v7933_v56 = vadd.f32 %v7932_v53, %v7905_v23  ;;  %v10706_v23 = vld [vmem:[%s15511_s18 + $0xb8] sm:$0xff] }
 0x679   : > { %8561 = vmatpush.bf16.msra.mxu1 %v10706_v23 }
 0x67a   : > { %v7961_v52 = vadd.f32 %v7960_v42, %v7933_v56 }
 0x67c   : > { %v7983_v21 = vpop.f32.mrf.mxu2 }
 0x67f   : > { %v7935_v57 = vpop.f32.mrf.mxu0 }
 0x680   : > { %v7963_v12 = vpop.f32.mrf.mxu1  ;;  %v15029_v40 = vpop.f32.mrf.mxu3  ;;  %v7936_v14 = vadd.f32 %v7935_v57, %v7908_v32  ;;  %v10704_v32 = vld [vmem:[%s15511_s18 + $0xa8] sm:$0xff] }
 0x681   : > { %8209 = vmatmul.bf16.gmra.mxu2 %v14420_v46  ;;  %v10691_v46 = vld [vmem:[%s15511_s18 + $0x40] sm:$0xff] }
 0x682   : > { %8158 = vmatmul.bf16.gmra.mxu0 %v14435_v0  ;;  %v7928_v0 = vadd.f32 %v7927_v16, %v7900_v51  ;;  %v7964_v9 = vadd.f32 %v7963_v12, %v7936_v14 }
 0x683   : > { %8186 = vmatmul.bf16.gmra.mxu1 %v14444_v59  ;;  %8555 = vmatpush.bf16.msra.mxu0 %v10691_v46 }
 0x684   : > { %v7986_v22 = vpop.f32.mrf.mxu2  ;;  %v7956_v55 = vadd.f32 %v7955_v3, %v7928_v0 }
 0x685   : > { %v15060_v60 = vadd.f32 %v7986_v22, %v7959_v48 }
 0x686   : > { %v15057_v16 = vadd.f32 %v7983_v21, %v7956_v55 }
 0x687   : > { %v7937_v63 = vpop.f32.mrf.mxu0  ;;  %15732 = vst [vmem:[#allocation97_spill] sm:$0xff] %v15060_v60 }
 0x688   : > { %v7965_v62 = vpop.f32.mrf.mxu1  ;;  %v15046_v59 = vpop.f32.mrf.mxu3  ;;  %15731 = vst [vmem:[#allocation96_spill] sm:$0xff] %v15057_v16  ;;  %v8234_v27 = vadd.f32 %v8233_v37, %v15057_v16  ;;  %v10705_v63 = vld [vmem:[%s15511_s18 + $0xb0] sm:$0xff] }
 0x689   : > { %8562 = vmatpush.bf16.msra.mxu1 %v10705_v63  ;;  %v15795_v16 = vld [vmem:[#allocation40_spill] sm:$0xff] }
 0x68a   : > { %v8235_v5 = vadd.f32 %v8234_v27, %v15060_v60  ;;  %v15789_v60 = vld [vmem:[#allocation51_spill] sm:$0xff] }
 0x68c   : > { %v7988_v54 = vpop.f32.mrf.mxu2 }
 0x68d   : > { %v15068_v36 = vadd.f32 %v7988_v54, %v7961_v52  ;;  %8563 = vmatpush.bf16.msra.mxu1 %v10704_v32  ;;  %v10703_v54 = vld [vmem:[%s15511_s18 + $0xa0] sm:$0xff]  ;;  %v10702_v52 = vld [vmem:[%s15511_s18 + $0x98] sm:$0xff] }
 0x68f   : > { %v8032_v29 = vpop.f32.mrf.mxu0  ;;  %15733 = vst [vmem:[#allocation98_spill] sm:$0xff] %v15068_v36  ;;  %v8236_v42 = vadd.f32 %v8235_v5, %v15068_v36  ;;  %v10701_v5 = vld [vmem:[%s15511_s18 + $0x90] sm:$0xff]  ;;  %v15786_v36 = vld [vmem:[#allocation31_spill] sm:$0xff] }
 0x690   : > { %v15063_v3 = vpop.f32.mrf.mxu1  ;;  %v15065_v18 = vpop.f32.mrf.mxu3 }
 0x691   : > { %8214 = vmatmul.bf16.gmra.mxu2 %v14510_v7  ;;  %8564 = vmatpush.bf16.msra.mxu1 %v10703_v54  ;;  %v10714_v54 = vld [vmem:[%s15511_s18 + $0xf8] sm:$0xff] }
 0x692   : > { %8574 = vmatpush.bf16.msra.mxu2 %v10714_v54 }
 0x694   : > { %v7991_v53 = vpop.f32.mrf.mxu2 }
 0x695   : > { %v15071_v61 = vadd.f32 %v7991_v53, %v7964_v9  ;;  %v6365_v9 = vperm.slane %v14910_v34, 2  ;;  %8565 = vmatpush.bf16.msra.mxu1 %v10702_v52 }
 0x697   : > { %15734 = vst [vmem:[#allocation99_spill] sm:$0xff] %v15071_v61  ;;  %v8237_v19 = vsel %vm1716_vm9, %v15071_v61, 0.0  ;;  %v8034_v7 = vpop.f32.mrf.mxu0  ;;  %v8005_v53 = vadd.f32 %v14990_v15, %v6365_v9 }
 0x698   : > { %v8238_v21 = vadd.f32 %v8237_v19, %v8236_v42  ;;  %v8062_v17 = vpop.f32.mrf.mxu1  ;;  %v8021_v25 = vpop.f32.mrf.mxu3  ;;  %v8007_v42 = vadd.f32 %v15000_v49, %v6365_v9  ;;  %v8010_v19 = vadd.f32 %v15006_v58, %v6365_v9  ;;  %v10699_v49 = vld [vmem:[%s15511_s18 + $0x80] sm:$0xff]  ;;  %v8017_v58 = vadd.f32 %v15046_v59, %v6365_v9 }
 0x699   : > { %8566 = vmatpush.bf16.msra.mxu1 %v10701_v5 }
 0x69a   : > { %v8239_v39 = vrot.slane %v8238_v21, 4  ;;  %v8035_v15 = vadd.f32 %v8034_v7, %v8007_v42 }
 0x69c   : > { %v8240_v45 = vadd.f32 %v8239_v39, %v8238_v21  ;;  %v7993_v57 = vpop.f32.mrf.mxu2  ;;  %v8063_v23 = vadd.f32 %v8062_v17, %v8035_v15 }
 0x69d   : > { %v8033_v57 = vadd.f32 %v8032_v29, %v8005_v53 }
 0x69e   : > { %v8241_v12 = vrot.slane %v8240_v45, 2 }
 0x69f   : > { %v8037_v51 = vpop.f32.mrf.mxu0 }
 0x6a0   : > { %v8242_v35 = vadd.f32 %v8241_v12, %v8240_v45  ;;  %v8065_v28 = vpop.f32.mrf.mxu1  ;;  %v15076_v31 = vpop.f32.mrf.mxu3  ;;  %v10700_v45 = vld [vmem:[%s15511_s18 + $0x88] sm:$0xff]  ;;  %v8012_v12 = vadd.f32 %v15016_v41, %v6365_v9  ;;  %v8020_v41 = vadd.f32 %v15065_v18, %v6365_v9 }
 0x6a1   : > { %8567 = vmatpush.bf16.msra.mxu1 %v10700_v45 }
 0x6a2   : > { %v8243_v30 = vrot.slane %v8242_v35, 1 }
 0x6a4   : > { %v8244_v33 = vadd.f32 %v8243_v30, %v8242_v35  ;;  %v8088_v22 = vpop.f32.mrf.mxu2  ;;  %v8015_v35 = vadd.f32 %v15029_v40, %v6365_v9  ;;  %v8038_v30 = vadd.f32 %v8037_v51, %v8010_v19 }
 0x6a5   : > { %8568 = vmatpush.bf16.msra.mxu1 %v10699_v49 }
 0x6a6   : > { %v8272_v46 = vmul.f32 %v8244_v33, %v11767_v13 }
 0x6a7   : > { %v8039_v26 = vpop.f32.mrf.mxu0 }
 0x6a8   : > { %v8276_v44 = vpack.c.bf16 %v8272_v46, %v8272_v46  ;;  %v8067_v24 = vpop.f32.mrf.mxu1  ;;  %v15082_v0 = vpop.f32.mrf.mxu3  ;;  %v8061_v46 = vadd.f32 %v15063_v3, %v8033_v57  ;;  %v8040_v29 = vadd.f32 %v8039_v26, %v8012_v12 }
 0x6aa   : > { %8556 = vmatmul.bf16.vlgmr.msra.gmra.mxu0 %v8276_v44  ;;  %v8066_v44 = vadd.f32 %v8065_v28, %v8038_v30  ;;  %v15127_v59 = vadd.f32 %v8088_v22, %v8061_v46  ;;  %v8068_v3 = vadd.f32 %v8067_v24, %v8040_v29 }
 0x6ac   : > { %v8090_v2 = vpop.f32.mrf.mxu2  ;;  %15736 = vst [vmem:[#allocation101_spill] sm:$0xff] %v15127_v59 }
 0x6ad   : > { %v15122_v51 = vadd.f32 %v8090_v2, %v8063_v23  ;;  %v10713_v2 = vld [vmem:[%s15511_s18 + $0xf0] sm:$0xff]  ;;  %v10711_v23 = vld [vmem:[%s15511_s18 + $0xe0] sm:$0xff] }
 0x6ae   : > { %8575 = vmatpush.bf16.msra.mxu2 %v10713_v2  ;;  %v10709_v2 = vld [vmem:[%s15511_s18 + $0xd0] sm:$0xff] }
 0x6af   : > { %v8042_v62 = vpop.f32.mrf.mxu0  ;;  %15735 = vst [vmem:[#allocation100_spill] sm:$0xff] %v15122_v51  ;;  %v8245_v18 = vadd.f32 %v15122_v51, %v15127_v59  ;;  %v15802_v51 = vld [vmem:[#allocation45_spill] sm:$0xff]  ;;  %v15806_v59 = vld [vmem:[#allocation48_spill] sm:$0xff] }
 0x6b0   : > { %v8070_v55 = vpop.f32.mrf.mxu1  ;;  %v15090_v48 = vpop.f32.mrf.mxu3  ;;  %v8043_v63 = vadd.f32 %v8042_v62, %v8015_v35 }
 0x6b2   : > { %v8071_v17 = vadd.f32 %v8070_v55, %v8043_v63 }
 0x6b4   : > { %v8093_v56 = vpop.f32.mrf.mxu2 }
 0x6b5   : > { %v15129_v52 = vadd.f32 %v8093_v56, %v8066_v44 }
 0x6b7   : > { %v8044_v14 = vpop.f32.mrf.mxu0  ;;  %15737 = vst [vmem:[#allocation102_spill] sm:$0xff] %v15129_v52  ;;  %v8246_v22 = vadd.f32 %v8245_v18, %v15129_v52  ;;  %v15798_v52 = vld [vmem:[#allocation42_spill] sm:$0xff] }
 0x6b8   : > { %v8072_v47 = vpop.f32.mrf.mxu1  ;;  %v15095_v37 = vpop.f32.mrf.mxu3  ;;  %v8045_v28 = vadd.f32 %v8044_v14, %v8017_v58 }
 0x6ba   : > { %v8073_v5 = vadd.f32 %v8072_v47, %v8045_v28 }
 0x6bc   : > { %v8095_v27 = vpop.f32.mrf.mxu2 }
 0x6bd   : > { %v15133_v9 = vadd.f32 %v8095_v27, %v8068_v3  ;;  %v10710_v3 = vld [vmem:[%s15511_s18 + $0xd8] sm:$0xff] }
 0x6bf   : > { %v8047_v21 = vpop.f32.mrf.mxu0  ;;  %15738 = vst [vmem:[#allocation103_spill] sm:$0xff] %v15133_v9  ;;  %v8247_v42 = vadd.f32 %v8246_v22, %v15133_v9  ;;  %v15794_v9 = vld [vmem:[#allocation39_spill] sm:$0xff] }
 0x6c0   : > { %v8075_v25 = vpop.f32.mrf.mxu1  ;;  %v15107_v39 = vpop.f32.mrf.mxu3  ;;  %v8048_v62 = vadd.f32 %v8047_v21, %v8020_v41 }
 0x6c2   : > { %v8076_v55 = vadd.f32 %v8075_v25, %v8048_v62  ;;  %v10712_v25 = vld [vmem:[%s15511_s18 + $0xe8] sm:$0xff] }
 0x6c3   : > { %8576 = vmatpush.bf16.msra.mxu2 %v10712_v25 }
 0x6c4   : > { %v8098_v33 = vpop.f32.mrf.mxu2 }
 0x6c5   : > { %v15139_v24 = vadd.f32 %v8098_v33, %v8071_v17 }
 0x6c7   : > { %v8049_v32 = vpop.f32.mrf.mxu0  ;;  %15739 = vst [vmem:[#allocation104_spill] sm:$0xff] %v15139_v24  ;;  %v8248_v27 = vadd.f32 %v8247_v42, %v15139_v24  ;;  %8577 = vmatpush.bf16.msra.mxu2 %v10711_v23 }
 0x6c8   : > { %v8077_v40 = vpop.f32.mrf.mxu1  ;;  %v15120_v7 = vpop.f32.mrf.mxu3 }
 0x6cb   : > { %8578 = vmatpush.bf16.msra.mxu2 %v10710_v3 }
 0x6cc   : > { %v8100_v26 = vpop.f32.mrf.mxu2 }
 0x6cd   : > { %v15144_v19 = vadd.f32 %v8100_v26, %v8073_v5 }
 0x6cf   : > { %v8144_v56 = vpop.f32.mrf.mxu0  ;;  %15740 = vst [vmem:[#allocation105_spill] sm:$0xff] %v15144_v19  ;;  %v8249_v57 = vadd.f32 %v8248_v27, %v15144_v19  ;;  %8579 = vmatpush.bf16.msra.mxu2 %v10709_v2 }
 0x6d0   : > { %v8172_v14 = vpop.f32.mrf.mxu1  ;;  %v15141_v53 = vpop.f32.mrf.mxu3 }
 0x6d4   : > { %v8103_v21 = vpop.f32.mrf.mxu2 }
 0x6d5   : > { %v15147_v45 = vadd.f32 %v8103_v21, %v8076_v55 }
 0x6d7   : > { %15741 = vst [vmem:[#allocation106_spill] sm:$0xff] %v15147_v45  ;;  %v8250_v47 = vsel %vm1716_vm9, %v15147_v45, 0.0  ;;  %v8146_v35 = vpop.f32.mrf.mxu0 }
 0x6d8   : > { %v8251_v12 = vadd.f32 %v8250_v47, %v8249_v57  ;;  %v8174_v15 = vpop.f32.mrf.mxu1  ;;  %v8133_v30 = vpop.f32.mrf.mxu3  ;;  %v6366_v57 = vperm.slane %v14910_v34, 3 }
 0x6da   : > { %v8252_v33 = vrot.slane %v8251_v12, 4  ;;  %v8117_v25 = vadd.f32 %v15076_v31, %v6366_v57  ;;  %v8122_v30 = vadd.f32 %v15090_v48, %v6366_v57  ;;  %v8124_v23 = vadd.f32 %v15095_v37, %v6366_v57  ;;  %v10707_v31 = vld [vmem:[%s15511_s18 + $0xc0] sm:$0xff] }
 0x6db   : > { %v8132_v37 = vadd.f32 %v15141_v53, %v6366_v57 }
 0x6dc   : > { %v8253_v49 = vadd.f32 %v8252_v33, %v8251_v12  ;;  %v8105_v58 = vpop.f32.mrf.mxu2  ;;  %v8119_v12 = vadd.f32 %v15082_v0, %v6366_v57  ;;  %v8129_v0 = vadd.f32 %v15120_v7, %v6366_v57 }
 0x6dd   : > { %v10708_v58 = vld [vmem:[%s15511_s18 + $0xc8] sm:$0xff] }
 0x6de   : > { %v8254_v46 = vrot.slane %v8253_v49, 2  ;;  %8580 = vmatpush.bf16.msra.mxu2 %v10708_v58  ;;  %v8147_v34 = vadd.f32 %v8146_v35, %v8119_v12 }
 0x6df   : > { %v8149_v29 = vpop.f32.mrf.mxu0 }
 0x6e0   : > { %v8255_v44 = vadd.f32 %v8254_v46, %v8253_v49  ;;  %v8177_v63 = vpop.f32.mrf.mxu1  ;;  %v8145_v46 = vadd.f32 %v8144_v56, %v8117_v25 }
 0x6e2   : > { %v8256_v32 = vrot.slane %v8255_v44, 1  ;;  %v8173_v48 = vadd.f32 %v8172_v14, %v8145_v46  ;;  %8581 = vmatpush.bf16.msra.mxu2 %v10707_v31 }
 0x6e4   : > { %v8257_v41 = vadd.f32 %v8256_v32, %v8255_v44  ;;  %v8200_v40 = vpop.f32.mrf.mxu2  ;;  %v8127_v44 = vadd.f32 %v15107_v39, %v6366_v57  ;;  %v8150_v32 = vadd.f32 %v8149_v29, %v8122_v30 }
 0x6e5   : > { %v15183_v35 = vadd.f32 %v8200_v40, %v8173_v48 }
 0x6e6   : > { %v8273_v54 = vmul.f32 %v8257_v41, %v11767_v13  ;;  %v8178_v3 = vadd.f32 %v8177_v63, %v8150_v32 }
 0x6e7   : > { %v8151_v28 = vpop.f32.mrf.mxu0  ;;  %15743 = vst [vmem:[#allocation108_spill] sm:$0xff] %v15183_v35 }
 0x6e8   : > { %v8277_v17 = vpack.c.bf16 %v8273_v54, %v8273_v54  ;;  %v8179_v26 = vpop.f32.mrf.mxu1  ;;  %v8175_v54 = vadd.f32 %v8174_v15, %v8147_v34 }
 0x6ea   : > { %8569 = vmatmul.bf16.vlgmr.msra.gmra.mxu1 %v8277_v17  ;;  %v8152_v17 = vadd.f32 %v8151_v28, %v8124_v23 }
 0x6ec   : > { %v8202_v62 = vpop.f32.mrf.mxu2  ;;  %v8180_v29 = vadd.f32 %v8179_v26, %v8152_v17 }
 0x6ed   : > { %v15162_v18 = vpop.f32.mrf.mxu3  ;;  %v15181_v39 = vadd.f32 %v8202_v62, %v8175_v54  ;;  %v10716_v54 = vld [vmem:[%s15512_s19 + $0x8] sm:$0xff] }
 0x6ee   : > { %8614 = vmatpush.bf16.msra.mxu3 %v10716_v54  ;;  %v15757_v54 = vld [vmem:[#allocation8_spill] sm:$0xff] }
 0x6ef   : > { %v8154_v22 = vpop.f32.mrf.mxu0  ;;  %15742 = vst [vmem:[#allocation107_spill] sm:$0xff] %v15181_v39  ;;  %v8258_v15 = vadd.f32 %v15181_v39, %v15183_v35  ;;  %v15801_v39 = vld [vmem:[#allocation55_spill] sm:$0xff]  ;;  %v15805_v35 = vld [vmem:[#allocation56_spill] sm:$0xff] }
 0x6f0   : > { %v8182_v5 = vpop.f32.mrf.mxu1  ;;  %v8155_v56 = vadd.f32 %v8154_v22, %v8127_v44 }
 0x6f2   : > { %v8183_v12 = vadd.f32 %v8182_v5, %v8155_v56 }
 0x6f4   : > { %v8205_v55 = vpop.f32.mrf.mxu2 }
 0x6f5   : > { %v8546_v42 = vpop.f32.mrf.mxu3  ;;  %v15185_v25 = vadd.f32 %v8205_v55, %v8178_v3  ;;  %v10715_v3 = vld [vmem:[%s15512_s19] sm:$0xff] }
 0x6f6   : > { %8615 = vmatpush.bf16.msra.mxu3 %v10715_v3 }
 0x6f7   : > { %v8156_v27 = vpop.f32.mrf.mxu0  ;;  %15744 = vst [vmem:[#allocation109_spill] sm:$0xff] %v15185_v25  ;;  %v8259_v28 = vadd.f32 %v8258_v15, %v15185_v25  ;;  %v15797_v25 = vld [vmem:[#allocation54_spill] sm:$0xff] }
 0x6f8   : > { %v8184_v21 = vpop.f32.mrf.mxu1  ;;  %v8157_v30 = vadd.f32 %v8156_v27, %v8129_v0 }
 0x6fa   : > { %v8185_v53 = vadd.f32 %v8184_v21, %v8157_v30 }
 0x6fc   : > { %v8207_v47 = vpop.f32.mrf.mxu2 }
 0x6fd   : > { %v15189_v63 = vadd.f32 %v8207_v47, %v8180_v29 }
 0x6ff   : > { %v8159_v33 = vpop.f32.mrf.mxu0  ;;  %15745 = vst [vmem:[#allocation110_spill] sm:$0xff] %v15189_v63  ;;  %v8260_v40 = vadd.f32 %v8259_v28, %v15189_v63  ;;  %v15793_v63 = vld [vmem:[#allocation53_spill] sm:$0xff] }
 0x700   : > { %v8187_v49 = vpop.f32.mrf.mxu1  ;;  %v8160_v14 = vadd.f32 %v8159_v33, %v8132_v37 }
 0x702   : > { %v8188_v62 = vadd.f32 %v8187_v49, %v8160_v14 }
 0x704   : > { %v8210_v41 = vpop.f32.mrf.mxu2 }
 0x705   : > { %v15192_v22 = vadd.f32 %v8210_v41, %v8183_v12 }
 0x707   : > { %v8161_v2 = vpop.f32.mrf.mxu0  ;;  %15746 = vst [vmem:[#allocation111_spill] sm:$0xff] %v15192_v22  ;;  %v8261_v5 = vadd.f32 %v8260_v40, %v15192_v22 }
 0x708   : > { %v8189_v42 = vpop.f32.mrf.mxu1 }
 0x70c   : > { %v8212_v7 = vpop.f32.mrf.mxu2 }
 0x70d   : > { %v15195_v26 = vadd.f32 %v8212_v7, %v8185_v53 }
 0x70f   : > { %15747 = vst [vmem:[#allocation112_spill] sm:$0xff] %v15195_v26  ;;  %v8262_v57 = vadd.f32 %v8261_v5, %v15195_v26  ;;  %v2131_v5 = vstv %s10722_s25 }
 0x710   : > { %v2141_v3 = vmul.f32 %v2131_v5, %v15757_v54  ;;  %v15770_v54 = vld [vmem:[#allocation21_spill] sm:$0xff] }
 0x714   : > { %v8215_v55 = vpop.f32.mrf.mxu2 }
 0x715   : > { %v15198_v27 = vadd.f32 %v8215_v55, %v8188_v62  ;;  %v15749_v55 = vld [vmem:[#allocation2_spill] sm:$0xff] }
 0x717   : > { %15748 = vst [vmem:[#allocation113_spill] sm:$0xff] %v15198_v27  ;;  %v8263_v47 = vsel %vm1716_vm9, %v15198_v27, 0.0 }
 0x718   : > { %v8264_v33 = vadd.f32 %v8263_v47, %v8262_v57  ;;  %v2133_v57 = vmul.f32 %v2131_v5, %v15749_v55  ;;  %v15750_v47 = vld [vmem:[#allocation4_spill] sm:$0xff] }
 0x71a   : > { %v8265_v58 = vrot.slane %v8264_v33, 4 }
 0x71c   : > { %v8266_v21 = vadd.f32 %v8265_v58, %v8264_v33  ;;  %v8217_v46 = vpop.f32.mrf.mxu2  ;;  %v2134_v33 = vmul.f32 %v2131_v5, %v15750_v47  ;;  %v15751_v58 = vld [vmem:[#allocation9_spill] sm:$0xff]  ;;  %v15767_v47 = vld [vmem:[#allocation22_spill] sm:$0xff] }
 0x71d   : > { %v15752_v46 = vld [vmem:[#allocation10_spill] sm:$0xff] }
 0x71e   : > { %v8267_v23 = vrot.slane %v8266_v21, 2 }
 0x720   : > { %v8268_v49 = vadd.f32 %v8267_v23, %v8266_v21  ;;  %v2135_v21 = vmul.f32 %v2131_v5, %v15751_v58  ;;  %v2136_v23 = vmul.f32 %v2131_v5, %v15752_v46  ;;  %v2151_v58 = vmul.f32 %v2131_v5, %v15767_v47  ;;  %v15768_v46 = vld [vmem:[#allocation25_spill] sm:$0xff] }
 0x722   : > { %v8269_v44 = vrot.slane %v8268_v49, 1 }
 0x724   : > { %v8270_v34 = vadd.f32 %v8269_v44, %v8268_v49  ;;  %v15753_v49 = vld [vmem:[#allocation3_spill] sm:$0xff] }
 0x725   : > { %v2137_v44 = vmul.f32 %v2131_v5, %v15753_v49  ;;  %v2152_v49 = vmul.f32 %v2131_v5, %v15768_v46  ;;  %v15780_v46 = vld [vmem:[#allocation29_spill] sm:$0xff] }
 0x726   : > { %v8274_v32 = vmul.f32 %v8270_v34, %v11767_v13  ;;  %v15754_v34 = vld [vmem:[#allocation5_spill] sm:$0xff]  ;;  %v15248_v45 = vmul.f32 %v2131_v5, %v15780_v46 }
 0x727   : > { %v8557_v41 = vpop.f32.mrf.mxu0 }
 0x728   : > { %v8558_v31 = vadd.f32 %v8557_v41, %v15162_v18  ;;  %v8278_v0 = vpack.c.bf16 %v8274_v32, %v8274_v32  ;;  %v2138_v32 = vmul.f32 %v2131_v5, %v15754_v34  ;;  %v15755_v41 = vld [vmem:[#allocation6_spill] sm:$0xff]  ;;  %v3532_v34 = vstv %s10724_s3  ;;  %15781 = vst [vmem:[#allocation3_spill] sm:$0xff] %v15248_v45 }
 0x729   : > { %v3539_v22 = vmul.f32 %v3532_v34, %v15787_v11  ;;  %v15792_v45 = vld [vmem:[#allocation38_spill] sm:$0xff]  ;;  %v3549_v11 = vmul.f32 %v3532_v34, %v15797_v25  ;;  %v3559_v25 = vmul.f32 %v3532_v34, %v15807_v10 }
 0x72a   : > { %8582 = vmatmul.bf16.vlgmr.msra.gmra.mxu2 %v8278_v0  ;;  %v15756_v0 = vld [vmem:[#allocation7_spill] sm:$0xff] }
 0x72f   : > { %v8559_v48 = vpop.f32.mrf.mxu0 }
 0x730   : > { %v2140_v48 = vmul.f32 %v2131_v5, %v15756_v0 }
 0x767   : > { %v8570_v17 = vpop.f32.mrf.mxu1 }
 0x768   : > { %v8571_v56 = vadd.f32 %v8570_v17, %v8558_v31  ;;  %v2139_v31 = vmul.f32 %v2131_v5, %v15755_v41  ;;  %v15758_v17 = vld [vmem:[#allocation11_spill] sm:$0xff]  ;;  %v15769_v41 = vld [vmem:[#allocation20_spill] sm:$0xff] }
 0x769   : > { %v2153_v0 = vmul.f32 %v2131_v5, %v15769_v41  ;;  %v15782_v41 = vld [vmem:[#allocation30_spill] sm:$0xff] }
 0x76a   : > { %v3534_v61 = vmul.f32 %v3532_v34, %v15782_v41  ;;  %v3544_v41 = vmul.f32 %v3532_v34, %v15792_v45  ;;  %v3554_v45 = vmul.f32 %v3532_v34, %v15802_v51 }
 0x76f   : > { %v8572_v2 = vpop.f32.mrf.mxu1 }
 0x770   : > { %v15759_v2 = vld [vmem:[#allocation12_spill] sm:$0xff] }
 0x7ad   : > { %v8583_v13 = vpop.f32.mrf.mxu2 }
 0x7ae   : > { %v8584_v37 = vadd.f32 %v8583_v13, %v8571_v56  ;;  %v2142_v56 = vmul.f32 %v2131_v5, %v15758_v17  ;;  %v2143_v13 = vmul.f32 %v2131_v5, %v15759_v2  ;;  %v2154_v17 = vmul.f32 %v2131_v5, %v15770_v54  ;;  %v15771_v2 = vld [vmem:[#allocation26_spill] sm:$0xff]  ;;  %v15783_v54 = vld [vmem:[#allocation32_spill] sm:$0xff] }
 0x7af   : > { %v3535_v4 = vmul.f32 %v3532_v34, %v15783_v54  ;;  %v3545_v54 = vmul.f32 %v3532_v34, %v15793_v63  ;;  %v3555_v63 = vmul.f32 %v3532_v34, %v15803_v6 }
 0x7b0   : > { %v8587_v42 = vmax.f32 %v8584_v37, 0.0  ;;  %v15760_v37 = vld [vmem:[#allocation13_spill] sm:$0xff] }
 0x7b2   : > { %v8588_v18 = vpack.c.bf16 %v8587_v42, %v8587_v42  ;;  %v2144_v42 = vmul.f32 %v2131_v5, %v15760_v37  ;;  %v2155_v37 = vmul.f32 %v2131_v5, %v15771_v2  ;;  %v15784_v2 = vld [vmem:[#allocation33_spill] sm:$0xff] }
 0x7b3   : > { %v3536_v26 = vmul.f32 %v3532_v34, %v15784_v2  ;;  %v3546_v2 = vmul.f32 %v3532_v34, %v15794_v9  ;;  %v3556_v9 = vmul.f32 %v3532_v34, %v15804_v43 }
 0x7b4   : > { %10338 = vmatmul.msk.bf16.vlgmr.msra.gmra.mxu3 %vm2105_vm13, %v8588_v18  ;;  %v15761_v18 = vld [vmem:[#allocation14_spill] sm:$0xff] }
 0x7b5   : > { %v8585_v29 = vpop.f32.mrf.mxu2 }
 0x7b6   : > { %v2145_v29 = vmul.f32 %v2131_v5, %v15761_v18  ;;  %v15772_v18 = vld [vmem:[#allocation27_spill] sm:$0xff] }
 0x837   : > { %v8617_v12 = vpop.f32.mrf.mxu3 }
 0x838   : > { %v8621_v30 = vmax.f32 %v8617_v12, 0.0  ;;  %v15762_v12 = vld [vmem:[#allocation15_spill] sm:$0xff] }
 0x83a   : > { %v8622_v7 = vsub.f32 0.0, %v8621_v30  ;;  %v2146_v30 = vmul.f32 %v2131_v5, %v15762_v12  ;;  %v15236_v12 = vmul.f32 %v2131_v5, %v15772_v18  ;;  %v15785_v18 = vld [vmem:[#allocation52_spill] sm:$0xff] }
 0x83b   : > { %v3537_v19 = vmul.f32 %v3532_v34, %v15785_v18  ;;  %v3547_v18 = vmul.f32 %v3532_v34, %v15795_v16  ;;  %v3557_v16 = vmul.f32 %v3532_v34, %v15805_v35 }
 0x83c   : > { %v8623_v14 = vmul.f32 1.442695, %v8622_v7  ;;  %v15763_v7 = vld [vmem:[#allocation16_spill] sm:$0xff]  ;;  %15773 = vst [vmem:[#allocation2_spill] sm:$0xff] %v15236_v12  ;;  %v3567_v12 = vadd.f32 %v3539_v22, %v2138_v32 }
 0x83d   : > { %v3565_v51 = vadd.f32 %v3537_v19, %v2136_v23  ;;  %v15312_v23 = vadd.f32 %v3556_v9, %v2155_v37  ;;  %v15820_v37 = vld [vmem:[#allocation94_spill] sm:$0xff] }
 0x83e   : > { %10758 = vpow2.f32 %v8623_v14  ;;  %v2147_v14 = vmul.f32 %v2131_v5, %v15763_v7  ;;  %v15774_v7 = vld [vmem:[#allocation23_spill] sm:$0xff] }
 0x83f   : > { %v8619_v15 = vpop.f32.mrf.mxu3 }
 0x840   : > { %v15764_v15 = vld [vmem:[#allocation17_spill] sm:$0xff] }
 0x844   : > { %v10759_v28 = vpop.eup %10758 }
 0x845   : > { %v8625_v53 = vadd.f32 1.0, %v10759_v28  ;;  %v2148_v28 = vmul.f32 %v2131_v5, %v15764_v15  ;;  %v15239_v15 = vmul.f32 %v2131_v5, %v15774_v7  ;;  %v3538_v7 = vmul.f32 %v3532_v34, %v15786_v36 }
 0x846   : > { %v3548_v36 = vmul.f32 %v3532_v34, %v15796_v50  ;;  %v3558_v50 = vmul.f32 %v3532_v34, %v15806_v59 }
 0x847   : > { %10760 = vrcp.f32 %v8625_v53  ;;  %v15765_v53 = vld [vmem:[#allocation18_spill] sm:$0xff]  ;;  %15775 = vst [vmem:[#allocation4_spill] sm:$0xff] %v15239_v15  ;;  %v3564_v15 = vadd.f32 %v3536_v26, %v2135_v21  ;;  %v3566_v6 = vadd.f32 %v3538_v7, %v2137_v44  ;;  %v15296_v19 = vadd.f32 %v3549_v11, %v2148_v28 }
 0x848   : > { %v15811_v44 = vld [vmem:[#allocation58_spill] sm:$0xff] }
 0x84d   : > { %v10761_v62 = vpop.eup %10760 }
 0x84e   : > { %v8627_v40 = vadd.f32 1.0, %v10761_v62  ;;  %v2149_v62 = vmul.f32 %v2131_v5, %v15765_v53  ;;  %v15776_v53 = vld [vmem:[#allocation24_spill] sm:$0xff] }
 0x84f   : > { %v15242_v27 = vmul.f32 %v2131_v5, %v15776_v53  ;;  %v15788_v53 = vld [vmem:[#allocation35_spill] sm:$0xff] }
 0x850   : > { %10727 = vpush %v8627_v40  ;;  %v15766_v40 = vld [vmem:[#allocation19_spill] sm:$0xff]  ;;  %v3540_v24 = vmul.f32 %v3532_v34, %v15788_v53  ;;  %v3550_v53 = vmul.f32 %v3532_v34, %v15798_v52  ;;  %v15277_v52 = vmul.f32 %v3532_v34, %v15808_v8  ;;  %v15284_v8 = vadd.f32 %v3544_v41, %v2143_v13  ;;  %v15814_v13 = vld [vmem:[#allocation2_spill] sm:$0xff]  ;;  %v15822_v41 = vld [vmem:[#allocation65_spill] sm:$0xff] }
 0x851   : > { %v2150_v55 = vmul.f32 %v2131_v5, %v15766_v40  ;;  %15777 = vst [vmem:[#allocation9_spill] sm:$0xff] %v15242_v27  ;;  %v15778_v40 = vld [vmem:[#allocation28_spill] sm:$0xff] }
 0x852   : > { %v15245_v47 = vmul.f32 %v2131_v5, %v15778_v40  ;;  %v3541_v40 = vmul.f32 %v3532_v34, %v15789_v60  ;;  %v15791_v5 = vld [vmem:[#allocation37_spill] sm:$0xff]  ;;  %v3551_v60 = vmul.f32 %v3532_v34, %v15799_v38  ;;  %15809 = vst [vmem:[#allocation5_spill] sm:$0xff] %v15277_v52  ;;  %v3568_v43 = vadd.f32 %v3540_v24, %v2139_v31  ;;  %v15812_v31 = vld [vmem:[#allocation66_spill] sm:$0xff] }
 0x853   : > { %v3543_v46 = vmul.f32 %v3532_v34, %v15791_v5  ;;  %v3553_v5 = vmul.f32 %v3532_v34, %v15801_v39  ;;  %v15810_v38 = vld [vmem:[#allocation57_spill] sm:$0xff]  ;;  %v3563_v39 = vadd.f32 %v3535_v4, %v2134_v33  ;;  %v15286_v52 = vadd.f32 %v3545_v54, %v2144_v42 }
 0x854   : > { %15779 = vst [vmem:[#allocation10_spill] sm:$0xff] %v15245_v47  ;;  %v15790_v47 = vld [vmem:[#allocation36_spill] sm:$0xff]  ;;  %v15280_v27 = vmul.f32 %v3532_v34, %v15810_v38  ;;  %v3569_v35 = vadd.f32 %v3541_v40, %v2140_v48  ;;  %v15290_v38 = vadd.f32 %v3547_v18, %v2146_v30  ;;  %v15294_v4 = vstv %s10726_s26  ;;  %v15821_v40 = vld [vmem:[#allocation101_spill] sm:$0xff] }
 0x855   : > { %v3542_v20 = vmul.f32 %v3532_v34, %v15790_v47  ;;  %v3552_v47 = vmul.f32 %v3532_v34, %v15800_v1  ;;  %v3562_v1 = vadd.f32 %v3534_v61, %v2133_v57  ;;  %v15282_v10 = vadd.f32 %v3543_v46, %v2142_v56 }
 0x856   : > { %v15288_v34 = vadd.f32 %v3546_v2, %v2145_v29  ;;  %v15292_v61 = vadd.f32 %v3548_v36, %v2147_v14  ;;  %v15298_v24 = vadd.f32 %v3550_v53, %v2149_v62  ;;  %v15304_v26 = vadd.f32 %v3553_v5, %v2152_v49  ;;  %v15815_v29 = vld [vmem:[#allocation4_spill] sm:$0xff]  ;;  %v15817_v62 = vld [vmem:[#allocation59_spill] sm:$0xff]  ;;  %v15823_v2 = vld [vmem:[#allocation70_spill] sm:$0xff] }
 0x857   : > { %v3570_v59 = vadd.f32 %v3542_v20, %v2141_v3  ;;  %v15300_v20 = vadd.f32 %v3551_v60, %v2150_v55  ;;  %v15302_v22 = vadd.f32 %v3552_v47, %v2151_v58  ;;  %v15306_v57 = vadd.f32 %v3554_v45, %v2153_v0  ;;  %v15813_v3 = vld [vmem:[#allocation69_spill] sm:$0xff]  ;;  %v15816_v14 = vld [vmem:[#allocation80_spill] sm:$0xff]  ;;  %v15819_v0 = vld [vmem:[#allocation87_spill] sm:$0xff] }
 0x858   : > { %v15308_v33 = vadd.f32 %v3555_v63, %v2154_v17  ;;  %v5442_v32 = vmul.f32 %v15294_v4, %v15811_v44  ;;  %v5443_v48 = vmul.f32 %v15294_v4, %v15812_v31  ;;  %v5444_v56 = vmul.f32 %v15294_v4, %v15813_v3  ;;  %v15818_v58 = vld [vmem:[#allocation9_spill] sm:$0xff]  ;;  %v15824_v36 = vld [vmem:[#allocation79_spill] sm:$0xff]  ;;  %v15825_v53 = vld [vmem:[#allocation108_spill] sm:$0xff] }
 0x859   : > { %v15321_v42 = vadd.f32 %v3557_v16, %v15814_v13  ;;  %v15324_v30 = vadd.f32 %v3558_v50, %v15815_v29  ;;  %v5445_v28 = vmul.f32 %v15294_v4, %v15816_v14  ;;  %v5446_v55 = vmul.f32 %v15294_v4, %v15817_v62  ;;  %v15826_v63 = vld [vmem:[#allocation86_spill] sm:$0xff]  ;;  %v15827_v16 = vld [vmem:[#allocation60_spill] sm:$0xff]  ;;  %v15828_v31 = vld [vmem:[#allocation93_spill] sm:$0xff] }
 0x85a   : > { %v15332_v49 = vadd.f32 %v3559_v25, %v15818_v58  ;;  %v5447_v54 = vmul.f32 %v15294_v4, %v15822_v41  ;;  %v5448_v18 = vmul.f32 %v15294_v4, %v15823_v2  ;;  %v5449_v11 = vmul.f32 %v15294_v4, %v15824_v36  ;;  %v15831_v13 = vld [vmem:[#allocation107_spill] sm:$0xff]  ;;  %v15833_v58 = vld [vmem:[#allocation88_spill] sm:$0xff] }
 0x85b   : > { %v5470_v47 = vadd.f32 %v5442_v32, %v3562_v1  ;;  %v5471_v5 = vadd.f32 %v5443_v48, %v3563_v39  ;;  %v5472_v45 = vadd.f32 %v5444_v56, %v3564_v15  ;;  %v5450_v50 = vmul.f32 %v15294_v4, %v15827_v16  ;;  %v15829_v1 = vld [vmem:[#allocation100_spill] sm:$0xff]  ;;  %v15830_v56 = vld [vmem:[#allocation67_spill] sm:$0xff]  ;;  %v15841_v16 = vld [vmem:[#allocation89_spill] sm:$0xff] }
 0x85c   : > { %v5473_v25 = vadd.f32 %v5445_v28, %v3565_v51  ;;  %v5474_v44 = vadd.f32 %v5446_v55, %v3566_v6  ;;  %v5451_v51 = vmul.f32 %v15294_v4, %v15830_v56  ;;  %v5475_v6 = vadd.f32 %v5447_v54, %v3567_v12  ;;  %v15832_v28 = vld [vmem:[#allocation73_spill] sm:$0xff]  ;;  %v15835_v12 = vld [vmem:[#allocation95_spill] sm:$0xff] }
 0x85d   : > { %v5452_v62 = vmul.f32 %v15294_v4, %v15832_v28  ;;  %v5476_v55 = vadd.f32 %v5448_v18, %v3568_v43  ;;  %v15836_v54 = vld [vmem:[#allocation61_spill] sm:$0xff]  ;;  %v5478_v43 = vadd.f32 %v5450_v50, %v3570_v59  ;;  %v15837_v18 = vld [vmem:[#allocation102_spill] sm:$0xff] }
 0x85e   : > { %v5454_v2 = vmul.f32 %v15294_v4, %v15836_v54 }
 0x881   : > { %s10728_s28 = spop %10727 }
 0x882   : > { %v15310_v21 = vstv %s10728_s28 }
 0x883   : > { %v8632_v17 = vmul.f32 %v15310_v21, %v15819_v0  ;;  %v8633_v7 = vmul.f32 %v15310_v21, %v15820_v37  ;;  %v8634_v46 = vmul.f32 %v15310_v21, %v15821_v40  ;;  %v8635_v60 = vmul.f32 %v15310_v21, %v15825_v53  ;;  %v15834_v37 = vld [vmem:[#allocation81_spill] sm:$0xff] }
 0x884   : > { %v8636_v9 = vmul.f32 %v15310_v21, %v15826_v63  ;;  %v8637_v3 = vmul.f32 %v15310_v21, %v15828_v31  ;;  %v8638_v15 = vmul.f32 %v15310_v21, %v15829_v1  ;;  %v8639_v29 = vmul.f32 %v15310_v21, %v15831_v13  ;;  %v15840_v63 = vld [vmem:[#allocation75_spill] sm:$0xff] }
 0x885   : > { %v8660_v39 = vadd.f32 %v8632_v17, %v5470_v47  ;;  %v8661_v32 = vadd.f32 %v8633_v7, %v5471_v5  ;;  %v8662_v48 = vadd.f32 %v8634_v46, %v5472_v45  ;;  %v8663_v14 = vadd.f32 %v8635_v60, %v5473_v25  ;;  %v15838_v60 = vld [vmem:[#allocation68_spill] sm:$0xff] }
 0x886   : > { %v8640_v0 = vmul.f32 %v15310_v21, %v15833_v58  ;;  %v8664_v17 = vadd.f32 %v8636_v9, %v5474_v44  ;;  %v5453_v7 = vmul.f32 %v15294_v4, %v15834_v37  ;;  %v5477_v40 = vadd.f32 %v5449_v11, %v3569_v35  ;;  %v15839_v11 = vld [vmem:[#allocation109_spill] sm:$0xff]  ;;  %v15842_v44 = vld [vmem:[#allocation82_spill] sm:$0xff]  ;;  %v15850_v37 = vld [vmem:[#allocation83_spill] sm:$0xff] }
 0x887   : > { %8688 = vst [vmem:[%s15355_s27] sm:$0xff] %v8660_v39  ;;  %v8641_v46 = vmul.f32 %v15310_v21, %v15835_v12  ;;  %v8665_v41 = vadd.f32 %v8637_v3, %v5475_v6  ;;  %v8642_v36 = vmul.f32 %v15310_v21, %v15837_v18  ;;  %v8666_v53 = vadd.f32 %v8638_v15, %v5476_v55  ;;  %v15843_v3 = vld [vmem:[#allocation96_spill] sm:$0xff]  ;;  %v15844_v39 = vld [vmem:[#allocation62_spill] sm:$0xff]  ;;  %v15846_v6 = vld [vmem:[#allocation71_spill] sm:$0xff] }
 0x888   : > { %8689 = vst [vmem:[%s15355_s27 + $0x8] sm:$0xff] %v8661_v32  ;;  %v5455_v47 = vmul.f32 %v15294_v4, %v15838_v60  ;;  %v5479_v35 = vadd.f32 %v5451_v51, %v15282_v10  ;;  %v8643_v5 = vmul.f32 %v15310_v21, %v15839_v11  ;;  %v8667_v45 = vadd.f32 %v8639_v29, %v5477_v40  ;;  %v15847_v29 = vld [vmem:[#allocation110_spill] sm:$0xff]  ;;  %v15851_v40 = vld [vmem:[#allocation97_spill] sm:$0xff]  ;;  %v15855_v60 = vld [vmem:[#allocation111_spill] sm:$0xff] }
 0x889   : > { %8690 = vst [vmem:[%s15355_s27 + $0x10] sm:$0xff] %v8662_v48  ;;  %v5456_v59 = vmul.f32 %v15294_v4, %v15840_v63  ;;  %v5480_v9 = vadd.f32 %v5452_v62, %v15284_v8  ;;  %v8644_v50 = vmul.f32 %v15310_v21, %v15841_v16  ;;  %v8668_v25 = vadd.f32 %v8640_v0, %v5478_v43  ;;  %v15845_v48 = vld [vmem:[#allocation103_spill] sm:$0xff]  ;;  %v15848_v62 = vld [vmem:[#allocation76_spill] sm:$0xff]  ;;  %v15849_v58 = vld [vmem:[#allocation90_spill] sm:$0xff] }
 0x88a   : > { %8691 = vst [vmem:[%s15355_s27 + $0x18] sm:$0xff] %v8663_v14  ;;  %v5457_v10 = vmul.f32 %v15294_v4, %v15842_v44  ;;  %v5481_v31 = vadd.f32 %v5453_v7, %v15286_v52  ;;  %v8645_v1 = vmul.f32 %v15310_v21, %v15843_v3  ;;  %v8669_v15 = vadd.f32 %v8641_v46, %v5479_v35  ;;  %v15856_v11 = vld [vmem:[#allocation77_spill] sm:$0xff] }
 0x88b   : > { %8692 = vst [vmem:[%s15355_s27 + $0x20] sm:$0xff] %v8664_v17  ;;  %v5458_v8 = vmul.f32 %v15294_v4, %v15844_v39  ;;  %v5482_v32 = vadd.f32 %v5454_v2, %v15288_v34  ;;  %v8646_v56 = vmul.f32 %v15310_v21, %v15845_v48  ;;  %v8670_v51 = vadd.f32 %v8642_v36, %v5480_v9  ;;  %v15853_v2 = vld [vmem:[#allocation104_spill] sm:$0xff]  ;;  %v15861_v3 = vld [vmem:[#allocation105_spill] sm:$0xff]  ;;  %v15862_v39 = vld [vmem:[#allocation74_spill] sm:$0xff] }
 0x88c   : > { %8693 = vst [vmem:[%s15355_s27 + $0x28] sm:$0xff] %v8665_v41  ;;  %v5459_v52 = vmul.f32 %v15294_v4, %v15846_v6  ;;  %v5483_v13 = vadd.f32 %v5455_v47, %v15290_v38  ;;  %v8647_v14 = vmul.f32 %v15310_v21, %v15847_v29  ;;  %v8671_v28 = vadd.f32 %v8643_v5, %v5481_v31  ;;  %v15852_v41 = vld [vmem:[#allocation63_spill] sm:$0xff]  ;;  %v15854_v36 = vld [vmem:[#allocation72_spill] sm:$0xff] }
 0x88d   : > { %8694 = vst [vmem:[%s15355_s27 + $0x30] sm:$0xff] %v8666_v53  ;;  %v5460_v34 = vmul.f32 %v15294_v4, %v15848_v62  ;;  %v5484_v55 = vadd.f32 %v5456_v59, %v15292_v61  ;;  %v8648_v0 = vmul.f32 %v15310_v21, %v15849_v58  ;;  %v8672_v17 = vadd.f32 %v8644_v50, %v5482_v32  ;;  %v15858_v9 = vld [vmem:[#allocation84_spill] sm:$0xff]  ;;  %v15859_v50 = vld [vmem:[#allocation98_spill] sm:$0xff]  ;;  %v15867_v62 = vld [vmem:[#allocation99_spill] sm:$0xff] }
 0x88e   : > { %8695 = vst [vmem:[%s15355_s27 + $0x38] sm:$0xff] %v8667_v45  ;;  %v5461_v38 = vmul.f32 %v15294_v4, %v15850_v37  ;;  %v5485_v7 = vadd.f32 %v5457_v10, %v15296_v19  ;;  %v8649_v12 = vmul.f32 %v15310_v21, %v15851_v40  ;;  %v8673_v46 = vadd.f32 %v8645_v1, %v5483_v13  ;;  %v15857_v45 = vld [vmem:[#allocation91_spill] sm:$0xff]  ;;  %v15860_v10 = vld [vmem:[#allocation64_spill] sm:$0xff]  ;;  %v15868_v58 = vld [vmem:[#allocation10_spill] sm:$0xff] }
 0x88f   : > { %8696 = vst [vmem:[%s15355_s27 + $0x40] sm:$0xff] %v8668_v25  ;;  %v5462_v61 = vmul.f32 %v15294_v4, %v15852_v41  ;;  %v5486_v54 = vadd.f32 %v5458_v8, %v15298_v24  ;;  %v8650_v43 = vmul.f32 %v15310_v21, %v15853_v2  ;;  %v8674_v18 = vadd.f32 %v8646_v56, %v5484_v55  ;;  %v15863_v32 = vld [vmem:[#allocation112_spill] sm:$0xff]  ;;  %v15870_v37 = vld [vmem:[#allocation106_spill] sm:$0xff] }
 0x890   : > { %8697 = vst [vmem:[%s15355_s27 + $0x48] sm:$0xff] %v8669_v15  ;;  %v5463_v19 = vmul.f32 %v15294_v4, %v15854_v36  ;;  %v5487_v53 = vadd.f32 %v5459_v52, %v15300_v20  ;;  %v8651_v47 = vmul.f32 %v15310_v21, %v15855_v60  ;;  %v8675_v35 = vadd.f32 %v8647_v14, %v5485_v7  ;;  %v15865_v52 = vld [vmem:[#allocation92_spill] sm:$0xff]  ;;  %v15866_v14 = vld [vmem:[#allocation85_spill] sm:$0xff] }
 0x891   : > { %8698 = vst [vmem:[%s15355_s27 + $0x50] sm:$0xff] %v8670_v51  ;;  %v5464_v24 = vmul.f32 %v15294_v4, %v15856_v11  ;;  %v5488_v5 = vadd.f32 %v5460_v34, %v15302_v22  ;;  %v8652_v63 = vmul.f32 %v15310_v21, %v15857_v45  ;;  %v8676_v59 = vadd.f32 %v8648_v0, %v5486_v54  ;;  %v15864_v51 = vld [vmem:[#allocation78_spill] sm:$0xff]  ;;  %v15869_v0 = vld [vmem:[#allocation5_spill] sm:$0xff] }
 0x892   : > { %8699 = vst [vmem:[%s15355_s27 + $0x58] sm:$0xff] %v8671_v28  ;;  %v5465_v20 = vmul.f32 %v15294_v4, %v15858_v9  ;;  %v5489_v16 = vadd.f32 %v5461_v38, %v15304_v26  ;;  %v8653_v25 = vmul.f32 %v15310_v21, %v15859_v50  ;;  %v8677_v44 = vadd.f32 %v8649_v12, %v5487_v53  ;;  %v15872_v12 = vld [vmem:[#allocation113_spill] sm:$0xff] }
 0x893   : > { %8700 = vst [vmem:[%s15355_s27 + $0x60] sm:$0xff] %v8672_v17  ;;  %v5466_v22 = vmul.f32 %v15294_v4, %v15860_v10  ;;  %v5490_v31 = vadd.f32 %v5462_v61, %v15306_v57  ;;  %v8654_v1 = vmul.f32 %v15310_v21, %v15861_v3  ;;  %v8678_v15 = vadd.f32 %v8650_v43, %v5488_v5 }
 0x894   : > { %8701 = vst [vmem:[%s15355_s27 + $0x68] sm:$0xff] %v8673_v46  ;;  %v5467_v26 = vmul.f32 %v15294_v4, %v15862_v39  ;;  %v5491_v8 = vadd.f32 %v5463_v19, %v15308_v33  ;;  %v8655_v48 = vmul.f32 %v15310_v21, %v15863_v32  ;;  %v8679_v56 = vadd.f32 %v8651_v47, %v5489_v16 }
 0x895   : > { %8702 = vst [vmem:[%s15355_s27 + $0x70] sm:$0xff] %v8674_v18  ;;  %v5468_v57 = vmul.f32 %v15294_v4, %v15864_v51  ;;  %v5492_v6 = vadd.f32 %v5464_v24, %v15312_v23  ;;  %v8656_v13 = vmul.f32 %v15310_v21, %v15865_v52  ;;  %v8680_v29 = vadd.f32 %v8652_v63, %v5490_v31 }
 0x896   : > { %8703 = vst [vmem:[%s15355_s27 + $0x78] sm:$0xff] %v8675_v35  ;;  %v5469_v33 = vmul.f32 %v15294_v4, %v15866_v14  ;;  %v5493_v28 = vadd.f32 %v5465_v20, %v15321_v42  ;;  %v8657_v34 = vmul.f32 %v15310_v21, %v15867_v62  ;;  %v8681_v55 = vadd.f32 %v8653_v25, %v5491_v8  ;;  %v15871_v4 = vld [vmem:[#allocation3_spill] sm:$0xff] }
 0x897   : > { %8704 = vst [vmem:[%s15355_s27 + $0x80] sm:$0xff] %v8676_v59  ;;  %v3588_v23 = vadd.f32 %v15869_v0, %v15868_v58  ;;  %v5494_v17 = vadd.f32 %v5466_v22, %v15324_v30  ;;  %v8658_v38 = vmul.f32 %v15310_v21, %v15870_v37  ;;  %v8682_v7 = vadd.f32 %v8654_v1, %v5492_v6 }
 0x898   : > { %8705 = vst [vmem:[%s15355_s27 + $0x88] sm:$0xff] %v8677_v44  ;;  %v3589_v42 = vadd.f32 %v15280_v27, %v15871_v4  ;;  %v5495_v40 = vadd.f32 %v5467_v26, %v15332_v49  ;;  %v8659_v46 = vmul.f32 %v15310_v21, %v15872_v12  ;;  %v8683_v30 = vadd.f32 %v8655_v48, %v5493_v28 }
 0x899   : > { %8706 = vst [vmem:[%s15355_s27 + $0x90] sm:$0xff] %v8678_v15  ;;  %v5496_v41 = vadd.f32 %v5468_v57, %v3588_v23  ;;  %v8684_v61 = vadd.f32 %v8656_v13, %v5494_v17 }
 0x89a   : > { %8707 = vst [vmem:[%s15355_s27 + $0x98] sm:$0xff] %v8679_v56  ;;  %v5497_v54 = vadd.f32 %v5469_v33, %v3589_v42  ;;  %v8685_v2 = vadd.f32 %v8657_v34, %v5495_v40 }
 0x89b   : > { %8708 = vst [vmem:[%s15355_s27 + $0xa0] sm:$0xff] %v8680_v29  ;;  %v8686_v43 = vadd.f32 %v8658_v38, %v5496_v41 }
 0x89c   : > { %8709 = vst [vmem:[%s15355_s27 + $0xa8] sm:$0xff] %v8681_v55  ;;  %v8687_v18 = vadd.f32 %v8659_v46, %v5497_v54 }
 0x89d   : > { %8710 = vst [vmem:[%s15355_s27 + $0xb0] sm:$0xff] %v8682_v7 }
 0x89e   : > { %8711 = vst [vmem:[%s15355_s27 + $0xb8] sm:$0xff] %v8683_v30 }
 0x89f   : > { %8712 = vst [vmem:[%s15355_s27 + $0xc0] sm:$0x1] %v8684_v61 }
 0x8a0   : > { %8713 = vst [vmem:[%s15355_s27 + $0xc8] sm:$0x1] %v8685_v2 }
 0x8a1   : > { %8714 = vst [vmem:[%s15355_s27 + $0xd0] sm:$0x1] %v8686_v43 }
 0x8a2   : > { %8715 = vst [vmem:[%s15355_s27 + $0xd8] sm:$0x1] %v8687_v18 }
 0x8a3 PF: > { %s30_s1 = sadd.s32 1, %s10817_s1  }
 0x8a4   : > { %p27_p4 = scmp.ge.s32.totalorder %s30_s1, 4  }
 0x8a6   :  { %29 = sbr.rel (!%p27_p4) target bundleno = 6 (0x6), region = 139 }

// kernel: _lambda_.3
= control target key start
LH: loop header
LB: loop body
LE: loop exit
PB: predicated region body
PF: predicated region fallthrough
CT: control target
= control target key end

     0   :  { %s5027_s0 = inlined_call_operand.vmem [shape: f32[2,49,512], index: 0, kind: input, shape index: {}]   ;;  %s5028_s1 = inlined_call_operand.vmem [shape: bf16[512,512], index: 1, kind: input, shape index: {}]   ;;  %s5029_s2 = inlined_call_operand.vmem [shape: f32[1,512], index: 2, kind: input, shape index: {}]   ;;  %s5030_s3 = inlined_call_operand.vmem [shape: bf16[512,256], index: 3, kind: input, shape index: {}]   ;;  %s5031_s4 = inlined_call_operand.vmem [shape: f32[1,256], index: 4, kind: input, shape index: {}]   ;;  %s5032_s5 = inlined_call_operand.vmem [shape: bf16[256,128], index: 5, kind: input, shape index: {}]   ;;  %s5033_s6 = inlined_call_operand.vmem [shape: f32[1,128], index: 6, kind: input, shape index: {}]   ;;  %s5034_s7 = inlined_call_operand.vmem [shape: bf16[128,1], index: 7, kind: input, shape index: {}]   ;;  %s5035_s8 = inlined_call_operand.<no memory space> [shape: f32[1,1], index: 8, kind: input, shape index: {}]   ;;  %s5036_s9 = inlined_call_operand.vmem [shape: bf16[256,5], index: 9, kind: input, shape index: {}]   ;;  %s5037_s10 = inlined_call_operand.vmem [shape: f32[1,5], index: 10, kind: input, shape index: {}]   ;;  %s5038_s11 = inlined_call_operand.hbm [shape: f32[1,5], index: 11, kind: output, shape index: {}]  }
   0x1   :  { %v16_v0 = vstv %s5035_s8 }
   0x2   :  { %17 = vst [vmem:[#allocation2] sm:$0x1] %v16_v0 }
   0x3   :  { %v2314_v1 = vld [vmem:[%s5028_s1 + $0xe0] sm:$0xf]  ;;  %v3158_v2 = vld [vmem:[%s5028_s1 + $0xec] sm:$0xf0]  ;;  %vm102_vm0 = vcmask 1040384   ;;  %vm379_vm2 = vcmask 1041409  }
   0x4   :  { %v2442_v3 = vld [vmem:[%s5028_s1 + $0x1e0] sm:$0xf]  ;;  %v2315_v4 = vor.u32 %v3158_v2, %v2314_v1  ;;  %v3190_v5 = vld [vmem:[%s5028_s1 + $0x1ec] sm:$0xf0] }
   0x5   :  { %v2570_v6 = vld [vmem:[%s5028_s1 + $0x2e0] sm:$0xf]  ;;  %v3222_v7 = vld [vmem:[%s5028_s1 + $0x2ec] sm:$0xf0]  ;;  %v2443_v8 = vor.u32 %v3190_v5, %v2442_v3 }
   0x6   :  { %v2571_v9 = vor.u32 %v3222_v7, %v2570_v6  ;;  %v2698_v10 = vld [vmem:[%s5028_s1 + $0x3e0] sm:$0xf]  ;;  %v3254_v11 = vld [vmem:[%s5028_s1 + $0x3ec] sm:$0xf0]  ;;  %1032 = vmatpush.bf16.msra.mxu0 %v2315_v4 }
   0x7   :  { %v2298_v12 = vld [vmem:[%s5028_s1 + $0xc0] sm:$0xf]  ;;  %v2699_v13 = vor.u32 %v3254_v11, %v2698_v10  ;;  %v3154_v14 = vld [vmem:[%s5028_s1 + $0xcc] sm:$0xf0]  ;;  %1045 = vmatpush.bf16.msra.mxu1 %v2443_v8 }
   0x8   :  { %v2426_v15 = vld [vmem:[%s5028_s1 + $0x1c0] sm:$0xf]  ;;  %v3186_v16 = vld [vmem:[%s5028_s1 + $0x1cc] sm:$0xf0]  ;;  %1058 = vmatpush.bf16.msra.mxu2 %v2571_v9  ;;  %v2299_v17 = vor.u32 %v3154_v14, %v2298_v12 }
   0x9   :  { %v2427_v18 = vor.u32 %v3186_v16, %v2426_v15  ;;  %v2554_v19 = vld [vmem:[%s5028_s1 + $0x2c0] sm:$0xf]  ;;  %v3218_v20 = vld [vmem:[%s5028_s1 + $0x2cc] sm:$0xf0]  ;;  %1071 = vmatpush.bf16.msra.mxu3 %v2699_v13 }
   0xa   :  { %v2682_v21 = vld [vmem:[%s5028_s1 + $0x3c0] sm:$0xf]  ;;  %v2555_v22 = vor.u32 %v3218_v20, %v2554_v19  ;;  %v3250_v23 = vld [vmem:[%s5028_s1 + $0x3cc] sm:$0xf0]  ;;  %1033 = vmatpush.bf16.msra.mxu0 %v2299_v17 }
   0xb   :  { %v2282_v24 = vld [vmem:[%s5028_s1 + $0xa0] sm:$0xf]  ;;  %v3150_v25 = vld [vmem:[%s5028_s1 + $0xac] sm:$0xf0]  ;;  %v2683_v26 = vor.u32 %v3250_v23, %v2682_v21  ;;  %1046 = vmatpush.bf16.msra.mxu1 %v2427_v18 }
   0xc   :  { %v2410_v27 = vld [vmem:[%s5028_s1 + $0x1a0] sm:$0xf]  ;;  %v3182_v28 = vld [vmem:[%s5028_s1 + $0x1ac] sm:$0xf0]  ;;  %v2283_v30 = vor.u32 %v3150_v25, %v2282_v24  ;;  %1059 = vmatpush.bf16.msra.mxu2 %v2555_v22 }
   0xd   :  { %v2538_v29 = vld [vmem:[%s5028_s1 + $0x2a0] sm:$0xf]  ;;  %v3214_v31 = vld [vmem:[%s5028_s1 + $0x2ac] sm:$0xf0]  ;;  %v2411_v34 = vor.u32 %v3182_v28, %v2410_v27  ;;  %1072 = vmatpush.bf16.msra.mxu3 %v2683_v26  ;;  %v3156_v28 = vld [vmem:[%s5028_s1 + $0xe4] sm:$0xf] }
   0xe   :  { %v2666_v32 = vld [vmem:[%s5028_s1 + $0x3a0] sm:$0xf]  ;;  %v3246_v33 = vld [vmem:[%s5028_s1 + $0x3ac] sm:$0xf0]  ;;  %v2539_v35 = vor.u32 %v3214_v31, %v2538_v29  ;;  %1034 = vmatpush.bf16.msra.mxu0 %v2283_v30  ;;  %v2316_v29 = vld [vmem:[%s5028_s1 + $0xf0] sm:$0xf0] }
   0xf   :  { %v2266_v36 = vld [vmem:[%s5028_s1 + $0x80] sm:$0xf]  ;;  %v3146_v37 = vld [vmem:[%s5028_s1 + $0x8c] sm:$0xf0]  ;;  %v2667_v39 = vor.u32 %v3246_v33, %v2666_v32  ;;  %1047 = vmatpush.bf16.msra.mxu1 %v2411_v34  ;;  %v3667_v31 = vld [vmem:[%s5028_s1 + $0x1e4] sm:$0xf] }
  0x10   :  { %v2394_v38 = vld [vmem:[%s5028_s1 + $0x180] sm:$0xf]  ;;  %v3178_v40 = vld [vmem:[%s5028_s1 + $0x18c] sm:$0xf0]  ;;  %v2267_v45 = vor.u32 %v3146_v37, %v2266_v36  ;;  %1060 = vmatpush.bf16.msra.mxu2 %v2539_v35  ;;  %v2444_v32 = vld [vmem:[%s5028_s1 + $0x1f0] sm:$0xf0] }
  0x11   :  { %v2522_v41 = vld [vmem:[%s5028_s1 + $0x280] sm:$0xf]  ;;  %v3210_v42 = vld [vmem:[%s5028_s1 + $0x28c] sm:$0xf0]  ;;  %v2395_v46 = vor.u32 %v3178_v40, %v2394_v38  ;;  %1073 = vmatpush.bf16.msra.mxu3 %v2667_v39  ;;  %v3220_v33 = vld [vmem:[%s5028_s1 + $0x2e4] sm:$0xf] }
  0x12   :  { %v2650_v43 = vld [vmem:[%s5028_s1 + $0x380] sm:$0xf]  ;;  %v3242_v44 = vld [vmem:[%s5028_s1 + $0x38c] sm:$0xf0]  ;;  %v2523_v47 = vor.u32 %v3210_v42, %v2522_v41  ;;  %1035 = vmatpush.bf16.msra.mxu0 %v2267_v45  ;;  %v2572_v34 = vld [vmem:[%s5028_s1 + $0x2f0] sm:$0xf0] }
  0x13   :  { %v2250_v48 = vld [vmem:[%s5028_s1 + $0x60] sm:$0xf]  ;;  %v3142_v49 = vld [vmem:[%s5028_s1 + $0x6c] sm:$0xf0]  ;;  %v2651_v51 = vor.u32 %v3242_v44, %v2650_v43  ;;  %1048 = vmatpush.bf16.msra.mxu1 %v2395_v46  ;;  %v3681_v35 = vld [vmem:[%s5028_s1 + $0x3e4] sm:$0xf] }
  0x14   :  { %v2378_v50 = vld [vmem:[%s5028_s1 + $0x160] sm:$0xf]  ;;  %v3174_v52 = vld [vmem:[%s5028_s1 + $0x16c] sm:$0xf0]  ;;  %v2251_v57 = vor.u32 %v3142_v49, %v2250_v48  ;;  %1061 = vmatpush.bf16.msra.mxu2 %v2523_v47  ;;  %v3689_v38 = vld [vmem:[%s5028_s1 + $0x3f0] sm:$0xf0] }
  0x15   :  { %v2506_v53 = vld [vmem:[%s5028_s1 + $0x260] sm:$0xf]  ;;  %v3206_v54 = vld [vmem:[%s5028_s1 + $0x26c] sm:$0xf0]  ;;  %v2379_v58 = vor.u32 %v3174_v52, %v2378_v50  ;;  %1074 = vmatpush.bf16.msra.mxu3 %v2651_v51  ;;  %v3700_v43 = vld [vmem:[%s5028_s1 + $0xc4] sm:$0xf] }
  0x16   :  { %v2634_v55 = vld [vmem:[%s5028_s1 + $0x360] sm:$0xf]  ;;  %v3238_v56 = vld [vmem:[%s5028_s1 + $0x36c] sm:$0xf0]  ;;  %v2507_v59 = vor.u32 %v3206_v54, %v2506_v53  ;;  %1036 = vmatpush.bf16.msra.mxu0 %v2251_v57  ;;  %v3705_v44 = vld [vmem:[%s5028_s1 + $0xd0] sm:$0xf0]  ;;  %v2319_v53 = vor.u32 %v3156_v28, %v2316_v29  ;;  %v2447_v57 = vor.u32 %v3667_v31, %v2444_v32 }
  0x17   :  { %v2234_v60 = vld [vmem:[%s5028_s1 + $0x40] sm:$0xf]  ;;  %v3138_v61 = vld [vmem:[%s5028_s1 + $0x4c] sm:$0xf0]  ;;  %v2635_v63 = vor.u32 %v3238_v56, %v2634_v55  ;;  %1049 = vmatpush.bf16.msra.mxu1 %v2379_v58  ;;  %v3710_v45 = vld [vmem:[%s5028_s1 + $0x1c4] sm:$0xf]  ;;  %v2575_v58 = vor.u32 %v3220_v33, %v2572_v34 }
  0x18   :  { %v2362_v62 = vld [vmem:[%s5028_s1 + $0x140] sm:$0xf]  ;;  %v3170_v0 = vld [vmem:[%s5028_s1 + $0x14c] sm:$0xf0]  ;;  %v2235_v5 = vor.u32 %v3138_v61, %v2234_v60  ;;  %1062 = vmatpush.bf16.msra.mxu2 %v2507_v59  ;;  %v3715_v46 = vld [vmem:[%s5028_s1 + $0x1d0] sm:$0xf0] }
  0x19   :  { %v2490_v1 = vld [vmem:[%s5028_s1 + $0x240] sm:$0xf]  ;;  %v3202_v2 = vld [vmem:[%s5028_s1 + $0x24c] sm:$0xf0]  ;;  %v2363_v7 = vor.u32 %v3170_v0, %v2362_v62  ;;  %1075 = vmatpush.bf16.msra.mxu3 %v2635_v63  ;;  %v3720_v47 = vld [vmem:[%s5028_s1 + $0x2c4] sm:$0xf] }
  0x1a   :  { %v2618_v3 = vld [vmem:[%s5028_s1 + $0x340] sm:$0xf]  ;;  %v3234_v4 = vld [vmem:[%s5028_s1 + $0x34c] sm:$0xf0]  ;;  %v2491_v8 = vor.u32 %v3202_v2, %v2490_v1  ;;  %1037 = vmatpush.bf16.msra.mxu0 %v2235_v5  ;;  %v3725_v48 = vld [vmem:[%s5028_s1 + $0x2d0] sm:$0xf0]  ;;  %v2703_v1 = vor.u32 %v3681_v35, %v3689_v38 }
  0x1b   :  { %v2218_v6 = vld [vmem:[%s5028_s1 + $0x20] sm:$0xf]  ;;  %v3134_v9 = vld [vmem:[%s5028_s1 + $0x2c] sm:$0xf0]  ;;  %v2619_v12 = vor.u32 %v3234_v4, %v2618_v3  ;;  %1050 = vmatpush.bf16.msra.mxu1 %v2363_v7  ;;  %v3400_v51 = vmov 49.0   ;;  %v48_v38 = vld [vmem:[%s5027_s0 + $0x38] sm:$0xff] }
  0x1c   :  { %v2346_v10 = vld [vmem:[%s5028_s1 + $0x120] sm:$0xf]  ;;  %v3166_v11 = vld [vmem:[%s5028_s1 + $0x12c] sm:$0xf0]  ;;  %v2219_v19 = vor.u32 %v3134_v9, %v2218_v6  ;;  %1063 = vmatpush.bf16.msra.mxu2 %v2491_v8  ;;  %3366 = vrcp.f32 %v3400_v51  ;;  %v3743_v59 = vld [vmem:[%s5028_s1 + $0x3c4] sm:$0xf] }
  0x1d   :  { %v2474_v13 = vld [vmem:[%s5028_s1 + $0x220] sm:$0xf]  ;;  %v3198_v14 = vld [vmem:[%s5028_s1 + $0x22c] sm:$0xf0]  ;;  %v2347_v24 = vor.u32 %v3166_v11, %v2346_v10  ;;  %1076 = vmatpush.bf16.msra.mxu3 %v2619_v12  ;;  %v3748_v60 = vld [vmem:[%s5028_s1 + $0x3d0] sm:$0xf0]  ;;  %v2303_v12 = vor.u32 %v3700_v43, %v3705_v44 }
  0x1e   :  { %v2602_v15 = vld [vmem:[%s5028_s1 + $0x320] sm:$0xf]  ;;  %v3230_v16 = vld [vmem:[%s5028_s1 + $0x32c] sm:$0xf0]  ;;  %v2475_v25 = vor.u32 %v3198_v14, %v2474_v13  ;;  %1038 = vmatpush.bf16.msra.mxu0 %v2219_v19  ;;  %v2431_v13 = vor.u32 %v3710_v45, %v3715_v46  ;;  %v2559_v14 = vor.u32 %v3720_v47, %v3725_v48  ;;  %v56_v44 = vld [vmem:[%s5027_s0 + $0x78] sm:$0xff] }
  0x1f   :  { %v2202_v17 = vld [vmem:[%s5028_s1] sm:$0xf]  ;;  %v3130_v18 = vld [vmem:[%s5028_s1 + $0xc] sm:$0xf0]  ;;  %v2603_v30 = vor.u32 %v3230_v16, %v2602_v15  ;;  %1051 = vmatpush.bf16.msra.mxu1 %v2347_v24  ;;  %v72_v51 = vld [vmem:[%s5027_s0 + $0xf8] sm:$0xff] }
  0x20   :  { %v2330_v20 = vld [vmem:[%s5028_s1 + $0x100] sm:$0xf]  ;;  %v3162_v21 = vld [vmem:[%s5028_s1 + $0x10c] sm:$0xf0]  ;;  %v2203_v37 = vor.u32 %v3130_v18, %v2202_v17  ;;  %1064 = vmatpush.bf16.msra.mxu2 %v2475_v25 }
  0x21   :  { %v2458_v22 = vld [vmem:[%s5028_s1 + $0x200] sm:$0xf]  ;;  %v3194_v23 = vld [vmem:[%s5028_s1 + $0x20c] sm:$0xf0]  ;;  %v2331_v41 = vor.u32 %v3162_v21, %v2330_v20  ;;  %1077 = vmatpush.bf16.msra.mxu3 %v2603_v30 }
  0x22   :  { %v2586_v26 = vld [vmem:[%s5028_s1 + $0x300] sm:$0xf]  ;;  %v3226_v27 = vld [vmem:[%s5028_s1 + $0x30c] sm:$0xf0]  ;;  %v2459_v42 = vor.u32 %v3194_v23, %v2458_v22  ;;  %1039 = vmatpush.bf16.msra.mxu0 %v2203_v37  ;;  %v3794_v18 = vpop.eup %3366  ;;  %v44_v37 = vld [vmem:[%s5027_s0 + $0x18] sm:$0xff] }
  0x23   :  { %v43_v36 = vld [vmem:[%s5027_s0 + $0x10] sm:$0xff]  ;;  %v2587_v52 = vor.u32 %v3226_v27, %v2586_v26  ;;  %v41_v4 = vld [vmem:[%s5027_s0] sm:$0xff]  ;;  %1052 = vmatpush.bf16.msra.mxu1 %v2331_v41  ;;  %v2687_v26 = vor.u32 %v3743_v59, %v3748_v60  ;;  %v203_v28 = vmul.f32 49.0, %v3794_v18  ;;  %vm207_vm1 = vweird.f32 %v3794_v18 }
  0x24   :  { %v47_v39 = vld [vmem:[%s5027_s0 + $0x30] sm:$0xff]  ;;  %v45_v5 = vld [vmem:[%s5027_s0 + $0x20] sm:$0xff]  ;;  %1065 = vmatpush.bf16.msra.mxu2 %v2459_v42  ;;  %v137_v45 = vadd.f32 %v48_v38, %v44_v37 }
  0x25   :  { %v51_v40 = vld [vmem:[%s5027_s0 + $0x50] sm:$0xff]  ;;  %v124_v50 = vadd.f32 %v47_v39, %v43_v36  ;;  %v49_v10 = vld [vmem:[%s5027_s0 + $0x40] sm:$0xff]  ;;  %v97_v11 = vadd.f32 %v45_v5, %v41_v4  ;;  %1078 = vmatpush.bf16.msra.mxu3 %v2587_v52  ;;  %v52_v39 = vld [vmem:[%s5027_s0 + $0x58] sm:$0xff] }
  0x26   :  { %v55_v49 = vld [vmem:[%s5027_s0 + $0x70] sm:$0xff]  ;;  %1084 = vmatpush.bf16.msrb.mxu0 %v2319_v53  ;;  %v53_v15 = vld [vmem:[%s5027_s0 + $0x60] sm:$0xff]  ;;  %v76_v52 = vld [vmem:[%s5027_s0 + $0x118] sm:$0xff] }
  0x27   :  { %v71_v54 = vld [vmem:[%s5027_s0 + $0xf0] sm:$0xff]  ;;  %v125_v63 = vadd.f32 %v124_v50, %v51_v40  ;;  %v65_v16 = vld [vmem:[%s5027_s0 + $0xc0] sm:$0x1]  ;;  %1097 = vmatpush.bf16.msrb.mxu1 %v2447_v57  ;;  %v98_v25 = vadd.f32 %v97_v11, %v49_v10  ;;  %v204_v40 = vsub.f32 1.0, %v203_v28  ;;  %v68_v50 = vld [vmem:[%s5027_s0 + $0xd8] sm:$0x1] }
  0x28   :  { %v75_v55 = vld [vmem:[%s5027_s0 + $0x110] sm:$0xff]  ;;  %v69_v17 = vld [vmem:[%s5027_s0 + $0xe0] sm:$0xff]  ;;  %1110 = vmatpush.bf16.msrb.mxu2 %v2575_v58  ;;  %v103_v36 = vsel %vm102_vm0, %v65_v16, 0.0  ;;  %v80_v57 = vld [vmem:[%s5027_s0 + $0x138] sm:$0xff]  ;;  %v138_v58 = vadd.f32 %v137_v45, %v52_v39  ;;  %v142_v59 = vsel %vm102_vm0, %v68_v50, 0.0 }
  0x29   :  { %v79_v56 = vld [vmem:[%s5027_s0 + $0x130] sm:$0xff]  ;;  %v176_v0 = vadd.f32 %v75_v55, %v71_v54  ;;  %v126_v8 = vadd.f32 %v125_v63, %v55_v49  ;;  %v73_v23 = vld [vmem:[%s5027_s0 + $0x100] sm:$0xff]  ;;  %1123 = vmatpush.bf16.msrb.mxu3 %v2703_v1  ;;  %v99_v35 = vadd.f32 %v98_v25, %v53_v15  ;;  %v205_v53 = vmul.f32 %v3794_v18, %v204_v40  ;;  %v64_v63 = vld [vmem:[%s5027_s0 + $0xb8] sm:$0xff] }
  0x2a   :  { %v59_v61 = vld [vmem:[%s5027_s0 + $0x90] sm:$0xff]  ;;  %v77_v24 = vld [vmem:[%s5027_s0 + $0x120] sm:$0xff]  ;;  %v150_v32 = vadd.f32 %v73_v23, %v69_v17  ;;  %1085 = vmatpush.bf16.msrb.mxu0 %v2303_v12  ;;  %v189_v1 = vadd.f32 %v76_v52, %v72_v51  ;;  %v84_v5 = vld [vmem:[%s5027_s0 + $0x158] sm:$0xff] }
  0x2b   :  { %v67_v62 = vld [vmem:[%s5027_s0 + $0xd0] sm:$0x1]  ;;  %v177_v9 = vadd.f32 %v176_v0, %v79_v56  ;;  %v127_v20 = vadd.f32 %v126_v8, %v59_v61  ;;  %v57_v29 = vld [vmem:[%s5027_s0 + $0x80] sm:$0xff]  ;;  %1098 = vmatpush.bf16.msrb.mxu1 %v2431_v13  ;;  %v60_v56 = vld [vmem:[%s5027_s0 + $0x98] sm:$0xff] }
  0x2c   :  { %v63_v2 = vld [vmem:[%s5027_s0 + $0xb0] sm:$0xff]  ;;  %v129_v21 = vsel %vm102_vm0, %v67_v62, 0.0  ;;  %v81_v30 = vld [vmem:[%s5027_s0 + $0x140] sm:$0xff]  ;;  %v151_v43 = vadd.f32 %v150_v32, %v77_v24  ;;  %1111 = vmatpush.bf16.msrb.mxu2 %v2559_v14  ;;  %v100_v48 = vadd.f32 %v99_v35, %v57_v29  ;;  %v96_v0 = vld [vmem:[%s5027_s0 + $0x1b8] sm:$0x1]  ;;  %v190_v14 = vadd.f32 %v189_v1, %v80_v57 }
  0x2d   :  { %v83_v3 = vld [vmem:[%s5027_s0 + $0x150] sm:$0xff]  ;;  %v93_v31 = vld [vmem:[%s5027_s0 + $0x1a0] sm:$0x1]  ;;  %v128_v33 = vadd.f32 %v127_v20, %v63_v2  ;;  %1124 = vmatpush.bf16.msrb.mxu3 %v2687_v26  ;;  %v3148_v2 = vld [vmem:[%s5028_s1 + $0xa4] sm:$0xf] }
  0x2e   :  { %v87_v6 = vld [vmem:[%s5027_s0 + $0x170] sm:$0xff]  ;;  %v178_v22 = vadd.f32 %v177_v9, %v83_v3  ;;  %v61_v41 = vld [vmem:[%s5027_s0 + $0xa0] sm:$0xff]  ;;  %v155_v49 = vsel %vm102_vm0, %v93_v31, 0.0  ;;  %v152_v55 = vadd.f32 %v151_v43, %v81_v30  ;;  %v206_v3 = vadd.f32 %v3794_v18, %v205_v53  ;;  %v88_v13 = vld [vmem:[%s5027_s0 + $0x178] sm:$0xff] }
  0x2f   :  { %v95_v7 = vld [vmem:[%s5027_s0 + $0x1b0] sm:$0x1]  ;;  %v85_v42 = vld [vmem:[%s5027_s0 + $0x160] sm:$0xff]  ;;  %v130_v46 = vadd.f32 %v129_v21, %v128_v33  ;;  %v101_v62 = vadd.f32 %v100_v48, %v61_v41  ;;  %v2284_v8 = vld [vmem:[%s5028_s1 + $0xb0] sm:$0xf0] }
  0x30   :  { %v91_v19 = vld [vmem:[%s5027_s0 + $0x190] sm:$0xff]  ;;  %v181_v27 = vsel %vm102_vm0, %v95_v7, 0.0  ;;  %v179_v34 = vadd.f32 %v178_v22, %v87_v6  ;;  %v89_v54 = vld [vmem:[%s5027_s0 + $0x180] sm:$0xff]  ;;  %v153_v4 = vadd.f32 %v152_v55, %v85_v42  ;;  %v139_v6 = vadd.f32 %v138_v58, %v56_v44  ;;  %v42_v23 = vld [vmem:[%s5027_s0 + $0x8] sm:$0xff] }
  0x31   :  { %v131_v60 = vrot.slane %v130_v46, 4  ;;  %v194_v7 = vsel %vm102_vm0, %v96_v0, 0.0  ;;  %v3180_v9 = vld [vmem:[%s5028_s1 + $0x1a4] sm:$0xf]  ;;  %v104_v12 = vadd.f32 %v103_v36, %v101_v62  ;;  %v2412_v15 = vld [vmem:[%s5028_s1 + $0x1b0] sm:$0xf0]  ;;  %v3892_v17 = vsel %vm207_vm1, %v3794_v18, %v206_v3 }
  0x32   :  { %v180_v47 = vadd.f32 %v179_v34, %v91_v19  ;;  %v3212_v16 = vld [vmem:[%s5028_s1 + $0x2a4] sm:$0xf]  ;;  %v154_v19 = vadd.f32 %v153_v4, %v89_v54  ;;  %v140_v20 = vadd.f32 %v139_v6, %v60_v56  ;;  %v2287_v21 = vor.u32 %v3148_v2, %v2284_v8  ;;  %v2540_v22 = vld [vmem:[%s5028_s1 + $0x2b0] sm:$0xf0]  ;;  %v46_v24 = vld [vmem:[%s5027_s0 + $0x28] sm:$0xff] }
  0x33   :  { %v132_v10 = vadd.f32 %v131_v60, %v130_v46  ;;  %v191_v18 = vadd.f32 %v190_v14, %v84_v5  ;;  %v3244_v28 = vld [vmem:[%s5028_s1 + $0x3a4] sm:$0xf]  ;;  %v2668_v29 = vld [vmem:[%s5028_s1 + $0x3b0] sm:$0xf0]  ;;  %v92_v31 = vld [vmem:[%s5027_s0 + $0x198] sm:$0xff]  ;;  %v2415_v33 = vor.u32 %v3180_v9, %v2412_v15  ;;  %v2543_v34 = vor.u32 %v3212_v16, %v2540_v22 }
  0x34   :  { %v182_v61 = vadd.f32 %v181_v27, %v180_v47  ;;  %v105_v27 = vrot.slane %v104_v12, 4  ;;  %v156_v30 = vadd.f32 %v155_v49, %v154_v19  ;;  %v141_v32 = vadd.f32 %v140_v20, %v64_v63  ;;  %1086 = vmatpush.bf16.msrb.mxu0 %v2287_v21  ;;  %v50_v39 = vld [vmem:[%s5027_s0 + $0x48] sm:$0xff] }
  0x35   :  { %v133_v25 = vrot.slane %v132_v10, 2  ;;  %v192_v38 = vadd.f32 %v191_v18, %v88_v13  ;;  %v66_v40 = vld [vmem:[%s5027_s0 + $0xc8] sm:$0x1]  ;;  %1099 = vmatpush.bf16.msrb.mxu1 %v2415_v33  ;;  %1112 = vmatpush.bf16.msrb.mxu2 %v2543_v34  ;;  %v2671_v43 = vor.u32 %v3244_v28, %v2668_v29  ;;  %v111_v47 = vadd.f32 %v46_v24, %v42_v23 }
  0x36   :  { %v183_v11 = vrot.slane %v182_v61, 4  ;;  %v106_v37 = vadd.f32 %v105_v27, %v104_v12  ;;  %v157_v41 = vrot.slane %v156_v30, 4  ;;  %v143_v42 = vadd.f32 %v142_v59, %v141_v32  ;;  %v54_v44 = vld [vmem:[%s5027_s0 + $0x68] sm:$0xff] }
  0x37   :  { %v134_v35 = vadd.f32 %v133_v25, %v132_v10  ;;  %v70_v45 = vld [vmem:[%s5027_s0 + $0xe8] sm:$0xff]  ;;  %v193_v51 = vadd.f32 %v192_v38, %v92_v31  ;;  %1125 = vmatpush.bf16.msrb.mxu3 %v2671_v43  ;;  %v112_v54 = vadd.f32 %v111_v47, %v50_v39  ;;  %v116_v55 = vsel %vm102_vm0, %v66_v40, 0.0 }
  0x38   :  { %v184_v26 = vadd.f32 %v183_v11, %v182_v61  ;;  %v74_v46 = vld [vmem:[%s5027_s0 + $0x108] sm:$0xff]  ;;  %v107_v50 = vrot.slane %v106_v37, 2  ;;  %v158_v52 = vadd.f32 %v157_v41, %v156_v30  ;;  %v144_v53 = vrot.slane %v143_v42, 4 }
  0x39   :  { %v135_v48 = vrot.slane %v134_v35, 1 }
  0x3a   :  { %v185_v36 = vrot.slane %v184_v26, 2 }
  0x3c   :  { %v186_v49 = vadd.f32 %v185_v36, %v184_v26 }
  0x3d   :  { %18 = vsyncpa [#allocation4], 0  ;;  %v136_v56 = vadd.f32 %v135_v48, %v134_v35  ;;  %v108_v58 = vadd.f32 %v107_v50, %v106_v37  ;;  %v195_v59 = vadd.f32 %v194_v7, %v193_v51  ;;  %v58_v60 = vld [vmem:[%s5027_s0 + $0x88] sm:$0xff]  ;;  %v159_v62 = vrot.slane %v158_v52, 2  ;;  %v3144_v28 = vld [vmem:[%s5028_s1 + $0x84] sm:$0xf] }
  0x3e   :  { %v187_v57 = vrot.slane %v186_v49, 1  ;;  %v78_v61 = vld [vmem:[%s5027_s0 + $0x128] sm:$0xff]  ;;  %v145_v63 = vadd.f32 %v144_v53, %v143_v42  ;;  %v113_v0 = vadd.f32 %v112_v54, %v54_v44  ;;  %v163_v1 = vadd.f32 %v74_v46, %v70_v45  ;;  %v2268_v33 = vld [vmem:[%s5028_s1 + $0x90] sm:$0xf0]  ;;  %v3176_v34 = vld [vmem:[%s5028_s1 + $0x184] sm:$0xf] }
  0x3f   :  { %v211_v3 = vmul.f32 %v3892_v17, %v136_v56  ;;  %v109_v4 = vrot.slane %v108_v58, 1  ;;  %v196_v5 = vrot.slane %v195_v59, 4  ;;  %v62_v6 = vld [vmem:[%s5027_s0 + $0xa8] sm:$0xff]  ;;  %v160_v8 = vadd.f32 %v159_v62, %v158_v52  ;;  %v2396_v39 = vld [vmem:[%s5028_s1 + $0x190] sm:$0xf0]  ;;  %s3402_s19 = smov [#allocation3]  }
  0x40   :  { %v188_v2 = vadd.f32 %v187_v57, %v186_v49  ;;  %v82_v7 = vld [vmem:[%s5027_s0 + $0x148] sm:$0xff]  ;;  %v146_v9 = vrot.slane %v145_v63, 2  ;;  %v114_v10 = vadd.f32 %v113_v0, %v58_v60  ;;  %v164_v11 = vadd.f32 %v163_v1, %v78_v61  ;;  %v3208_v40 = vld [vmem:[%s5028_s1 + $0x284] sm:$0xf]  ;;  %v2524_v45 = vld [vmem:[%s5028_s1 + $0x290] sm:$0xf0] }
  0x41   :  { %v219_v13 = vpack.c.bf16 %v211_v3, %v211_v3  ;;  %v110_v14 = vadd.f32 %v109_v4, %v108_v58  ;;  %v197_v15 = vadd.f32 %v196_v5, %v195_v59  ;;  %v86_v16 = vld [vmem:[%s5027_s0 + $0x168] sm:$0xff]  ;;  %v161_v19 = vrot.slane %v160_v8, 1  ;;  %v3240_v46 = vld [vmem:[%s5028_s1 + $0x384] sm:$0xf]  ;;  %v2652_v51 = vld [vmem:[%s5028_s1 + $0x390] sm:$0xf0] }
  0x42   :  { %v215_v12 = vmul.f32 %v3892_v17, %v188_v2  ;;  %v147_v20 = vadd.f32 %v146_v9, %v145_v63  ;;  %v94_v21 = vld [vmem:[%s5027_s0 + $0x1a8] sm:$0x1]  ;;  %v115_v22 = vadd.f32 %v114_v10, %v62_v6  ;;  %v165_v23 = vadd.f32 %v164_v11, %v82_v7  ;;  %v3140_v52 = vld [vmem:[%s5028_s1 + $0x64] sm:$0xf]  ;;  %v2252_v57 = vld [vmem:[%s5028_s1 + $0x70] sm:$0xf0] }
  0x43   :  { %v373_v25 = vunpack.c.l.b16 %v219_v13  ;;  %v209_v26 = vmul.f32 %v3892_v17, %v110_v14  ;;  %v198_v27 = vrot.slane %v197_v15, 2  ;;  %v90_v18 = vld [vmem:[%s5027_s0 + $0x188] sm:$0xff]  ;;  %v162_v29 = vadd.f32 %v161_v19, %v160_v8  ;;  %v3172_v58 = vld [vmem:[%s5028_s1 + $0x164] sm:$0xf]  ;;  %v2380_v59 = vld [vmem:[%s5028_s1 + $0x170] sm:$0xf0] }
  0x44   :  { %v223_v24 = vpack.c.bf16 %v215_v12, %v215_v12  ;;  %v148_v30 = vrot.slane %v147_v20, 1  ;;  %v117_v31 = vadd.f32 %v116_v55, %v115_v22  ;;  %v166_v32 = vadd.f32 %v165_v23, %v86_v16  ;;  %v3204_v0 = vld [vmem:[%s5028_s1 + $0x264] sm:$0xf]  ;;  %v2508_v1 = vld [vmem:[%s5028_s1 + $0x270] sm:$0xf0]  ;;  %s2191_s22 = sshll.u32 %s5038_s11, 4  ;;  %s2192_s22 = int_to_ptr.hbm [resolvable:$true] %s2191_s22 }
  0x45   :  { %v217_v36 = vpack.c.bf16 %v209_v26, %v209_v26  ;;  %v199_v37 = vadd.f32 %v198_v27, %v197_v15  ;;  %v168_v38 = vsel %vm102_vm0, %v94_v21, 0.0  ;;  %v213_v41 = vmul.f32 %v3892_v17, %v162_v29  ;;  %v3236_v6 = vld [vmem:[%s5028_s1 + $0x364] sm:$0xf]  ;;  %v2636_v7 = vld [vmem:[%s5028_s1 + $0x370] sm:$0xf0] }
  0x46   :  { %v377_v35 = vunpack.c.l.b16 %v223_v24  ;;  %v149_v42 = vadd.f32 %v148_v30, %v147_v20  ;;  %v118_v43 = vrot.slane %v117_v31, 4  ;;  %v167_v44 = vadd.f32 %v166_v32, %v90_v18  ;;  %v3136_v12 = vld [vmem:[%s5028_s1 + $0x44] sm:$0xf]  ;;  %v2236_v13 = vld [vmem:[%s5028_s1 + $0x50] sm:$0xf0] }
  0x47   :  { %v371_v48 = vunpack.c.l.b16 %v217_v36  ;;  %v200_v49 = vrot.slane %v199_v37, 1  ;;  %v2271_v50 = vor.u32 %v3144_v28, %v2268_v33  ;;  %v221_v54 = vpack.c.bf16 %v213_v41, %v213_v41  ;;  %v3168_v20 = vld [vmem:[%s5028_s1 + $0x144] sm:$0xf]  ;;  %v2364_v21 = vld [vmem:[%s5028_s1 + $0x150] sm:$0xf0] }
  0x48   :  { %v382_v47 = vsel %vm379_vm2, %v377_v35, %v373_v25  ;;  %v212_v55 = vmul.f32 %v3892_v17, %v149_v42  ;;  %v119_v56 = vadd.f32 %v118_v43, %v117_v31  ;;  %v169_v61 = vadd.f32 %v168_v38, %v167_v44  ;;  %v3200_v22 = vld [vmem:[%s5028_s1 + $0x244] sm:$0xf]  ;;  %v2492_v27 = vld [vmem:[%s5028_s1 + $0x250] sm:$0xf0] }
  0x49   :  { %v3982_v53 = vpack.c.b16 %v382_v47, %v382_v47  ;;  %v201_v60 = vadd.f32 %v200_v49, %v199_v37  ;;  %1087 = vmatpush.bf16.msrb.mxu0 %v2271_v50  ;;  %v2399_v62 = vor.u32 %v3176_v34, %v2396_v39  ;;  %v2527_v63 = vor.u32 %v3208_v40, %v2524_v45  ;;  %v3232_v18 = vld [vmem:[%s5028_s1 + $0x344] sm:$0xf]  ;;  %v2620_v28 = vld [vmem:[%s5028_s1 + $0x350] sm:$0xf0] }
  0x4a   :  { %v375_v2 = vunpack.c.l.b16 %v221_v54  ;;  %v220_v3 = vpack.c.bf16 %v212_v55, %v212_v55  ;;  %v120_v4 = vrot.slane %v119_v56, 2  ;;  %v2655_v5 = vor.u32 %v3240_v46, %v2652_v51  ;;  %v3132_v31 = vld [vmem:[%s5028_s1 + $0x24] sm:$0xf]  ;;  %v2220_v32 = vld [vmem:[%s5028_s1 + $0x30] sm:$0xf0] }
  0x4b   :  { %1066 = vmatmul.bf16.vlgmr.msra.gmra.mxu2 %v3982_v53  ;;  %v216_v8 = vmul.f32 %v3892_v17, %v201_v60  ;;  %v170_v9 = vrot.slane %v169_v61, 4  ;;  %1100 = vmatpush.bf16.msrb.mxu1 %v2399_v62  ;;  %v2255_v10 = vor.u32 %v3140_v52, %v2252_v57  ;;  %v2383_v11 = vor.u32 %v3172_v58, %v2380_v59  ;;  %v3164_v38 = vld [vmem:[%s5028_s1 + $0x124] sm:$0xf]  ;;  %v2348_v39 = vld [vmem:[%s5028_s1 + $0x130] sm:$0xf0] }
  0x4c   :  { %1113 = vmatpush.bf16.msrb.mxu2 %v2527_v63  ;;  %v380_v14 = vsel %vm379_vm2, %v375_v2, %v371_v48  ;;  %v374_v15 = vunpack.c.l.b16 %v220_v3  ;;  %v121_v16 = vadd.f32 %v120_v4, %v119_v56  ;;  %1126 = vmatpush.bf16.msrb.mxu3 %v2655_v5  ;;  %v2511_v19 = vor.u32 %v3204_v0, %v2508_v1  ;;  %v3196_v40 = vld [vmem:[%s5028_s1 + $0x224] sm:$0xf]  ;;  %v2476_v45 = vld [vmem:[%s5028_s1 + $0x230] sm:$0xf0]  ;;  %v2322_v55 = vld [vmem:[%s5028_s1 + $0xe8] sm:$0xf] }
  0x4d   :  { %v4024_v23 = vpack.c.b16 %v380_v14, %v380_v14  ;;  %v224_v24 = vpack.c.bf16 %v216_v8, %v216_v8  ;;  %v171_v25 = vadd.f32 %v170_v9, %v169_v61  ;;  %1088 = vmatpush.bf16.msrb.mxu0 %v2255_v10  ;;  %v2639_v26 = vor.u32 %v3236_v6, %v2636_v7  ;;  %v3228_v46 = vld [vmem:[%s5028_s1 + $0x324] sm:$0xf]  ;;  %v2604_v47 = vld [vmem:[%s5028_s1 + $0x330] sm:$0xf0]  ;;  %v3159_v56 = vld [vmem:[%s5028_s1 + $0xf4] sm:$0xf0] }
  0x4e   :  { %v122_v29 = vrot.slane %v121_v16, 1  ;;  %v2239_v30 = vor.u32 %v3136_v12, %v2236_v13  ;;  %v2367_v35 = vor.u32 %v3168_v20, %v2364_v21  ;;  %v2495_v37 = vor.u32 %v3200_v22, %v2492_v27  ;;  %v3128_v50 = vld [vmem:[%s5028_s1 + $0x4] sm:$0xf]  ;;  %v2204_v51 = vld [vmem:[%s5028_s1 + $0x10] sm:$0xf0] }
  0x4f   :  { %1040 = vmatmul.bf16.vlgmr.msra.gmra.mxu0 %v4024_v23  ;;  %v378_v33 = vunpack.c.l.b16 %v224_v24  ;;  %v172_v34 = vrot.slane %v171_v25, 2  ;;  %1101 = vmatpush.bf16.msrb.mxu1 %v2383_v11  ;;  %v2623_v43 = vor.u32 %v3232_v18, %v2620_v28  ;;  %v2223_v44 = vor.u32 %v3132_v31, %v2220_v32  ;;  %v3160_v59 = vld [vmem:[%s5028_s1 + $0x104] sm:$0xf]  ;;  %v2332_v60 = vld [vmem:[%s5028_s1 + $0x110] sm:$0xf0] }
  0x50   :  { %v123_v36 = vadd.f32 %v122_v29, %v121_v16  ;;  %1114 = vmatpush.bf16.msrb.mxu2 %v2511_v19  ;;  %1127 = vmatpush.bf16.msrb.mxu3 %v2639_v26  ;;  %v2351_v54 = vor.u32 %v3164_v38, %v2348_v39  ;;  %v2479_v57 = vor.u32 %v3196_v40, %v2476_v45  ;;  %v3192_v61 = vld [vmem:[%s5028_s1 + $0x204] sm:$0xf]  ;;  %v2460_v1 = vld [vmem:[%s5028_s1 + $0x210] sm:$0xf0]  ;;  %v2578_v5 = vld [vmem:[%s5028_s1 + $0x2e8] sm:$0xf] }
  0x51   :  { %v383_v41 = vsel %vm379_vm2, %v378_v33, %v374_v15  ;;  %v173_v42 = vadd.f32 %v172_v34, %v171_v25  ;;  %1089 = vmatpush.bf16.msrb.mxu0 %v2239_v30  ;;  %v2607_v58 = vor.u32 %v3228_v46, %v2604_v47  ;;  %v2207_v0 = vor.u32 %v3128_v50, %v2204_v51  ;;  %v3224_v2 = vld [vmem:[%s5028_s1 + $0x304] sm:$0xf]  ;;  %v2588_v3 = vld [vmem:[%s5028_s1 + $0x310] sm:$0xf0]  ;;  %v3223_v6 = vld [vmem:[%s5028_s1 + $0x2f4] sm:$0xf0] }
  0x52   :  { %v4061_v48 = vpack.c.b16 %v383_v41, %v383_v41  ;;  %v210_v49 = vmul.f32 %v3892_v17, %v123_v36  ;;  %v2323_v4 = vor.u32 %v3159_v56, %v2322_v55  ;;  %v2706_v7 = vld [vmem:[%s5028_s1 + $0x3e8] sm:$0xf]  ;;  %v2335_v9 = vor.u32 %v3160_v59, %v2332_v60  ;;  %v3255_v10 = vld [vmem:[%s5028_s1 + $0x3f4] sm:$0xf0] }
  0x53   :  { %v174_v52 = vrot.slane %v173_v42, 1  ;;  %1102 = vmatpush.bf16.msrb.mxu1 %v2367_v35  ;;  %v2306_v11 = vld [vmem:[%s5028_s1 + $0xc8] sm:$0xf]  ;;  %v3155_v12 = vld [vmem:[%s5028_s1 + $0xd4] sm:$0xf0]  ;;  %v2463_v13 = vor.u32 %v3192_v61, %v2460_v1  ;;  %v2579_v20 = vor.u32 %v3223_v6, %v2578_v5  ;;  %v2707_v21 = vor.u32 %v3255_v10, %v2706_v7 }
  0x54   :  { %1079 = vmatmul.bf16.vlgmr.msra.gmra.mxu3 %v4061_v48  ;;  %1115 = vmatpush.bf16.msrb.mxu2 %v2495_v37  ;;  %v218_v63 = vpack.c.bf16 %v210_v49, %v210_v49  ;;  %v2450_v16 = vld [vmem:[%s5028_s1 + $0x1e8] sm:$0xf]  ;;  %v3191_v19 = vld [vmem:[%s5028_s1 + $0x1f4] sm:$0xf0]  ;;  %v2307_v22 = vor.u32 %v3155_v12, %v2306_v11  ;;  %vm1983_vm3 = vcmask 1024   ;;  %vm2010_vm4 = vcmask 1041408  }
  0x55   :  { %v175_v62 = vadd.f32 %v174_v52, %v173_v42  ;;  %1128 = vmatpush.bf16.msrb.mxu3 %v2623_v43  ;;  %1090 = vmatpush.bf16.msrb.mxu0 %v2223_v44  ;;  %v2562_v24 = vld [vmem:[%s5028_s1 + $0x2c8] sm:$0xf]  ;;  %v3219_v25 = vld [vmem:[%s5028_s1 + $0x2d4] sm:$0xf0]  ;;  %v2451_v31 = vor.u32 %v3191_v19, %v2450_v16  ;;  %vm2182_vm5 = vcmask 32768  }
  0x56   :  { %v372_v15 = vunpack.c.l.b16 %v218_v63  ;;  %v2690_v26 = vld [vmem:[%s5028_s1 + $0x3c8] sm:$0xf]  ;;  %v3251_v18 = vld [vmem:[%s5028_s1 + $0x3d4] sm:$0xf0]  ;;  %v2563_v34 = vor.u32 %v3219_v25, %v2562_v24 }
  0x57   :  { %v214_v8 = vmul.f32 %v3892_v17, %v175_v62  ;;  %1103 = vmatpush.bf16.msrb.mxu1 %v2351_v54  ;;  %v2591_v17 = vor.u32 %v3224_v2, %v2588_v3  ;;  %v2290_v28 = vld [vmem:[%s5028_s1 + $0xa8] sm:$0xf]  ;;  %v3151_v29 = vld [vmem:[%s5028_s1 + $0xb4] sm:$0xf0]  ;;  %v2691_v36 = vor.u32 %v3251_v18, %v2690_v26 }
  0x58   :  { %1116 = vmatpush.bf16.msrb.mxu2 %v2479_v57  ;;  %v2434_v32 = vld [vmem:[%s5028_s1 + $0x1c8] sm:$0xf]  ;;  %v3187_v33 = vld [vmem:[%s5028_s1 + $0x1d4] sm:$0xf0]  ;;  %v2291_v37 = vor.u32 %v3151_v29, %v2290_v28 }
  0x59   :  { %v222_v14 = vpack.c.bf16 %v214_v8, %v214_v8  ;;  %1129 = vmatpush.bf16.msrb.mxu3 %v2607_v58  ;;  %1091 = vmatpush.bf16.msrb.mxu0 %v2207_v0  ;;  %v2546_v38 = vld [vmem:[%s5028_s1 + $0x2a8] sm:$0xf]  ;;  %v3215_v39 = vld [vmem:[%s5028_s1 + $0x2b4] sm:$0xf0]  ;;  %v2435_v44 = vor.u32 %v3187_v33, %v2434_v32  ;;  %v2324_v32 = vld [vmem:[%s5028_s1 + $0xf8] sm:$0xf0] }
  0x5a   :  { %v2674_v40 = vld [vmem:[%s5028_s1 + $0x3a8] sm:$0xf]  ;;  %v3247_v41 = vld [vmem:[%s5028_s1 + $0x3b4] sm:$0xf0]  ;;  %v2547_v47 = vor.u32 %v3215_v39, %v2546_v38 }
  0x5b   :  { %v376_v27 = vunpack.c.l.b16 %v222_v14  ;;  %1104 = vmatpush.bf16.msrb.mxu1 %v2335_v9  ;;  %v2274_v42 = vld [vmem:[%s5028_s1 + $0x88] sm:$0xf]  ;;  %v3147_v43 = vld [vmem:[%s5028_s1 + $0x94] sm:$0xf0]  ;;  %v2675_v49 = vor.u32 %v3247_v41, %v2674_v40 }
  0x5c   :  { %1117 = vmatpush.bf16.msrb.mxu2 %v2463_v13  ;;  %v2418_v45 = vld [vmem:[%s5028_s1 + $0x1a8] sm:$0xf]  ;;  %v3183_v46 = vld [vmem:[%s5028_s1 + $0x1b4] sm:$0xf0]  ;;  %v2275_v50 = vor.u32 %v3147_v43, %v2274_v42 }
  0x5d   :  { %1136 = vmatpush.bf16.msra.mxu0 %v2323_v4  ;;  %v381_v30 = vsel %vm379_vm2, %v376_v27, %v372_v15  ;;  %1130 = vmatpush.bf16.msrb.mxu3 %v2591_v17  ;;  %v2530_v51 = vld [vmem:[%s5028_s1 + $0x288] sm:$0xf]  ;;  %v3211_v52 = vld [vmem:[%s5028_s1 + $0x294] sm:$0xf0]  ;;  %v2419_v58 = vor.u32 %v3183_v46, %v2418_v45  ;;  %v3221_v45 = vld [vmem:[%s5028_s1 + $0x2ec] sm:$0xf] }
  0x5e   :  { %v4145_v35 = vpack.c.b16 %v381_v30, %v381_v30  ;;  %v2658_v54 = vld [vmem:[%s5028_s1 + $0x388] sm:$0xf]  ;;  %v3243_v55 = vld [vmem:[%s5028_s1 + $0x394] sm:$0xf0]  ;;  %v2531_v61 = vor.u32 %v3211_v52, %v2530_v51  ;;  %v2580_v46 = vld [vmem:[%s5028_s1 + $0x2f8] sm:$0xf0] }
  0x5f   :  { %1118 = vmatmul.bf16.vlgmr.msrb.gmra.mxu2 %v3982_v53  ;;  %1092 = vmatmul.bf16.vlgmr.msrb.gmra.mxu0 %v4024_v23  ;;  %v2258_v56 = vld [vmem:[%s5028_s1 + $0x68] sm:$0xf]  ;;  %v3143_v57 = vld [vmem:[%s5028_s1 + $0x74] sm:$0xf0]  ;;  %v2659_v62 = vor.u32 %v3243_v55, %v2658_v54  ;;  %v3153_v52 = vld [vmem:[%s5028_s1 + $0xcc] sm:$0xf] }
  0x60   :  { %1162 = vmatpush.bf16.msra.mxu2 %v2579_v20  ;;  %1053 = vmatmul.bf16.vlgmr.msra.gmra.mxu1 %v4145_v35  ;;  %v2402_v59 = vld [vmem:[%s5028_s1 + $0x188] sm:$0xf]  ;;  %v3179_v60 = vld [vmem:[%s5028_s1 + $0x194] sm:$0xf0]  ;;  %v2259_v63 = vor.u32 %v3143_v57, %v2258_v56  ;;  %v2308_v54 = vld [vmem:[%s5028_s1 + $0xd8] sm:$0xf0] }
  0x61   :  { %1175 = vmatpush.bf16.msra.mxu3 %v2707_v21  ;;  %1137 = vmatpush.bf16.msra.mxu0 %v2307_v22  ;;  %v2514_v0 = vld [vmem:[%s5028_s1 + $0x268] sm:$0xf]  ;;  %v3207_v1 = vld [vmem:[%s5028_s1 + $0x274] sm:$0xf0]  ;;  %v2403_v6 = vor.u32 %v3179_v60, %v2402_v59  ;;  %v2583_v59 = vor.u32 %v3221_v45, %v2580_v46  ;;  %v2452_v60 = vld [vmem:[%s5028_s1 + $0x1f8] sm:$0xf0] }
  0x62   :  { %1149 = vmatpush.bf16.msra.mxu1 %v2451_v31  ;;  %v2642_v2 = vld [vmem:[%s5028_s1 + $0x368] sm:$0xf]  ;;  %v3239_v3 = vld [vmem:[%s5028_s1 + $0x374] sm:$0xf0]  ;;  %v2515_v9 = vor.u32 %v3207_v1, %v2514_v0  ;;  %v3157_v31 = vld [vmem:[%s5028_s1 + $0xec] sm:$0xf]  ;;  %v2311_v0 = vor.u32 %v3153_v52, %v2308_v54 }
  0x63   :  { %v2242_v4 = vld [vmem:[%s5028_s1 + $0x48] sm:$0xf]  ;;  %v3139_v5 = vld [vmem:[%s5028_s1 + $0x54] sm:$0xf0]  ;;  %v2643_v10 = vor.u32 %v3239_v3, %v2642_v2  ;;  %v3249_v1 = vld [vmem:[%s5028_s1 + $0x3cc] sm:$0xf] }
  0x64   :  { %1163 = vmatpush.bf16.msra.mxu2 %v2563_v34  ;;  %1131 = vmatmul.bf16.vlgmr.msrb.gmra.mxu3 %v4061_v48  ;;  %v2386_v7 = vld [vmem:[%s5028_s1 + $0x168] sm:$0xf]  ;;  %v3175_v8 = vld [vmem:[%s5028_s1 + $0x174] sm:$0xf0]  ;;  %v2243_v11 = vor.u32 %v3139_v5, %v2242_v4  ;;  %v2692_v2 = vld [vmem:[%s5028_s1 + $0x3d8] sm:$0xf0] }
  0x65   :  { %1176 = vmatpush.bf16.msra.mxu3 %v2691_v36  ;;  %1138 = vmatpush.bf16.msra.mxu0 %v2291_v37  ;;  %v2498_v12 = vld [vmem:[%s5028_s1 + $0x248] sm:$0xf]  ;;  %v3203_v13 = vld [vmem:[%s5028_s1 + $0x254] sm:$0xf0]  ;;  %v2387_v19 = vor.u32 %v3175_v8, %v2386_v7  ;;  %v3149_v4 = vld [vmem:[%s5028_s1 + $0xac] sm:$0xf] }
  0x66   :  { %1150 = vmatpush.bf16.msra.mxu1 %v2435_v44  ;;  %v2626_v14 = vld [vmem:[%s5028_s1 + $0x348] sm:$0xf]  ;;  %v3235_v15 = vld [vmem:[%s5028_s1 + $0x354] sm:$0xf0]  ;;  %v2499_v22 = vor.u32 %v3203_v13, %v2498_v12  ;;  %v2327_v44 = vor.u32 %v3157_v31, %v2324_v32  ;;  %v2292_v5 = vld [vmem:[%s5028_s1 + $0xb8] sm:$0xf0] }
  0x67   :  { %v2226_v17 = vld [vmem:[%s5028_s1 + $0x28] sm:$0xf]  ;;  %v3135_v16 = vld [vmem:[%s5028_s1 + $0x34] sm:$0xf0]  ;;  %v2627_v24 = vor.u32 %v3235_v15, %v2626_v14  ;;  %v3185_v7 = vld [vmem:[%s5028_s1 + $0x1cc] sm:$0xf]  ;;  %v2295_v13 = vor.u32 %v3149_v4, %v2292_v5 }
  0x68   :  { %1164 = vmatpush.bf16.msra.mxu2 %v2547_v47  ;;  %v2370_v20 = vld [vmem:[%s5028_s1 + $0x148] sm:$0xf]  ;;  %v3171_v21 = vld [vmem:[%s5028_s1 + $0x154] sm:$0xf0]  ;;  %v2227_v25 = vor.u32 %v3135_v16, %v2226_v17  ;;  %v3253_v47 = vld [vmem:[%s5028_s1 + $0x3ec] sm:$0xf] }
  0x69   :  { %1177 = vmatpush.bf16.msra.mxu3 %v2675_v49  ;;  %1139 = vmatpush.bf16.msra.mxu0 %v2275_v50  ;;  %v2482_v26 = vld [vmem:[%s5028_s1 + $0x228] sm:$0xf]  ;;  %v3199_v27 = vld [vmem:[%s5028_s1 + $0x234] sm:$0xf0]  ;;  %v2371_v33 = vor.u32 %v3171_v21, %v2370_v20  ;;  %v2708_v49 = vld [vmem:[%s5028_s1 + $0x3f8] sm:$0xf0] }
  0x6a   :  { %1151 = vmatpush.bf16.msra.mxu1 %v2419_v58  ;;  %v2610_v18 = vld [vmem:[%s5028_s1 + $0x328] sm:$0xf]  ;;  %v3231_v28 = vld [vmem:[%s5028_s1 + $0x334] sm:$0xf0]  ;;  %v2483_v37 = vor.u32 %v3199_v27, %v2482_v26  ;;  %v3189_v58 = vld [vmem:[%s5028_s1 + $0x1ec] sm:$0xf] }
  0x6b   :  { %v2210_v29 = vld [vmem:[%s5028_s1 + $0x8] sm:$0xf]  ;;  %v3131_v30 = vld [vmem:[%s5028_s1 + $0x14] sm:$0xf0]  ;;  %v2611_v38 = vor.u32 %v3231_v28, %v2610_v18  ;;  %v2548_v12 = vld [vmem:[%s5028_s1 + $0x2b8] sm:$0xf0] }
  0x6c   :  { %1165 = vmatpush.bf16.msra.mxu2 %v2531_v61  ;;  %v2354_v34 = vld [vmem:[%s5028_s1 + $0x128] sm:$0xf]  ;;  %v3167_v36 = vld [vmem:[%s5028_s1 + $0x134] sm:$0xf0]  ;;  %v2211_v39 = vor.u32 %v3131_v30, %v2210_v29  ;;  %v2711_v61 = vor.u32 %v3253_v47, %v2708_v49  ;;  %v3245_v14 = vld [vmem:[%s5028_s1 + $0x3ac] sm:$0xf] }
  0x6d   :  { %1178 = vmatpush.bf16.msra.mxu3 %v2659_v62  ;;  %1140 = vmatpush.bf16.msra.mxu0 %v2259_v63  ;;  %v2466_v40 = vld [vmem:[%s5028_s1 + $0x208] sm:$0xf]  ;;  %v3195_v41 = vld [vmem:[%s5028_s1 + $0x214] sm:$0xf0]  ;;  %v2355_v50 = vor.u32 %v3167_v36, %v2354_v34  ;;  %v3217_v62 = vld [vmem:[%s5028_s1 + $0x2cc] sm:$0xf] }
  0x6e   :  { %1152 = vmatpush.bf16.msra.mxu1 %v2403_v6  ;;  %v2594_v42 = vld [vmem:[%s5028_s1 + $0x308] sm:$0xf]  ;;  %v3227_v43 = vld [vmem:[%s5028_s1 + $0x314] sm:$0xf0]  ;;  %v2467_v51 = vor.u32 %v3195_v41, %v2466_v40  ;;  %v2564_v63 = vld [vmem:[%s5028_s1 + $0x2d8] sm:$0xf0]  ;;  %v2455_v6 = vor.u32 %v3189_v58, %v2452_v60 }
  0x6f   :  { %v2338_v55 = vld [vmem:[%s5028_s1 + $0x108] sm:$0xf]  ;;  %v3163_v56 = vld [vmem:[%s5028_s1 + $0x114] sm:$0xf0]  ;;  %v2595_v57 = vor.u32 %v3227_v43, %v2594_v42  ;;  %v2567_v8 = vor.u32 %v3217_v62, %v2564_v63  ;;  %v2676_v15 = vld [vmem:[%s5028_s1 + $0x3b8] sm:$0xf0] }
  0x70   :  { %1166 = vmatpush.bf16.msra.mxu2 %v2515_v9  ;;  %1105 = vmatmul.bf16.vlgmr.msrb.gmra.mxu1 %v4145_v35  ;;  %v2339_v3 = vor.u32 %v3163_v56, %v2338_v55  ;;  %v2436_v9 = vld [vmem:[%s5028_s1 + $0x1d8] sm:$0xf0]  ;;  %v3145_v17 = vld [vmem:[%s5028_s1 + $0x8c] sm:$0xf] }
  0x71   :  { %1179 = vmatpush.bf16.msra.mxu3 %v2643_v10  ;;  %1141 = vmatpush.bf16.msra.mxu0 %v2243_v11  ;;  %v2695_v10 = vor.u32 %v3249_v1, %v2692_v2  ;;  %v3213_v11 = vld [vmem:[%s5028_s1 + $0x2ac] sm:$0xf]  ;;  %v2276_v16 = vld [vmem:[%s5028_s1 + $0x98] sm:$0xf0] }
  0x72   :  { %1153 = vmatpush.bf16.msra.mxu1 %v2387_v19  ;;  %v2439_v19 = vor.u32 %v3185_v7, %v2436_v9  ;;  %v3181_v20 = vld [vmem:[%s5028_s1 + $0x1ac] sm:$0xf]  ;;  %v2551_v21 = vor.u32 %v3213_v11, %v2548_v12  ;;  %v2532_v26 = vld [vmem:[%s5028_s1 + $0x298] sm:$0xf0]  ;;  %v2279_v27 = vor.u32 %v3145_v17, %v2276_v16  ;;  %v2770_v9 = vld [vmem:[%s5030_s3 + $0x70] sm:$0xf] }
  0x73   :  { %v3241_v18 = vld [vmem:[%s5028_s1 + $0x38c] sm:$0xf]  ;;  %v2660_v28 = vld [vmem:[%s5028_s1 + $0x398] sm:$0xf0] }
  0x74   :  { %1167 = vmatpush.bf16.msra.mxu2 %v2499_v22  ;;  %v2420_v22 = vld [vmem:[%s5028_s1 + $0x1b8] sm:$0xf0]  ;;  %v3141_v29 = vld [vmem:[%s5028_s1 + $0x6c] sm:$0xf]  ;;  %v2663_v36 = vor.u32 %v3241_v18, %v2660_v28  ;;  %v2834_v18 = vld [vmem:[%s5030_s3 + $0xf0] sm:$0xf] }
  0x75   :  { %1180 = vmatpush.bf16.msra.mxu3 %v2627_v24  ;;  %1142 = vmatpush.bf16.msra.mxu0 %v2227_v25  ;;  %v2679_v24 = vor.u32 %v3245_v14, %v2676_v15  ;;  %v3209_v25 = vld [vmem:[%s5028_s1 + $0x28c] sm:$0xf]  ;;  %v2260_v30 = vld [vmem:[%s5028_s1 + $0x78] sm:$0xf0]  ;;  %v2423_v31 = vor.u32 %v3181_v20, %v2420_v22  ;;  %v2762_v22 = vld [vmem:[%s5030_s3 + $0x60] sm:$0xf] }
  0x76   :  { %1154 = vmatpush.bf16.msra.mxu1 %v2371_v33  ;;  %v3177_v32 = vld [vmem:[%s5028_s1 + $0x18c] sm:$0xf]  ;;  %v2535_v33 = vor.u32 %v3209_v25, %v2532_v26  ;;  %v2404_v34 = vld [vmem:[%s5028_s1 + $0x198] sm:$0xf0]  ;;  %v3287_v28 = vld [vmem:[%s5030_s3 + $0xf4] sm:$0xf0] }
  0x77   :  { %v3237_v40 = vld [vmem:[%s5028_s1 + $0x36c] sm:$0xf]  ;;  %v2644_v41 = vld [vmem:[%s5028_s1 + $0x378] sm:$0xf0] }
  0x78   :  { %1168 = vmatpush.bf16.msra.mxu2 %v2483_v37  ;;  %v3205_v37 = vld [vmem:[%s5028_s1 + $0x26c] sm:$0xf]  ;;  %v2244_v43 = vld [vmem:[%s5028_s1 + $0x58] sm:$0xf0]  ;;  %v2647_v49 = vor.u32 %v3237_v40, %v2644_v41 }
  0x79   :  { %1181 = vmatpush.bf16.msra.mxu3 %v2611_v38  ;;  %1143 = vmatpush.bf16.msra.mxu0 %v2211_v39  ;;  %v2516_v38 = vld [vmem:[%s5028_s1 + $0x278] sm:$0xf0]  ;;  %v2263_v39 = vor.u32 %v3141_v29, %v2260_v30  ;;  %v3137_v42 = vld [vmem:[%s5028_s1 + $0x4c] sm:$0xf] }
  0x7a   :  { %1155 = vmatpush.bf16.msra.mxu1 %v2355_v50  ;;  %v3173_v45 = vld [vmem:[%s5028_s1 + $0x16c] sm:$0xf]  ;;  %v2519_v46 = vor.u32 %v3205_v37, %v2516_v38  ;;  %v2388_v47 = vld [vmem:[%s5028_s1 + $0x178] sm:$0xf0]  ;;  %v2247_v52 = vor.u32 %v3137_v42, %v2244_v43  ;;  %v3265_v38 = vld [vmem:[%s5030_s3 + $0x44] sm:$0xf0] }
  0x7b   :  { %v3201_v50 = vld [vmem:[%s5028_s1 + $0x24c] sm:$0xf]  ;;  %v2628_v55 = vld [vmem:[%s5028_s1 + $0x358] sm:$0xf0]  ;;  %v2391_v58 = vor.u32 %v3173_v45, %v2388_v47  ;;  %v2730_v42 = vld [vmem:[%s5030_s3 + $0x20] sm:$0xf] }
  0x7c   :  { %1169 = vmatpush.bf16.msra.mxu2 %v2467_v51  ;;  %1144 = vmatmul.bf16.vlgmr.msra.gmra.mxu0 %v4024_v23  ;;  %v2500_v51 = vld [vmem:[%s5028_s1 + $0x258] sm:$0xf0]  ;;  %v3233_v54 = vld [vmem:[%s5028_s1 + $0x34c] sm:$0xf]  ;;  %v3259_v45 = vld [vmem:[%s5030_s3 + $0x14] sm:$0xf0] }
  0x7d   :  { %1188 = vmatpush.bf16.msrb.mxu0 %v2327_v44  ;;  %1182 = vmatpush.bf16.msra.mxu3 %v2595_v57  ;;  %v2407_v44 = vor.u32 %v3177_v32, %v2404_v34  ;;  %v3133_v56 = vld [vmem:[%s5028_s1 + $0x2c] sm:$0xf]  ;;  %v2228_v57 = vld [vmem:[%s5028_s1 + $0x38] sm:$0xf0]  ;;  %v2503_v60 = vor.u32 %v3201_v50, %v2500_v51  ;;  %v2631_v62 = vor.u32 %v3233_v54, %v2628_v55  ;;  %v3267_v32 = vld [vmem:[%s5030_s3 + $0x54] sm:$0xf0] }
  0x7e   :  { %1156 = vmatpush.bf16.msra.mxu1 %v2339_v3  ;;  %v3197_v63 = vld [vmem:[%s5028_s1 + $0x22c] sm:$0xf]  ;;  %v2231_v1 = vor.u32 %v3133_v56, %v2228_v57  ;;  %v2612_v3 = vld [vmem:[%s5028_s1 + $0x338] sm:$0xf0]  ;;  %v2826_v34 = vld [vmem:[%s5030_s3 + $0xe0] sm:$0xf] }
  0x7f   :  { %1170 = vmatmul.bf16.vlgmr.msra.gmra.mxu2 %v3982_v53  ;;  %v3229_v2 = vld [vmem:[%s5028_s1 + $0x32c] sm:$0xf]  ;;  %v2212_v5 = vld [vmem:[%s5028_s1 + $0x18] sm:$0xf0]  ;;  %v2714_v47 = vld [vmem:[%s5030_s3] sm:$0xf] }
  0x80   :  { %1214 = vmatpush.bf16.msrb.mxu2 %v2583_v59  ;;  %1183 = vmatmul.bf16.vlgmr.msra.gmra.mxu3 %v4061_v48  ;;  %v3169_v59 = vld [vmem:[%s5028_s1 + $0x14c] sm:$0xf]  ;;  %v2356_v11 = vld [vmem:[%s5028_s1 + $0x138] sm:$0xf0]  ;;  %v2615_v12 = vor.u32 %v3229_v2, %v2612_v3  ;;  %v3270_v50 = vld [vmem:[%s5030_s3 + $0x74] sm:$0xf] }
  0x81   :  { %1227 = vmatpush.bf16.msrb.mxu3 %v2711_v61  ;;  %1189 = vmatpush.bf16.msrb.mxu0 %v2311_v0  ;;  %v2372_v61 = vld [vmem:[%s5028_s1 + $0x158] sm:$0xf0]  ;;  %v3129_v4 = vld [vmem:[%s5028_s1 + $0xc] sm:$0xf]  ;;  %v2818_v54 = vld [vmem:[%s5030_s3 + $0xd0] sm:$0xf] }
  0x82   :  { %1201 = vmatpush.bf16.msrb.mxu1 %v2455_v6  ;;  %v2484_v0 = vld [vmem:[%s5028_s1 + $0x238] sm:$0xf0]  ;;  %v2375_v6 = vor.u32 %v3169_v59, %v2372_v61  ;;  %v3165_v7 = vld [vmem:[%s5028_s1 + $0x12c] sm:$0xf]  ;;  %v2215_v15 = vor.u32 %v3129_v4, %v2212_v5  ;;  %v3283_v56 = vld [vmem:[%s5030_s3 + $0xd4] sm:$0xf0] }
  0x83   :  { %1157 = vmatmul.bf16.vlgmr.msra.gmra.mxu1 %v4145_v35  ;;  %v2468_v14 = vld [vmem:[%s5028_s1 + $0x218] sm:$0xf0]  ;;  %v3225_v17 = vld [vmem:[%s5028_s1 + $0x30c] sm:$0xf]  ;;  %v2359_v20 = vor.u32 %v3165_v7, %v2356_v11  ;;  %v3268_v57 = vld [vmem:[%s5030_s3 + $0x64] sm:$0xf]  ;;  %v2819_v59 = vor.u32 %v3283_v56, %v2818_v54 }
  0x84   :  { %1215 = vmatpush.bf16.msrb.mxu2 %v2567_v8  ;;  %v2487_v8 = vor.u32 %v3197_v63, %v2484_v0  ;;  %v2596_v16 = vld [vmem:[%s5028_s1 + $0x318] sm:$0xf0]  ;;  %v3161_v25 = vld [vmem:[%s5028_s1 + $0x10c] sm:$0xf]  ;;  %v3266_v61 = vld [vmem:[%s5030_s3 + $0x54] sm:$0xf] }
  0x85   :  { %1228 = vmatpush.bf16.msrb.mxu3 %v2695_v10  ;;  %1190 = vmatpush.bf16.msrb.mxu0 %v2295_v13  ;;  %v3271_v10 = vld [vmem:[%s5030_s3 + $0x74] sm:$0xf0]  ;;  %v3193_v13 = vld [vmem:[%s5028_s1 + $0x20c] sm:$0xf]  ;;  %v2340_v26 = vld [vmem:[%s5028_s1 + $0x118] sm:$0xf0] }
  0x86   :  { %1202 = vmatpush.bf16.msrb.mxu1 %v2439_v19  ;;  %v2771_v19 = vor.u32 %v3271_v10, %v2770_v9  ;;  %v2343_v30 = vor.u32 %v3161_v25, %v2340_v26  ;;  %v2772_v51 = vld [vmem:[%s5030_s3 + $0x78] sm:$0xf0]  ;;  %v2810_v0 = vld [vmem:[%s5030_s3 + $0xc0] sm:$0xf]  ;;  %v3264_v3 = vld [vmem:[%s5030_s3 + $0x44] sm:$0xf] }
  0x87   :  { %v2775_v55 = vor.u32 %v3270_v50, %v2772_v51  ;;  %v2748_v4 = vld [vmem:[%s5030_s3 + $0x48] sm:$0xf0]  ;;  %v3279_v7 = vld [vmem:[%s5030_s3 + $0xb4] sm:$0xf0]  ;;  %v3262_v9 = vld [vmem:[%s5030_s3 + $0x34] sm:$0xf] }
  0x88   :  { %1216 = vmatpush.bf16.msrb.mxu2 %v2551_v21  ;;  %v2471_v21 = vor.u32 %v3193_v13, %v2468_v14  ;;  %v2751_v5 = vor.u32 %v3264_v3, %v2748_v4  ;;  %v2740_v10 = vld [vmem:[%s5030_s3 + $0x38] sm:$0xf0]  ;;  %v3277_v13 = vld [vmem:[%s5030_s3 + $0xa4] sm:$0xf0]  ;;  %v2898_v25 = vld [vmem:[%s5030_s3 + $0x170] sm:$0xf] }
  0x89   :  { %1229 = vmatpush.bf16.msrb.mxu3 %v2679_v24  ;;  %1191 = vmatpush.bf16.msrb.mxu0 %v2279_v27  ;;  %v3269_v24 = vld [vmem:[%s5030_s3 + $0x64] sm:$0xf0]  ;;  %v2599_v27 = vor.u32 %v3225_v17, %v2596_v16  ;;  %v2743_v11 = vor.u32 %v3262_v9, %v2740_v10  ;;  %v2732_v17 = vld [vmem:[%s5030_s3 + $0x28] sm:$0xf0]  ;;  %v2786_v16 = vld [vmem:[%s5030_s3 + $0x90] sm:$0xf] }
  0x8a   :  { %1203 = vmatpush.bf16.msrb.mxu1 %v2423_v31  ;;  %v2763_v29 = vor.u32 %v3269_v24, %v2762_v22  ;;  %v2754_v31 = vld [vmem:[%s5030_s3 + $0x50] sm:$0xf]  ;;  %v3258_v22 = vld [vmem:[%s5030_s3 + $0x14] sm:$0xf]  ;;  %v2724_v24 = vld [vmem:[%s5030_s3 + $0x18] sm:$0xf0] }
  0x8b   :  { %v2755_v37 = vor.u32 %v3267_v32, %v2754_v31  ;;  %v2778_v26 = vld [vmem:[%s5030_s3 + $0x80] sm:$0xf]  ;;  %v2727_v31 = vor.u32 %v3258_v22, %v2724_v24  ;;  %v2962_v9 = vld [vmem:[%s5030_s3 + $0x1f0] sm:$0xf]  ;;  %v3319_v10 = vld [vmem:[%s5030_s3 + $0x1f4] sm:$0xf0] }
  0x8c   :  { %1217 = vmatpush.bf16.msrb.mxu2 %v2535_v33  ;;  %v2835_v33 = vor.u32 %v3287_v28, %v2834_v18  ;;  %v3303_v18 = vld [vmem:[%s5030_s3 + $0x174] sm:$0xf0]  ;;  %v2890_v32 = vld [vmem:[%s5030_s3 + $0x160] sm:$0xf]  ;;  %v3274_v24 = vld [vmem:[%s5030_s3 + $0x94] sm:$0xf] }
  0x8d   :  { %1230 = vmatpush.bf16.msrb.mxu3 %v2663_v36  ;;  %1192 = vmatpush.bf16.msrb.mxu0 %v2263_v39  ;;  %v3285_v36 = vld [vmem:[%s5030_s3 + $0xe4] sm:$0xf0]  ;;  %v2899_v28 = vor.u32 %v3303_v18, %v2898_v25  ;;  %v2874_v54 = vld [vmem:[%s5030_s3 + $0x140] sm:$0xf]  ;;  %v3291_v22 = vld [vmem:[%s5030_s3 + $0x114] sm:$0xf0] }
  0x8e   :  { %1204 = vmatpush.bf16.msrb.mxu1 %v2407_v44  ;;  %v2827_v39 = vor.u32 %v3285_v36, %v2826_v34  ;;  %v2722_v44 = vld [vmem:[%s5030_s3 + $0x10] sm:$0xf]  ;;  %v2788_v25 = vld [vmem:[%s5030_s3 + $0x98] sm:$0xf0]  ;;  %s2189_s1 = sshll.u32 %s3402_s19, 4  ;;  %s2190_s1 = int_to_ptr.vmem [resolvable:$true] %s2189_s1 }
  0x90   :  { %1218 = vmatpush.bf16.msrb.mxu2 %v2519_v46  ;;  %v2723_v46 = vor.u32 %v3259_v45, %v2722_v44 }
  0x91   :  { %1231 = vmatpush.bf16.msrb.mxu3 %v2647_v49  ;;  %1193 = vmatpush.bf16.msrb.mxu0 %v2247_v52  ;;  %v3257_v49 = vld [vmem:[%s5030_s3 + $0x4] sm:$0xf0] }
  0x92   :  { %1205 = vmatpush.bf16.msrb.mxu1 %v2391_v58  ;;  %v2715_v52 = vor.u32 %v3257_v49, %v2714_v47  ;;  %v2764_v58 = vld [vmem:[%s5030_s3 + $0x68] sm:$0xf0]  ;;  %v3299_v47 = vld [vmem:[%s5030_s3 + $0x154] sm:$0xf0]  ;;  %v3282_v49 = vld [vmem:[%s5030_s3 + $0xd4] sm:$0xf] }
  0x94   :  { %1219 = vmatpush.bf16.msrb.mxu2 %v2503_v60  ;;  %v2767_v60 = vor.u32 %v3268_v57, %v2764_v58  ;;  %v3280_v57 = vld [vmem:[%s5030_s3 + $0xc4] sm:$0xf]  ;;  %v2812_v58 = vld [vmem:[%s5030_s3 + $0xc8] sm:$0xf0] }
  0x95   :  { %1232 = vmatpush.bf16.msrb.mxu3 %v2631_v62  ;;  %1194 = vmatpush.bf16.msrb.mxu0 %v2231_v1  ;;  %v2756_v62 = vld [vmem:[%s5030_s3 + $0x58] sm:$0xf0]  ;;  %v3281_v1 = vld [vmem:[%s5030_s3 + $0xc4] sm:$0xf0] }
  0x96   :  { %1206 = vmatpush.bf16.msrb.mxu1 %v2375_v6  ;;  %v2759_v63 = vor.u32 %v3266_v61, %v2756_v62  ;;  %v2811_v2 = vor.u32 %v3281_v1, %v2810_v0  ;;  %v2802_v6 = vld [vmem:[%s5030_s3 + $0xb0] sm:$0xf]  ;;  %v2815_v61 = vor.u32 %v3280_v57, %v2812_v58  ;;  %v3278_v0 = vld [vmem:[%s5030_s3 + $0xb4] sm:$0xf]  ;;  %v2804_v1 = vld [vmem:[%s5030_s3 + $0xb8] sm:$0xf0] }
  0x97   :  { %v2866_v62 = vld [vmem:[%s5030_s3 + $0x130] sm:$0xf]  ;;  %v3311_v58 = vld [vmem:[%s5030_s3 + $0x1b4] sm:$0xf0] }
  0x98   :  { %1220 = vmatpush.bf16.msrb.mxu2 %v2487_v8  ;;  %v2803_v8 = vor.u32 %v3279_v7, %v2802_v6  ;;  %v2807_v7 = vor.u32 %v3278_v0, %v2804_v1  ;;  %v2930_v57 = vld [vmem:[%s5030_s3 + $0x1b0] sm:$0xf]  ;;  %v2922_v1 = vld [vmem:[%s5030_s3 + $0x1a0] sm:$0xf] }
  0x99   :  { %1233 = vmatpush.bf16.msrb.mxu3 %v2615_v12  ;;  %1195 = vmatpush.bf16.msrb.mxu0 %v2215_v15  ;;  %v2794_v12 = vld [vmem:[%s5030_s3 + $0xa0] sm:$0xf]  ;;  %v3260_v15 = vld [vmem:[%s5030_s3 + $0x24] sm:$0xf] }
  0x9a   :  { %1207 = vmatpush.bf16.msrb.mxu1 %v2359_v20  ;;  %v2795_v14 = vor.u32 %v3277_v13, %v2794_v12  ;;  %v3275_v20 = vld [vmem:[%s5030_s3 + $0x94] sm:$0xf0]  ;;  %v3276_v12 = vld [vmem:[%s5030_s3 + $0xa4] sm:$0xf]  ;;  %v2796_v13 = vld [vmem:[%s5030_s3 + $0xa8] sm:$0xf0] }
  0x9c   :  { %1221 = vmatpush.bf16.msrb.mxu2 %v2471_v21  ;;  %1196 = vmatmul.bf16.vlgmr.msrb.gmra.mxu0 %v4024_v23  ;;  %v2746_v23 = vld [vmem:[%s5030_s3 + $0x40] sm:$0xf]  ;;  %v2787_v21 = vor.u32 %v3275_v20, %v2786_v16  ;;  %v2799_v20 = vor.u32 %v3276_v12, %v2796_v13 }
  0x9d   :  { %1634 = vmatpush.bf16.msra.mxu0 %v2771_v19  ;;  %1234 = vmatpush.bf16.msrb.mxu3 %v2599_v27  ;;  %v2747_v40 = vor.u32 %v3265_v38, %v2746_v23  ;;  %v2735_v19 = vor.u32 %v3260_v15, %v2732_v17  ;;  %v3273_v27 = vld [vmem:[%s5030_s3 + $0x84] sm:$0xf0]  ;;  %v2716_v23 = vld [vmem:[%s5030_s3 + $0x8] sm:$0xf0] }
  0x9e   :  { %1208 = vmatpush.bf16.msrb.mxu1 %v2343_v30  ;;  %v2836_v30 = vld [vmem:[%s5030_s3 + $0xf8] sm:$0xf0]  ;;  %v2779_v36 = vor.u32 %v3273_v27, %v2778_v26 }
  0x9f   :  { %1222 = vmatmul.bf16.vlgmr.msrb.gmra.mxu2 %v3982_v53  ;;  %v2738_v53 = vld [vmem:[%s5030_s3 + $0x30] sm:$0xf] }
  0xa0   :  { %1235 = vmatmul.bf16.vlgmr.msrb.gmra.mxu3 %v4061_v48  ;;  %v3263_v48 = vld [vmem:[%s5030_s3 + $0x34] sm:$0xf0]  ;;  %1660 = vmatpush.bf16.msra.mxu2 %v2899_v28 }
  0xa1   :  { %1635 = vmatpush.bf16.msra.mxu0 %v2763_v29  ;;  %1209 = vmatmul.bf16.vlgmr.msrb.gmra.mxu1 %v4145_v35  ;;  %v2739_v41 = vor.u32 %v3263_v48, %v2738_v53  ;;  %v3261_v35 = vld [vmem:[%s5030_s3 + $0x24] sm:$0xf0]  ;;  %v3286_v29 = vld [vmem:[%s5030_s3 + $0xf4] sm:$0xf]  ;;  %v3284_v53 = vld [vmem:[%s5030_s3 + $0xe4] sm:$0xf] }
  0xa2   :  { %1647 = vmatpush.bf16.msra.mxu1 %v2835_v33  ;;  %v2731_v43 = vor.u32 %v3261_v35, %v2730_v42  ;;  %v3301_v33 = vld [vmem:[%s5030_s3 + $0x164] sm:$0xf0]  ;;  %v2828_v48 = vld [vmem:[%s5030_s3 + $0xe8] sm:$0xf0]  ;;  %v4661_v35 = vld [vmem:[%s5029_s2] sm:$0xf] }
  0xa3   :  { %v2891_v38 = vor.u32 %v3301_v33, %v2890_v32  ;;  %v2831_v42 = vor.u32 %v3284_v53, %v2828_v48  ;;  %v355_v44 = vperm.slane %v4661_v35, 0  ;;  %v356_v27 = vperm.slane %v4661_v35, 1  ;;  %v3272_v32 = vld [vmem:[%s5030_s3 + $0x84] sm:$0xf]  ;;  %v2946_v53 = vld [vmem:[%s5030_s3 + $0x1d0] sm:$0xf] }
  0xa4   :  { %v2791_v33 = vor.u32 %v3274_v24, %v2788_v25  ;;  %v3315_v48 = vld [vmem:[%s5030_s3 + $0x1d4] sm:$0xf0]  ;;  %v2964_v24 = vld [vmem:[%s5030_s3 + $0x1f8] sm:$0xf0]  ;;  %v3292_v25 = vld [vmem:[%s5030_s3 + $0x124] sm:$0xf] }
  0xa5   :  { %1636 = vmatpush.bf16.msra.mxu0 %v2755_v37  ;;  %v3256_v37 = vld [vmem:[%s5030_s3 + $0x4] sm:$0xf]  ;;  %1661 = vmatpush.bf16.msra.mxu2 %v2891_v38  ;;  %v3302_v38 = vld [vmem:[%s5030_s3 + $0x174] sm:$0xf] }
  0xa6   :  { %1648 = vmatpush.bf16.msra.mxu1 %v2827_v39 }
  0xa9   :  { %1637 = vmatpush.bf16.msra.mxu0 %v2747_v40  ;;  %v2839_v40 = vor.u32 %v3286_v29, %v2836_v30  ;;  %v2842_v30 = vld [vmem:[%s5030_s3 + $0x100] sm:$0xf] }
  0xaa   :  { %1649 = vmatpush.bf16.msra.mxu1 %v2819_v59 }
  0xad   :  { %1638 = vmatpush.bf16.msra.mxu0 %v2739_v41  ;;  %v2719_v41 = vor.u32 %v3256_v37, %v2716_v23  ;;  %v3317_v37 = vld [vmem:[%s5030_s3 + $0x1e4] sm:$0xf0] }
  0xae   :  { %1650 = vmatpush.bf16.msra.mxu1 %v2811_v2 }
  0xb1   :  { %1639 = vmatpush.bf16.msra.mxu0 %v2731_v43 }
  0xb2   :  { %1651 = vmatpush.bf16.msra.mxu1 %v2803_v8  ;;  %v3293_v8 = vld [vmem:[%s5030_s3 + $0x124] sm:$0xf0] }
  0xb5   :  { %1640 = vmatpush.bf16.msra.mxu0 %v2723_v46  ;;  %v2882_v46 = vld [vmem:[%s5030_s3 + $0x150] sm:$0xf] }
  0xb6   :  { %1652 = vmatpush.bf16.msra.mxu1 %v2795_v14  ;;  %v2883_v51 = vor.u32 %v3299_v47, %v2882_v46  ;;  %v2963_v14 = vor.u32 %v3319_v10, %v2962_v9  ;;  %v2938_v47 = vld [vmem:[%s5030_s3 + $0x1c0] sm:$0xf]  ;;  %v357_v9 = vperm.slane %v4661_v35, 2  ;;  %v2914_v10 = vld [vmem:[%s5030_s3 + $0x190] sm:$0xf] }
  0xb8   :  { %1662 = vmatpush.bf16.msra.mxu2 %v2883_v51  ;;  %1673 = vmatpush.bf16.msra.mxu3 %v2963_v14  ;;  %v2892_v51 = vld [vmem:[%s5030_s3 + $0x168] sm:$0xf0]  ;;  %v3294_v14 = vld [vmem:[%s5030_s3 + $0x134] sm:$0xf] }
  0xb9   :  { %1641 = vmatpush.bf16.msra.mxu0 %v2715_v52  ;;  %v2820_v52 = vld [vmem:[%s5030_s3 + $0xd8] sm:$0xf0] }
  0xba   :  { %1653 = vmatpush.bf16.msra.mxu1 %v2787_v21  ;;  %v2823_v56 = vor.u32 %v3282_v49, %v2820_v52  ;;  %v2850_v21 = vld [vmem:[%s5030_s3 + $0x110] sm:$0xf]  ;;  %v3313_v49 = vld [vmem:[%s5030_s3 + $0x1c4] sm:$0xf0] }
  0xbb   :  { %v2851_v29 = vor.u32 %v3291_v22, %v2850_v21  ;;  %v3318_v22 = vld [vmem:[%s5030_s3 + $0x1f4] sm:$0xf] }
  0xbd   :  { %1686 = vmatpush.bf16.msrb.mxu0 %v2775_v55  ;;  %v3297_v55 = vld [vmem:[%s5030_s3 + $0x144] sm:$0xf0] }
  0xbe   :  { %1654 = vmatpush.bf16.msra.mxu1 %v2779_v36  ;;  %v2875_v59 = vor.u32 %v3297_v55, %v2874_v54  ;;  %v2954_v36 = vld [vmem:[%s5030_s3 + $0x1e0] sm:$0xf]  ;;  %v2939_v54 = vor.u32 %v3313_v49, %v2938_v47 }
  0xc0   :  { %1663 = vmatpush.bf16.msra.mxu2 %v2875_v59 }
  0xc1   :  { %1687 = vmatpush.bf16.msrb.mxu0 %v2767_v60 }
  0xc2   :  { %1699 = vmatpush.bf16.msrb.mxu1 %v2839_v40  ;;  %v2955_v40 = vor.u32 %v3317_v37, %v2954_v36  ;;  %v2852_v37 = vld [vmem:[%s5030_s3 + $0x118] sm:$0xf0] }
  0xc4   :  { %1674 = vmatpush.bf16.msra.mxu3 %v2955_v40 }
  0xc5   :  { %1688 = vmatpush.bf16.msrb.mxu0 %v2759_v63  ;;  %v3295_v63 = vld [vmem:[%s5030_s3 + $0x134] sm:$0xf0] }
  0xc6   :  { %1700 = vmatpush.bf16.msrb.mxu1 %v2831_v42  ;;  %v2867_v4 = vor.u32 %v3295_v63, %v2866_v62  ;;  %v2947_v42 = vor.u32 %v3315_v48, %v2946_v53  ;;  %v2884_v62 = vld [vmem:[%s5030_s3 + $0x158] sm:$0xf0]  ;;  %v2931_v63 = vor.u32 %v3311_v58, %v2930_v57  ;;  %v3288_v53 = vld [vmem:[%s5030_s3 + $0x104] sm:$0xf] }
  0xc7   :  { %v3308_v58 = vld [vmem:[%s5030_s3 + $0x1a4] sm:$0xf] }
  0xc8   :  { %1664 = vmatpush.bf16.msra.mxu2 %v2867_v4  ;;  %1675 = vmatpush.bf16.msra.mxu3 %v2947_v42  ;;  %v2844_v42 = vld [vmem:[%s5030_s3 + $0x108] sm:$0xf0] }
  0xc9   :  { %1689 = vmatpush.bf16.msrb.mxu0 %v2751_v5  ;;  %v2858_v5 = vld [vmem:[%s5030_s3 + $0x120] sm:$0xf]  ;;  %v2847_v47 = vor.u32 %v3288_v53, %v2844_v42  ;;  %v3329_v42 = vld [vmem:[%s5032_s5 + $0x48] sm:$0xff] }
  0xca   :  { %1701 = vmatpush.bf16.msrb.mxu1 %v2823_v56  ;;  %v2859_v17 = vor.u32 %v3293_v8, %v2858_v5  ;;  %v3296_v5 = vld [vmem:[%s5030_s3 + $0x144] sm:$0xf]  ;;  %v1308_v53 = vld [vmem:[%s5031_s4] sm:$0x3] }
  0xcc   :  { %v1041_v34 = vpop.f32.mrf.mxu0  ;;  %1665 = vmatpush.bf16.msra.mxu2 %v2859_v17  ;;  %1676 = vmatpush.bf16.msra.mxu3 %v2939_v54 }
  0xcd   :  { %1690 = vmatpush.bf16.msrb.mxu0 %v2743_v11  ;;  %v1042_v60 = vadd.f32 %v1041_v34, %v355_v44  ;;  %v2780_v34 = vld [vmem:[%s5030_s3 + $0x88] sm:$0xf0] }
  0xce   :  { %v1067_v39 = vpop.f32.mrf.mxu2  ;;  %1702 = vmatpush.bf16.msrb.mxu1 %v2815_v61  ;;  %v2783_v44 = vor.u32 %v3272_v32, %v2780_v34  ;;  %v3298_v61 = vld [vmem:[%s5030_s3 + $0x154] sm:$0xf] }
  0xcf   :  { %v3290_v32 = vld [vmem:[%s5030_s3 + $0x114] sm:$0xf] }
  0xd0   :  { %1666 = vmatpush.bf16.msra.mxu2 %v2851_v29  ;;  %1677 = vmatpush.bf16.msra.mxu3 %v2931_v63  ;;  %v2967_v29 = vor.u32 %v3318_v22, %v2964_v24  ;;  %v2855_v40 = vor.u32 %v3290_v32, %v2852_v37  ;;  %v3306_v63 = vld [vmem:[%s5030_s3 + $0x194] sm:$0xf]  ;;  %v3325_v24 = vld [vmem:[%s5032_s5 + $0x28] sm:$0xff]  ;;  %v3320_v37 = vld [vmem:[%s5032_s5] sm:$0xff] }
  0xd1   :  { %1691 = vmatpush.bf16.msrb.mxu0 %v2735_v19 }
  0xd2   :  { %1703 = vmatpush.bf16.msrb.mxu1 %v2807_v7 }
  0xd4   :  { %v1043_v43 = vpop.f32.mrf.mxu0 }
  0xd5   :  { %1692 = vmatpush.bf16.msrb.mxu0 %v2727_v31  ;;  %v3289_v31 = vld [vmem:[%s5030_s3 + $0x104] sm:$0xf0] }
  0xd6   :  { %v1069_v45 = vpop.f32.mrf.mxu2  ;;  %1704 = vmatpush.bf16.msrb.mxu1 %v2799_v20  ;;  %v3305_v20 = vld [vmem:[%s5030_s3 + $0x184] sm:$0xf0] }
  0xd7   :  { %v1080_v50 = vpop.f32.mrf.mxu3 }
  0xd9   :  { %1693 = vmatpush.bf16.msrb.mxu0 %v2719_v41  ;;  %v2843_v41 = vor.u32 %v3289_v31, %v2842_v30 }
  0xda   :  { %1705 = vmatpush.bf16.msrb.mxu1 %v2791_v33 }
  0xdb   :  { %1667 = vmatpush.bf16.msra.mxu2 %v2843_v41 }
  0xdc   :  { %v1093_v2 = vpop.f32.mrf.mxu0 }
  0xdd   :  { %v1054_v3 = vpop.f32.mrf.mxu1  ;;  %v1094_v43 = vadd.f32 %v1093_v2, %v356_v27  ;;  %v3309_v2 = vld [vmem:[%s5030_s3 + $0x1a4] sm:$0xf0] }
  0xde   :  { %v1055_v6 = vadd.f32 %v1054_v3, %v1042_v60  ;;  %1706 = vmatpush.bf16.msrb.mxu1 %v2783_v44  ;;  %v2887_v3 = vor.u32 %v3298_v61, %v2884_v62  ;;  %v2923_v8 = vor.u32 %v3309_v2, %v2922_v1  ;;  %v2948_v44 = vld [vmem:[%s5030_s3 + $0x1d8] sm:$0xf0] }
  0xdf   :  { %v1082_v11 = vpop.f32.mrf.mxu3 }
  0xe0   :  { %v1068_v15 = vadd.f32 %v1067_v39, %v1055_v6  ;;  %v2900_v39 = vld [vmem:[%s5030_s3 + $0x178] sm:$0xf0]  ;;  %v2876_v6 = vld [vmem:[%s5030_s3 + $0x148] sm:$0xf0]  ;;  %v3307_v11 = vld [vmem:[%s5030_s3 + $0x194] sm:$0xf0]  ;;  %1678 = vmatpush.bf16.msra.mxu3 %v2923_v8 }
  0xe1   :  { %v2903_v46 = vor.u32 %v3302_v38, %v2900_v39  ;;  %v2879_v12 = vor.u32 %v3296_v5, %v2876_v6  ;;  %v2915_v17 = vor.u32 %v3307_v11, %v2914_v10  ;;  %v2956_v38 = vld [vmem:[%s5030_s3 + $0x1e8] sm:$0xf0] }
  0xe2   :  { %v1081_v16 = vadd.f32 %v1080_v50, %v1068_v15  ;;  %v1119_v19 = vpop.f32.mrf.mxu2  ;;  %v3300_v50 = vld [vmem:[%s5030_s3 + $0x164] sm:$0xf]  ;;  %v2868_v15 = vld [vmem:[%s5030_s3 + $0x138] sm:$0xf0] }
  0xe3   :  { %1712 = vmatpush.bf16.msrb.mxu2 %v2903_v46  ;;  %v2895_v56 = vor.u32 %v3300_v50, %v2892_v51  ;;  %v2871_v21 = vor.u32 %v3294_v14, %v2868_v15  ;;  %v3312_v51 = vld [vmem:[%s5030_s3 + $0x1c4] sm:$0xf] }
  0xe4   :  { %v1240_v26 = vpack.c.bf16 %v1081_v16, %v1081_v16  ;;  %v1095_v18 = vpop.f32.mrf.mxu0  ;;  %1679 = vmatpush.bf16.msra.mxu3 %v2915_v17 }
  0xe5   :  { %v1056_v28 = vpop.f32.mrf.mxu1 }
  0xe6   :  { %1642 = vmatmul.bf16.vlgmr.msra.gmra.mxu0 %v1240_v26 }
  0xe7   :  { %v1132_v23 = vpop.f32.mrf.mxu3  ;;  %1713 = vmatpush.bf16.msrb.mxu2 %v2895_v56  ;;  %v2932_v56 = vld [vmem:[%s5030_s3 + $0x1b8] sm:$0xf0] }
  0xea   :  { %v1121_v45 = vpop.f32.mrf.mxu2 }
  0xeb   :  { %1714 = vmatpush.bf16.msrb.mxu2 %v2887_v3  ;;  %v3304_v3 = vld [vmem:[%s5030_s3 + $0x184] sm:$0xf] }
  0xed   :  { %v1106_v52 = vpop.f32.mrf.mxu1 }
  0xee   :  { %v1107_v55 = vadd.f32 %v1106_v52, %v1094_v43  ;;  %v3314_v43 = vld [vmem:[%s5030_s3 + $0x1d4] sm:$0xf]  ;;  %v2940_v52 = vld [vmem:[%s5030_s3 + $0x1c8] sm:$0xf0] }
  0xef   :  { %v1134_v59 = vpop.f32.mrf.mxu3  ;;  %1715 = vmatpush.bf16.msrb.mxu2 %v2879_v12  ;;  %v2951_v49 = vor.u32 %v3314_v43, %v2948_v44  ;;  %v2943_v54 = vor.u32 %v3312_v51, %v2940_v52  ;;  %v3328_v43 = vld [vmem:[%s5032_s5 + $0x40] sm:$0xff]  ;;  %v3343_v44 = vld [vmem:[%s5034_s7 + $0x38] sm:$0xff] }
  0xf0   :  { %v1120_v60 = vadd.f32 %v1119_v19, %v1107_v55  ;;  %v2906_v19 = vld [vmem:[%s5030_s3 + $0x180] sm:$0xf]  ;;  %v3310_v55 = vld [vmem:[%s5030_s3 + $0x1b4] sm:$0xf]  ;;  %v2924_v59 = vld [vmem:[%s5030_s3 + $0x1a8] sm:$0xf0] }
  0xf1   :  { %v2907_v18 = vor.u32 %v3305_v20, %v2906_v19  ;;  %v2935_v57 = vor.u32 %v3310_v55, %v2932_v56  ;;  %v2927_v61 = vor.u32 %v3308_v58, %v2924_v59  ;;  %v3327_v19 = vld [vmem:[%s5032_s5 + $0x38] sm:$0xff]  ;;  %v3326_v20 = vld [vmem:[%s5032_s5 + $0x30] sm:$0xff]  ;;  %v1311_v55 = vperm.slane %v1308_v53, 1 }
  0xf2   :  { %v1133_v0 = vadd.f32 %v1132_v23, %v1120_v60  ;;  %v3316_v23 = vld [vmem:[%s5030_s3 + $0x1e4] sm:$0xf]  ;;  %v358_v60 = vperm.slane %v4661_v35, 3  ;;  %v2908_v35 = vld [vmem:[%s5030_s3 + $0x188] sm:$0xf0]  ;;  %1874 = vmatpush.bf16.msra.mxu0 %v3327_v19 }
  0xf3   :  { %1716 = vmatpush.bf16.msrb.mxu2 %v2871_v21  ;;  %1680 = vmatpush.bf16.msra.mxu3 %v2907_v18  ;;  %v2959_v48 = vor.u32 %v3316_v23, %v2956_v38  ;;  %v2911_v6 = vor.u32 %v3304_v3, %v2908_v35  ;;  %v3332_v23 = vld [vmem:[%s5032_s5 + $0x60] sm:$0xff]  ;;  %v3339_v35 = vld [vmem:[%s5034_s7 + $0x18] sm:$0xff] }
  0xf4   :  { %v1241_v4 = vpack.c.bf16 %v1133_v0, %v1133_v0  ;;  %v2916_v0 = vld [vmem:[%s5030_s3 + $0x198] sm:$0xf0]  ;;  %v3340_v3 = vld [vmem:[%s5034_s7 + $0x20] sm:$0xff] }
  0xf5   :  { %v1108_v7 = vpop.f32.mrf.mxu1  ;;  %v2919_v2 = vor.u32 %v3306_v63, %v2916_v0 }
  0xf6   :  { %1694 = vmatmul.bf16.vlgmr.msrb.gmra.mxu0 %v1240_v26  ;;  %1655 = vmatmul.bf16.vlgmr.msra.gmra.mxu1 %v1241_v4  ;;  %v2860_v26 = vld [vmem:[%s5030_s3 + $0x128] sm:$0xf0] }
  0xf7   :  { %v2863_v31 = vor.u32 %v3292_v25, %v2860_v26  ;;  %1725 = vmatpush.bf16.msrb.mxu3 %v2967_v29  ;;  %1875 = vmatpush.bf16.msra.mxu0 %v3326_v20  ;;  %v3324_v25 = vld [vmem:[%s5032_s5 + $0x20] sm:$0xff]  ;;  %v3335_v26 = vld [vmem:[%s5032_s5 + $0x78] sm:$0xff]  ;;  %v3322_v29 = vld [vmem:[%s5032_s5 + $0x10] sm:$0xff] }
  0xf8   :  { %1887 = vmatpush.bf16.msra.mxu1 %v3335_v26 }
  0xf9   :  { %v1145_v13 = vpop.f32.mrf.mxu0  ;;  %1717 = vmatpush.bf16.msrb.mxu2 %v2863_v31 }
  0xfa   :  { %v1146_v16 = vadd.f32 %v1145_v13, %v357_v9 }
  0xfb   :  { %1726 = vmatpush.bf16.msrb.mxu3 %v2959_v48  ;;  %1876 = vmatpush.bf16.msra.mxu0 %v3325_v24 }
  0xfd   :  { %1718 = vmatpush.bf16.msrb.mxu2 %v2855_v40  ;;  %v3330_v40 = vld [vmem:[%s5032_s5 + $0x50] sm:$0xff] }
  0xff   :  { %1727 = vmatpush.bf16.msrb.mxu3 %v2951_v49  ;;  %1877 = vmatpush.bf16.msra.mxu0 %v3324_v25 }
 0x100   :  { %v1158_v27 = vpop.f32.mrf.mxu1 }
 0x101   :  { %v1159_v28 = vadd.f32 %v1158_v27, %v1146_v16  ;;  %v1147_v36 = vpop.f32.mrf.mxu0  ;;  %1719 = vmatpush.bf16.msrb.mxu2 %v2847_v47 }
 0x102   :  { %v1171_v30 = vpop.f32.mrf.mxu2  ;;  %v3333_v36 = vld [vmem:[%s5032_s5 + $0x68] sm:$0xff] }
 0x103   :  { %v1172_v33 = vadd.f32 %v1171_v30, %v1159_v28  ;;  %v1184_v34 = vpop.f32.mrf.mxu3  ;;  %1728 = vmatpush.bf16.msrb.mxu3 %v2943_v54  ;;  %v3323_v28 = vld [vmem:[%s5032_s5 + $0x18] sm:$0xff]  ;;  %v3334_v30 = vld [vmem:[%s5032_s5 + $0x70] sm:$0xff] }
 0x104   :  { %1878 = vmatpush.bf16.msra.mxu0 %v3323_v28  ;;  %1888 = vmatpush.bf16.msra.mxu1 %v3334_v30  ;;  %v3351_v30 = vld [vmem:[%s5036_s9 + $0x38] sm:$0xff] }
 0x105   :  { %v1185_v39 = vadd.f32 %v1184_v34, %v1172_v33  ;;  %v3321_v34 = vld [vmem:[%s5032_s5 + $0x8] sm:$0xff] }
 0x106   :  { %1707 = vmatmul.bf16.vlgmr.msrb.gmra.mxu1 %v1241_v4 }
 0x107   :  { %v1242_v41 = vpack.c.bf16 %v1185_v39, %v1185_v39  ;;  %1729 = vmatpush.bf16.msrb.mxu3 %v2935_v57  ;;  %v3331_v39 = vld [vmem:[%s5032_s5 + $0x58] sm:$0xff] }
 0x108   :  { %v1160_v45 = vpop.f32.mrf.mxu1  ;;  %1879 = vmatpush.bf16.msra.mxu0 %v3322_v29  ;;  %1889 = vmatpush.bf16.msra.mxu1 %v3333_v36  ;;  %v3349_v36 = vld [vmem:[%s5036_s9 + $0x28] sm:$0xff] }
 0x109   :  { %1668 = vmatmul.bf16.vlgmr.msra.gmra.mxu2 %v1242_v41 }
 0x10a   :  { %v1173_v46 = vpop.f32.mrf.mxu2  ;;  %1970 = vmatpush.bf16.msra.mxu2 %v3343_v44 }
 0x10b   :  { %v1186_v50 = vpop.f32.mrf.mxu3  ;;  %1730 = vmatpush.bf16.msrb.mxu3 %v2927_v61 }
 0x10c   :  { %1880 = vmatpush.bf16.msra.mxu0 %v3321_v34  ;;  %1890 = vmatpush.bf16.msra.mxu1 %v3332_v23  ;;  %v3358_v34 = vld [vmem:[%s5036_s9 + $0x70] sm:$0xff] }
 0x10f   :  { %1731 = vmatpush.bf16.msrb.mxu3 %v2919_v2  ;;  %v3341_v2 = vld [vmem:[%s5034_s7 + $0x28] sm:$0xff] }
 0x110   :  { %1881 = vmatpush.bf16.msra.mxu0 %v3320_v37  ;;  %1891 = vmatpush.bf16.msra.mxu1 %v3331_v39  ;;  %v3357_v37 = vld [vmem:[%s5036_s9 + $0x68] sm:$0xff]  ;;  %v3348_v39 = vld [vmem:[%s5036_s9 + $0x20] sm:$0xff] }
 0x113   :  { %1732 = vmatpush.bf16.msrb.mxu3 %v2911_v6 }
 0x114   :  { %1892 = vmatpush.bf16.msra.mxu1 %v3330_v40  ;;  %v3356_v40 = vld [vmem:[%s5036_s9 + $0x60] sm:$0xff] }
 0x118   :  { %1893 = vmatpush.bf16.msra.mxu1 %v3329_v42 }
 0x119   :  { %v1197_v62 = vpop.f32.mrf.mxu0  ;;  %1720 = vmatmul.bf16.vlgmr.msrb.gmra.mxu2 %v1242_v41  ;;  %v1310_v41 = vperm.slane %v1308_v53, 0 }
 0x11a   :  { %v1198_v1 = vadd.f32 %v1197_v62, %v358_v60 }
 0x11c   :  { %1894 = vmatpush.bf16.msra.mxu1 %v3328_v43 }
 0x11e   :  { %v1210_v4 = vpop.f32.mrf.mxu1 }
 0x11f   :  { %v1211_v5 = vadd.f32 %v1210_v4, %v1198_v1  ;;  %v3342_v1 = vld [vmem:[%s5034_s7 + $0x30] sm:$0xff] }
 0x120   :  { %1971 = vmatpush.bf16.msra.mxu2 %v3342_v1  ;;  %v3338_v4 = vld [vmem:[%s5034_s7 + $0x10] sm:$0xff] }
 0x121   :  { %v1199_v8 = vpop.f32.mrf.mxu0 }
 0x122   :  { %v1223_v7 = vpop.f32.mrf.mxu2 }
 0x123   :  { %v1224_v9 = vadd.f32 %v1223_v7, %v1211_v5  ;;  %v1236_v10 = vpop.f32.mrf.mxu3  ;;  %v3337_v5 = vld [vmem:[%s5034_s7 + $0x8] sm:$0xff]  ;;  %v3336_v7 = vld [vmem:[%s5034_s7] sm:$0xff] }
 0x124   :  { %1972 = vmatpush.bf16.msra.mxu2 %v3341_v2 }
 0x125   :  { %v1237_v11 = vadd.f32 %v1236_v10, %v1224_v9  ;;  %v3364_v9 = vld [vmem:[%s5033_s6] ss:$0 sm:$0xff] }
 0x126   :  { %v1212_v13 = vpop.f32.mrf.mxu1 }
 0x127   :  { %v1243_v12 = vpack.c.bf16 %v1237_v11, %v1237_v11 }
 0x128   :  { %1973 = vmatpush.bf16.msra.mxu2 %v3340_v3 }
 0x129   :  { %1681 = vmatmul.bf16.vlgmr.msra.gmra.mxu3 %v1243_v12 }
 0x12a   :  { %v1225_v14 = vpop.f32.mrf.mxu2  ;;  %2156 = vmatpush.bf16.msra.mxu3 %v3351_v30 }
 0x12b   :  { %v1238_v15 = vpop.f32.mrf.mxu3 }
 0x12c   :  { %1974 = vmatpush.bf16.msra.mxu2 %v3339_v35 }
 0x130   :  { %1975 = vmatpush.bf16.msra.mxu2 %v3338_v4 }
 0x134   :  { %1976 = vmatpush.bf16.msra.mxu2 %v3337_v5 }
 0x138   :  { %1977 = vmatpush.bf16.msra.mxu2 %v3336_v7 }
 0x139   :  { %1733 = vmatmul.bf16.vlgmr.msrb.gmra.mxu3 %v1243_v12 }
 0x163   :  { %v1643_v17 = vpop.f32.mrf.mxu0 }
 0x164   :  { %v1644_v45 = vadd.f32 %v1643_v17, %v1310_v41  ;;  %v3365_v17 = vld [vmem:[#allocation2] ss:$0 sm:$0xff] }
 0x16b   :  { %v1645_v16 = vpop.f32.mrf.mxu0 }
 0x173   :  { %v1695_v21 = vpop.f32.mrf.mxu0  ;;  %v1656_v22 = vpop.f32.mrf.mxu1 }
 0x174   :  { %v1657_v47 = vadd.f32 %v1656_v22, %v1644_v45  ;;  %v1696_v57 = vadd.f32 %v1695_v21, %v1311_v55  ;;  %v3401_v22 = vmov 0   ;;  %v3353_v55 = vld [vmem:[%s5036_s9 + $0x48] sm:$0xff] }
 0x175   :  { %3363 = vset.pattern.permute.xlu0 %v3401_v22 }
 0x17b   :  { %v1697_v27 = vpop.f32.mrf.mxu0  ;;  %v1658_v18 = vpop.f32.mrf.mxu1 }
 0x183   :  { %v1708_v31 = vpop.f32.mrf.mxu1 }
 0x184   :  { %v1709_v58 = vadd.f32 %v1708_v31, %v1696_v57  ;;  %v3359_v31 = vld [vmem:[%s5036_s9 + $0x78] sm:$0xff]  ;;  %v3352_v57 = vld [vmem:[%s5036_s9 + $0x40] sm:$0xff] }
 0x185   :  { %2169 = vmatpush.bf16.msrb.mxu0 %v3359_v31 }
 0x189   :  { %2170 = vmatpush.bf16.msrb.mxu0 %v3358_v34 }
 0x18b   :  { %v1710_v33 = vpop.f32.mrf.mxu1 }
 0x18c   :  { %v1669_v32 = vpop.f32.mrf.mxu2  ;;  %v3350_v33 = vld [vmem:[%s5036_s9 + $0x30] sm:$0xff] }
 0x18d   :  { %v1670_v49 = vadd.f32 %v1669_v32, %v1657_v47  ;;  %2157 = vmatpush.bf16.msra.mxu3 %v3350_v33  ;;  %2171 = vmatpush.bf16.msrb.mxu0 %v3357_v37  ;;  %v3347_v47 = vld [vmem:[%s5036_s9 + $0x18] sm:$0xff] }
 0x191   :  { %2158 = vmatpush.bf16.msra.mxu3 %v3349_v36  ;;  %2172 = vmatpush.bf16.msrb.mxu0 %v3356_v40 }
 0x194   :  { %v1671_v38 = vpop.f32.mrf.mxu2 }
 0x195   :  { %2159 = vmatpush.bf16.msra.mxu3 %v3348_v39 }
 0x199   :  { %2160 = vmatpush.bf16.msra.mxu3 %v3347_v47 }
 0x19c   :  { %v1721_v48 = vpop.f32.mrf.mxu2 }
 0x19d   :  { %v1722_v59 = vadd.f32 %v1721_v48, %v1709_v58 }
 0x1a4   :  { %v1723_v46 = vpop.f32.mrf.mxu2 }
 0x1ac   :  { %v1682_v50 = vpop.f32.mrf.mxu3 }
 0x1ad   :  { %v1683_v51 = vadd.f32 %v1682_v50, %v1670_v49  ;;  %v3355_v49 = vld [vmem:[%s5036_s9 + $0x58] sm:$0xff]  ;;  %v3346_v50 = vld [vmem:[%s5036_s9 + $0x10] sm:$0xff] }
 0x1ae   :  { %2173 = vmatpush.bf16.msrb.mxu0 %v3355_v49  ;;  %2161 = vmatpush.bf16.msra.mxu3 %v3346_v50 }
 0x1af   :  { %v4937_v52 = vmax.f32 %v1683_v51, 0.0  ;;  %v3354_v51 = vld [vmem:[%s5036_s9 + $0x50] sm:$0xff] }
 0x1b1   :  { %v1740_v54 = vpack.c.bf16 %v4937_v52, %v4937_v52 }
 0x1b2   :  { %2174 = vmatpush.bf16.msrb.mxu0 %v3354_v51 }
 0x1b3   :  { %1882 = vmatmul.bf16.vlgmr.msra.gmra.mxu0 %v1740_v54  ;;  %v3345_v54 = vld [vmem:[%s5036_s9 + $0x8] sm:$0xff] }
 0x1b4   :  { %v1684_v56 = vpop.f32.mrf.mxu3  ;;  %2162 = vmatpush.bf16.msra.mxu3 %v3345_v54 }
 0x1b5   :  { %v3344_v56 = vld [vmem:[%s5036_s9] sm:$0xff] }
 0x1b6   :  { %2175 = vmatpush.bf16.msrb.mxu0 %v3353_v55 }
 0x1b8   :  { %2163 = vmatpush.bf16.msra.mxu3 %v3344_v56 }
 0x1ba   :  { %2176 = vmatpush.bf16.msrb.mxu0 %v3352_v57 }
 0x1bc   :  { %v1734_v60 = vpop.f32.mrf.mxu3 }
 0x1bd   :  { %v1735_v61 = vadd.f32 %v1734_v60, %v1722_v59 }
 0x1bf   :  { %v4941_v62 = vmax.f32 %v1735_v61, 0.0 }
 0x1c1   :  { %v1741_v63 = vpack.c.bf16 %v4941_v62, %v4941_v62 }
 0x1c3   :  { %1895 = vmatmul.bf16.vlgmr.msra.gmra.mxu1 %v1741_v63 }
 0x1c4   :  { %v1736_v0 = vpop.f32.mrf.mxu3 }
 0x230   :  { %v1883_v6 = vpop.f32.mrf.mxu0 }
 0x231   :  { %v1884_v10 = vadd.f32 %v3364_v9, %v1883_v6 }
 0x238   :  { %v1885_v8 = vpop.f32.mrf.mxu0 }
 0x240   :  { %v1896_v11 = vpop.f32.mrf.mxu1 }
 0x241   :  { %v1897_v12 = vadd.f32 %v1896_v11, %v1884_v10 }
 0x243   :  { %3368 = vtanh.f32 %v1897_v12 }
 0x248   :  { %v1898_v13 = vpop.f32.mrf.mxu1 }
 0x249   :  { %v3369_v14 = vpop.eup %3368 }
 0x24a   :  { %v1901_v15 = vpack.c.bf16 %v3369_v14, %v3369_v14 }
 0x24c   :  { %1978 = vmatmul.bf16.vlgmr.msra.gmra.mxu2 %v1901_v15 }
 0x2cf   :  { %v1979_v16 = vpop.f32.mrf.mxu2 }
 0x2d0   :  { %v1980_v19 = vadd.f32 %v3365_v17, %v1979_v16 }
 0x2d2   :  { %v1984_v20 = vsel %vm1983_vm3, %v1980_v19, -inf }
 0x2d3   :  { %v1985_v21 = vrot.slane %v1984_v20, 4 }
 0x2d5   :  { %v1986_v24 = vmax.f32 %v1984_v20, %v1985_v21 }
 0x2d7   :  { %v1987_v25 = vrot.slane %v1986_v24, 2  ;;  %v1981_v26 = vpop.f32.mrf.mxu2 }
 0x2d9   :  { %v1988_v27 = vmax.f32 %v1986_v24, %v1987_v25 }
 0x2db   :  { %v1989_v18 = vrot.slane %v1988_v27, 1 }
 0x2dd   :  { %v1990_v28 = vmax.f32 %v1988_v27, %v1989_v18 }
 0x2df   :  { %v1991_v29 = vsub.f32 %v1980_v19, %v1990_v28 }
 0x2e1   :  { %v1992_v32 = vmul.f32 1.442695, %v1991_v29 }
 0x2e3   :  { %3370 = vpow2.f32 %v1992_v32 }
 0x2e9   :  { %v3371_v23 = vpop.eup %3370 }
 0x2ea   :  { %v1994_v38 = vsel %vm1983_vm3, %v3371_v23, 0.0 }
 0x2eb   :  { %v1995_v53 = vrot.slane %v1994_v38, 4 }
 0x2ed   :  { %v1996_v48 = vadd.f32 %v1995_v53, %v1994_v38 }
 0x2ef   :  { %v1997_v41 = vrot.slane %v1996_v48, 2 }
 0x2f1   :  { %v1998_v42 = vadd.f32 %v1997_v41, %v1996_v48 }
 0x2f3   :  { %v1999_v43 = vrot.slane %v1998_v42, 1 }
 0x2f5   :  { %v2000_v44 = vadd.f32 %v1999_v43, %v1998_v42 }
 0x2f7   :  { %3372 = vrcp.f32 %v2000_v44 }
 0x2fd   :  { %v3373_v45 = vpop.eup %3372 }
 0x2fe   :  { %v2002_v46 = vmul.f32 %v3373_v45, %v3371_v23 }
 0x300   :  { %2005 = vperm.xlu0 %3363, %v2002_v46  }
 0x372   :  { %v2006_v58 = vpop.permute.xlu0 %2005 }
 0x373   :  { %v2008_v59 = vmul.f32 %v2006_v58, %v4937_v52  ;;  %v2009_v60 = vmul.f32 %v2006_v58, %v4941_v62  ;;  %v2059_v62 = vld [vmem:[%s5037_s10] sm:$0x1] }
 0x375   :  { %v2011_v61 = vsel %vm2010_vm4, %v2008_v59, 0.0  ;;  %v2018_v63 = vsel %vm2010_vm4, %v2009_v60, 0.0 }
 0x376   :  { %v2012_v0 = vrot.slane %v2011_v61, 4  ;;  %v2019_v1 = vrot.slane %v2018_v63, 4 }
 0x378   :  { %v2013_v2 = vadd.f32 %v2012_v0, %v2011_v61  ;;  %v2020_v3 = vadd.f32 %v2019_v1, %v2018_v63 }
 0x37a   :  { %v2014_v35 = vrot.slane %v2013_v2, 2  ;;  %v2021_v4 = vrot.slane %v2020_v3, 2 }
 0x37c   :  { %v2015_v5 = vadd.f32 %v2014_v35, %v2013_v2  ;;  %v2022_v6 = vadd.f32 %v2021_v4, %v2020_v3 }
 0x37e   :  { %v2016_v7 = vrot.slane %v2015_v5, 1  ;;  %v2023_v8 = vrot.slane %v2022_v6, 1 }
 0x380   :  { %v2017_v9 = vadd.f32 %v2016_v7, %v2015_v5  ;;  %v2024_v10 = vadd.f32 %v2023_v8, %v2022_v6 }
 0x382   :  { %v2025_v11 = vpack.c.bf16 %v2017_v9, %v2017_v9  ;;  %v2026_v12 = vpack.c.bf16 %v2024_v10, %v2024_v10 }
 0x384   :  { %2164 = vmatmul.bf16.vlgmr.msra.gmra.mxu3 %v2025_v11  ;;  %2177 = vmatmul.bf16.vlgmr.msrb.gmra.mxu0 %v2026_v12 }
 0x401   :  { %v2178_v52 = vpop.f32.mrf.mxu0 }
 0x407   :  { %v2165_v13 = vpop.f32.mrf.mxu3 }
 0x408   :  { %v2166_v14 = vadd.f32 %v2165_v13, %v2059_v62 }
 0x409   :  { %v2180_v15 = vpop.f32.mrf.mxu0 }
 0x40a   :  { %v2179_v17 = vadd.f32 %v2178_v52, %v2166_v14 }
 0x40c   :  { %2183 = vst.msk [vmem:[#allocation3] sm:$0x1] %vm2182_vm5, %v2179_v17 }
 0x40d   :  { %2194 = dma.vmem_to_hbm [thread:$0]  %s2190_s1, 16, %s2192_s22, [#allocation4]  }
 0x40f   :  { %v2167_v16 = vpop.f32.mrf.mxu3 }
 0x410   :  { %3398 = dma.done.wait [#allocation4], 16  }
 0x411   :  { %3399 = vsyncadd [#allocation4], 4294967280 }
 0x412   :  { %2199 = vsyncpa [#allocation4], 1 }

</bundles_post_ra>
